<compile_context>
chip_gen: v7x
topology: tpu7x:2x2x1
jax: 0.10.0
libtpu: 0.0.40
codegen_flags: <defaults>
</compile_context>

<pallas_src>
import numpy as np

import jax
import jax.numpy as jnp
from jax.experimental import pallas as pl
from jax.experimental.pallas import tpu as pltpu


# ---------------------------------------------------------------------------
# Shared index helpers (host-side weight expansion <-> in-kernel operand build)
# ---------------------------------------------------------------------------
def _rc(e):
    """e = delta + k  ->  (rho, sigma) with e = 4*sigma + rho, rho in [0, 4)."""
    return e % 4, e // 4


def _k1col(ti, tj):
    """conv1 expanded-K column group for tap combo (ti, tj); 3 channels each."""
    return ti * 8 + tj


def _k2col(a, sa, b, sb):
    """conv2 expanded-K column group for (phase a,b ; shift sa,sb); 16 ch each."""
    return ((a * 2 + sa) * 2 + b) * 2 + sb


# ---------------------------------------------------------------------------
# Fused kernel: conv1 + pool1 + conv2 + pool2 + fc1 + fc2 + sigmoid (per image)
# ---------------------------------------------------------------------------
def _cnn_fused_kernel(xz_ref, w1_ref, b1_ref, mask_ref, w2_ref, b2_ref,
                      wf1_ref, bf1_ref, wfc2_ref, bfc2_ref, o_ref,
                      rhs1_ref, rhs2_ref):
    f32 = jnp.float32
    bf16 = jnp.bfloat16

    # -- stage 1: build conv1 im2col operand (192, 289) in VMEM ----------------
    # xz holds the mod-4 phase split of the padded 68x68 input:
    #   xz[0, ri*4+rj, ci, m*17+n] = xpad1[4m+ri, 4n+rj, ci]
    # Row group _k1col(ti, tj) holds the 3 channels of input tap offset
    # (ti-2, tj-2) relative to 4*(u, v): a lane-shifted phase block (shifts only
    # wrap into lanes the downstream math never reads).
    for ti in range(8):
        rho_i, sig_i = _rc(ti - 2)
        for tj in range(8):
            rho_j, sig_j = _rc(tj - 2)
            blk = xz_ref[0, rho_i * 4 + rho_j].astype(f32)        # (3, 289)
            sh = sig_i * 17 + sig_j
            if sh != 0:
                # piece[:, L] = blk[:, L + sh]
                blk = jnp.concatenate([blk[:, sh:], blk[:, :sh]], axis=1)
            r0 = 3 * _k1col(ti, tj)
            rhs1_ref[r0:r0 + 3, :] = blk

    # -- conv1 (+ pool-window enumeration) as a single MXU pass ----------------
    r1 = jnp.dot(w1_ref[...], rhs1_ref[...].astype(bf16),
                 preferred_element_type=f32)                      # (256, 289)

    # -- pool1 + bias + ReLU + zero-pad mask; emit conv2 operand rows ----------
    # pool(relu(conv + b)) == relu(b + max_q conv_q): per-channel bias, monotone.
    b1c = b1_ref[...]                                             # (16, 1)
    for a in range(2):                     # conv2-input phase (row parity)
        for b in range(2):                 # conv2-input phase (col parity)
            g = a * 2 + b
            base = g * 64
            pooled = r1[base:base + 16, :]
            for q in range(1, 4):          # max over the 2x2 pool1 window
                pooled = jnp.maximum(
                    pooled, r1[base + q * 16:base + (q + 1) * 16, :])
            xg = jnp.maximum(pooled + b1c, 0.0) * mask_ref[g]     # (16, 289)
            for sa in range(2):
                for sb in range(2):
                    sh = sa * 17 + sb
                    piece = xg if sh == 0 else jnp.concatenate(
                        [xg[:, sh:], xg[:, :sh]], axis=1)
                    r0 = 16 * _k2col(a, sa, b, sb)
                    rhs2_ref[r0:r0 + 16, :] = piece

    # -- conv2 + pool2 + bias + ReLU (one MXU pass + VPU max) ------------------
    r2 = jnp.dot(w2_ref[...], rhs2_ref[...].astype(bf16),
                 preferred_element_type=f32)                      # (128, 289)
    act2 = r2[0:32, :]
    for q in range(1, 4):
        act2 = jnp.maximum(act2, r2[q * 32:(q + 1) * 32, :])
    act2 = jnp.maximum(act2 + b2_ref[...], 0.0)                   # (32, 289)

    # -- fc1: flatten permutation + 15x15 validity folded into the weights -----
    rf = jnp.dot(act2.astype(bf16), wf1_ref[...],
                 preferred_element_type=f32)                      # (32, 4096)
    h = rf[0:1, 0:128]
    for d in range(1, 32):
        h = h + rf[d:d + 1, d * 128:(d + 1) * 128]
    h = jnp.maximum(h + bf1_ref[...], 0.0)                        # (1, 128)

    # -- fc2 on the VPU + exact sigmoid -----------------------------------------
    z = jnp.sum(h * wfc2_ref[...], axis=1, keepdims=True) + bfc2_ref[...]
    o_ref[0] = 1.0 / (1.0 + jnp.exp(-z))


def _fused_forward(xz, kp):
    bsz = xz.shape[0]
    return pl.pallas_call(
        _cnn_fused_kernel,
        grid=(bsz,),
        in_specs=[
            pl.BlockSpec((1, 16, 3, 289), lambda i: (i, 0, 0, 0)),   # phase input
            pl.BlockSpec((256, 192), lambda i: (0, 0)),              # conv1 weights
            pl.BlockSpec((16, 1), lambda i: (0, 0)),                 # conv1 bias
            pl.BlockSpec((4, 1, 289), lambda i: (0, 0, 0)),          # pad masks
            pl.BlockSpec((128, 256), lambda i: (0, 0)),              # conv2 weights
            pl.BlockSpec((32, 1), lambda i: (0, 0)),                 # conv2 bias
            pl.BlockSpec((289, 4096), lambda i: (0, 0)),             # fc1 weights
            pl.BlockSpec((1, 128), lambda i: (0, 0)),                # fc1 bias
            pl.BlockSpec((1, 128), lambda i: (0, 0)),                # fc2 weights
            pl.BlockSpec((1, 1), lambda i: (0, 0)),                  # fc2 bias
        ],
        out_specs=pl.BlockSpec((1, 1, 1), lambda i: (i, 0, 0)),
        out_shape=jax.ShapeDtypeStruct((bsz, 1, 1), jnp.float32),
        scratch_shapes=[
            pltpu.VMEM((192, 289), jnp.float32),   # conv1 im2col operand
            pltpu.VMEM((256, 289), jnp.float32),   # conv2 im2col operand
        ],
        compiler_params=pltpu.CompilerParams(
            dimension_semantics=("parallel",),
            vmem_limit_bytes=32 * 1024 * 1024,
        ),
    )(xz, kp["w1e"], kp["b1c"], kp["mask1"], kp["w2e"], kp["b2c"],
      kp["wf1e"], kp["bf1r"], kp["wfc2r"], kp["bfc2"])


# ---------------------------------------------------------------------------
# Parameters (PyTorch layouts) + one-time expansion into kernel layouts
# ---------------------------------------------------------------------------
def init_params(key):
    """Parameters in PyTorch layouts: Conv2d (Cout,Cin,KH,KW); Linear (out,in)."""
    ks = jax.random.split(key, 8)
    return {
        "conv1_w": jax.random.normal(ks[0], (16, 3, 5, 5), jnp.float32) * 0.1,
        "conv1_b": jax.random.normal(ks[1], (16,), jnp.float32) * 0.1,
        "conv2_w": jax.random.normal(ks[2], (32, 16, 3, 3), jnp.float32) * 0.1,
        "conv2_b": jax.random.normal(ks[3], (32,), jnp.float32) * 0.1,
        "fc1_w": jax.random.normal(ks[4], (128, 32 * 15 * 15), jnp.float32) * 0.02,
        "fc1_b": jax.random.normal(ks[5], (128,), jnp.float32) * 0.1,
        "fc2_w": jax.random.normal(ks[6], (1, 128), jnp.float32) * 0.1,
        "fc2_b": jax.random.normal(ks[7], (1,), jnp.float32) * 0.1,
    }


def prepare_params(p):
    """One-time relayout of PyTorch-layout params into fused-kernel layouts."""
    w1 = np.asarray(p["conv1_w"], np.float32)     # (co=16, ci=3, kh=5, kw=5)
    w2 = np.asarray(p["conv2_w"], np.float32)     # (d=32, co=16, kh=3, kw=3)
    f1 = np.asarray(p["fc1_w"], np.float32)       # (128, 32*15*15)

    # conv1: rows = (conv2-phase a,b ; pool1 window q1 ; co); cols = (tap ti,tj ; ci)
    w1e = np.zeros((256, 192), np.float32)
    for a in range(2):
        for b in range(2):
            for q1i in range(2):
                for q1j in range(2):
                    di = 2 * a - 2 + q1i
                    dj = 2 * b - 2 + q1j
                    row0 = ((a * 2 + b) * 4 + (q1i * 2 + q1j)) * 16
                    for kh in range(5):
                        ti = di + kh + 2
                        for kw in range(5):
                            tj = dj + kw + 2
                            col0 = 3 * _k1col(ti, tj)
                            for co in range(16):
                                for ci in range(3):
                                    w1e[row0 + co, col0 + ci] = w1[co, ci, kh, kw]

    # conv2: rows = (pool2 window q2 ; d); cols = (phase a,b ; shift sa,sb ; co)
    w2e = np.zeros((128, 256), np.float32)
    for q2i in range(2):
        for q2j in range(2):
            row0 = (q2i * 2 + q2j) * 32
            for a in range(2):
                for sa in range(2):
                    kh = 2 * sa + a - q2i
                    if not 0 <= kh < 3:
                        continue
                    for b in range(2):
                        for sb in range(2):
                            kw = 2 * sb + b - q2j
                            if not 0 <= kw < 3:
                                continue
                            col0 = 16 * _k2col(a, sa, b, sb)
                            for d in range(32):
                                for co in range(16):
                                    w2e[row0 + d, col0 + co] = w2[d, co, kh, kw]

    # fc1: (289, 32*128).  Folds PyTorch's NCHW flatten order (d*225 + s*15 + t)
    # and zeroes the 17x17-lane positions outside the real 15x15 pool2 output.
    wf1e = np.zeros((289, 32 * 128), np.float32)
    for d in range(32):
        for s in range(15):
            for t in range(15):
                wf1e[s * 17 + t, d * 128:(d + 1) * 128] = f1[:, d * 225 + s * 15 + t]

    # pool1-output zero-padding mask per conv2 phase (a, b): the u==0 row (a==0)
    # / v==0 col (b==0) of each 17x17 phase block is conv2's zero padding.
    mask = np.ones((2, 2, 17, 17), np.float32)
    mask[0, :, 0, :] = 0.0
    mask[:, 0, :, 0] = 0.0
    mask1 = mask.reshape(4, 1, 289)

    return {
        "w1e": jnp.asarray(w1e, jnp.bfloat16),
        "b1c": jnp.asarray(np.asarray(p["conv1_b"], np.float32).reshape(16, 1)),
        "mask1": jnp.asarray(mask1, jnp.float32),
        "w2e": jnp.asarray(w2e, jnp.bfloat16),
        "b2c": jnp.asarray(np.asarray(p["conv2_b"], np.float32).reshape(32, 1)),
        "wf1e": jnp.asarray(wf1e, jnp.bfloat16),
        "bf1r": jnp.asarray(np.asarray(p["fc1_b"], np.float32).reshape(1, 128)),
        "wfc2r": jnp.asarray(np.asarray(p["fc2_w"], np.float32).reshape(1, 128)),
        "bfc2": jnp.asarray(np.asarray(p["fc2_b"], np.float32).reshape(1, 1)),
    }


# ---------------------------------------------------------------------------
# Forward
# ---------------------------------------------------------------------------
@jax.jit
def model_forward(kp, x_nchw):
    bsz = x_nchw.shape[0]
    # conv1 padding=1 plus 2 extra zero rows/cols so the 66x66 padded image splits
    # exactly into mod-4 phases of 17x17 (zero-duplication space-to-depth; the real
    # im2col expansion happens in VMEM inside the kernel).
    xp = jnp.pad(x_nchw, ((0, 0), (0, 0), (1, 3), (1, 3)))          # (B,3,68,68)
    xz = xp.reshape(bsz, 3, 17, 4, 17, 4)
    xz = jnp.transpose(xz, (0, 3, 5, 1, 2, 4))                      # (B,4,4,3,17,17)
    xz = xz.reshape(bsz, 16, 3, 17 * 17).astype(jnp.bfloat16)
    out = _fused_forward(xz, kp)                                    # (B,1,1)
    return out.reshape(bsz, 1)


# ---------------------------------------------------------------------------
# Pure-XLA f32 reference (for parity checking only)
# ---------------------------------------------------------------------------
def reference_forward(p, x):
    dn = ("NCHW", "OIHW", "NCHW")
    y = jax.lax.conv_general_dilated(x, p["conv1_w"], (1, 1), ((1, 1), (1, 1)),
                                     dimension_numbers=dn)
    y = jax.nn.relu(y + p["conv1_b"].reshape(1, -1, 1, 1))
    y = jax.lax.reduce_window(y, -jnp.inf, jax.lax.max,
                              (1, 1, 2, 2), (1, 1, 2, 2), "VALID")
    y = jax.lax.conv_general_dilated(y, p["conv2_w"], (1, 1), ((1, 1), (1, 1)),
                                     dimension_numbers=dn)
    y = jax.nn.relu(y + p["conv2_b"].reshape(1, -1, 1, 1))
    y = jax.lax.reduce_window(y, -jnp.inf, jax.lax.max,
                              (1, 1, 2, 2), (1, 1, 2, 2), "VALID")
    y = y.reshape(y.shape[0], -1)
    y = jax.nn.relu(y @ p["fc1_w"].T + p["fc1_b"])
    z = y @ p["fc2_w"].T + p["fc2_b"]
    return jax.nn.sigmoid(z)


if __name__ == "__main__":
    key = jax.random.PRNGKey(0)
    pkey, xkey = jax.random.split(key)
    params = init_params(pkey)
    kparams = prepare_params(params)
    # fc1 expects 32*15*15 features -> input spatial must be 64x64 (batch=2, C=3).
    x = jax.random.normal(xkey, (2, 3, 64, 64), jnp.float32)

    out = jax.block_until_ready(model_forward(kparams, x))
    assert out.shape == (2, 1), out.shape
    assert bool(jnp.all(jnp.isfinite(out)))

    # Parity vs. f32 XLA reference (bf16 MXU operands => loose tolerance).
    ref = jax.block_until_ready(reference_forward(params, x))
    assert bool(jnp.all(jnp.abs(out - ref) < 0.05)), (out, ref)

    print("KERNEL_OK")
</pallas_src>

<mosaic_0001>
module attributes {stable_mosaic.version = 11 : i64} {
  func.func @_cnn_fused_kernel(%arg0: i32, %arg1: memref<1x16x3x289xbf16, #tpu.memory_space<vmem>>, %arg2: memref<256x192xbf16, #tpu.memory_space<vmem>>, %arg3: memref<16x1xf32, #tpu.memory_space<vmem>>, %arg4: memref<4x1x289xf32, #tpu.memory_space<vmem>>, %arg5: memref<128x256xbf16, #tpu.memory_space<vmem>>, %arg6: memref<32x1xf32, #tpu.memory_space<vmem>>, %arg7: memref<289x4096xbf16, #tpu.memory_space<vmem>>, %arg8: memref<1x128xf32, #tpu.memory_space<vmem>>, %arg9: memref<1x128xf32, #tpu.memory_space<vmem>>, %arg10: memref<1x1xf32, #tpu.memory_space<vmem>>, %arg11: memref<1x1x1xf32, #tpu.memory_space<vmem>>, %arg12: memref<192x289xf32, #tpu.memory_space<vmem>>, %arg13: memref<256x289xf32, #tpu.memory_space<vmem>>) attributes {dimension_semantics = [#tpu.dimension_semantics<parallel>], iteration_bounds = array<i64: 2>, scalar_prefetch = 0 : i64, scratch_operands = 2 : i64, tpu.core_type = #tpu.core_type<tc>, window_params = [{transform_indices = @transform_0, window_bounds = array<i64: 1, 16, 3, 289>}, {pipeline_mode = #tpu.pipeline_mode<synchronous>, transform_indices = @transform_1, window_bounds = array<i64: 256, 192>}, {pipeline_mode = #tpu.pipeline_mode<synchronous>, transform_indices = @transform_2, window_bounds = array<i64: 16, 1>}, {pipeline_mode = #tpu.pipeline_mode<synchronous>, transform_indices = @transform_3, window_bounds = array<i64: 4, 1, 289>}, {pipeline_mode = #tpu.pipeline_mode<synchronous>, transform_indices = @transform_4, window_bounds = array<i64: 128, 256>}, {pipeline_mode = #tpu.pipeline_mode<synchronous>, transform_indices = @transform_5, window_bounds = array<i64: 32, 1>}, {pipeline_mode = #tpu.pipeline_mode<synchronous>, transform_indices = @transform_6, window_bounds = array<i64: 289, 4096>}, {pipeline_mode = #tpu.pipeline_mode<synchronous>, transform_indices = @transform_7, window_bounds = array<i64: 1, 128>}, {pipeline_mode = #tpu.pipeline_mode<synchronous>, transform_indices = @transform_8, window_bounds = array<i64: 1, 128>}, {pipeline_mode = #tpu.pipeline_mode<synchronous>, transform_indices = @transform_9, window_bounds = array<i64: 1, 1>}, {transform_indices = @transform_10, window_bounds = array<i64: 1, 1, 1>}]} {
    %c0 = arith.constant 0 : index
    %c10 = arith.constant 10 : index
    %c0_0 = arith.constant 0 : index
    %c0_1 = arith.constant 0 : index
    %0 = vector.load %arg1[%c0, %c10, %c0_0, %c0_1] : memref<1x16x3x289xbf16, #tpu.memory_space<vmem>>, vector<1x1x3x289xbf16>
    %1 = vector.shape_cast %0 : vector<1x1x3x289xbf16> to vector<3x289xbf16>
    %2 = arith.extf %1 : vector<3x289xbf16> to vector<3x289xf32>
    %3 = vector.extract_strided_slice %2 {offsets = [0, 271], sizes = [3, 18], strides = [1, 1]} : vector<3x289xf32> to vector<3x18xf32>
    %4 = vector.extract_strided_slice %2 {offsets = [0, 0], sizes = [3, 271], strides = [1, 1]} : vector<3x289xf32> to vector<3x271xf32>
    %5 = tpu.concatenate %3, %4 in 1 : vector<3x18xf32>, vector<3x271xf32> -> vector<3x289xf32>
    %c0_2 = arith.constant 0 : index
    %c0_3 = arith.constant 0 : index
    %6 = vector.load %arg12[%c0_2, %c0_3] : memref<192x289xf32, #tpu.memory_space<vmem>>, vector<3x289xf32>
    tpu.vector_store %arg12[%c0_2, %c0_3], %5 {strides = array<i32>} : memref<192x289xf32, #tpu.memory_space<vmem>>, vector<3x289xf32>,
    %c0_4 = arith.constant 0 : index
    %c11 = arith.constant 11 : index
    %c0_5 = arith.constant 0 : index
    %c0_6 = arith.constant 0 : index
    %7 = vector.load %arg1[%c0_4, %c11, %c0_5, %c0_6] : memref<1x16x3x289xbf16, #tpu.memory_space<vmem>>, vector<1x1x3x289xbf16>
    %8 = vector.shape_cast %7 : vector<1x1x3x289xbf16> to vector<3x289xbf16>
    %9 = arith.extf %8 : vector<3x289xbf16> to vector<3x289xf32>
    %10 = vector.extract_strided_slice %9 {offsets = [0, 271], sizes = [3, 18], strides = [1, 1]} : vector<3x289xf32> to vector<3x18xf32>
    %11 = vector.extract_strided_slice %9 {offsets = [0, 0], sizes = [3, 271], strides = [1, 1]} : vector<3x289xf32> to vector<3x271xf32>
    %12 = tpu.concatenate %10, %11 in 1 : vector<3x18xf32>, vector<3x271xf32> -> vector<3x289xf32>
    %c3 = arith.constant 3 : index
    %c0_7 = arith.constant 0 : index
    %13 = vector.load %arg12[%c3, %c0_7] : memref<192x289xf32, #tpu.memory_space<vmem>>, vector<3x289xf32>
    tpu.vector_store %arg12[%c3, %c0_7], %12 {strides = array<i32>} : memref<192x289xf32, #tpu.memory_space<vmem>>, vector<3x289xf32>,
    %c0_8 = arith.constant 0 : index
    %c8 = arith.constant 8 : index
    %c0_9 = arith.constant 0 : index
    %c0_10 = arith.constant 0 : index
    %14 = vector.load %arg1[%c0_8, %c8, %c0_9, %c0_10] : memref<1x16x3x289xbf16, #tpu.memory_space<vmem>>, vector<1x1x3x289xbf16>
    %15 = vector.shape_cast %14 : vector<1x1x3x289xbf16> to vector<3x289xbf16>
    %16 = arith.extf %15 : vector<3x289xbf16> to vector<3x289xf32>
    %17 = vector.extract_strided_slice %16 {offsets = [0, 272], sizes = [3, 17], strides = [1, 1]} : vector<3x289xf32> to vector<3x17xf32>
    %18 = vector.extract_strided_slice %16 {offsets = [0, 0], sizes = [3, 272], strides = [1, 1]} : vector<3x289xf32> to vector<3x272xf32>
    %19 = tpu.concatenate %17, %18 in 1 : vector<3x17xf32>, vector<3x272xf32> -> vector<3x289xf32>
    %c6 = arith.constant 6 : index
    %c0_11 = arith.constant 0 : index
    %20 = vector.load %arg12[%c6, %c0_11] : memref<192x289xf32, #tpu.memory_space<vmem>>, vector<3x289xf32>
    tpu.vector_store %arg12[%c6, %c0_11], %19 {strides = array<i32>} : memref<192x289xf32, #tpu.memory_space<vmem>>, vector<3x289xf32>,
    %c0_12 = arith.constant 0 : index
    %c9 = arith.constant 9 : index
    %c0_13 = arith.constant 0 : index
    %c0_14 = arith.constant 0 : index
    %21 = vector.load %arg1[%c0_12, %c9, %c0_13, %c0_14] : memref<1x16x3x289xbf16, #tpu.memory_space<vmem>>, vector<1x1x3x289xbf16>
    %22 = vector.shape_cast %21 : vector<1x1x3x289xbf16> to vector<3x289xbf16>
    %23 = arith.extf %22 : vector<3x289xbf16> to vector<3x289xf32>
    %24 = vector.extract_strided_slice %23 {offsets = [0, 272], sizes = [3, 17], strides = [1, 1]} : vector<3x289xf32> to vector<3x17xf32>
    %25 = vector.extract_strided_slice %23 {offsets = [0, 0], sizes = [3, 272], strides = [1, 1]} : vector<3x289xf32> to vector<3x272xf32>
    %26 = tpu.concatenate %24, %25 in 1 : vector<3x17xf32>, vector<3x272xf32> -> vector<3x289xf32>
    %c9_15 = arith.constant 9 : index
    %c0_16 = arith.constant 0 : index
    %27 = vector.load %arg12[%c9_15, %c0_16] : memref<192x289xf32, #tpu.memory_space<vmem>>, vector<3x289xf32>
    tpu.vector_store %arg12[%c9_15, %c0_16], %26 {strides = array<i32>} : memref<192x289xf32, #tpu.memory_space<vmem>>, vector<3x289xf32>,
    %c0_17 = arith.constant 0 : index
    %c10_18 = arith.constant 10 : index
    %c0_19 = arith.constant 0 : index
    %c0_20 = arith.constant 0 : index
    %28 = vector.load %arg1[%c0_17, %c10_18, %c0_19, %c0_20] : memref<1x16x3x289xbf16, #tpu.memory_space<vmem>>, vector<1x1x3x289xbf16>
    %29 = vector.shape_cast %28 : vector<1x1x3x289xbf16> to vector<3x289xbf16>
    %30 = arith.extf %29 : vector<3x289xbf16> to vector<3x289xf32>
    %31 = vector.extract_strided_slice %30 {offsets = [0, 272], sizes = [3, 17], strides = [1, 1]} : vector<3x289xf32> to vector<3x17xf32>
    %32 = vector.extract_strided_slice %30 {offsets = [0, 0], sizes = [3, 272], strides = [1, 1]} : vector<3x289xf32> to vector<3x272xf32>
    %33 = tpu.concatenate %31, %32 in 1 : vector<3x17xf32>, vector<3x272xf32> -> vector<3x289xf32>
    %c12 = arith.constant 12 : index
    %c0_21 = arith.constant 0 : index
    %34 = vector.load %arg12[%c12, %c0_21] : memref<192x289xf32, #tpu.memory_space<vmem>>, vector<3x289xf32>
    tpu.vector_store %arg12[%c12, %c0_21], %33 {strides = array<i32>} : memref<192x289xf32, #tpu.memory_space<vmem>>, vector<3x289xf32>,
    %c0_22 = arith.constant 0 : index
    %c11_23 = arith.constant 11 : index
    %c0_24 = arith.constant 0 : index
    %c0_25 = arith.constant 0 : index
    %35 = vector.load %arg1[%c0_22, %c11_23, %c0_24, %c0_25] : memref<1x16x3x289xbf16, #tpu.memory_space<vmem>>, vector<1x1x3x289xbf16>
    %36 = vector.shape_cast %35 : vector<1x1x3x289xbf16> to vector<3x289xbf16>
    %37 = arith.extf %36 : vector<3x289xbf16> to vector<3x289xf32>
    %38 = vector.extract_strided_slice %37 {offsets = [0, 272], sizes = [3, 17], strides = [1, 1]} : vector<3x289xf32> to vector<3x17xf32>
    %39 = vector.extract_strided_slice %37 {offsets = [0, 0], sizes = [3, 272], strides = [1, 1]} : vector<3x289xf32> to vector<3x272xf32>
    %40 = tpu.concatenate %38, %39 in 1 : vector<3x17xf32>, vector<3x272xf32> -> vector<3x289xf32>
    %c15 = arith.constant 15 : index
    %c0_26 = arith.constant 0 : index
    %41 = vector.load %arg12[%c15, %c0_26] : memref<192x289xf32, #tpu.memory_space<vmem>>, vector<3x289xf32>
    tpu.vector_store %arg12[%c15, %c0_26], %40 {strides = array<i32>} : memref<192x289xf32, #tpu.memory_space<vmem>>, vector<3x289xf32>,
    %c0_27 = arith.constant 0 : index
    %c8_28 = arith.constant 8 : index
    %c0_29 = arith.constant 0 : index
    %c0_30 = arith.constant 0 : index
    %42 = vector.load %arg1[%c0_27, %c8_28, %c0_29, %c0_30] : memref<1x16x3x289xbf16, #tpu.memory_space<vmem>>, vector<1x1x3x289xbf16>
    %43 = vector.shape_cast %42 : vector<1x1x3x289xbf16> to vector<3x289xbf16>
    %44 = arith.extf %43 : vector<3x289xbf16> to vector<3x289xf32>
    %45 = vector.extract_strided_slice %44 {offsets = [0, 273], sizes = [3, 16], strides = [1, 1]} : vector<3x289xf32> to vector<3x16xf32>
    %46 = vector.extract_strided_slice %44 {offsets = [0, 0], sizes = [3, 273], strides = [1, 1]} : vector<3x289xf32> to vector<3x273xf32>
    %47 = tpu.concatenate %45, %46 in 1 : vector<3x16xf32>, vector<3x273xf32> -> vector<3x289xf32>
    %c18 = arith.constant 18 : index
    %c0_31 = arith.constant 0 : index
    %48 = vector.load %arg12[%c18, %c0_31] : memref<192x289xf32, #tpu.memory_space<vmem>>, vector<3x289xf32>
    tpu.vector_store %arg12[%c18, %c0_31], %47 {strides = array<i32>} : memref<192x289xf32, #tpu.memory_space<vmem>>, vector<3x289xf32>,
    %c0_32 = arith.constant 0 : index
    %c9_33 = arith.constant 9 : index
    %c0_34 = arith.constant 0 : index
    %c0_35 = arith.constant 0 : index
    %49 = vector.load %arg1[%c0_32, %c9_33, %c0_34, %c0_35] : memref<1x16x3x289xbf16, #tpu.memory_space<vmem>>, vector<1x1x3x289xbf16>
    %50 = vector.shape_cast %49 : vector<1x1x3x289xbf16> to vector<3x289xbf16>
    %51 = arith.extf %50 : vector<3x289xbf16> to vector<3x289xf32>
    %52 = vector.extract_strided_slice %51 {offsets = [0, 273], sizes = [3, 16], strides = [1, 1]} : vector<3x289xf32> to vector<3x16xf32>
    %53 = vector.extract_strided_slice %51 {offsets = [0, 0], sizes = [3, 273], strides = [1, 1]} : vector<3x289xf32> to vector<3x273xf32>
    %54 = tpu.concatenate %52, %53 in 1 : vector<3x16xf32>, vector<3x273xf32> -> vector<3x289xf32>
    %c21 = arith.constant 21 : index
    %c0_36 = arith.constant 0 : index
    %55 = vector.load %arg12[%c21, %c0_36] : memref<192x289xf32, #tpu.memory_space<vmem>>, vector<3x289xf32>
    tpu.vector_store %arg12[%c21, %c0_36], %54 {strides = array<i32>} : memref<192x289xf32, #tpu.memory_space<vmem>>, vector<3x289xf32>,
    %c0_37 = arith.constant 0 : index
    %c14 = arith.constant 14 : index
    %c0_38 = arith.constant 0 : index
    %c0_39 = arith.constant 0 : index
    %56 = vector.load %arg1[%c0_37, %c14, %c0_38, %c0_39] : memref<1x16x3x289xbf16, #tpu.memory_space<vmem>>, vector<1x1x3x289xbf16>
    %57 = vector.shape_cast %56 : vector<1x1x3x289xbf16> to vector<3x289xbf16>
    %58 = arith.extf %57 : vector<3x289xbf16> to vector<3x289xf32>
    %59 = vector.extract_strided_slice %58 {offsets = [0, 271], sizes = [3, 18], strides = [1, 1]} : vector<3x289xf32> to vector<3x18xf32>
    %60 = vector.extract_strided_slice %58 {offsets = [0, 0], sizes = [3, 271], strides = [1, 1]} : vector<3x289xf32> to vector<3x271xf32>
    %61 = tpu.concatenate %59, %60 in 1 : vector<3x18xf32>, vector<3x271xf32> -> vector<3x289xf32>
    %c24 = arith.constant 24 : index
    %c0_40 = arith.constant 0 : index
    %62 = vector.load %arg12[%c24, %c0_40] : memref<192x289xf32, #tpu.memory_space<vmem>>, vector<3x289xf32>
    tpu.vector_store %arg12[%c24, %c0_40], %61 {strides = array<i32>} : memref<192x289xf32, #tpu.memory_space<vmem>>, vector<3x289xf32>,
    %c0_41 = arith.constant 0 : index
    %c15_42 = arith.constant 15 : index
    %c0_43 = arith.constant 0 : index
    %c0_44 = arith.constant 0 : index
    %63 = vector.load %arg1[%c0_41, %c15_42, %c0_43, %c0_44] : memref<1x16x3x289xbf16, #tpu.memory_space<vmem>>, vector<1x1x3x289xbf16>
    %64 = vector.shape_cast %63 : vector<1x1x3x289xbf16> to vector<3x289xbf16>
    %65 = arith.extf %64 : vector<3x289xbf16> to vector<3x289xf32>
    %66 = vector.extract_strided_slice %65 {offsets = [0, 271], sizes = [3, 18], strides = [1, 1]} : vector<3x289xf32> to vector<3x18xf32>
    %67 = vector.extract_strided_slice %65 {offsets = [0, 0], sizes = [3, 271], strides = [1, 1]} : vector<3x289xf32> to vector<3x271xf32>
    %68 = tpu.concatenate %66, %67 in 1 : vector<3x18xf32>, vector<3x271xf32> -> vector<3x289xf32>
    %c27 = arith.constant 27 : index
    %c0_45 = arith.constant 0 : index
    %69 = vector.load %arg12[%c27, %c0_45] : memref<192x289xf32, #tpu.memory_space<vmem>>, vector<3x289xf32>
    tpu.vector_store %arg12[%c27, %c0_45], %68 {strides = array<i32>} : memref<192x289xf32, #tpu.memory_space<vmem>>, vector<3x289xf32>,
    %c0_46 = arith.constant 0 : index
    %c12_47 = arith.constant 12 : index
    %c0_48 = arith.constant 0 : index
    %c0_49 = arith.constant 0 : index
    %70 = vector.load %arg1[%c0_46, %c12_47, %c0_48, %c0_49] : memref<1x16x3x289xbf16, #tpu.memory_space<vmem>>, vector<1x1x3x289xbf16>
    %71 = vector.shape_cast %70 : vector<1x1x3x289xbf16> to vector<3x289xbf16>
    %72 = arith.extf %71 : vector<3x289xbf16> to vector<3x289xf32>
    %73 = vector.extract_strided_slice %72 {offsets = [0, 272], sizes = [3, 17], strides = [1, 1]} : vector<3x289xf32> to vector<3x17xf32>
    %74 = vector.extract_strided_slice %72 {offsets = [0, 0], sizes = [3, 272], strides = [1, 1]} : vector<3x289xf32> to vector<3x272xf32>
    %75 = tpu.concatenate %73, %74 in 1 : vector<3x17xf32>, vector<3x272xf32> -> vector<3x289xf32>
    %c30 = arith.constant 30 : index
    %c0_50 = arith.constant 0 : index
    %76 = vector.load %arg12[%c30, %c0_50] : memref<192x289xf32, #tpu.memory_space<vmem>>, vector<3x289xf32>
    tpu.vector_store %arg12[%c30, %c0_50], %75 {strides = array<i32>} : memref<192x289xf32, #tpu.memory_space<vmem>>, vector<3x289xf32>,
    %c0_51 = arith.constant 0 : index
    %c13 = arith.constant 13 : index
    %c0_52 = arith.constant 0 : index
    %c0_53 = arith.constant 0 : index
    %77 = vector.load %arg1[%c0_51, %c13, %c0_52, %c0_53] : memref<1x16x3x289xbf16, #tpu.memory_space<vmem>>, vector<1x1x3x289xbf16>
    %78 = vector.shape_cast %77 : vector<1x1x3x289xbf16> to vector<3x289xbf16>
    %79 = arith.extf %78 : vector<3x289xbf16> to vector<3x289xf32>
    %80 = vector.extract_strided_slice %79 {offsets = [0, 272], sizes = [3, 17], strides = [1, 1]} : vector<3x289xf32> to vector<3x17xf32>
    %81 = vector.extract_strided_slice %79 {offsets = [0, 0], sizes = [3, 272], strides = [1, 1]} : vector<3x289xf32> to vector<3x272xf32>
    %82 = tpu.concatenate %80, %81 in 1 : vector<3x17xf32>, vector<3x272xf32> -> vector<3x289xf32>
    %c33 = arith.constant 33 : index
    %c0_54 = arith.constant 0 : index
    %83 = vector.load %arg12[%c33, %c0_54] : memref<192x289xf32, #tpu.memory_space<vmem>>, vector<3x289xf32>
    tpu.vector_store %arg12[%c33, %c0_54], %82 {strides = array<i32>} : memref<192x289xf32, #tpu.memory_space<vmem>>, vector<3x289xf32>,
    %c0_55 = arith.constant 0 : index
    %c14_56 = arith.constant 14 : index
    %c0_57 = arith.constant 0 : index
    %c0_58 = arith.constant 0 : index
    %84 = vector.load %arg1[%c0_55, %c14_56, %c0_57, %c0_58] : memref<1x16x3x289xbf16, #tpu.memory_space<vmem>>, vector<1x1x3x289xbf16>
    %85 = vector.shape_cast %84 : vector<1x1x3x289xbf16> to vector<3x289xbf16>
    %86 = arith.extf %85 : vector<3x289xbf16> to vector<3x289xf32>
    %87 = vector.extract_strided_slice %86 {offsets = [0, 272], sizes = [3, 17], strides = [1, 1]} : vector<3x289xf32> to vector<3x17xf32>
    %88 = vector.extract_strided_slice %86 {offsets = [0, 0], sizes = [3, 272], strides = [1, 1]} : vector<3x289xf32> to vector<3x272xf32>
    %89 = tpu.concatenate %87, %88 in 1 : vector<3x17xf32>, vector<3x272xf32> -> vector<3x289xf32>
    %c36 = arith.constant 36 : index
    %c0_59 = arith.constant 0 : index
    %90 = vector.load %arg12[%c36, %c0_59] : memref<192x289xf32, #tpu.memory_space<vmem>>, vector<3x289xf32>
    tpu.vector_store %arg12[%c36, %c0_59], %89 {strides = array<i32>} : memref<192x289xf32, #tpu.memory_space<vmem>>, vector<3x289xf32>,
    %c0_60 = arith.constant 0 : index
    %c15_61 = arith.constant 15 : index
    %c0_62 = arith.constant 0 : index
    %c0_63 = arith.constant 0 : index
    %91 = vector.load %arg1[%c0_60, %c15_61, %c0_62, %c0_63] : memref<1x16x3x289xbf16, #tpu.memory_space<vmem>>, vector<1x1x3x289xbf16>
    %92 = vector.shape_cast %91 : vector<1x1x3x289xbf16> to vector<3x289xbf16>
    %93 = arith.extf %92 : vector<3x289xbf16> to vector<3x289xf32>
    %94 = vector.extract_strided_slice %93 {offsets = [0, 272], sizes = [3, 17], strides = [1, 1]} : vector<3x289xf32> to vector<3x17xf32>
    %95 = vector.extract_strided_slice %93 {offsets = [0, 0], sizes = [3, 272], strides = [1, 1]} : vector<3x289xf32> to vector<3x272xf32>
    %96 = tpu.concatenate %94, %95 in 1 : vector<3x17xf32>, vector<3x272xf32> -> vector<3x289xf32>
    %c39 = arith.constant 39 : index
    %c0_64 = arith.constant 0 : index
    %97 = vector.load %arg12[%c39, %c0_64] : memref<192x289xf32, #tpu.memory_space<vmem>>, vector<3x289xf32>
    tpu.vector_store %arg12[%c39, %c0_64], %96 {strides = array<i32>} : memref<192x289xf32, #tpu.memory_space<vmem>>, vector<3x289xf32>,
    %c0_65 = arith.constant 0 : index
    %c12_66 = arith.constant 12 : index
    %c0_67 = arith.constant 0 : index
    %c0_68 = arith.constant 0 : index
    %98 = vector.load %arg1[%c0_65, %c12_66, %c0_67, %c0_68] : memref<1x16x3x289xbf16, #tpu.memory_space<vmem>>, vector<1x1x3x289xbf16>
    %99 = vector.shape_cast %98 : vector<1x1x3x289xbf16> to vector<3x289xbf16>
    %100 = arith.extf %99 : vector<3x289xbf16> to vector<3x289xf32>
    %101 = vector.extract_strided_slice %100 {offsets = [0, 273], sizes = [3, 16], strides = [1, 1]} : vector<3x289xf32> to vector<3x16xf32>
    %102 = vector.extract_strided_slice %100 {offsets = [0, 0], sizes = [3, 273], strides = [1, 1]} : vector<3x289xf32> to vector<3x273xf32>
    %103 = tpu.concatenate %101, %102 in 1 : vector<3x16xf32>, vector<3x273xf32> -> vector<3x289xf32>
    %c42 = arith.constant 42 : index
    %c0_69 = arith.constant 0 : index
    %104 = vector.load %arg12[%c42, %c0_69] : memref<192x289xf32, #tpu.memory_space<vmem>>, vector<3x289xf32>
    tpu.vector_store %arg12[%c42, %c0_69], %103 {strides = array<i32>} : memref<192x289xf32, #tpu.memory_space<vmem>>, vector<3x289xf32>,
    %c0_70 = arith.constant 0 : index
    %c13_71 = arith.constant 13 : index
    %c0_72 = arith.constant 0 : index
    %c0_73 = arith.constant 0 : index
    %105 = vector.load %arg1[%c0_70, %c13_71, %c0_72, %c0_73] : memref<1x16x3x289xbf16, #tpu.memory_space<vmem>>, vector<1x1x3x289xbf16>
    %106 = vector.shape_cast %105 : vector<1x1x3x289xbf16> to vector<3x289xbf16>
    %107 = arith.extf %106 : vector<3x289xbf16> to vector<3x289xf32>
    %108 = vector.extract_strided_slice %107 {offsets = [0, 273], sizes = [3, 16], strides = [1, 1]} : vector<3x289xf32> to vector<3x16xf32>
    %109 = vector.extract_strided_slice %107 {offsets = [0, 0], sizes = [3, 273], strides = [1, 1]} : vector<3x289xf32> to vector<3x273xf32>
    %110 = tpu.concatenate %108, %109 in 1 : vector<3x16xf32>, vector<3x273xf32> -> vector<3x289xf32>
    %c45 = arith.constant 45 : index
    %c0_74 = arith.constant 0 : index
    %111 = vector.load %arg12[%c45, %c0_74] : memref<192x289xf32, #tpu.memory_space<vmem>>, vector<3x289xf32>
    tpu.vector_store %arg12[%c45, %c0_74], %110 {strides = array<i32>} : memref<192x289xf32, #tpu.memory_space<vmem>>, vector<3x289xf32>,
    %c0_75 = arith.constant 0 : index
    %c2 = arith.constant 2 : index
    %c0_76 = arith.constant 0 : index
    %c0_77 = arith.constant 0 : index
    %112 = vector.load %arg1[%c0_75, %c2, %c0_76, %c0_77] : memref<1x16x3x289xbf16, #tpu.memory_space<vmem>>, vector<1x1x3x289xbf16>
    %113 = vector.shape_cast %112 : vector<1x1x3x289xbf16> to vector<3x289xbf16>
    %114 = arith.extf %113 : vector<3x289xbf16> to vector<3x289xf32>
    %115 = vector.extract_strided_slice %114 {offsets = [0, 288], sizes = [3, 1], strides = [1, 1]} : vector<3x289xf32> to vector<3x1xf32>
    %116 = vector.extract_strided_slice %114 {offsets = [0, 0], sizes = [3, 288], strides = [1, 1]} : vector<3x289xf32> to vector<3x288xf32>
    %117 = tpu.concatenate %115, %116 in 1 : vector<3x1xf32>, vector<3x288xf32> -> vector<3x289xf32>
    %c48 = arith.constant 48 : index
    %c0_78 = arith.constant 0 : index
    %118 = vector.load %arg12[%c48, %c0_78] : memref<192x289xf32, #tpu.memory_space<vmem>>, vector<3x289xf32>
    tpu.vector_store %arg12[%c48, %c0_78], %117 {strides = array<i32>} : memref<192x289xf32, #tpu.memory_space<vmem>>, vector<3x289xf32>,
    %c0_79 = arith.constant 0 : index
    %c3_80 = arith.constant 3 : index
    %c0_81 = arith.constant 0 : index
    %c0_82 = arith.constant 0 : index
    %119 = vector.load %arg1[%c0_79, %c3_80, %c0_81, %c0_82] : memref<1x16x3x289xbf16, #tpu.memory_space<vmem>>, vector<1x1x3x289xbf16>
    %120 = vector.shape_cast %119 : vector<1x1x3x289xbf16> to vector<3x289xbf16>
    %121 = arith.extf %120 : vector<3x289xbf16> to vector<3x289xf32>
    %122 = vector.extract_strided_slice %121 {offsets = [0, 288], sizes = [3, 1], strides = [1, 1]} : vector<3x289xf32> to vector<3x1xf32>
    %123 = vector.extract_strided_slice %121 {offsets = [0, 0], sizes = [3, 288], strides = [1, 1]} : vector<3x289xf32> to vector<3x288xf32>
    %124 = tpu.concatenate %122, %123 in 1 : vector<3x1xf32>, vector<3x288xf32> -> vector<3x289xf32>
    %c51 = arith.constant 51 : index
    %c0_83 = arith.constant 0 : index
    %125 = vector.load %arg12[%c51, %c0_83] : memref<192x289xf32, #tpu.memory_space<vmem>>, vector<3x289xf32>
    tpu.vector_store %arg12[%c51, %c0_83], %124 {strides = array<i32>} : memref<192x289xf32, #tpu.memory_space<vmem>>, vector<3x289xf32>,
    %c0_84 = arith.constant 0 : index
    %c0_85 = arith.constant 0 : index
    %c0_86 = arith.constant 0 : index
    %c0_87 = arith.constant 0 : index
    %126 = vector.load %arg1[%c0_84, %c0_85, %c0_86, %c0_87] : memref<1x16x3x289xbf16, #tpu.memory_space<vmem>>, vector<1x1x3x289xbf16>
    %127 = vector.shape_cast %126 : vector<1x1x3x289xbf16> to vector<3x289xbf16>
    %128 = arith.extf %127 : vector<3x289xbf16> to vector<3x289xf32>
    %c54 = arith.constant 54 : index
    %c0_88 = arith.constant 0 : index
    %129 = vector.load %arg12[%c54, %c0_88] : memref<192x289xf32, #tpu.memory_space<vmem>>, vector<3x289xf32>
    tpu.vector_store %arg12[%c54, %c0_88], %128 {strides = array<i32>} : memref<192x289xf32, #tpu.memory_space<vmem>>, vector<3x289xf32>,
    %c0_89 = arith.constant 0 : index
    %c1 = arith.constant 1 : index
    %c0_90 = arith.constant 0 : index
    %c0_91 = arith.constant 0 : index
    %130 = vector.load %arg1[%c0_89, %c1, %c0_90, %c0_91] : memref<1x16x3x289xbf16, #tpu.memory_space<vmem>>, vector<1x1x3x289xbf16>
    %131 = vector.shape_cast %130 : vector<1x1x3x289xbf16> to vector<3x289xbf16>
    %132 = arith.extf %131 : vector<3x289xbf16> to vector<3x289xf32>
    %c57 = arith.constant 57 : index
    %c0_92 = arith.constant 0 : index
    %133 = vector.load %arg12[%c57, %c0_92] : memref<192x289xf32, #tpu.memory_space<vmem>>, vector<3x289xf32>
    tpu.vector_store %arg12[%c57, %c0_92], %132 {strides = array<i32>} : memref<192x289xf32, #tpu.memory_space<vmem>>, vector<3x289xf32>,
    %c0_93 = arith.constant 0 : index
    %c2_94 = arith.constant 2 : index
    %c0_95 = arith.constant 0 : index
    %c0_96 = arith.constant 0 : index
    %134 = vector.load %arg1[%c0_93, %c2_94, %c0_95, %c0_96] : memref<1x16x3x289xbf16, #tpu.memory_space<vmem>>, vector<1x1x3x289xbf16>
    %135 = vector.shape_cast %134 : vector<1x1x3x289xbf16> to vector<3x289xbf16>
    %136 = arith.extf %135 : vector<3x289xbf16> to vector<3x289xf32>
    %c60 = arith.constant 60 : index
    %c0_97 = arith.constant 0 : index
    %137 = vector.load %arg12[%c60, %c0_97] : memref<192x289xf32, #tpu.memory_space<vmem>>, vector<3x289xf32>
    tpu.vector_store %arg12[%c60, %c0_97], %136 {strides = array<i32>} : memref<192x289xf32, #tpu.memory_space<vmem>>, vector<3x289xf32>,
    %c0_98 = arith.constant 0 : index
    %c3_99 = arith.constant 3 : index
    %c0_100 = arith.constant 0 : index
    %c0_101 = arith.constant 0 : index
    %138 = vector.load %arg1[%c0_98, %c3_99, %c0_100, %c0_101] : memref<1x16x3x289xbf16, #tpu.memory_space<vmem>>, vector<1x1x3x289xbf16>
    %139 = vector.shape_cast %138 : vector<1x1x3x289xbf16> to vector<3x289xbf16>
    %140 = arith.extf %139 : vector<3x289xbf16> to vector<3x289xf32>
    %c63 = arith.constant 63 : index
    %c0_102 = arith.constant 0 : index
    %141 = vector.load %arg12[%c63, %c0_102] : memref<192x289xf32, #tpu.memory_space<vmem>>, vector<3x289xf32>
    tpu.vector_store %arg12[%c63, %c0_102], %140 {strides = array<i32>} : memref<192x289xf32, #tpu.memory_space<vmem>>, vector<3x289xf32>,
    %c0_103 = arith.constant 0 : index
    %c0_104 = arith.constant 0 : index
    %c0_105 = arith.constant 0 : index
    %c0_106 = arith.constant 0 : index
    %142 = vector.load %arg1[%c0_103, %c0_104, %c0_105, %c0_106] : memref<1x16x3x289xbf16, #tpu.memory_space<vmem>>, vector<1x1x3x289xbf16>
    %143 = vector.shape_cast %142 : vector<1x1x3x289xbf16> to vector<3x289xbf16>
    %144 = arith.extf %143 : vector<3x289xbf16> to vector<3x289xf32>
    %145 = vector.extract_strided_slice %144 {offsets = [0, 1], sizes = [3, 288], strides = [1, 1]} : vector<3x289xf32> to vector<3x288xf32>
    %146 = vector.extract_strided_slice %144 {offsets = [0, 0], sizes = [3, 1], strides = [1, 1]} : vector<3x289xf32> to vector<3x1xf32>
    %147 = tpu.concatenate %145, %146 in 1 : vector<3x288xf32>, vector<3x1xf32> -> vector<3x289xf32>
    %c66 = arith.constant 66 : index
    %c0_107 = arith.constant 0 : index
    %148 = vector.load %arg12[%c66, %c0_107] : memref<192x289xf32, #tpu.memory_space<vmem>>, vector<3x289xf32>
    tpu.vector_store %arg12[%c66, %c0_107], %147 {strides = array<i32>} : memref<192x289xf32, #tpu.memory_space<vmem>>, vector<3x289xf32>,
    %c0_108 = arith.constant 0 : index
    %c1_109 = arith.constant 1 : index
    %c0_110 = arith.constant 0 : index
    %c0_111 = arith.constant 0 : index
    %149 = vector.load %arg1[%c0_108, %c1_109, %c0_110, %c0_111] : memref<1x16x3x289xbf16, #tpu.memory_space<vmem>>, vector<1x1x3x289xbf16>
    %150 = vector.shape_cast %149 : vector<1x1x3x289xbf16> to vector<3x289xbf16>
    %151 = arith.extf %150 : vector<3x289xbf16> to vector<3x289xf32>
    %152 = vector.extract_strided_slice %151 {offsets = [0, 1], sizes = [3, 288], strides = [1, 1]} : vector<3x289xf32> to vector<3x288xf32>
    %153 = vector.extract_strided_slice %151 {offsets = [0, 0], sizes = [3, 1], strides = [1, 1]} : vector<3x289xf32> to vector<3x1xf32>
    %154 = tpu.concatenate %152, %153 in 1 : vector<3x288xf32>, vector<3x1xf32> -> vector<3x289xf32>
    %c69 = arith.constant 69 : index
    %c0_112 = arith.constant 0 : index
    %155 = vector.load %arg12[%c69, %c0_112] : memref<192x289xf32, #tpu.memory_space<vmem>>, vector<3x289xf32>
    tpu.vector_store %arg12[%c69, %c0_112], %154 {strides = array<i32>} : memref<192x289xf32, #tpu.memory_space<vmem>>, vector<3x289xf32>,
    %c0_113 = arith.constant 0 : index
    %c6_114 = arith.constant 6 : index
    %c0_115 = arith.constant 0 : index
    %c0_116 = arith.constant 0 : index
    %156 = vector.load %arg1[%c0_113, %c6_114, %c0_115, %c0_116] : memref<1x16x3x289xbf16, #tpu.memory_space<vmem>>, vector<1x1x3x289xbf16>
    %157 = vector.shape_cast %156 : vector<1x1x3x289xbf16> to vector<3x289xbf16>
    %158 = arith.extf %157 : vector<3x289xbf16> to vector<3x289xf32>
    %159 = vector.extract_strided_slice %158 {offsets = [0, 288], sizes = [3, 1], strides = [1, 1]} : vector<3x289xf32> to vector<3x1xf32>
    %160 = vector.extract_strided_slice %158 {offsets = [0, 0], sizes = [3, 288], strides = [1, 1]} : vector<3x289xf32> to vector<3x288xf32>
    %161 = tpu.concatenate %159, %160 in 1 : vector<3x1xf32>, vector<3x288xf32> -> vector<3x289xf32>
    %c72 = arith.constant 72 : index
    %c0_117 = arith.constant 0 : index
    %162 = vector.load %arg12[%c72, %c0_117] : memref<192x289xf32, #tpu.memory_space<vmem>>, vector<3x289xf32>
    tpu.vector_store %arg12[%c72, %c0_117], %161 {strides = array<i32>} : memref<192x289xf32, #tpu.memory_space<vmem>>, vector<3x289xf32>,
    %c0_118 = arith.constant 0 : index
    %c7 = arith.constant 7 : index
    %c0_119 = arith.constant 0 : index
    %c0_120 = arith.constant 0 : index
    %163 = vector.load %arg1[%c0_118, %c7, %c0_119, %c0_120] : memref<1x16x3x289xbf16, #tpu.memory_space<vmem>>, vector<1x1x3x289xbf16>
    %164 = vector.shape_cast %163 : vector<1x1x3x289xbf16> to vector<3x289xbf16>
    %165 = arith.extf %164 : vector<3x289xbf16> to vector<3x289xf32>
    %166 = vector.extract_strided_slice %165 {offsets = [0, 288], sizes = [3, 1], strides = [1, 1]} : vector<3x289xf32> to vector<3x1xf32>
    %167 = vector.extract_strided_slice %165 {offsets = [0, 0], sizes = [3, 288], strides = [1, 1]} : vector<3x289xf32> to vector<3x288xf32>
    %168 = tpu.concatenate %166, %167 in 1 : vector<3x1xf32>, vector<3x288xf32> -> vector<3x289xf32>
    %c75 = arith.constant 75 : index
    %c0_121 = arith.constant 0 : index
    %169 = vector.load %arg12[%c75, %c0_121] : memref<192x289xf32, #tpu.memory_space<vmem>>, vector<3x289xf32>
    tpu.vector_store %arg12[%c75, %c0_121], %168 {strides = array<i32>} : memref<192x289xf32, #tpu.memory_space<vmem>>, vector<3x289xf32>,
    %c0_122 = arith.constant 0 : index
    %c4 = arith.constant 4 : index
    %c0_123 = arith.constant 0 : index
    %c0_124 = arith.constant 0 : index
    %170 = vector.load %arg1[%c0_122, %c4, %c0_123, %c0_124] : memref<1x16x3x289xbf16, #tpu.memory_space<vmem>>, vector<1x1x3x289xbf16>
    %171 = vector.shape_cast %170 : vector<1x1x3x289xbf16> to vector<3x289xbf16>
    %172 = arith.extf %171 : vector<3x289xbf16> to vector<3x289xf32>
    %c78 = arith.constant 78 : index
    %c0_125 = arith.constant 0 : index
    %173 = vector.load %arg12[%c78, %c0_125] : memref<192x289xf32, #tpu.memory_space<vmem>>, vector<3x289xf32>
    tpu.vector_store %arg12[%c78, %c0_125], %172 {strides = array<i32>} : memref<192x289xf32, #tpu.memory_space<vmem>>, vector<3x289xf32>,
    %c0_126 = arith.constant 0 : index
    %c5 = arith.constant 5 : index
    %c0_127 = arith.constant 0 : index
    %c0_128 = arith.constant 0 : index
    %174 = vector.load %arg1[%c0_126, %c5, %c0_127, %c0_128] : memref<1x16x3x289xbf16, #tpu.memory_space<vmem>>, vector<1x1x3x289xbf16>
    %175 = vector.shape_cast %174 : vector<1x1x3x289xbf16> to vector<3x289xbf16>
    %176 = arith.extf %175 : vector<3x289xbf16> to vector<3x289xf32>
    %c81 = arith.constant 81 : index
    %c0_129 = arith.constant 0 : index
    %177 = vector.load %arg12[%c81, %c0_129] : memref<192x289xf32, #tpu.memory_space<vmem>>, vector<3x289xf32>
    tpu.vector_store %arg12[%c81, %c0_129], %176 {strides = array<i32>} : memref<192x289xf32, #tpu.memory_space<vmem>>, vector<3x289xf32>,
    %c0_130 = arith.constant 0 : index
    %c6_131 = arith.constant 6 : index
    %c0_132 = arith.constant 0 : index
    %c0_133 = arith.constant 0 : index
    %178 = vector.load %arg1[%c0_130, %c6_131, %c0_132, %c0_133] : memref<1x16x3x289xbf16, #tpu.memory_space<vmem>>, vector<1x1x3x289xbf16>
    %179 = vector.shape_cast %178 : vector<1x1x3x289xbf16> to vector<3x289xbf16>
    %180 = arith.extf %179 : vector<3x289xbf16> to vector<3x289xf32>
    %c84 = arith.constant 84 : index
    %c0_134 = arith.constant 0 : index
    %181 = vector.load %arg12[%c84, %c0_134] : memref<192x289xf32, #tpu.memory_space<vmem>>, vector<3x289xf32>
    tpu.vector_store %arg12[%c84, %c0_134], %180 {strides = array<i32>} : memref<192x289xf32, #tpu.memory_space<vmem>>, vector<3x289xf32>,
    %c0_135 = arith.constant 0 : index
    %c7_136 = arith.constant 7 : index
    %c0_137 = arith.constant 0 : index
    %c0_138 = arith.constant 0 : index
    %182 = vector.load %arg1[%c0_135, %c7_136, %c0_137, %c0_138] : memref<1x16x3x289xbf16, #tpu.memory_space<vmem>>, vector<1x1x3x289xbf16>
    %183 = vector.shape_cast %182 : vector<1x1x3x289xbf16> to vector<3x289xbf16>
    %184 = arith.extf %183 : vector<3x289xbf16> to vector<3x289xf32>
    %c87 = arith.constant 87 : index
    %c0_139 = arith.constant 0 : index
    %185 = vector.load %arg12[%c87, %c0_139] : memref<192x289xf32, #tpu.memory_space<vmem>>, vector<3x289xf32>
    tpu.vector_store %arg12[%c87, %c0_139], %184 {strides = array<i32>} : memref<192x289xf32, #tpu.memory_space<vmem>>, vector<3x289xf32>,
    %c0_140 = arith.constant 0 : index
    %c4_141 = arith.constant 4 : index
    %c0_142 = arith.constant 0 : index
    %c0_143 = arith.constant 0 : index
    %186 = vector.load %arg1[%c0_140, %c4_141, %c0_142, %c0_143] : memref<1x16x3x289xbf16, #tpu.memory_space<vmem>>, vector<1x1x3x289xbf16>
    %187 = vector.shape_cast %186 : vector<1x1x3x289xbf16> to vector<3x289xbf16>
    %188 = arith.extf %187 : vector<3x289xbf16> to vector<3x289xf32>
    %189 = vector.extract_strided_slice %188 {offsets = [0, 1], sizes = [3, 288], strides = [1, 1]} : vector<3x289xf32> to vector<3x288xf32>
    %190 = vector.extract_strided_slice %188 {offsets = [0, 0], sizes = [3, 1], strides = [1, 1]} : vector<3x289xf32> to vector<3x1xf32>
    %191 = tpu.concatenate %189, %190 in 1 : vector<3x288xf32>, vector<3x1xf32> -> vector<3x289xf32>
    %c90 = arith.constant 90 : index
    %c0_144 = arith.constant 0 : index
    %192 = vector.load %arg12[%c90, %c0_144] : memref<192x289xf32, #tpu.memory_space<vmem>>, vector<3x289xf32>
    tpu.vector_store %arg12[%c90, %c0_144], %191 {strides = array<i32>} : memref<192x289xf32, #tpu.memory_space<vmem>>, vector<3x289xf32>,
    %c0_145 = arith.constant 0 : index
    %c5_146 = arith.constant 5 : index
    %c0_147 = arith.constant 0 : index
    %c0_148 = arith.constant 0 : index
    %193 = vector.load %arg1[%c0_145, %c5_146, %c0_147, %c0_148] : memref<1x16x3x289xbf16, #tpu.memory_space<vmem>>, vector<1x1x3x289xbf16>
    %194 = vector.shape_cast %193 : vector<1x1x3x289xbf16> to vector<3x289xbf16>
    %195 = arith.extf %194 : vector<3x289xbf16> to vector<3x289xf32>
    %196 = vector.extract_strided_slice %195 {offsets = [0, 1], sizes = [3, 288], strides = [1, 1]} : vector<3x289xf32> to vector<3x288xf32>
    %197 = vector.extract_strided_slice %195 {offsets = [0, 0], sizes = [3, 1], strides = [1, 1]} : vector<3x289xf32> to vector<3x1xf32>
    %198 = tpu.concatenate %196, %197 in 1 : vector<3x288xf32>, vector<3x1xf32> -> vector<3x289xf32>
    %c93 = arith.constant 93 : index
    %c0_149 = arith.constant 0 : index
    %199 = vector.load %arg12[%c93, %c0_149] : memref<192x289xf32, #tpu.memory_space<vmem>>, vector<3x289xf32>
    tpu.vector_store %arg12[%c93, %c0_149], %198 {strides = array<i32>} : memref<192x289xf32, #tpu.memory_space<vmem>>, vector<3x289xf32>,
    %c0_150 = arith.constant 0 : index
    %c10_151 = arith.constant 10 : index
    %c0_152 = arith.constant 0 : index
    %c0_153 = arith.constant 0 : index
    %200 = vector.load %arg1[%c0_150, %c10_151, %c0_152, %c0_153] : memref<1x16x3x289xbf16, #tpu.memory_space<vmem>>, vector<1x1x3x289xbf16>
    %201 = vector.shape_cast %200 : vector<1x1x3x289xbf16> to vector<3x289xbf16>
    %202 = arith.extf %201 : vector<3x289xbf16> to vector<3x289xf32>
    %203 = vector.extract_strided_slice %202 {offsets = [0, 288], sizes = [3, 1], strides = [1, 1]} : vector<3x289xf32> to vector<3x1xf32>
    %204 = vector.extract_strided_slice %202 {offsets = [0, 0], sizes = [3, 288], strides = [1, 1]} : vector<3x289xf32> to vector<3x288xf32>
    %205 = tpu.concatenate %203, %204 in 1 : vector<3x1xf32>, vector<3x288xf32> -> vector<3x289xf32>
    %c96 = arith.constant 96 : index
    %c0_154 = arith.constant 0 : index
    %206 = vector.load %arg12[%c96, %c0_154] : memref<192x289xf32, #tpu.memory_space<vmem>>, vector<3x289xf32>
    tpu.vector_store %arg12[%c96, %c0_154], %205 {strides = array<i32>} : memref<192x289xf32, #tpu.memory_space<vmem>>, vector<3x289xf32>,
    %c0_155 = arith.constant 0 : index
    %c11_156 = arith.constant 11 : index
    %c0_157 = arith.constant 0 : index
    %c0_158 = arith.constant 0 : index
    %207 = vector.load %arg1[%c0_155, %c11_156, %c0_157, %c0_158] : memref<1x16x3x289xbf16, #tpu.memory_space<vmem>>, vector<1x1x3x289xbf16>
    %208 = vector.shape_cast %207 : vector<1x1x3x289xbf16> to vector<3x289xbf16>
    %209 = arith.extf %208 : vector<3x289xbf16> to vector<3x289xf32>
    %210 = vector.extract_strided_slice %209 {offsets = [0, 288], sizes = [3, 1], strides = [1, 1]} : vector<3x289xf32> to vector<3x1xf32>
    %211 = vector.extract_strided_slice %209 {offsets = [0, 0], sizes = [3, 288], strides = [1, 1]} : vector<3x289xf32> to vector<3x288xf32>
    %212 = tpu.concatenate %210, %211 in 1 : vector<3x1xf32>, vector<3x288xf32> -> vector<3x289xf32>
    %c99 = arith.constant 99 : index
    %c0_159 = arith.constant 0 : index
    %213 = vector.load %arg12[%c99, %c0_159] : memref<192x289xf32, #tpu.memory_space<vmem>>, vector<3x289xf32>
    tpu.vector_store %arg12[%c99, %c0_159], %212 {strides = array<i32>} : memref<192x289xf32, #tpu.memory_space<vmem>>, vector<3x289xf32>,
    %c0_160 = arith.constant 0 : index
    %c8_161 = arith.constant 8 : index
    %c0_162 = arith.constant 0 : index
    %c0_163 = arith.constant 0 : index
    %214 = vector.load %arg1[%c0_160, %c8_161, %c0_162, %c0_163] : memref<1x16x3x289xbf16, #tpu.memory_space<vmem>>, vector<1x1x3x289xbf16>
    %215 = vector.shape_cast %214 : vector<1x1x3x289xbf16> to vector<3x289xbf16>
    %216 = arith.extf %215 : vector<3x289xbf16> to vector<3x289xf32>
    %c102 = arith.constant 102 : index
    %c0_164 = arith.constant 0 : index
    %217 = vector.load %arg12[%c102, %c0_164] : memref<192x289xf32, #tpu.memory_space<vmem>>, vector<3x289xf32>
    tpu.vector_store %arg12[%c102, %c0_164], %216 {strides = array<i32>} : memref<192x289xf32, #tpu.memory_space<vmem>>, vector<3x289xf32>,
    %c0_165 = arith.constant 0 : index
    %c9_166 = arith.constant 9 : index
    %c0_167 = arith.constant 0 : index
    %c0_168 = arith.constant 0 : index
    %218 = vector.load %arg1[%c0_165, %c9_166, %c0_167, %c0_168] : memref<1x16x3x289xbf16, #tpu.memory_space<vmem>>, vector<1x1x3x289xbf16>
    %219 = vector.shape_cast %218 : vector<1x1x3x289xbf16> to vector<3x289xbf16>
    %220 = arith.extf %219 : vector<3x289xbf16> to vector<3x289xf32>
    %c105 = arith.constant 105 : index
    %c0_169 = arith.constant 0 : index
    %221 = vector.load %arg12[%c105, %c0_169] : memref<192x289xf32, #tpu.memory_space<vmem>>, vector<3x289xf32>
    tpu.vector_store %arg12[%c105, %c0_169], %220 {strides = array<i32>} : memref<192x289xf32, #tpu.memory_space<vmem>>, vector<3x289xf32>,
    %c0_170 = arith.constant 0 : index
    %c10_171 = arith.constant 10 : index
    %c0_172 = arith.constant 0 : index
    %c0_173 = arith.constant 0 : index
    %222 = vector.load %arg1[%c0_170, %c10_171, %c0_172, %c0_173] : memref<1x16x3x289xbf16, #tpu.memory_space<vmem>>, vector<1x1x3x289xbf16>
    %223 = vector.shape_cast %222 : vector<1x1x3x289xbf16> to vector<3x289xbf16>
    %224 = arith.extf %223 : vector<3x289xbf16> to vector<3x289xf32>
    %c108 = arith.constant 108 : index
    %c0_174 = arith.constant 0 : index
    %225 = vector.load %arg12[%c108, %c0_174] : memref<192x289xf32, #tpu.memory_space<vmem>>, vector<3x289xf32>
    tpu.vector_store %arg12[%c108, %c0_174], %224 {strides = array<i32>} : memref<192x289xf32, #tpu.memory_space<vmem>>, vector<3x289xf32>,
    %c0_175 = arith.constant 0 : index
    %c11_176 = arith.constant 11 : index
    %c0_177 = arith.constant 0 : index
    %c0_178 = arith.constant 0 : index
    %226 = vector.load %arg1[%c0_175, %c11_176, %c0_177, %c0_178] : memref<1x16x3x289xbf16, #tpu.memory_space<vmem>>, vector<1x1x3x289xbf16>
    %227 = vector.shape_cast %226 : vector<1x1x3x289xbf16> to vector<3x289xbf16>
    %228 = arith.extf %227 : vector<3x289xbf16> to vector<3x289xf32>
    %c111 = arith.constant 111 : index
    %c0_179 = arith.constant 0 : index
    %229 = vector.load %arg12[%c111, %c0_179] : memref<192x289xf32, #tpu.memory_space<vmem>>, vector<3x289xf32>
    tpu.vector_store %arg12[%c111, %c0_179], %228 {strides = array<i32>} : memref<192x289xf32, #tpu.memory_space<vmem>>, vector<3x289xf32>,
    %c0_180 = arith.constant 0 : index
    %c8_181 = arith.constant 8 : index
    %c0_182 = arith.constant 0 : index
    %c0_183 = arith.constant 0 : index
    %230 = vector.load %arg1[%c0_180, %c8_181, %c0_182, %c0_183] : memref<1x16x3x289xbf16, #tpu.memory_space<vmem>>, vector<1x1x3x289xbf16>
    %231 = vector.shape_cast %230 : vector<1x1x3x289xbf16> to vector<3x289xbf16>
    %232 = arith.extf %231 : vector<3x289xbf16> to vector<3x289xf32>
    %233 = vector.extract_strided_slice %232 {offsets = [0, 1], sizes = [3, 288], strides = [1, 1]} : vector<3x289xf32> to vector<3x288xf32>
    %234 = vector.extract_strided_slice %232 {offsets = [0, 0], sizes = [3, 1], strides = [1, 1]} : vector<3x289xf32> to vector<3x1xf32>
    %235 = tpu.concatenate %233, %234 in 1 : vector<3x288xf32>, vector<3x1xf32> -> vector<3x289xf32>
    %c114 = arith.constant 114 : index
    %c0_184 = arith.constant 0 : index
    %236 = vector.load %arg12[%c114, %c0_184] : memref<192x289xf32, #tpu.memory_space<vmem>>, vector<3x289xf32>
    tpu.vector_store %arg12[%c114, %c0_184], %235 {strides = array<i32>} : memref<192x289xf32, #tpu.memory_space<vmem>>, vector<3x289xf32>,
    %c0_185 = arith.constant 0 : index
    %c9_186 = arith.constant 9 : index
    %c0_187 = arith.constant 0 : index
    %c0_188 = arith.constant 0 : index
    %237 = vector.load %arg1[%c0_185, %c9_186, %c0_187, %c0_188] : memref<1x16x3x289xbf16, #tpu.memory_space<vmem>>, vector<1x1x3x289xbf16>
    %238 = vector.shape_cast %237 : vector<1x1x3x289xbf16> to vector<3x289xbf16>
    %239 = arith.extf %238 : vector<3x289xbf16> to vector<3x289xf32>
    %240 = vector.extract_strided_slice %239 {offsets = [0, 1], sizes = [3, 288], strides = [1, 1]} : vector<3x289xf32> to vector<3x288xf32>
    %241 = vector.extract_strided_slice %239 {offsets = [0, 0], sizes = [3, 1], strides = [1, 1]} : vector<3x289xf32> to vector<3x1xf32>
    %242 = tpu.concatenate %240, %241 in 1 : vector<3x288xf32>, vector<3x1xf32> -> vector<3x289xf32>
    %c117 = arith.constant 117 : index
    %c0_189 = arith.constant 0 : index
    %243 = vector.load %arg12[%c117, %c0_189] : memref<192x289xf32, #tpu.memory_space<vmem>>, vector<3x289xf32>
    tpu.vector_store %arg12[%c117, %c0_189], %242 {strides = array<i32>} : memref<192x289xf32, #tpu.memory_space<vmem>>, vector<3x289xf32>,
    %c0_190 = arith.constant 0 : index
    %c14_191 = arith.constant 14 : index
    %c0_192 = arith.constant 0 : index
    %c0_193 = arith.constant 0 : index
    %244 = vector.load %arg1[%c0_190, %c14_191, %c0_192, %c0_193] : memref<1x16x3x289xbf16, #tpu.memory_space<vmem>>, vector<1x1x3x289xbf16>
    %245 = vector.shape_cast %244 : vector<1x1x3x289xbf16> to vector<3x289xbf16>
    %246 = arith.extf %245 : vector<3x289xbf16> to vector<3x289xf32>
    %247 = vector.extract_strided_slice %246 {offsets = [0, 288], sizes = [3, 1], strides = [1, 1]} : vector<3x289xf32> to vector<3x1xf32>
    %248 = vector.extract_strided_slice %246 {offsets = [0, 0], sizes = [3, 288], strides = [1, 1]} : vector<3x289xf32> to vector<3x288xf32>
    %249 = tpu.concatenate %247, %248 in 1 : vector<3x1xf32>, vector<3x288xf32> -> vector<3x289xf32>
    %c120 = arith.constant 120 : index
    %c0_194 = arith.constant 0 : index
    %250 = vector.load %arg12[%c120, %c0_194] : memref<192x289xf32, #tpu.memory_space<vmem>>, vector<3x289xf32>
    tpu.vector_store %arg12[%c120, %c0_194], %249 {strides = array<i32>} : memref<192x289xf32, #tpu.memory_space<vmem>>, vector<3x289xf32>,
    %c0_195 = arith.constant 0 : index
    %c15_196 = arith.constant 15 : index
    %c0_197 = arith.constant 0 : index
    %c0_198 = arith.constant 0 : index
    %251 = vector.load %arg1[%c0_195, %c15_196, %c0_197, %c0_198] : memref<1x16x3x289xbf16, #tpu.memory_space<vmem>>, vector<1x1x3x289xbf16>
    %252 = vector.shape_cast %251 : vector<1x1x3x289xbf16> to vector<3x289xbf16>
    %253 = arith.extf %252 : vector<3x289xbf16> to vector<3x289xf32>
    %254 = vector.extract_strided_slice %253 {offsets = [0, 288], sizes = [3, 1], strides = [1, 1]} : vector<3x289xf32> to vector<3x1xf32>
    %255 = vector.extract_strided_slice %253 {offsets = [0, 0], sizes = [3, 288], strides = [1, 1]} : vector<3x289xf32> to vector<3x288xf32>
    %256 = tpu.concatenate %254, %255 in 1 : vector<3x1xf32>, vector<3x288xf32> -> vector<3x289xf32>
    %c123 = arith.constant 123 : index
    %c0_199 = arith.constant 0 : index
    %257 = vector.load %arg12[%c123, %c0_199] : memref<192x289xf32, #tpu.memory_space<vmem>>, vector<3x289xf32>
    tpu.vector_store %arg12[%c123, %c0_199], %256 {strides = array<i32>} : memref<192x289xf32, #tpu.memory_space<vmem>>, vector<3x289xf32>,
    %c0_200 = arith.constant 0 : index
    %c12_201 = arith.constant 12 : index
    %c0_202 = arith.constant 0 : index
    %c0_203 = arith.constant 0 : index
    %258 = vector.load %arg1[%c0_200, %c12_201, %c0_202, %c0_203] : memref<1x16x3x289xbf16, #tpu.memory_space<vmem>>, vector<1x1x3x289xbf16>
    %259 = vector.shape_cast %258 : vector<1x1x3x289xbf16> to vector<3x289xbf16>
    %260 = arith.extf %259 : vector<3x289xbf16> to vector<3x289xf32>
    %c126 = arith.constant 126 : index
    %c0_204 = arith.constant 0 : index
    %261 = vector.load %arg12[%c126, %c0_204] : memref<192x289xf32, #tpu.memory_space<vmem>>, vector<3x289xf32>
    tpu.vector_store %arg12[%c126, %c0_204], %260 {strides = array<i32>} : memref<192x289xf32, #tpu.memory_space<vmem>>, vector<3x289xf32>,
    %c0_205 = arith.constant 0 : index
    %c13_206 = arith.constant 13 : index
    %c0_207 = arith.constant 0 : index
    %c0_208 = arith.constant 0 : index
    %262 = vector.load %arg1[%c0_205, %c13_206, %c0_207, %c0_208] : memref<1x16x3x289xbf16, #tpu.memory_space<vmem>>, vector<1x1x3x289xbf16>
    %263 = vector.shape_cast %262 : vector<1x1x3x289xbf16> to vector<3x289xbf16>
    %264 = arith.extf %263 : vector<3x289xbf16> to vector<3x289xf32>
    %c129 = arith.constant 129 : index
    %c0_209 = arith.constant 0 : index
    %265 = vector.load %arg12[%c129, %c0_209] : memref<192x289xf32, #tpu.memory_space<vmem>>, vector<3x289xf32>
    tpu.vector_store %arg12[%c129, %c0_209], %264 {strides = array<i32>} : memref<192x289xf32, #tpu.memory_space<vmem>>, vector<3x289xf32>,
    %c0_210 = arith.constant 0 : index
    %c14_211 = arith.constant 14 : index
    %c0_212 = arith.constant 0 : index
    %c0_213 = arith.constant 0 : index
    %266 = vector.load %arg1[%c0_210, %c14_211, %c0_212, %c0_213] : memref<1x16x3x289xbf16, #tpu.memory_space<vmem>>, vector<1x1x3x289xbf16>
    %267 = vector.shape_cast %266 : vector<1x1x3x289xbf16> to vector<3x289xbf16>
    %268 = arith.extf %267 : vector<3x289xbf16> to vector<3x289xf32>
    %c132 = arith.constant 132 : index
    %c0_214 = arith.constant 0 : index
    %269 = vector.load %arg12[%c132, %c0_214] : memref<192x289xf32, #tpu.memory_space<vmem>>, vector<3x289xf32>
    tpu.vector_store %arg12[%c132, %c0_214], %268 {strides = array<i32>} : memref<192x289xf32, #tpu.memory_space<vmem>>, vector<3x289xf32>,
    %c0_215 = arith.constant 0 : index
    %c15_216 = arith.constant 15 : index
    %c0_217 = arith.constant 0 : index
    %c0_218 = arith.constant 0 : index
    %270 = vector.load %arg1[%c0_215, %c15_216, %c0_217, %c0_218] : memref<1x16x3x289xbf16, #tpu.memory_space<vmem>>, vector<1x1x3x289xbf16>
    %271 = vector.shape_cast %270 : vector<1x1x3x289xbf16> to vector<3x289xbf16>
    %272 = arith.extf %271 : vector<3x289xbf16> to vector<3x289xf32>
    %c135 = arith.constant 135 : index
    %c0_219 = arith.constant 0 : index
    %273 = vector.load %arg12[%c135, %c0_219] : memref<192x289xf32, #tpu.memory_space<vmem>>, vector<3x289xf32>
    tpu.vector_store %arg12[%c135, %c0_219], %272 {strides = array<i32>} : memref<192x289xf32, #tpu.memory_space<vmem>>, vector<3x289xf32>,
    %c0_220 = arith.constant 0 : index
    %c12_221 = arith.constant 12 : index
    %c0_222 = arith.constant 0 : index
    %c0_223 = arith.constant 0 : index
    %274 = vector.load %arg1[%c0_220, %c12_221, %c0_222, %c0_223] : memref<1x16x3x289xbf16, #tpu.memory_space<vmem>>, vector<1x1x3x289xbf16>
    %275 = vector.shape_cast %274 : vector<1x1x3x289xbf16> to vector<3x289xbf16>
    %276 = arith.extf %275 : vector<3x289xbf16> to vector<3x289xf32>
    %277 = vector.extract_strided_slice %276 {offsets = [0, 1], sizes = [3, 288], strides = [1, 1]} : vector<3x289xf32> to vector<3x288xf32>
    %278 = vector.extract_strided_slice %276 {offsets = [0, 0], sizes = [3, 1], strides = [1, 1]} : vector<3x289xf32> to vector<3x1xf32>
    %279 = tpu.concatenate %277, %278 in 1 : vector<3x288xf32>, vector<3x1xf32> -> vector<3x289xf32>
    %c138 = arith.constant 138 : index
    %c0_224 = arith.constant 0 : index
    %280 = vector.load %arg12[%c138, %c0_224] : memref<192x289xf32, #tpu.memory_space<vmem>>, vector<3x289xf32>
    tpu.vector_store %arg12[%c138, %c0_224], %279 {strides = array<i32>} : memref<192x289xf32, #tpu.memory_space<vmem>>, vector<3x289xf32>,
    %c0_225 = arith.constant 0 : index
    %c13_226 = arith.constant 13 : index
    %c0_227 = arith.constant 0 : index
    %c0_228 = arith.constant 0 : index
    %281 = vector.load %arg1[%c0_225, %c13_226, %c0_227, %c0_228] : memref<1x16x3x289xbf16, #tpu.memory_space<vmem>>, vector<1x1x3x289xbf16>
    %282 = vector.shape_cast %281 : vector<1x1x3x289xbf16> to vector<3x289xbf16>
    %283 = arith.extf %282 : vector<3x289xbf16> to vector<3x289xf32>
    %284 = vector.extract_strided_slice %283 {offsets = [0, 1], sizes = [3, 288], strides = [1, 1]} : vector<3x289xf32> to vector<3x288xf32>
    %285 = vector.extract_strided_slice %283 {offsets = [0, 0], sizes = [3, 1], strides = [1, 1]} : vector<3x289xf32> to vector<3x1xf32>
    %286 = tpu.concatenate %284, %285 in 1 : vector<3x288xf32>, vector<3x1xf32> -> vector<3x289xf32>
    %c141 = arith.constant 141 : index
    %c0_229 = arith.constant 0 : index
    %287 = vector.load %arg12[%c141, %c0_229] : memref<192x289xf32, #tpu.memory_space<vmem>>, vector<3x289xf32>
    tpu.vector_store %arg12[%c141, %c0_229], %286 {strides = array<i32>} : memref<192x289xf32, #tpu.memory_space<vmem>>, vector<3x289xf32>,
    %c0_230 = arith.constant 0 : index
    %c2_231 = arith.constant 2 : index
    %c0_232 = arith.constant 0 : index
    %c0_233 = arith.constant 0 : index
    %288 = vector.load %arg1[%c0_230, %c2_231, %c0_232, %c0_233] : memref<1x16x3x289xbf16, #tpu.memory_space<vmem>>, vector<1x1x3x289xbf16>
    %289 = vector.shape_cast %288 : vector<1x1x3x289xbf16> to vector<3x289xbf16>
    %290 = arith.extf %289 : vector<3x289xbf16> to vector<3x289xf32>
    %291 = vector.extract_strided_slice %290 {offsets = [0, 16], sizes = [3, 273], strides = [1, 1]} : vector<3x289xf32> to vector<3x273xf32>
    %292 = vector.extract_strided_slice %290 {offsets = [0, 0], sizes = [3, 16], strides = [1, 1]} : vector<3x289xf32> to vector<3x16xf32>
    %293 = tpu.concatenate %291, %292 in 1 : vector<3x273xf32>, vector<3x16xf32> -> vector<3x289xf32>
    %c144 = arith.constant 144 : index
    %c0_234 = arith.constant 0 : index
    %294 = vector.load %arg12[%c144, %c0_234] : memref<192x289xf32, #tpu.memory_space<vmem>>, vector<3x289xf32>
    tpu.vector_store %arg12[%c144, %c0_234], %293 {strides = array<i32>} : memref<192x289xf32, #tpu.memory_space<vmem>>, vector<3x289xf32>,
    %c0_235 = arith.constant 0 : index
    %c3_236 = arith.constant 3 : index
    %c0_237 = arith.constant 0 : index
    %c0_238 = arith.constant 0 : index
    %295 = vector.load %arg1[%c0_235, %c3_236, %c0_237, %c0_238] : memref<1x16x3x289xbf16, #tpu.memory_space<vmem>>, vector<1x1x3x289xbf16>
    %296 = vector.shape_cast %295 : vector<1x1x3x289xbf16> to vector<3x289xbf16>
    %297 = arith.extf %296 : vector<3x289xbf16> to vector<3x289xf32>
    %298 = vector.extract_strided_slice %297 {offsets = [0, 16], sizes = [3, 273], strides = [1, 1]} : vector<3x289xf32> to vector<3x273xf32>
    %299 = vector.extract_strided_slice %297 {offsets = [0, 0], sizes = [3, 16], strides = [1, 1]} : vector<3x289xf32> to vector<3x16xf32>
    %300 = tpu.concatenate %298, %299 in 1 : vector<3x273xf32>, vector<3x16xf32> -> vector<3x289xf32>
    %c147 = arith.constant 147 : index
    %c0_239 = arith.constant 0 : index
    %301 = vector.load %arg12[%c147, %c0_239] : memref<192x289xf32, #tpu.memory_space<vmem>>, vector<3x289xf32>
    tpu.vector_store %arg12[%c147, %c0_239], %300 {strides = array<i32>} : memref<192x289xf32, #tpu.memory_space<vmem>>, vector<3x289xf32>,
    %c0_240 = arith.constant 0 : index
    %c0_241 = arith.constant 0 : index
    %c0_242 = arith.constant 0 : index
    %c0_243 = arith.constant 0 : index
    %302 = vector.load %arg1[%c0_240, %c0_241, %c0_242, %c0_243] : memref<1x16x3x289xbf16, #tpu.memory_space<vmem>>, vector<1x1x3x289xbf16>
    %303 = vector.shape_cast %302 : vector<1x1x3x289xbf16> to vector<3x289xbf16>
    %304 = arith.extf %303 : vector<3x289xbf16> to vector<3x289xf32>
    %305 = vector.extract_strided_slice %304 {offsets = [0, 17], sizes = [3, 272], strides = [1, 1]} : vector<3x289xf32> to vector<3x272xf32>
    %306 = vector.extract_strided_slice %304 {offsets = [0, 0], sizes = [3, 17], strides = [1, 1]} : vector<3x289xf32> to vector<3x17xf32>
    %307 = tpu.concatenate %305, %306 in 1 : vector<3x272xf32>, vector<3x17xf32> -> vector<3x289xf32>
    %c150 = arith.constant 150 : index
    %c0_244 = arith.constant 0 : index
    %308 = vector.load %arg12[%c150, %c0_244] : memref<192x289xf32, #tpu.memory_space<vmem>>, vector<3x289xf32>
    tpu.vector_store %arg12[%c150, %c0_244], %307 {strides = array<i32>} : memref<192x289xf32, #tpu.memory_space<vmem>>, vector<3x289xf32>,
    %c0_245 = arith.constant 0 : index
    %c1_246 = arith.constant 1 : index
    %c0_247 = arith.constant 0 : index
    %c0_248 = arith.constant 0 : index
    %309 = vector.load %arg1[%c0_245, %c1_246, %c0_247, %c0_248] : memref<1x16x3x289xbf16, #tpu.memory_space<vmem>>, vector<1x1x3x289xbf16>
    %310 = vector.shape_cast %309 : vector<1x1x3x289xbf16> to vector<3x289xbf16>
    %311 = arith.extf %310 : vector<3x289xbf16> to vector<3x289xf32>
    %312 = vector.extract_strided_slice %311 {offsets = [0, 17], sizes = [3, 272], strides = [1, 1]} : vector<3x289xf32> to vector<3x272xf32>
    %313 = vector.extract_strided_slice %311 {offsets = [0, 0], sizes = [3, 17], strides = [1, 1]} : vector<3x289xf32> to vector<3x17xf32>
    %314 = tpu.concatenate %312, %313 in 1 : vector<3x272xf32>, vector<3x17xf32> -> vector<3x289xf32>
    %c153 = arith.constant 153 : index
    %c0_249 = arith.constant 0 : index
    %315 = vector.load %arg12[%c153, %c0_249] : memref<192x289xf32, #tpu.memory_space<vmem>>, vector<3x289xf32>
    tpu.vector_store %arg12[%c153, %c0_249], %314 {strides = array<i32>} : memref<192x289xf32, #tpu.memory_space<vmem>>, vector<3x289xf32>,
    %c0_250 = arith.constant 0 : index
    %c2_251 = arith.constant 2 : index
    %c0_252 = arith.constant 0 : index
    %c0_253 = arith.constant 0 : index
    %316 = vector.load %arg1[%c0_250, %c2_251, %c0_252, %c0_253] : memref<1x16x3x289xbf16, #tpu.memory_space<vmem>>, vector<1x1x3x289xbf16>
    %317 = vector.shape_cast %316 : vector<1x1x3x289xbf16> to vector<3x289xbf16>
    %318 = arith.extf %317 : vector<3x289xbf16> to vector<3x289xf32>
    %319 = vector.extract_strided_slice %318 {offsets = [0, 17], sizes = [3, 272], strides = [1, 1]} : vector<3x289xf32> to vector<3x272xf32>
    %320 = vector.extract_strided_slice %318 {offsets = [0, 0], sizes = [3, 17], strides = [1, 1]} : vector<3x289xf32> to vector<3x17xf32>
    %321 = tpu.concatenate %319, %320 in 1 : vector<3x272xf32>, vector<3x17xf32> -> vector<3x289xf32>
    %c156 = arith.constant 156 : index
    %c0_254 = arith.constant 0 : index
    %322 = vector.load %arg12[%c156, %c0_254] : memref<192x289xf32, #tpu.memory_space<vmem>>, vector<3x289xf32>
    tpu.vector_store %arg12[%c156, %c0_254], %321 {strides = array<i32>} : memref<192x289xf32, #tpu.memory_space<vmem>>, vector<3x289xf32>,
    %c0_255 = arith.constant 0 : index
    %c3_256 = arith.constant 3 : index
    %c0_257 = arith.constant 0 : index
    %c0_258 = arith.constant 0 : index
    %323 = vector.load %arg1[%c0_255, %c3_256, %c0_257, %c0_258] : memref<1x16x3x289xbf16, #tpu.memory_space<vmem>>, vector<1x1x3x289xbf16>
    %324 = vector.shape_cast %323 : vector<1x1x3x289xbf16> to vector<3x289xbf16>
    %325 = arith.extf %324 : vector<3x289xbf16> to vector<3x289xf32>
    %326 = vector.extract_strided_slice %325 {offsets = [0, 17], sizes = [3, 272], strides = [1, 1]} : vector<3x289xf32> to vector<3x272xf32>
    %327 = vector.extract_strided_slice %325 {offsets = [0, 0], sizes = [3, 17], strides = [1, 1]} : vector<3x289xf32> to vector<3x17xf32>
    %328 = tpu.concatenate %326, %327 in 1 : vector<3x272xf32>, vector<3x17xf32> -> vector<3x289xf32>
    %c159 = arith.constant 159 : index
    %c0_259 = arith.constant 0 : index
    %329 = vector.load %arg12[%c159, %c0_259] : memref<192x289xf32, #tpu.memory_space<vmem>>, vector<3x289xf32>
    tpu.vector_store %arg12[%c159, %c0_259], %328 {strides = array<i32>} : memref<192x289xf32, #tpu.memory_space<vmem>>, vector<3x289xf32>,
    %c0_260 = arith.constant 0 : index
    %c0_261 = arith.constant 0 : index
    %c0_262 = arith.constant 0 : index
    %c0_263 = arith.constant 0 : index
    %330 = vector.load %arg1[%c0_260, %c0_261, %c0_262, %c0_263] : memref<1x16x3x289xbf16, #tpu.memory_space<vmem>>, vector<1x1x3x289xbf16>
    %331 = vector.shape_cast %330 : vector<1x1x3x289xbf16> to vector<3x289xbf16>
    %332 = arith.extf %331 : vector<3x289xbf16> to vector<3x289xf32>
    %333 = vector.extract_strided_slice %332 {offsets = [0, 18], sizes = [3, 271], strides = [1, 1]} : vector<3x289xf32> to vector<3x271xf32>
    %334 = vector.extract_strided_slice %332 {offsets = [0, 0], sizes = [3, 18], strides = [1, 1]} : vector<3x289xf32> to vector<3x18xf32>
    %335 = tpu.concatenate %333, %334 in 1 : vector<3x271xf32>, vector<3x18xf32> -> vector<3x289xf32>
    %c162 = arith.constant 162 : index
    %c0_264 = arith.constant 0 : index
    %336 = vector.load %arg12[%c162, %c0_264] : memref<192x289xf32, #tpu.memory_space<vmem>>, vector<3x289xf32>
    tpu.vector_store %arg12[%c162, %c0_264], %335 {strides = array<i32>} : memref<192x289xf32, #tpu.memory_space<vmem>>, vector<3x289xf32>,
    %c0_265 = arith.constant 0 : index
    %c1_266 = arith.constant 1 : index
    %c0_267 = arith.constant 0 : index
    %c0_268 = arith.constant 0 : index
    %337 = vector.load %arg1[%c0_265, %c1_266, %c0_267, %c0_268] : memref<1x16x3x289xbf16, #tpu.memory_space<vmem>>, vector<1x1x3x289xbf16>
    %338 = vector.shape_cast %337 : vector<1x1x3x289xbf16> to vector<3x289xbf16>
    %339 = arith.extf %338 : vector<3x289xbf16> to vector<3x289xf32>
    %340 = vector.extract_strided_slice %339 {offsets = [0, 18], sizes = [3, 271], strides = [1, 1]} : vector<3x289xf32> to vector<3x271xf32>
    %341 = vector.extract_strided_slice %339 {offsets = [0, 0], sizes = [3, 18], strides = [1, 1]} : vector<3x289xf32> to vector<3x18xf32>
    %342 = tpu.concatenate %340, %341 in 1 : vector<3x271xf32>, vector<3x18xf32> -> vector<3x289xf32>
    %c165 = arith.constant 165 : index
    %c0_269 = arith.constant 0 : index
    %343 = vector.load %arg12[%c165, %c0_269] : memref<192x289xf32, #tpu.memory_space<vmem>>, vector<3x289xf32>
    tpu.vector_store %arg12[%c165, %c0_269], %342 {strides = array<i32>} : memref<192x289xf32, #tpu.memory_space<vmem>>, vector<3x289xf32>,
    %c0_270 = arith.constant 0 : index
    %c6_271 = arith.constant 6 : index
    %c0_272 = arith.constant 0 : index
    %c0_273 = arith.constant 0 : index
    %344 = vector.load %arg1[%c0_270, %c6_271, %c0_272, %c0_273] : memref<1x16x3x289xbf16, #tpu.memory_space<vmem>>, vector<1x1x3x289xbf16>
    %345 = vector.shape_cast %344 : vector<1x1x3x289xbf16> to vector<3x289xbf16>
    %346 = arith.extf %345 : vector<3x289xbf16> to vector<3x289xf32>
    %347 = vector.extract_strided_slice %346 {offsets = [0, 16], sizes = [3, 273], strides = [1, 1]} : vector<3x289xf32> to vector<3x273xf32>
    %348 = vector.extract_strided_slice %346 {offsets = [0, 0], sizes = [3, 16], strides = [1, 1]} : vector<3x289xf32> to vector<3x16xf32>
    %349 = tpu.concatenate %347, %348 in 1 : vector<3x273xf32>, vector<3x16xf32> -> vector<3x289xf32>
    %c168 = arith.constant 168 : index
    %c0_274 = arith.constant 0 : index
    %350 = vector.load %arg12[%c168, %c0_274] : memref<192x289xf32, #tpu.memory_space<vmem>>, vector<3x289xf32>
    tpu.vector_store %arg12[%c168, %c0_274], %349 {strides = array<i32>} : memref<192x289xf32, #tpu.memory_space<vmem>>, vector<3x289xf32>,
    %c0_275 = arith.constant 0 : index
    %c7_276 = arith.constant 7 : index
    %c0_277 = arith.constant 0 : index
    %c0_278 = arith.constant 0 : index
    %351 = vector.load %arg1[%c0_275, %c7_276, %c0_277, %c0_278] : memref<1x16x3x289xbf16, #tpu.memory_space<vmem>>, vector<1x1x3x289xbf16>
    %352 = vector.shape_cast %351 : vector<1x1x3x289xbf16> to vector<3x289xbf16>
    %353 = arith.extf %352 : vector<3x289xbf16> to vector<3x289xf32>
    %354 = vector.extract_strided_slice %353 {offsets = [0, 16], sizes = [3, 273], strides = [1, 1]} : vector<3x289xf32> to vector<3x273xf32>
    %355 = vector.extract_strided_slice %353 {offsets = [0, 0], sizes = [3, 16], strides = [1, 1]} : vector<3x289xf32> to vector<3x16xf32>
    %356 = tpu.concatenate %354, %355 in 1 : vector<3x273xf32>, vector<3x16xf32> -> vector<3x289xf32>
    %c171 = arith.constant 171 : index
    %c0_279 = arith.constant 0 : index
    %357 = vector.load %arg12[%c171, %c0_279] : memref<192x289xf32, #tpu.memory_space<vmem>>, vector<3x289xf32>
    tpu.vector_store %arg12[%c171, %c0_279], %356 {strides = array<i32>} : memref<192x289xf32, #tpu.memory_space<vmem>>, vector<3x289xf32>,
    %c0_280 = arith.constant 0 : index
    %c4_281 = arith.constant 4 : index
    %c0_282 = arith.constant 0 : index
    %c0_283 = arith.constant 0 : index
    %358 = vector.load %arg1[%c0_280, %c4_281, %c0_282, %c0_283] : memref<1x16x3x289xbf16, #tpu.memory_space<vmem>>, vector<1x1x3x289xbf16>
    %359 = vector.shape_cast %358 : vector<1x1x3x289xbf16> to vector<3x289xbf16>
    %360 = arith.extf %359 : vector<3x289xbf16> to vector<3x289xf32>
    %361 = vector.extract_strided_slice %360 {offsets = [0, 17], sizes = [3, 272], strides = [1, 1]} : vector<3x289xf32> to vector<3x272xf32>
    %362 = vector.extract_strided_slice %360 {offsets = [0, 0], sizes = [3, 17], strides = [1, 1]} : vector<3x289xf32> to vector<3x17xf32>
    %363 = tpu.concatenate %361, %362 in 1 : vector<3x272xf32>, vector<3x17xf32> -> vector<3x289xf32>
    %c174 = arith.constant 174 : index
    %c0_284 = arith.constant 0 : index
    %364 = vector.load %arg12[%c174, %c0_284] : memref<192x289xf32, #tpu.memory_space<vmem>>, vector<3x289xf32>
    tpu.vector_store %arg12[%c174, %c0_284], %363 {strides = array<i32>} : memref<192x289xf32, #tpu.memory_space<vmem>>, vector<3x289xf32>,
    %c0_285 = arith.constant 0 : index
    %c5_286 = arith.constant 5 : index
    %c0_287 = arith.constant 0 : index
    %c0_288 = arith.constant 0 : index
    %365 = vector.load %arg1[%c0_285, %c5_286, %c0_287, %c0_288] : memref<1x16x3x289xbf16, #tpu.memory_space<vmem>>, vector<1x1x3x289xbf16>
    %366 = vector.shape_cast %365 : vector<1x1x3x289xbf16> to vector<3x289xbf16>
    %367 = arith.extf %366 : vector<3x289xbf16> to vector<3x289xf32>
    %368 = vector.extract_strided_slice %367 {offsets = [0, 17], sizes = [3, 272], strides = [1, 1]} : vector<3x289xf32> to vector<3x272xf32>
    %369 = vector.extract_strided_slice %367 {offsets = [0, 0], sizes = [3, 17], strides = [1, 1]} : vector<3x289xf32> to vector<3x17xf32>
    %370 = tpu.concatenate %368, %369 in 1 : vector<3x272xf32>, vector<3x17xf32> -> vector<3x289xf32>
    %c177 = arith.constant 177 : index
    %c0_289 = arith.constant 0 : index
    %371 = vector.load %arg12[%c177, %c0_289] : memref<192x289xf32, #tpu.memory_space<vmem>>, vector<3x289xf32>
    tpu.vector_store %arg12[%c177, %c0_289], %370 {strides = array<i32>} : memref<192x289xf32, #tpu.memory_space<vmem>>, vector<3x289xf32>,
    %c0_290 = arith.constant 0 : index
    %c6_291 = arith.constant 6 : index
    %c0_292 = arith.constant 0 : index
    %c0_293 = arith.constant 0 : index
    %372 = vector.load %arg1[%c0_290, %c6_291, %c0_292, %c0_293] : memref<1x16x3x289xbf16, #tpu.memory_space<vmem>>, vector<1x1x3x289xbf16>
    %373 = vector.shape_cast %372 : vector<1x1x3x289xbf16> to vector<3x289xbf16>
    %374 = arith.extf %373 : vector<3x289xbf16> to vector<3x289xf32>
    %375 = vector.extract_strided_slice %374 {offsets = [0, 17], sizes = [3, 272], strides = [1, 1]} : vector<3x289xf32> to vector<3x272xf32>
    %376 = vector.extract_strided_slice %374 {offsets = [0, 0], sizes = [3, 17], strides = [1, 1]} : vector<3x289xf32> to vector<3x17xf32>
    %377 = tpu.concatenate %375, %376 in 1 : vector<3x272xf32>, vector<3x17xf32> -> vector<3x289xf32>
    %c180 = arith.constant 180 : index
    %c0_294 = arith.constant 0 : index
    %378 = vector.load %arg12[%c180, %c0_294] : memref<192x289xf32, #tpu.memory_space<vmem>>, vector<3x289xf32>
    tpu.vector_store %arg12[%c180, %c0_294], %377 {strides = array<i32>} : memref<192x289xf32, #tpu.memory_space<vmem>>, vector<3x289xf32>,
    %c0_295 = arith.constant 0 : index
    %c7_296 = arith.constant 7 : index
    %c0_297 = arith.constant 0 : index
    %c0_298 = arith.constant 0 : index
    %379 = vector.load %arg1[%c0_295, %c7_296, %c0_297, %c0_298] : memref<1x16x3x289xbf16, #tpu.memory_space<vmem>>, vector<1x1x3x289xbf16>
    %380 = vector.shape_cast %379 : vector<1x1x3x289xbf16> to vector<3x289xbf16>
    %381 = arith.extf %380 : vector<3x289xbf16> to vector<3x289xf32>
    %382 = vector.extract_strided_slice %381 {offsets = [0, 17], sizes = [3, 272], strides = [1, 1]} : vector<3x289xf32> to vector<3x272xf32>
    %383 = vector.extract_strided_slice %381 {offsets = [0, 0], sizes = [3, 17], strides = [1, 1]} : vector<3x289xf32> to vector<3x17xf32>
    %384 = tpu.concatenate %382, %383 in 1 : vector<3x272xf32>, vector<3x17xf32> -> vector<3x289xf32>
    %c183 = arith.constant 183 : index
    %c0_299 = arith.constant 0 : index
    %385 = vector.load %arg12[%c183, %c0_299] : memref<192x289xf32, #tpu.memory_space<vmem>>, vector<3x289xf32>
    tpu.vector_store %arg12[%c183, %c0_299], %384 {strides = array<i32>} : memref<192x289xf32, #tpu.memory_space<vmem>>, vector<3x289xf32>,
    %c0_300 = arith.constant 0 : index
    %c4_301 = arith.constant 4 : index
    %c0_302 = arith.constant 0 : index
    %c0_303 = arith.constant 0 : index
    %386 = vector.load %arg1[%c0_300, %c4_301, %c0_302, %c0_303] : memref<1x16x3x289xbf16, #tpu.memory_space<vmem>>, vector<1x1x3x289xbf16>
    %387 = vector.shape_cast %386 : vector<1x1x3x289xbf16> to vector<3x289xbf16>
    %388 = arith.extf %387 : vector<3x289xbf16> to vector<3x289xf32>
    %389 = vector.extract_strided_slice %388 {offsets = [0, 18], sizes = [3, 271], strides = [1, 1]} : vector<3x289xf32> to vector<3x271xf32>
    %390 = vector.extract_strided_slice %388 {offsets = [0, 0], sizes = [3, 18], strides = [1, 1]} : vector<3x289xf32> to vector<3x18xf32>
    %391 = tpu.concatenate %389, %390 in 1 : vector<3x271xf32>, vector<3x18xf32> -> vector<3x289xf32>
    %c186 = arith.constant 186 : index
    %c0_304 = arith.constant 0 : index
    %392 = vector.load %arg12[%c186, %c0_304] : memref<192x289xf32, #tpu.memory_space<vmem>>, vector<3x289xf32>
    tpu.vector_store %arg12[%c186, %c0_304], %391 {strides = array<i32>} : memref<192x289xf32, #tpu.memory_space<vmem>>, vector<3x289xf32>,
    %c0_305 = arith.constant 0 : index
    %c5_306 = arith.constant 5 : index
    %c0_307 = arith.constant 0 : index
    %c0_308 = arith.constant 0 : index
    %393 = vector.load %arg1[%c0_305, %c5_306, %c0_307, %c0_308] : memref<1x16x3x289xbf16, #tpu.memory_space<vmem>>, vector<1x1x3x289xbf16>
    %394 = vector.shape_cast %393 : vector<1x1x3x289xbf16> to vector<3x289xbf16>
    %395 = arith.extf %394 : vector<3x289xbf16> to vector<3x289xf32>
    %396 = vector.extract_strided_slice %395 {offsets = [0, 18], sizes = [3, 271], strides = [1, 1]} : vector<3x289xf32> to vector<3x271xf32>
    %397 = vector.extract_strided_slice %395 {offsets = [0, 0], sizes = [3, 18], strides = [1, 1]} : vector<3x289xf32> to vector<3x18xf32>
    %398 = tpu.concatenate %396, %397 in 1 : vector<3x271xf32>, vector<3x18xf32> -> vector<3x289xf32>
    %c189 = arith.constant 189 : index
    %c0_309 = arith.constant 0 : index
    %399 = vector.load %arg12[%c189, %c0_309] : memref<192x289xf32, #tpu.memory_space<vmem>>, vector<3x289xf32>
    tpu.vector_store %arg12[%c189, %c0_309], %398 {strides = array<i32>} : memref<192x289xf32, #tpu.memory_space<vmem>>, vector<3x289xf32>,
    %c0_310 = arith.constant 0 : index
    %c0_311 = arith.constant 0 : index
    %400 = vector.load %arg2[%c0_310, %c0_311] : memref<256x192xbf16, #tpu.memory_space<vmem>>, vector<256x192xbf16>
    %c0_312 = arith.constant 0 : index
    %c0_313 = arith.constant 0 : index
    %401 = vector.load %arg12[%c0_312, %c0_313] : memref<192x289xf32, #tpu.memory_space<vmem>>, vector<192x289xf32>
    %402 = arith.truncf %401 : vector<192x289xf32> to vector<192x289xbf16>
    %cst = arith.constant dense<0.000000e+00> : vector<256x289xf32>
    %403 = tpu.matmul %400, %402, %cst {dimension_numbers = #tpu.dot_dimension_numbers<[1], [0], [0], [1], [0, 0, 1, 1], [], []>} : vector<256x192xbf16>, vector<192x289xbf16>, vector<256x289xf32> -> vector<256x289xf32>
    %c0_314 = arith.constant 0 : index
    %c0_315 = arith.constant 0 : index
    %404 = vector.load %arg3[%c0_314, %c0_315] : memref<16x1xf32, #tpu.memory_space<vmem>>, vector<16x1xf32>
    %405 = vector.extract_strided_slice %403 {offsets = [0, 0], sizes = [16, 289], strides = [1, 1]} : vector<256x289xf32> to vector<16x289xf32>
    %406 = vector.extract_strided_slice %403 {offsets = [16, 0], sizes = [16, 289], strides = [1, 1]} : vector<256x289xf32> to vector<16x289xf32>
    %407 = arith.maximumf %405, %406 : vector<16x289xf32>
    %408 = vector.extract_strided_slice %403 {offsets = [32, 0], sizes = [16, 289], strides = [1, 1]} : vector<256x289xf32> to vector<16x289xf32>
    %409 = arith.maximumf %407, %408 : vector<16x289xf32>
    %410 = vector.extract_strided_slice %403 {offsets = [48, 0], sizes = [16, 289], strides = [1, 1]} : vector<256x289xf32> to vector<16x289xf32>
    %411 = arith.maximumf %409, %410 : vector<16x289xf32>
    %412 = vector.broadcast %404 : vector<16x1xf32> to vector<16x289xf32>
    %413 = arith.addf %411, %412 : vector<16x289xf32>
    %cst_316 = arith.constant 0.000000e+00 : f32
    %414 = vector.broadcast %cst_316 : f32 to vector<16x289xf32>
    %415 = arith.maximumf %413, %414 : vector<16x289xf32>
    %c0_317 = arith.constant 0 : index
    %c0_318 = arith.constant 0 : index
    %c0_319 = arith.constant 0 : index
    %416 = vector.load %arg4[%c0_317, %c0_318, %c0_319] : memref<4x1x289xf32, #tpu.memory_space<vmem>>, vector<1x1x289xf32>
    %417 = vector.shape_cast %416 : vector<1x1x289xf32> to vector<1x289xf32>
    %418 = vector.broadcast %417 : vector<1x289xf32> to vector<16x289xf32>
    %419 = arith.mulf %415, %418 : vector<16x289xf32>
    %c0_320 = arith.constant 0 : index
    %c0_321 = arith.constant 0 : index
    %420 = vector.load %arg13[%c0_320, %c0_321] : memref<256x289xf32, #tpu.memory_space<vmem>>, vector<16x289xf32>
    tpu.vector_store %arg13[%c0_320, %c0_321], %419 {strides = array<i32>} : memref<256x289xf32, #tpu.memory_space<vmem>>, vector<16x289xf32>,
    %421 = vector.extract_strided_slice %419 {offsets = [0, 1], sizes = [16, 288], strides = [1, 1]} : vector<16x289xf32> to vector<16x288xf32>
    %422 = vector.extract_strided_slice %419 {offsets = [0, 0], sizes = [16, 1], strides = [1, 1]} : vector<16x289xf32> to vector<16x1xf32>
    %423 = tpu.concatenate %421, %422 in 1 : vector<16x288xf32>, vector<16x1xf32> -> vector<16x289xf32>
    %c16 = arith.constant 16 : index
    %c0_322 = arith.constant 0 : index
    %424 = vector.load %arg13[%c16, %c0_322] : memref<256x289xf32, #tpu.memory_space<vmem>>, vector<16x289xf32>
    tpu.vector_store %arg13[%c16, %c0_322], %423 {strides = array<i32>} : memref<256x289xf32, #tpu.memory_space<vmem>>, vector<16x289xf32>,
    %425 = vector.extract_strided_slice %419 {offsets = [0, 17], sizes = [16, 272], strides = [1, 1]} : vector<16x289xf32> to vector<16x272xf32>
    %426 = vector.extract_strided_slice %419 {offsets = [0, 0], sizes = [16, 17], strides = [1, 1]} : vector<16x289xf32> to vector<16x17xf32>
    %427 = tpu.concatenate %425, %426 in 1 : vector<16x272xf32>, vector<16x17xf32> -> vector<16x289xf32>
    %c64 = arith.constant 64 : index
    %c0_323 = arith.constant 0 : index
    %428 = vector.load %arg13[%c64, %c0_323] : memref<256x289xf32, #tpu.memory_space<vmem>>, vector<16x289xf32>
    tpu.vector_store %arg13[%c64, %c0_323], %427 {strides = array<i32>} : memref<256x289xf32, #tpu.memory_space<vmem>>, vector<16x289xf32>,
    %429 = vector.extract_strided_slice %419 {offsets = [0, 18], sizes = [16, 271], strides = [1, 1]} : vector<16x289xf32> to vector<16x271xf32>
    %430 = vector.extract_strided_slice %419 {offsets = [0, 0], sizes = [16, 18], strides = [1, 1]} : vector<16x289xf32> to vector<16x18xf32>
    %431 = tpu.concatenate %429, %430 in 1 : vector<16x271xf32>, vector<16x18xf32> -> vector<16x289xf32>
    %c80 = arith.constant 80 : index
    %c0_324 = arith.constant 0 : index
    %432 = vector.load %arg13[%c80, %c0_324] : memref<256x289xf32, #tpu.memory_space<vmem>>, vector<16x289xf32>
    tpu.vector_store %arg13[%c80, %c0_324], %431 {strides = array<i32>} : memref<256x289xf32, #tpu.memory_space<vmem>>, vector<16x289xf32>,
    %433 = vector.extract_strided_slice %403 {offsets = [64, 0], sizes = [16, 289], strides = [1, 1]} : vector<256x289xf32> to vector<16x289xf32>
    %434 = vector.extract_strided_slice %403 {offsets = [80, 0], sizes = [16, 289], strides = [1, 1]} : vector<256x289xf32> to vector<16x289xf32>
    %435 = arith.maximumf %433, %434 : vector<16x289xf32>
    %436 = vector.extract_strided_slice %403 {offsets = [96, 0], sizes = [16, 289], strides = [1, 1]} : vector<256x289xf32> to vector<16x289xf32>
    %437 = arith.maximumf %435, %436 : vector<16x289xf32>
    %438 = vector.extract_strided_slice %403 {offsets = [112, 0], sizes = [16, 289], strides = [1, 1]} : vector<256x289xf32> to vector<16x289xf32>
    %439 = arith.maximumf %437, %438 : vector<16x289xf32>
    %440 = vector.broadcast %404 : vector<16x1xf32> to vector<16x289xf32>
    %441 = arith.addf %439, %440 : vector<16x289xf32>
    %cst_325 = arith.constant 0.000000e+00 : f32
    %442 = vector.broadcast %cst_325 : f32 to vector<16x289xf32>
    %443 = arith.maximumf %441, %442 : vector<16x289xf32>
    %c1_326 = arith.constant 1 : index
    %c0_327 = arith.constant 0 : index
    %c0_328 = arith.constant 0 : index
    %444 = vector.load %arg4[%c1_326, %c0_327, %c0_328] : memref<4x1x289xf32, #tpu.memory_space<vmem>>, vector<1x1x289xf32>
    %445 = vector.shape_cast %444 : vector<1x1x289xf32> to vector<1x289xf32>
    %446 = vector.broadcast %445 : vector<1x289xf32> to vector<16x289xf32>
    %447 = arith.mulf %443, %446 : vector<16x289xf32>
    %c32 = arith.constant 32 : index
    %c0_329 = arith.constant 0 : index
    %448 = vector.load %arg13[%c32, %c0_329] : memref<256x289xf32, #tpu.memory_space<vmem>>, vector<16x289xf32>
    tpu.vector_store %arg13[%c32, %c0_329], %447 {strides = array<i32>} : memref<256x289xf32, #tpu.memory_space<vmem>>, vector<16x289xf32>,
    %449 = vector.extract_strided_slice %447 {offsets = [0, 1], sizes = [16, 288], strides = [1, 1]} : vector<16x289xf32> to vector<16x288xf32>
    %450 = vector.extract_strided_slice %447 {offsets = [0, 0], sizes = [16, 1], strides = [1, 1]} : vector<16x289xf32> to vector<16x1xf32>
    %451 = tpu.concatenate %449, %450 in 1 : vector<16x288xf32>, vector<16x1xf32> -> vector<16x289xf32>
    %c48_330 = arith.constant 48 : index
    %c0_331 = arith.constant 0 : index
    %452 = vector.load %arg13[%c48_330, %c0_331] : memref<256x289xf32, #tpu.memory_space<vmem>>, vector<16x289xf32>
    tpu.vector_store %arg13[%c48_330, %c0_331], %451 {strides = array<i32>} : memref<256x289xf32, #tpu.memory_space<vmem>>, vector<16x289xf32>,
    %453 = vector.extract_strided_slice %447 {offsets = [0, 17], sizes = [16, 272], strides = [1, 1]} : vector<16x289xf32> to vector<16x272xf32>
    %454 = vector.extract_strided_slice %447 {offsets = [0, 0], sizes = [16, 17], strides = [1, 1]} : vector<16x289xf32> to vector<16x17xf32>
    %455 = tpu.concatenate %453, %454 in 1 : vector<16x272xf32>, vector<16x17xf32> -> vector<16x289xf32>
    %c96_332 = arith.constant 96 : index
    %c0_333 = arith.constant 0 : index
    %456 = vector.load %arg13[%c96_332, %c0_333] : memref<256x289xf32, #tpu.memory_space<vmem>>, vector<16x289xf32>
    tpu.vector_store %arg13[%c96_332, %c0_333], %455 {strides = array<i32>} : memref<256x289xf32, #tpu.memory_space<vmem>>, vector<16x289xf32>,
    %457 = vector.extract_strided_slice %447 {offsets = [0, 18], sizes = [16, 271], strides = [1, 1]} : vector<16x289xf32> to vector<16x271xf32>
    %458 = vector.extract_strided_slice %447 {offsets = [0, 0], sizes = [16, 18], strides = [1, 1]} : vector<16x289xf32> to vector<16x18xf32>
    %459 = tpu.concatenate %457, %458 in 1 : vector<16x271xf32>, vector<16x18xf32> -> vector<16x289xf32>
    %c112 = arith.constant 112 : index
    %c0_334 = arith.constant 0 : index
    %460 = vector.load %arg13[%c112, %c0_334] : memref<256x289xf32, #tpu.memory_space<vmem>>, vector<16x289xf32>
    tpu.vector_store %arg13[%c112, %c0_334], %459 {strides = array<i32>} : memref<256x289xf32, #tpu.memory_space<vmem>>, vector<16x289xf32>,
    %461 = vector.extract_strided_slice %403 {offsets = [128, 0], sizes = [16, 289], strides = [1, 1]} : vector<256x289xf32> to vector<16x289xf32>
    %462 = vector.extract_strided_slice %403 {offsets = [144, 0], sizes = [16, 289], strides = [1, 1]} : vector<256x289xf32> to vector<16x289xf32>
    %463 = arith.maximumf %461, %462 : vector<16x289xf32>
    %464 = vector.extract_strided_slice %403 {offsets = [160, 0], sizes = [16, 289], strides = [1, 1]} : vector<256x289xf32> to vector<16x289xf32>
    %465 = arith.maximumf %463, %464 : vector<16x289xf32>
    %466 = vector.extract_strided_slice %403 {offsets = [176, 0], sizes = [16, 289], strides = [1, 1]} : vector<256x289xf32> to vector<16x289xf32>
    %467 = arith.maximumf %465, %466 : vector<16x289xf32>
    %468 = vector.broadcast %404 : vector<16x1xf32> to vector<16x289xf32>
    %469 = arith.addf %467, %468 : vector<16x289xf32>
    %cst_335 = arith.constant 0.000000e+00 : f32
    %470 = vector.broadcast %cst_335 : f32 to vector<16x289xf32>
    %471 = arith.maximumf %469, %470 : vector<16x289xf32>
    %c2_336 = arith.constant 2 : index
    %c0_337 = arith.constant 0 : index
    %c0_338 = arith.constant 0 : index
    %472 = vector.load %arg4[%c2_336, %c0_337, %c0_338] : memref<4x1x289xf32, #tpu.memory_space<vmem>>, vector<1x1x289xf32>
    %473 = vector.shape_cast %472 : vector<1x1x289xf32> to vector<1x289xf32>
    %474 = vector.broadcast %473 : vector<1x289xf32> to vector<16x289xf32>
    %475 = arith.mulf %471, %474 : vector<16x289xf32>
    %c128 = arith.constant 128 : index
    %c0_339 = arith.constant 0 : index
    %476 = vector.load %arg13[%c128, %c0_339] : memref<256x289xf32, #tpu.memory_space<vmem>>, vector<16x289xf32>
    tpu.vector_store %arg13[%c128, %c0_339], %475 {strides = array<i32>} : memref<256x289xf32, #tpu.memory_space<vmem>>, vector<16x289xf32>,
    %477 = vector.extract_strided_slice %475 {offsets = [0, 1], sizes = [16, 288], strides = [1, 1]} : vector<16x289xf32> to vector<16x288xf32>
    %478 = vector.extract_strided_slice %475 {offsets = [0, 0], sizes = [16, 1], strides = [1, 1]} : vector<16x289xf32> to vector<16x1xf32>
    %479 = tpu.concatenate %477, %478 in 1 : vector<16x288xf32>, vector<16x1xf32> -> vector<16x289xf32>
    %c144_340 = arith.constant 144 : index
    %c0_341 = arith.constant 0 : index
    %480 = vector.load %arg13[%c144_340, %c0_341] : memref<256x289xf32, #tpu.memory_space<vmem>>, vector<16x289xf32>
    tpu.vector_store %arg13[%c144_340, %c0_341], %479 {strides = array<i32>} : memref<256x289xf32, #tpu.memory_space<vmem>>, vector<16x289xf32>,
    %481 = vector.extract_strided_slice %475 {offsets = [0, 17], sizes = [16, 272], strides = [1, 1]} : vector<16x289xf32> to vector<16x272xf32>
    %482 = vector.extract_strided_slice %475 {offsets = [0, 0], sizes = [16, 17], strides = [1, 1]} : vector<16x289xf32> to vector<16x17xf32>
    %483 = tpu.concatenate %481, %482 in 1 : vector<16x272xf32>, vector<16x17xf32> -> vector<16x289xf32>
    %c192 = arith.constant 192 : index
    %c0_342 = arith.constant 0 : index
    %484 = vector.load %arg13[%c192, %c0_342] : memref<256x289xf32, #tpu.memory_space<vmem>>, vector<16x289xf32>
    tpu.vector_store %arg13[%c192, %c0_342], %483 {strides = array<i32>} : memref<256x289xf32, #tpu.memory_space<vmem>>, vector<16x289xf32>,
    %485 = vector.extract_strided_slice %475 {offsets = [0, 18], sizes = [16, 271], strides = [1, 1]} : vector<16x289xf32> to vector<16x271xf32>
    %486 = vector.extract_strided_slice %475 {offsets = [0, 0], sizes = [16, 18], strides = [1, 1]} : vector<16x289xf32> to vector<16x18xf32>
    %487 = tpu.concatenate %485, %486 in 1 : vector<16x271xf32>, vector<16x18xf32> -> vector<16x289xf32>
    %c208 = arith.constant 208 : index
    %c0_343 = arith.constant 0 : index
    %488 = vector.load %arg13[%c208, %c0_343] : memref<256x289xf32, #tpu.memory_space<vmem>>, vector<16x289xf32>
    tpu.vector_store %arg13[%c208, %c0_343], %487 {strides = array<i32>} : memref<256x289xf32, #tpu.memory_space<vmem>>, vector<16x289xf32>,
    %489 = vector.extract_strided_slice %403 {offsets = [192, 0], sizes = [16, 289], strides = [1, 1]} : vector<256x289xf32> to vector<16x289xf32>
    %490 = vector.extract_strided_slice %403 {offsets = [208, 0], sizes = [16, 289], strides = [1, 1]} : vector<256x289xf32> to vector<16x289xf32>
    %491 = arith.maximumf %489, %490 : vector<16x289xf32>
    %492 = vector.extract_strided_slice %403 {offsets = [224, 0], sizes = [16, 289], strides = [1, 1]} : vector<256x289xf32> to vector<16x289xf32>
    %493 = arith.maximumf %491, %492 : vector<16x289xf32>
    %494 = vector.extract_strided_slice %403 {offsets = [240, 0], sizes = [16, 289], strides = [1, 1]} : vector<256x289xf32> to vector<16x289xf32>
    %495 = arith.maximumf %493, %494 : vector<16x289xf32>
    %496 = vector.broadcast %404 : vector<16x1xf32> to vector<16x289xf32>
    %497 = arith.addf %495, %496 : vector<16x289xf32>
    %cst_344 = arith.constant 0.000000e+00 : f32
    %498 = vector.broadcast %cst_344 : f32 to vector<16x289xf32>
    %499 = arith.maximumf %497, %498 : vector<16x289xf32>
    %c3_345 = arith.constant 3 : index
    %c0_346 = arith.constant 0 : index
    %c0_347 = arith.constant 0 : index
    %500 = vector.load %arg4[%c3_345, %c0_346, %c0_347] : memref<4x1x289xf32, #tpu.memory_space<vmem>>, vector<1x1x289xf32>
    %501 = vector.shape_cast %500 : vector<1x1x289xf32> to vector<1x289xf32>
    %502 = vector.broadcast %501 : vector<1x289xf32> to vector<16x289xf32>
    %503 = arith.mulf %499, %502 : vector<16x289xf32>
    %c160 = arith.constant 160 : index
    %c0_348 = arith.constant 0 : index
    %504 = vector.load %arg13[%c160, %c0_348] : memref<256x289xf32, #tpu.memory_space<vmem>>, vector<16x289xf32>
    tpu.vector_store %arg13[%c160, %c0_348], %503 {strides = array<i32>} : memref<256x289xf32, #tpu.memory_space<vmem>>, vector<16x289xf32>,
    %505 = vector.extract_strided_slice %503 {offsets = [0, 1], sizes = [16, 288], strides = [1, 1]} : vector<16x289xf32> to vector<16x288xf32>
    %506 = vector.extract_strided_slice %503 {offsets = [0, 0], sizes = [16, 1], strides = [1, 1]} : vector<16x289xf32> to vector<16x1xf32>
    %507 = tpu.concatenate %505, %506 in 1 : vector<16x288xf32>, vector<16x1xf32> -> vector<16x289xf32>
    %c176 = arith.constant 176 : index
    %c0_349 = arith.constant 0 : index
    %508 = vector.load %arg13[%c176, %c0_349] : memref<256x289xf32, #tpu.memory_space<vmem>>, vector<16x289xf32>
    tpu.vector_store %arg13[%c176, %c0_349], %507 {strides = array<i32>} : memref<256x289xf32, #tpu.memory_space<vmem>>, vector<16x289xf32>,
    %509 = vector.extract_strided_slice %503 {offsets = [0, 17], sizes = [16, 272], strides = [1, 1]} : vector<16x289xf32> to vector<16x272xf32>
    %510 = vector.extract_strided_slice %503 {offsets = [0, 0], sizes = [16, 17], strides = [1, 1]} : vector<16x289xf32> to vector<16x17xf32>
    %511 = tpu.concatenate %509, %510 in 1 : vector<16x272xf32>, vector<16x17xf32> -> vector<16x289xf32>
    %c224 = arith.constant 224 : index
    %c0_350 = arith.constant 0 : index
    %512 = vector.load %arg13[%c224, %c0_350] : memref<256x289xf32, #tpu.memory_space<vmem>>, vector<16x289xf32>
    tpu.vector_store %arg13[%c224, %c0_350], %511 {strides = array<i32>} : memref<256x289xf32, #tpu.memory_space<vmem>>, vector<16x289xf32>,
    %513 = vector.extract_strided_slice %503 {offsets = [0, 18], sizes = [16, 271], strides = [1, 1]} : vector<16x289xf32> to vector<16x271xf32>
    %514 = vector.extract_strided_slice %503 {offsets = [0, 0], sizes = [16, 18], strides = [1, 1]} : vector<16x289xf32> to vector<16x18xf32>
    %515 = tpu.concatenate %513, %514 in 1 : vector<16x271xf32>, vector<16x18xf32> -> vector<16x289xf32>
    %c240 = arith.constant 240 : index
    %c0_351 = arith.constant 0 : index
    %516 = vector.load %arg13[%c240, %c0_351] : memref<256x289xf32, #tpu.memory_space<vmem>>, vector<16x289xf32>
    tpu.vector_store %arg13[%c240, %c0_351], %515 {strides = array<i32>} : memref<256x289xf32, #tpu.memory_space<vmem>>, vector<16x289xf32>,
    %c0_352 = arith.constant 0 : index
    %c0_353 = arith.constant 0 : index
    %517 = vector.load %arg5[%c0_352, %c0_353] : memref<128x256xbf16, #tpu.memory_space<vmem>>, vector<128x256xbf16>
    %c0_354 = arith.constant 0 : index
    %c0_355 = arith.constant 0 : index
    %518 = vector.load %arg13[%c0_354, %c0_355] : memref<256x289xf32, #tpu.memory_space<vmem>>, vector<256x289xf32>
    %519 = arith.truncf %518 : vector<256x289xf32> to vector<256x289xbf16>
    %cst_356 = arith.constant dense<0.000000e+00> : vector<128x289xf32>
    %520 = tpu.matmul %517, %519, %cst_356 {dimension_numbers = #tpu.dot_dimension_numbers<[1], [0], [0], [1], [0, 0, 1, 1], [], []>} : vector<128x256xbf16>, vector<256x289xbf16>, vector<128x289xf32> -> vector<128x289xf32>
    %521 = vector.extract_strided_slice %520 {offsets = [0, 0], sizes = [32, 289], strides = [1, 1]} : vector<128x289xf32> to vector<32x289xf32>
    %522 = vector.extract_strided_slice %520 {offsets = [32, 0], sizes = [32, 289], strides = [1, 1]} : vector<128x289xf32> to vector<32x289xf32>
    %523 = arith.maximumf %521, %522 : vector<32x289xf32>
    %524 = vector.extract_strided_slice %520 {offsets = [64, 0], sizes = [32, 289], strides = [1, 1]} : vector<128x289xf32> to vector<32x289xf32>
    %525 = arith.maximumf %523, %524 : vector<32x289xf32>
    %526 = vector.extract_strided_slice %520 {offsets = [96, 0], sizes = [32, 289], strides = [1, 1]} : vector<128x289xf32> to vector<32x289xf32>
    %527 = arith.maximumf %525, %526 : vector<32x289xf32>
    %c0_357 = arith.constant 0 : index
    %c0_358 = arith.constant 0 : index
    %528 = vector.load %arg6[%c0_357, %c0_358] : memref<32x1xf32, #tpu.memory_space<vmem>>, vector<32x1xf32>
    %529 = vector.broadcast %528 : vector<32x1xf32> to vector<32x289xf32>
    %530 = arith.addf %527, %529 : vector<32x289xf32>
    %cst_359 = arith.constant 0.000000e+00 : f32
    %531 = vector.broadcast %cst_359 : f32 to vector<32x289xf32>
    %532 = arith.maximumf %530, %531 : vector<32x289xf32>
    %533 = arith.truncf %532 : vector<32x289xf32> to vector<32x289xbf16>
    %c0_360 = arith.constant 0 : index
    %c0_361 = arith.constant 0 : index
    %534 = vector.load %arg7[%c0_360, %c0_361] : memref<289x4096xbf16, #tpu.memory_space<vmem>>, vector<289x4096xbf16>
    %cst_362 = arith.constant dense<0.000000e+00> : vector<32x4096xf32>
    %535 = tpu.matmul %533, %534, %cst_362 {dimension_numbers = #tpu.dot_dimension_numbers<[1], [0], [0], [1], [0, 0, 1, 1], [], []>} : vector<32x289xbf16>, vector<289x4096xbf16>, vector<32x4096xf32> -> vector<32x4096xf32>
    %536 = vector.extract_strided_slice %535 {offsets = [0, 0], sizes = [1, 128], strides = [1, 1]} : vector<32x4096xf32> to vector<1x128xf32>
    %537 = vector.extract_strided_slice %535 {offsets = [1, 128], sizes = [1, 128], strides = [1, 1]} : vector<32x4096xf32> to vector<1x128xf32>
    %538 = arith.addf %536, %537 : vector<1x128xf32>
    %539 = vector.extract_strided_slice %535 {offsets = [2, 256], sizes = [1, 128], strides = [1, 1]} : vector<32x4096xf32> to vector<1x128xf32>
    %540 = arith.addf %538, %539 : vector<1x128xf32>
    %541 = vector.extract_strided_slice %535 {offsets = [3, 384], sizes = [1, 128], strides = [1, 1]} : vector<32x4096xf32> to vector<1x128xf32>
    %542 = arith.addf %540, %541 : vector<1x128xf32>
    %543 = vector.extract_strided_slice %535 {offsets = [4, 512], sizes = [1, 128], strides = [1, 1]} : vector<32x4096xf32> to vector<1x128xf32>
    %544 = arith.addf %542, %543 : vector<1x128xf32>
    %545 = vector.extract_strided_slice %535 {offsets = [5, 640], sizes = [1, 128], strides = [1, 1]} : vector<32x4096xf32> to vector<1x128xf32>
    %546 = arith.addf %544, %545 : vector<1x128xf32>
    %547 = vector.extract_strided_slice %535 {offsets = [6, 768], sizes = [1, 128], strides = [1, 1]} : vector<32x4096xf32> to vector<1x128xf32>
    %548 = arith.addf %546, %547 : vector<1x128xf32>
    %549 = vector.extract_strided_slice %535 {offsets = [7, 896], sizes = [1, 128], strides = [1, 1]} : vector<32x4096xf32> to vector<1x128xf32>
    %550 = arith.addf %548, %549 : vector<1x128xf32>
    %551 = vector.extract_strided_slice %535 {offsets = [8, 1024], sizes = [1, 128], strides = [1, 1]} : vector<32x4096xf32> to vector<1x128xf32>
    %552 = arith.addf %550, %551 : vector<1x128xf32>
    %553 = vector.extract_strided_slice %535 {offsets = [9, 1152], sizes = [1, 128], strides = [1, 1]} : vector<32x4096xf32> to vector<1x128xf32>
    %554 = arith.addf %552, %553 : vector<1x128xf32>
    %555 = vector.extract_strided_slice %535 {offsets = [10, 1280], sizes = [1, 128], strides = [1, 1]} : vector<32x4096xf32> to vector<1x128xf32>
    %556 = arith.addf %554, %555 : vector<1x128xf32>
    %557 = vector.extract_strided_slice %535 {offsets = [11, 1408], sizes = [1, 128], strides = [1, 1]} : vector<32x4096xf32> to vector<1x128xf32>
    %558 = arith.addf %556, %557 : vector<1x128xf32>
    %559 = vector.extract_strided_slice %535 {offsets = [12, 1536], sizes = [1, 128], strides = [1, 1]} : vector<32x4096xf32> to vector<1x128xf32>
    %560 = arith.addf %558, %559 : vector<1x128xf32>
    %561 = vector.extract_strided_slice %535 {offsets = [13, 1664], sizes = [1, 128], strides = [1, 1]} : vector<32x4096xf32> to vector<1x128xf32>
    %562 = arith.addf %560, %561 : vector<1x128xf32>
    %563 = vector.extract_strided_slice %535 {offsets = [14, 1792], sizes = [1, 128], strides = [1, 1]} : vector<32x4096xf32> to vector<1x128xf32>
    %564 = arith.addf %562, %563 : vector<1x128xf32>
    %565 = vector.extract_strided_slice %535 {offsets = [15, 1920], sizes = [1, 128], strides = [1, 1]} : vector<32x4096xf32> to vector<1x128xf32>
    %566 = arith.addf %564, %565 : vector<1x128xf32>
    %567 = vector.extract_strided_slice %535 {offsets = [16, 2048], sizes = [1, 128], strides = [1, 1]} : vector<32x4096xf32> to vector<1x128xf32>
    %568 = arith.addf %566, %567 : vector<1x128xf32>
    %569 = vector.extract_strided_slice %535 {offsets = [17, 2176], sizes = [1, 128], strides = [1, 1]} : vector<32x4096xf32> to vector<1x128xf32>
    %570 = arith.addf %568, %569 : vector<1x128xf32>
    %571 = vector.extract_strided_slice %535 {offsets = [18, 2304], sizes = [1, 128], strides = [1, 1]} : vector<32x4096xf32> to vector<1x128xf32>
    %572 = arith.addf %570, %571 : vector<1x128xf32>
    %573 = vector.extract_strided_slice %535 {offsets = [19, 2432], sizes = [1, 128], strides = [1, 1]} : vector<32x4096xf32> to vector<1x128xf32>
    %574 = arith.addf %572, %573 : vector<1x128xf32>
    %575 = vector.extract_strided_slice %535 {offsets = [20, 2560], sizes = [1, 128], strides = [1, 1]} : vector<32x4096xf32> to vector<1x128xf32>
    %576 = arith.addf %574, %575 : vector<1x128xf32>
    %577 = vector.extract_strided_slice %535 {offsets = [21, 2688], sizes = [1, 128], strides = [1, 1]} : vector<32x4096xf32> to vector<1x128xf32>
    %578 = arith.addf %576, %577 : vector<1x128xf32>
    %579 = vector.extract_strided_slice %535 {offsets = [22, 2816], sizes = [1, 128], strides = [1, 1]} : vector<32x4096xf32> to vector<1x128xf32>
    %580 = arith.addf %578, %579 : vector<1x128xf32>
    %581 = vector.extract_strided_slice %535 {offsets = [23, 2944], sizes = [1, 128], strides = [1, 1]} : vector<32x4096xf32> to vector<1x128xf32>
    %582 = arith.addf %580, %581 : vector<1x128xf32>
    %583 = vector.extract_strided_slice %535 {offsets = [24, 3072], sizes = [1, 128], strides = [1, 1]} : vector<32x4096xf32> to vector<1x128xf32>
    %584 = arith.addf %582, %583 : vector<1x128xf32>
    %585 = vector.extract_strided_slice %535 {offsets = [25, 3200], sizes = [1, 128], strides = [1, 1]} : vector<32x4096xf32> to vector<1x128xf32>
    %586 = arith.addf %584, %585 : vector<1x128xf32>
    %587 = vector.extract_strided_slice %535 {offsets = [26, 3328], sizes = [1, 128], strides = [1, 1]} : vector<32x4096xf32> to vector<1x128xf32>
    %588 = arith.addf %586, %587 : vector<1x128xf32>
    %589 = vector.extract_strided_slice %535 {offsets = [27, 3456], sizes = [1, 128], strides = [1, 1]} : vector<32x4096xf32> to vector<1x128xf32>
    %590 = arith.addf %588, %589 : vector<1x128xf32>
    %591 = vector.extract_strided_slice %535 {offsets = [28, 3584], sizes = [1, 128], strides = [1, 1]} : vector<32x4096xf32> to vector<1x128xf32>
    %592 = arith.addf %590, %591 : vector<1x128xf32>
    %593 = vector.extract_strided_slice %535 {offsets = [29, 3712], sizes = [1, 128], strides = [1, 1]} : vector<32x4096xf32> to vector<1x128xf32>
    %594 = arith.addf %592, %593 : vector<1x128xf32>
    %595 = vector.extract_strided_slice %535 {offsets = [30, 3840], sizes = [1, 128], strides = [1, 1]} : vector<32x4096xf32> to vector<1x128xf32>
    %596 = arith.addf %594, %595 : vector<1x128xf32>
    %597 = vector.extract_strided_slice %535 {offsets = [31, 3968], sizes = [1, 128], strides = [1, 1]} : vector<32x4096xf32> to vector<1x128xf32>
    %598 = arith.addf %596, %597 : vector<1x128xf32>
    %c0_363 = arith.constant 0 : index
    %c0_364 = arith.constant 0 : index
    %599 = vector.load %arg8[%c0_363, %c0_364] : memref<1x128xf32, #tpu.memory_space<vmem>>, vector<1x128xf32>
    %600 = arith.addf %598, %599 : vector<1x128xf32>
    %cst_365 = arith.constant 0.000000e+00 : f32
    %601 = vector.broadcast %cst_365 : f32 to vector<1x128xf32>
    %602 = arith.maximumf %600, %601 : vector<1x128xf32>
    %c0_366 = arith.constant 0 : index
    %c0_367 = arith.constant 0 : index
    %603 = vector.load %arg9[%c0_366, %c0_367] : memref<1x128xf32, #tpu.memory_space<vmem>>, vector<1x128xf32>
    %604 = arith.mulf %602, %603 : vector<1x128xf32>
    %cst_368 = arith.constant dense<0.000000e+00> : vector<1xf32>
    %605 = vector.multi_reduction <add>, %604, %cst_368 [1] : vector<1x128xf32> to vector<1xf32>
    %606 = vector.shape_cast %605 : vector<1xf32> to vector<1x1xf32>
    %c0_369 = arith.constant 0 : index
    %c0_370 = arith.constant 0 : index
    %607 = vector.load %arg10[%c0_369, %c0_370] : memref<1x1xf32, #tpu.memory_space<vmem>>, vector<1x1xf32>
    %608 = arith.addf %606, %607 : vector<1x1xf32>
    %cst_371 = arith.constant 0.000000e+00 : f32
    %609 = vector.broadcast %cst_371 : f32 to vector<1x1xf32>
    %610 = arith.subf %609, %608 : vector<1x1xf32>
    %611 = math.exp %610 : vector<1x1xf32>
    %cst_372 = arith.constant 1.000000e+00 : f32
    %612 = vector.broadcast %cst_372 : f32 to vector<1x1xf32>
    %613 = arith.addf %612, %611 : vector<1x1xf32>
    %cst_373 = arith.constant 1.000000e+00 : f32
    %614 = vector.broadcast %cst_373 : f32 to vector<1x1xf32>
    %615 = arith.divf %614, %613 : vector<1x1xf32>
    %c0_374 = arith.constant 0 : index
    %c0_375 = arith.constant 0 : index
    %c0_376 = arith.constant 0 : index
    %616 = vector.load %arg11[%c0_374, %c0_375, %c0_376] : memref<1x1x1xf32, #tpu.memory_space<vmem>>, vector<1x1x1xf32>
    %617 = vector.shape_cast %616 : vector<1x1x1xf32> to vector<1x1xf32>
    %618 = vector.shape_cast %615 : vector<1x1xf32> to vector<1x1x1xf32>
    tpu.vector_store %arg11[%c0_374, %c0_375, %c0_376], %618 {strides = array<i32>} : memref<1x1x1xf32, #tpu.memory_space<vmem>>, vector<1x1x1xf32>,
    return
  }
  func.func @transform_0(%arg0: i32) -> (i32, i32, i32, i32) {
    %c0_i32 = arith.constant 0 : i32
    %c0_i32_0 = arith.constant 0 : i32
    %c0_i32_1 = arith.constant 0 : i32
    %c0_i32_2 = arith.constant 0 : i32
    return %arg0, %c0_i32, %c0_i32_0, %c0_i32_1 : i32, i32, i32, i32
  }
  func.func @transform_1(%arg0: i32) -> (i32, i32) {
    %c0_i32 = arith.constant 0 : i32
    %c0_i32_0 = arith.constant 0 : i32
    %c0_i32_1 = arith.constant 0 : i32
    return %c0_i32, %c0_i32_0 : i32, i32
  }
  func.func @transform_2(%arg0: i32) -> (i32, i32) {
    %c0_i32 = arith.constant 0 : i32
    %c0_i32_0 = arith.constant 0 : i32
    %c0_i32_1 = arith.constant 0 : i32
    return %c0_i32, %c0_i32_0 : i32, i32
  }
  func.func @transform_3(%arg0: i32) -> (i32, i32, i32) {
    %c0_i32 = arith.constant 0 : i32
    %c0_i32_0 = arith.constant 0 : i32
    %c0_i32_1 = arith.constant 0 : i32
    %c0_i32_2 = arith.constant 0 : i32
    return %c0_i32, %c0_i32_0, %c0_i32_1 : i32, i32, i32
  }
  func.func @transform_4(%arg0: i32) -> (i32, i32) {
    %c0_i32 = arith.constant 0 : i32
    %c0_i32_0 = arith.constant 0 : i32
    %c0_i32_1 = arith.constant 0 : i32
    return %c0_i32, %c0_i32_0 : i32, i32
  }
  func.func @transform_5(%arg0: i32) -> (i32, i32) {
    %c0_i32 = arith.constant 0 : i32
    %c0_i32_0 = arith.constant 0 : i32
    %c0_i32_1 = arith.constant 0 : i32
    return %c0_i32, %c0_i32_0 : i32, i32
  }
  func.func @transform_6(%arg0: i32) -> (i32, i32) {
    %c0_i32 = arith.constant 0 : i32
    %c0_i32_0 = arith.constant 0 : i32
    %c0_i32_1 = arith.constant 0 : i32
    return %c0_i32, %c0_i32_0 : i32, i32
  }
  func.func @transform_7(%arg0: i32) -> (i32, i32) {
    %c0_i32 = arith.constant 0 : i32
    %c0_i32_0 = arith.constant 0 : i32
    %c0_i32_1 = arith.constant 0 : i32
    return %c0_i32, %c0_i32_0 : i32, i32
  }
  func.func @transform_8(%arg0: i32) -> (i32, i32) {
    %c0_i32 = arith.constant 0 : i32
    %c0_i32_0 = arith.constant 0 : i32
    %c0_i32_1 = arith.constant 0 : i32
    return %c0_i32, %c0_i32_0 : i32, i32
  }
  func.func @transform_9(%arg0: i32) -> (i32, i32) {
    %c0_i32 = arith.constant 0 : i32
    %c0_i32_0 = arith.constant 0 : i32
    %c0_i32_1 = arith.constant 0 : i32
    return %c0_i32, %c0_i32_0 : i32, i32
  }
  func.func @transform_10(%arg0: i32) -> (i32, i32, i32) {
    %c0_i32 = arith.constant 0 : i32
    %c0_i32_0 = arith.constant 0 : i32
    %c0_i32_1 = arith.constant 0 : i32
    return %arg0, %c0_i32, %c0_i32_0 : i32, i32, i32
  }
}

</mosaic_0001>

<bundles_post_ra>
// kernel: model_forward.1
= control target key start
LH: loop header
LB: loop body
LE: loop exit
PB: predicated region body
PF: predicated region fallthrough
CT: control target
= control target key end

     0   :  { %s10900_s15 = smov 0   ;;  %s14626_s0 = inlined_call_operand.vmem [shape: bf16[2,16,3,289], index: 0, kind: input, shape index: {}]   ;;  %s14627_s1 = inlined_call_operand.vmem [shape: bf16[256,192], index: 1, kind: input, shape index: {}]   ;;  %s14628_s2 = inlined_call_operand.vmem [shape: f32[16,1], index: 2, kind: input, shape index: {}]   ;;  %s14629_s3 = inlined_call_operand.vmem [shape: f32[4,1,289], index: 3, kind: input, shape index: {}]   ;;  %s14630_s4 = inlined_call_operand.vmem [shape: bf16[128,256], index: 4, kind: input, shape index: {}]   ;;  %s14631_s5 = inlined_call_operand.vmem [shape: f32[32,1], index: 5, kind: input, shape index: {}]   ;;  %s14632_s6 = inlined_call_operand.vmem [shape: bf16[289,4096], index: 6, kind: input, shape index: {}]   ;;  %s14633_s7 = inlined_call_operand.vmem [shape: f32[1,128], index: 7, kind: input, shape index: {}]   ;;  %s14634_s8 = inlined_call_operand.vmem [shape: f32[1,128], index: 8, kind: input, shape index: {}]   ;;  %s14635_s9 = inlined_call_operand.<no memory space> [shape: f32[1,1], index: 9, kind: input, shape index: {}]   ;;  %s14636_s10 = inlined_call_operand.vmem [shape: f32[2,1,1], index: 10, kind: output, shape index: {}]  }
   0x1   :  { %v15_v0 = vstv %s14635_s9 }
   0x2   :  { %16 = vst [vmem:[#allocation4] sm:$0x1] %v15_v0 }
   0x3 LB: > { %s9298_s16 = sadd.s32 4294967295, %s10827_s15   ;;  %p9302_p0 = scmp.ge.s32.totalorder %s10827_s15, 1  ;;  %s10827_s15 = sphi %s10900_s15, %s22_s15  }
   0x4   : > { %p314_p1 = scmp.lt.s32.totalorder %s10827_s15, 3 }
   0x6   : > { %p315_p2 = pnand %p9302_p0, %p314_p1 }
   0x7   : > { %p350_p3 = scmp.lt.s32.totalorder (!%p315_p2), %s9298_s16, 1  ;;  %s10829_s20 = smov (!%p315_p2), 112   ;;  %vm447_vm0 = vcmask (!%p315_p2), 269318   ;;  %vm451_vm1 = vcmask (!%p315_p2), 262144   ;;  %vm482_vm2 = vcmask (!%p315_p2), 265217   ;;  %vm512_vm3 = vcmask (!%p315_p2), 268292  }
   0x8   : > { %318 = sbr.rel (%p315_p2) target bundleno = 2155 (0x86b), region = 60  ;;  %s10830_s21 = smov (!%p315_p2), 113   ;;  %vm542_vm4 = vcmask (!%p315_p2), 269319   ;;  %vm546_vm5 = vcmask (!%p315_p2), 263168   ;;  %vm375_vm6 = vcmask (!%p315_p2), 146432   ;;  %vm433_vm7 = vcmask (!%p315_p2), 138240  }
   0x9   : > { %s10831_s22 = smov (!%p315_p2), 18   ;;  %s10832_s23 = smov (!%p315_p2), 17   ;;  %vm384_vm8 = vcmask (!%p315_p2), 264192   ;;  %vm415_vm9 = vcmask (!%p315_p2), 267267   ;;  %vm563_vm10 = vcmask (!%p315_p2), 130048   ;;  %vm577_vm11 = vcmask (!%p315_p2), 266242  }
   0xa   : > { %s10833_s24 = smov (!%p315_p2), 16   ;;  %s10834_s25 = smov (!%p315_p2), 111   ;;  %vm607_vm12 = vcmask (!%p315_p2), 269317   ;;  %vm862_vm13 = vcmask (!%p315_p2), 7168   ;;  %vm14638_vm14 = vcmask (!%p315_p2), 1039360   ;;  %vm14637_vm15 = vcmask (!%p315_p2), 523264  }
   0xb   : > { %s10836_s26 = smov (!%p315_p2), 1   ;;  %s10837_s27 = smov (!%p315_p2), 96  }
   0xc   : > { %s10838_s28 = smov (!%p315_p2), 127   ;;  %s10839_s29 = smov (!%p315_p2), 32  }
   0xd   : > { %s10840_s30 = smov (!%p315_p2), 110   ;;  %s10841_s11 = smov (!%p315_p2), 15  }
   0xf   : > { %s14692_s16 = smov (!%p350_p3, %s9298_s16), 1 }
  0x10   : > { %s10209_s9 = smul.u32 96, %s14692_s16 }
  0x12   : > { %s10914_s19 = scalar_lea.vmem %s14626_s0, %s10209_s9 }
  0x13   : > { %v9306_v1 = vld [vmem:[%s10914_s19 + $0x30] sm:$0x3f]  ;;  %v9307_v2 = vld [vmem:[%s10914_s19 + $0x36] sm:$0x3f]  ;;  %v9304_v3 = vld [vmem:[%s10914_s19 + $0x3c] sm:$0x3f] }
  0x14   : > { %v420_v4 = vunpack.c.h.bf16 %v9306_v1  ;;  %v456_v5 = vunpack.c.h.bf16 %v9307_v2  ;;  %v419_v6 = vunpack.c.l.bf16 %v9306_v1  ;;  %v9305_v7 = vld [vmem:[%s10914_s19 + $0x42] sm:$0x3f]  ;;  %v9308_v8 = vld [vmem:[%s10914_s19 + $0x3c] sm:$0x3f]  ;;  %v455_v10 = vunpack.c.l.bf16 %v9307_v2  ;;  %v9310_v30 = vld [vmem:[%s10914_s19 + $0x30] sm:$0x3f] }
  0x15   : > { %v9309_v9 = vld [vmem:[%s10914_s19 + $0x42] sm:$0x3f]  ;;  %v362_v11 = vunpack.c.h.bf16 %v9304_v3  ;;  %v388_v12 = vunpack.c.l.bf16 %v9305_v7  ;;  %v389_v13 = vunpack.c.h.bf16 %v9305_v7  ;;  %v486_v15 = vunpack.c.h.bf16 %v9308_v8  ;;  %v9311_v33 = vld [vmem:[%s10914_s19 + $0x36] sm:$0x3f]  ;;  %v9314_v38 = vld [vmem:[%s10914_s19 + $0x48] sm:$0x3f] }
  0x16   : > { %v10236_v14 = vpack.i.bf16 %v456_v5, %v420_v4  ;;  %v516_v16 = vunpack.c.h.bf16 %v9309_v9  ;;  %v426_v19 = vcombine.high %v419_v6, %v419_v6  ;;  %v515_v20 = vunpack.c.l.bf16 %v9309_v9  ;;  %v9313_v35 = vld [vmem:[%s10914_s19 + $0x5a] sm:$0x3f]  ;;  %v9312_v48 = vld [vmem:[%s10914_s19 + $0x54] sm:$0x3f]  ;;  %v9315_v55 = vld [vmem:[%s10914_s19 + $0x4e] sm:$0x3f] }
  0x17   : > { %v10231_v17 = vpack.i.bf16 %v362_v11, %v389_v13  ;;  %v395_v18 = vcombine.high %v388_v12, %v388_v12  ;;  %v462_v23 = vcombine.high %v455_v10, %v455_v10  ;;  %v485_v24 = vunpack.c.l.bf16 %v9308_v8  ;;  %v9316_v0 = vld [vmem:[%s10914_s19 + $0x54] sm:$0x3f]  ;;  %v9317_v1 = vld [vmem:[%s10914_s19 + $0x5a] sm:$0x3f]  ;;  %v9319_v7 = vld [vmem:[%s10914_s19 + $0x4e] sm:$0x3f] }
  0x18   : > { %10237 = vrot.lane.b32.xlu0 %v10236_v14, %s10829_s20  ;;  %v10241_v22 = vpack.i.bf16 %v516_v16, %v486_v15  ;;  %v361_v25 = vunpack.c.l.bf16 %v9304_v3  ;;  %v10251_v26 = vpack.i.bf16 %v426_v19, %v419_v6  ;;  %v522_v27 = vcombine.high %v515_v20, %v515_v20  ;;  %v9318_v6 = vld [vmem:[%s10914_s19 + $0x48] sm:$0x3f] }
  0x19   : > { %10232 = vrot.lane.b32.xlu1 %v10231_v17, %s10830_s21  ;;  %v10246_v21 = vpack.i.bf16 %v395_v18, %v388_v12  ;;  %v10256_v28 = vpack.i.bf16 %v462_v23, %v455_v10  ;;  %v492_v29 = vcombine.high %v485_v24, %v485_v24  ;;  %v549_v37 = vunpack.c.l.bf16 %v9310_v30 }
  0x1a   : > { %v10266_v31 = vpack.i.bf16 %v522_v27, %v515_v20  ;;  %v368_v32 = vcombine.high %v361_v25, %v361_v25  ;;  %v580_v39 = vunpack.c.l.bf16 %v9311_v33  ;;  %v636_v41 = vunpack.c.l.bf16 %v9313_v35 }
  0x1b   : > { %v10261_v34 = vpack.i.bf16 %v492_v29, %v485_v24  ;;  %v556_v40 = vcombine.high %v549_v37, %v549_v37  ;;  %v666_v43 = vunpack.c.l.bf16 %v9314_v38  ;;  %v550_v50 = vunpack.c.h.bf16 %v9310_v30 }
  0x1c   : > { %10247 = vrot.lane.b32.xlu0 %v10246_v21, %s10831_s22  ;;  %v10271_v36 = vpack.i.bf16 %v368_v32, %v361_v25  ;;  %v587_v42 = vcombine.high %v580_v39, %v580_v39  ;;  %v643_v45 = vcombine.high %v636_v41, %v636_v41  ;;  %v581_v51 = vunpack.c.h.bf16 %v9311_v33  ;;  %v9321_v25 = vld [vmem:[%s10914_s19 + $0x12] sm:$0x3f]  ;;  %v10966_v33 = vld [vmem:[%s10914_s19] sm:$0x3f] }
  0x1d   : > { %10242 = vrot.lane.b32.xlu1 %v10241_v22, %s10829_s20  ;;  %v10291_v44 = vpack.i.bf16 %v556_v40, %v549_v37  ;;  %v673_v47 = vcombine.high %v666_v43, %v666_v43  ;;  %v612_v53 = vunpack.c.h.bf16 %v9312_v48  ;;  %v637_v54 = vunpack.c.h.bf16 %v9313_v35  ;;  %v902_v35 = vld [vmem:[%s10914_s19] sm:$0x3f]  ;;  %v9324_v40 = vld [vmem:[%s10914_s19 + $0x12] sm:$0x3f] }
  0x1e   : > { %v10296_v46 = vpack.i.bf16 %v587_v42, %v580_v39  ;;  %v10301_v49 = vpack.i.bf16 %v643_v45, %v636_v41  ;;  %v10311_v56 = vpack.i.bf16 %v581_v51, %v550_v50  ;;  %v667_v57 = vunpack.c.h.bf16 %v9314_v38  ;;  %v9323_v39 = vld [vmem:[%s10914_s19 + $0xc] sm:$0x3f] }
  0x1f   : > { %v10306_v52 = vpack.i.bf16 %v673_v47, %v666_v43  ;;  %v700_v58 = vunpack.c.h.bf16 %v9315_v55  ;;  %v611_v59 = vunpack.c.l.bf16 %v9312_v48  ;;  %v10316_v60 = vpack.i.bf16 %v612_v53, %v637_v54  ;;  %v10981_v42 = vld [vmem:[%s10914_s19 + $0x2a] sm:$0x3f] }
  0x20   : > { %10252 = vrot.lane.b32.xlu0 %v10251_v26, %s10832_s23  ;;  %v699_v63 = vunpack.c.l.bf16 %v9315_v55  ;;  %v728_v4 = vunpack.c.l.bf16 %v9316_v0  ;;  %v757_v5 = vunpack.c.l.bf16 %v9317_v1  ;;  %v789_v10 = vunpack.c.l.bf16 %v9318_v6  ;;  %v9320_v26 = vld [vmem:[%s10914_s19 + $0xc] sm:$0x3f] }
  0x21   : > { %10257 = vrot.lane.b32.xlu1 %v10256_v28, %s10832_s23  ;;  %v10321_v61 = vpack.i.bf16 %v700_v58, %v667_v57  ;;  %v618_v62 = vcombine.high %v611_v59, %v611_v59  ;;  %v818_v13 = vunpack.c.l.bf16 %v9319_v7  ;;  %v10835_v18 = vmov 0  }
  0x22   : > { %v706_v3 = vcombine.high %v699_v63, %v699_v63  ;;  %v10341_v8 = vpack.i.bf16 %v699_v63, %v667_v57  ;;  %v735_v9 = vcombine.high %v728_v4, %v728_v4  ;;  %v764_v12 = vcombine.high %v757_v5, %v757_v5  ;;  %2548 = vmatprep.subr.bf16.mxu1 %v10835_v18 }
  0x23   : > { %v10331_v2 = vpack.i.bf16 %v618_v62, %v611_v59  ;;  %v796_v15 = vcombine.high %v789_v10, %v789_v10  ;;  %10711 = vset.pattern.permute.xlu0 %v10835_v18  ;;  %10712 = vset.pattern.permute.xlu1 %v10835_v18  ;;  %v729_v20 = vunpack.c.h.bf16 %v9316_v0  ;;  %v758_v21 = vunpack.c.h.bf16 %v9317_v1 }
  0x24   : > { %10267 = vrot.lane.b32.xlu0 %v10266_v31, %s10832_s23  ;;  %v10346_v11 = vpack.i.bf16 %v728_v4, %v706_v3  ;;  %v10356_v16 = vpack.i.bf16 %v700_v58, %v764_v12  ;;  %v790_v23 = vunpack.c.h.bf16 %v9318_v6  ;;  %v819_v24 = vunpack.c.h.bf16 %v9319_v7  ;;  %v9326_v12 = vld [vmem:[%s10914_s19 + $0x24] sm:$0x3f] }
  0x25   : > { %10262 = vrot.lane.b32.xlu1 %v10261_v34, %s10832_s23  ;;  %v10361_v19 = vpack.i.bf16 %v796_v15, %v789_v10  ;;  %v10371_v27 = vpack.i.bf16 %v758_v21, %v729_v20  ;;  %v874_v28 = vunpack.c.l.bf16 %v9321_v25  ;;  %v848_v29 = vunpack.c.l.bf16 %v9320_v26  ;;  %v10969_v34 = vld [vmem:[%s10914_s19 + $0x6] sm:$0x3f]  ;;  %v9332_v21 = vld [vmem:[%s10914_s19 + $0x18] sm:$0x3f] }
  0x26   : > { %v10376_v30 = vpack.i.bf16 %v819_v24, %v790_v23  ;;  %v849_v31 = vunpack.c.h.bf16 %v9320_v26  ;;  %v875_v32 = vunpack.c.h.bf16 %v9321_v25  ;;  %v10978_v41 = vunpack.c.l.bf16 %v10966_v33  ;;  %v9333_v24 = vld [vmem:[%s10914_s19 + $0x1e] sm:$0x3f] }
  0x27   : > { %v881_v37 = vcombine.high %v874_v28, %v874_v28  ;;  %v855_v38 = vcombine.high %v848_v29, %v848_v29  ;;  %v903_v45 = vunpack.c.l.bf16 %v902_v35  ;;  %v968_v47 = vunpack.c.h.bf16 %v10966_v33 }
  0x28   : > { %10272 = vrot.lane.b32.xlu0 %v10271_v36, %s10831_s22  ;;  %v9322_v36 = vld [vmem:[%s10914_s19 + $0x6] sm:$0x3f]  ;;  %v10396_v43 = vpack.i.bf16 %v849_v31, %v875_v32  ;;  %v937_v48 = vunpack.c.l.bf16 %v9323_v39  ;;  %v904_v50 = vunpack.c.h.bf16 %v902_v35  ;;  %v1053_v53 = vunpack.c.l.bf16 %v10981_v42 }
  0x29   : > { %10277 = vrot.lane.b32.xlu1 %v10231_v17, %s10831_s22  ;;  %v825_v17 = vcombine.high %v818_v13, %v818_v13  ;;  %v10391_v51 = vpack.i.bf16 %v881_v37, %v874_v28  ;;  %v907_v54 = vcombine.high %v903_v45, %v903_v45  ;;  %v971_v55 = vcombine.high %v10978_v41, %v10978_v41  ;;  %v9331_v31 = vld [vmem:[%s10914_s19 + $0x2a] sm:$0x3f]  ;;  %v11019_v37 = vld [vmem:[%s10914_s19 + $0x42] sm:$0x3f] }
  0x2a   : > { %946 = vst [vmem:[#allocation2 + $0xb0] sm:$0x70] %v937_v48  ;;  %v908_v58 = vrot.slane %v903_v45, 2  ;;  %v910_v1 = vrot.slane %v904_v50, 2  ;;  %v938_v3 = vunpack.c.h.bf16 %v9323_v39  ;;  %v950_v4 = vunpack.c.h.bf16 %v9324_v40 }
  0x2b   : > { %v909_v59 = vrot.slane %v907_v54, 2  ;;  %v10411_v10 = vpack.i.bf16 %v968_v47, %v971_v55  ;;  %v1028_v20 = vunpack.c.l.bf16 %v9326_v12  ;;  %v1129_v35 = vunpack.c.l.bf16 %v9331_v31  ;;  %v9334_v54 = vld [vmem:[%s10914_s19 + $0x3c] sm:$0x3f] }
  0x2c   : > { %10282 = vrot.lane.b32.xlu0 %v10236_v14, %s10832_s23  ;;  %v10351_v14 = vpack.i.bf16 %v757_v5, %v735_v9  ;;  %914 = vst [vmem:[#allocation2 + $0xa8] ss:$-20 sps:$4 sm:$0xc1] %v908_v58   ;;  %v999_v5 = vunpack.c.h.bf16 %v10969_v34  ;;  %916 = vst.msk [vmem:[#allocation2 + $0xa0] sm:$0xc0] %vm447_vm0, %v910_v1  ;;  %v956_v9 = vrot.slane %v950_v4, 1  ;;  %v1177_v47 = vunpack.c.h.bf16 %v9333_v24 }
  0x2d   : > { %10287 = vrot.lane.b32.xlu1 %v10241_v22, %s10832_s23  ;;  %v10366_v22 = vpack.i.bf16 %v825_v17, %v818_v13  ;;  %915 = vst [vmem:[#allocation2 + $0xb0] ss:$-20 sps:$4 sm:$0xc1] %v909_v59   ;;  %919 = vst.msk [vmem:[#allocation2 + $0xb8] sm:$0x1] %vm451_vm1, %v910_v1  ;;  %v1054_v17 = vunpack.c.h.bf16 %v10981_v42  ;;  %v1035_v32 = vcombine.high %v1028_v20, %v1028_v20 }
  0x2e   : > { %962 = vst.msk [vmem:[#allocation2 + $0xb8] sm:$0x80] %vm542_vm4, %v956_v9  ;;  %v1133_v39 = vcombine.high %v1129_v35, %v1129_v35  ;;  %v9330_v42 = vld [vmem:[%s10914_s19 + $0x24] sm:$0x3f]  ;;  %v11033_v1 = vld [vmem:[%s10914_s19 + $0x30] sm:$0x3f] }
  0x2f   : > { %965 = vst.msk [vmem:[#allocation2 + $0xd0] sm:$0x3] %vm546_vm5, %v956_v9  ;;  %v1117_v45 = vunpack.c.l.bf16 %v9330_v42  ;;  %v9339_v4 = vld [vmem:[%s10914_s19 + $0x42] sm:$0x3f] }
  0x30   : > { %10292 = vrot.lane.b32.xlu0 %v10291_v44, %s10833_s24  ;;  %v10984_v44 = vunpack.c.l.bf16 %v10969_v34  ;;  %v1303_v9 = vunpack.c.l.bf16 %v9339_v4 }
  0x31   : > { %10297 = vrot.lane.b32.xlu1 %v10296_v46, %s10833_s24  ;;  %v922_v46 = vunpack.c.l.bf16 %v9322_v36  ;;  %1126 = vst [vmem:[#allocation2 + $0xf8] sm:$0x70] %v1117_v45 }
  0x32   : > { %v1002_v6 = vcombine.high %v10984_v44, %v10984_v44  ;;  %v10426_v23 = vpack.i.bf16 %v10984_v44, %v10978_v41 }
  0x34   : > { %10302 = vrot.lane.b32.xlu0 %v10301_v49, %s10831_s22  ;;  %v949_v49 = vunpack.c.l.bf16 %v9324_v40  ;;  %v10416_v13 = vpack.i.bf16 %v999_v5, %v1002_v6  ;;  %v1148_v40 = vunpack.c.h.bf16 %v9332_v21  ;;  %v1206_v6 = vunpack.c.h.bf16 %v9334_v54 }
  0x35   : > { %10307 = vrot.lane.b32.xlu1 %v10306_v52, %s10832_s23  ;;  %v10401_v52 = vpack.i.bf16 %v855_v38, %v848_v29  ;;  %v1147_v29 = vunpack.c.l.bf16 %v9332_v21 }
  0x36   : > { %v953_v57 = vcombine.high %v949_v49, %v949_v49  ;;  %v954_v62 = vrot.slane %v949_v49, 1  ;;  %v1229_v49 = vunpack.c.l.bf16 %v11019_v37 }
  0x37   : > { %v1151_v41 = vcombine.high %v1147_v29, %v1147_v29 }
  0x38   : > { %10312 = vrot.lane.b32.xlu0 %v10311_v56, %s10834_s25  ;;  %v955_v0 = vrot.slane %v953_v57, 1  ;;  %960 = vst [vmem:[#allocation2 + $0xc0] ss:$-20 sps:$4 sm:$0x83] %v954_v62   ;;  %v1134_v57 = vrot.slane %v1129_v35, 1 }
  0x39   : > { %10317 = vrot.lane.b32.xlu1 %v10316_v60, %s10830_s21 }
  0x3a   : > { %961 = vst [vmem:[#allocation2 + $0xc8] ss:$-20 sps:$4 sm:$0x83] %v955_v0   ;;  %v9337_v0 = vld [vmem:[%s10914_s19 + $0x36] sm:$0x3f] }
  0x3b   : > { %1140 = vst [vmem:[#allocation2 + $0x108] ss:$-20 sps:$4 sm:$0x83] %v1134_v57  }
  0x3c   : > { %10322 = vrot.lane.b32.xlu0 %v10321_v61, %s10829_s20  ;;  %v941_v61 = vcombine.low %v937_v48, %v937_v48 }
  0x3d   : > { %10327 = vrot.lane.b32.xlu1 %v10311_v56, %s10833_s24  ;;  %v926_v56 = vcombine.high %v922_v46, %v922_v46 }
  0x3e   : > { %945 = vst [vmem:[#allocation2 + $0xa8] sm:$0x70] %v941_v61 }
  0x3f   : > { %v928_v63 = vrot.slane %v926_v56, 7  ;;  %v1121_v56 = vcombine.low %v1117_v45, %v1117_v45 }
  0x40   : > { %10332 = vrot.lane.b32.xlu0 %v10331_v2, %s10831_s22  ;;  %v923_v2 = vunpack.c.h.bf16 %v9322_v36  ;;  %v1176_v36 = vunpack.c.l.bf16 %v9333_v24 }
  0x41   : > { %10337 = vrot.lane.b32.xlu1 %v10316_v60, %s10831_s22  ;;  %v927_v60 = vrot.slane %v922_v46, 7  ;;  %934 = vst [vmem:[#allocation2 + $0xb0] sm:$0xe] %v928_v63  ;;  %v1135_v46 = vrot.slane %v1133_v39, 1  ;;  %v9336_v63 = vld [vmem:[%s10914_s19 + $0x30] sm:$0x3f]  ;;  %v1322_v39 = vunpack.c.h.bf16 %v11033_v1 }
  0x42   : > { %v929_v7 = vrot.slane %v923_v2, 7  ;;  %v1180_v48 = vcombine.high %v1176_v36, %v1176_v36  ;;  %1125 = vst [vmem:[#allocation2 + $0xf0] sm:$0x70] %v1121_v56  ;;  %v1258_v2 = vunpack.c.l.bf16 %v9336_v63  ;;  %v10461_v5 = vpack.i.bf16 %v1176_v36, %v1147_v29 }
  0x43   : > { %933 = vst [vmem:[#allocation2 + $0xa8] sm:$0xe] %v927_v60  ;;  %1141 = vst [vmem:[#allocation2 + $0x110] ss:$-20 sps:$4 sm:$0x83] %v1135_v46   ;;  %v1236_v60 = vcombine.high %v1229_v49, %v1229_v49 }
  0x44   : > { %10342 = vrot.lane.b32.xlu0 %v10341_v8, %s10832_s23  ;;  %v942_v8 = vcombine.low %v938_v3, %v938_v3  ;;  %935 = vst.msk [vmem:[#allocation2 + $0xb8] sm:$0xe] %vm482_vm2, %v929_v7  ;;  %v10456_v59 = vpack.i.bf16 %v1177_v47, %v1180_v48  ;;  %v1276_v3 = vunpack.c.l.bf16 %v9337_v0  ;;  %v1230_v7 = vunpack.c.h.bf16 %v11019_v37  ;;  %v9342_v47 = vld [vmem:[%s10914_s19 + $0x54] sm:$0x3f]  ;;  %v9344_v48 = vld [vmem:[%s10914_s19 + $0x48] sm:$0x3f] }
  0x45   : > { %10347 = vrot.lane.b32.xlu1 %v10346_v11, %s10832_s23  ;;  %v1060_v11 = vcombine.high %v1053_v53, %v1053_v53  ;;  %v1263_v21 = vrot.slane %v1258_v2, 2 }
  0x46   : > { %947 = vst.msk [vmem:[#allocation2 + $0xb8] sm:$0x70] %vm512_vm3, %v942_v8  ;;  %v9338_v8 = vld [vmem:[%s10914_s19 + $0x3c] sm:$0x3f] }
  0x47   : > { %1269 = vst [vmem:[#allocation2 + $0x138] ss:$-20 sps:$4 sm:$0xc1] %v1263_v21   ;;  %v1292_v29 = vunpack.c.h.bf16 %v9338_v8 }
  0x48   : > { %10352 = vrot.lane.b32.xlu0 %v10351_v14, %s10832_s23  ;;  %v9328_v14 = vld [vmem:[%s10914_s19 + $0x18] sm:$0x3f] }
  0x49   : > { %10357 = vrot.lane.b32.xlu1 %v10356_v16, %s10832_s23  ;;  %v1083_v15 = vunpack.c.l.bf16 %v9328_v14  ;;  %v1029_v16 = vunpack.c.h.bf16 %v9326_v12  ;;  %v1280_v12 = vcombine.high %v1276_v3, %v1276_v3  ;;  %v1296_v36 = vcombine.low %v1292_v29, %v1292_v29 }
  0x4b   : > { %v1088_v26 = vrot.slane %v1083_v15, 2  ;;  %v10431_v28 = vpack.i.bf16 %v1029_v16, %v1054_v17  ;;  %v1307_v16 = vcombine.high %v1303_v9, %v1303_v9  ;;  %v9341_v17 = vld [vmem:[%s10914_s19 + $0x36] sm:$0x3f]  ;;  %1301 = vst.msk [vmem:[#allocation2 + $0x148] sm:$0x70] %vm512_vm3, %v1296_v36 }
  0x4c   : > { %10362 = vrot.lane.b32.xlu0 %v10361_v19, %s10833_s24  ;;  %v10421_v19 = vpack.i.bf16 %v1060_v11, %v1053_v53  ;;  %v10451_v53 = vpack.i.bf16 %v1148_v40, %v1151_v41  ;;  %v1262_v11 = vcombine.high %v1258_v2, %v1258_v2 }
  0x4d   : > { %10367 = vrot.lane.b32.xlu1 %v10366_v22, %s10833_s24  ;;  %v1087_v22 = vcombine.high %v1083_v15, %v1083_v15  ;;  %1094 = vst [vmem:[#allocation2 + $0xf0] ss:$-20 sps:$4 sm:$0xc1] %v1088_v26   ;;  %v11045_v15 = vunpack.c.l.bf16 %v11033_v1  ;;  %v1259_v26 = vunpack.c.h.bf16 %v9336_v63  ;;  %v9347_v1 = vld [vmem:[%s10914_s19 + $0x5a] sm:$0x3f] }
  0x4f   : > { %v1089_v25 = vrot.slane %v1087_v22, 2  ;;  %v1281_v22 = vrot.slane %v1276_v3, 7  ;;  %v1325_v40 = vcombine.high %v11045_v15, %v11045_v15  ;;  %v11079_v3 = vld [vmem:[%s10914_s19] sm:$0x3f] }
  0x50   : > { %10372 = vrot.lane.b32.xlu0 %v10371_v27, %s10829_s20 }
  0x51   : > { %10377 = vrot.lane.b32.xlu1 %v10376_v30, %s10834_s25  ;;  %1095 = vst [vmem:[#allocation2 + $0xf8] ss:$-20 sps:$4 sm:$0xc1] %v1089_v25   ;;  %v1308_v25 = vrot.slane %v1303_v9, 1  ;;  %1287 = vst [vmem:[#allocation2 + $0x138] sm:$0xe] %v1281_v22 }
  0x53   : > { %1314 = vst [vmem:[#allocation2 + $0x150] ss:$-20 sps:$4 sm:$0x83] %v1308_v25   ;;  %v11109_v25 = vld [vmem:[%s10914_s19 + $0x6] sm:$0x3f] }
  0x54   : > { %10382 = vrot.lane.b32.xlu0 %v10371_v27, %s10832_s23  ;;  %v1084_v27 = vunpack.c.h.bf16 %v9328_v14  ;;  %v10471_v14 = vpack.i.bf16 %v1236_v60, %v1229_v49  ;;  %v1432_v49 = vunpack.c.l.bf16 %v9344_v48 }
  0x55   : > { %10387 = vrot.lane.b32.xlu1 %v10376_v30, %s10833_s24  ;;  %v9329_v30 = vld [vmem:[%s10914_s19 + $0x1e] sm:$0x3f] }
  0x56   : > { %v1090_v33 = vrot.slane %v1084_v27, 2  ;;  %v1102_v34 = vunpack.c.l.bf16 %v9329_v30  ;;  %v1103_v50 = vunpack.c.h.bf16 %v9329_v30  ;;  %v1304_v30 = vunpack.c.h.bf16 %v9339_v4 }
  0x57   : > { %v1436_v56 = vcombine.high %v1432_v49, %v1432_v49  ;;  %v1437_v60 = vrot.slane %v1432_v49, 2 }
  0x58   : > { %10392 = vrot.lane.b32.xlu0 %v10391_v51, %s10836_s26  ;;  %1096 = vst.msk [vmem:[#allocation2 + $0xe8] sm:$0xc0] %vm447_vm0, %v1090_v33  ;;  %v1106_v38 = vcombine.high %v1102_v34, %v1102_v34  ;;  %v1118_v51 = vunpack.c.h.bf16 %v9330_v42  ;;  %v1107_v55 = vrot.slane %v1102_v34, 7  ;;  %v1109_v58 = vrot.slane %v1103_v50, 7 }
  0x59   : > { %10397 = vrot.lane.b32.xlu1 %v10396_v43, %s10837_s27  ;;  %1099 = vst.msk [vmem:[#allocation2 + $0x100] sm:$0x1] %vm451_vm1, %v1090_v33  ;;  %v9343_v33 = vld [vmem:[%s10914_s19 + $0x5a] sm:$0x3f]  ;;  %v1265_v34 = vrot.slane %v1259_v26, 2  ;;  %v1310_v37 = vrot.slane %v1304_v30, 1  ;;  %v1351_v42 = vunpack.c.h.bf16 %v9341_v17  ;;  %v1379_v50 = vunpack.c.l.bf16 %v9342_v47 }
  0x5a   : > { %v1108_v44 = vrot.slane %v1106_v38, 7  ;;  %v1122_v61 = vcombine.low %v1118_v51, %v1118_v51  ;;  %1113 = vst [vmem:[#allocation2 + $0xf0] sm:$0xe] %v1107_v55  ;;  %1115 = vst.msk [vmem:[#allocation2 + $0x100] sm:$0xe] %vm482_vm2, %v1109_v58  ;;  %v1403_v41 = vunpack.c.l.bf16 %v9343_v33 }
  0x5b   : > { %1271 = vst.msk [vmem:[#allocation2 + $0x130] sm:$0xc0] %vm447_vm0, %v1265_v34  ;;  %v9349_v51 = vld [vmem:[%s10914_s19 + $0x4e] sm:$0x3f]  ;;  %v9348_v55 = vld [vmem:[%s10914_s19 + $0x48] sm:$0x3f] }
  0x5c   : > { %10402 = vrot.lane.b32.xlu0 %v10401_v52, %s10836_s26  ;;  %1114 = vst [vmem:[#allocation2 + $0xf8] sm:$0xe] %v1108_v44  ;;  %v1130_v52 = vunpack.c.h.bf16 %v9331_v31  ;;  %1127 = vst.msk [vmem:[#allocation2 + $0x100] sm:$0x70] %vm512_vm3, %v1122_v61  ;;  %v10476_v31 = vpack.i.bf16 %v1206_v6, %v1230_v7  ;;  %v10491_v44 = vpack.i.bf16 %v1322_v39, %v1325_v40  ;;  %v11071_v58 = vunpack.c.l.bf16 %v9349_v51  ;;  %v11083_v7 = vld [vmem:[%s10914_s19 + $0x12] sm:$0x3f] }
  0x5d   : > { %10407 = vrot.lane.b32.xlu1 %v10396_v43, %s10836_s26  ;;  %v10441_v43 = vpack.i.bf16 %v1035_v32, %v1028_v20  ;;  %v1282_v20 = vrot.slane %v1280_v12, 7  ;;  %v1350_v32 = vunpack.c.l.bf16 %v9341_v17  ;;  %1274 = vst.msk [vmem:[#allocation2 + $0x148] sm:$0x1] %vm451_vm1, %v1265_v34  ;;  %v1410_v45 = vcombine.high %v1403_v41, %v1403_v41  ;;  %1443 = vst [vmem:[#allocation2 + $0x180] ss:$-20 sps:$4 sm:$0xc1] %v1437_v60  }
  0x5e   : > { %v1136_v62 = vrot.slane %v1130_v52, 1  ;;  %1316 = vst.msk [vmem:[#allocation2 + $0x148] sm:$0x80] %vm542_vm4, %v1310_v37  ;;  %v1433_v61 = vunpack.c.h.bf16 %v9344_v48  ;;  %v11073_v63 = vunpack.c.l.bf16 %v9348_v55  ;;  %v1477_v6 = vunpack.c.l.bf16 %v9347_v1  ;;  %v9346_v17 = vld [vmem:[%s10914_s19 + $0x54] sm:$0x3f] }
  0x5f   : > { %1288 = vst [vmem:[#allocation2 + $0x140] sm:$0xe] %v1282_v20  ;;  %1319 = vst.msk [vmem:[#allocation2 + $0x160] sm:$0x3] %vm546_vm5, %v1310_v37  ;;  %v10501_v52 = vpack.i.bf16 %v1410_v45, %v1403_v41  ;;  %v10506_v57 = vpack.i.bf16 %v1350_v32, %v11045_v15  ;;  %v1528_v9 = vcombine.high %v11071_v58, %v11071_v58  ;;  %v11092_v15 = vunpack.c.l.bf16 %v11079_v3 }
  0x60   : > { %10412 = vrot.lane.b32.xlu0 %v10411_v10, %s10838_s28  ;;  %1142 = vst.msk [vmem:[#allocation2 + $0x100] sm:$0x80] %vm542_vm4, %v1136_v62  ;;  %v1205_v10 = vunpack.c.l.bf16 %v9334_v54  ;;  %v1404_v54 = vunpack.c.h.bf16 %v9343_v33  ;;  %v1439_v4 = vrot.slane %v1433_v61, 2  ;;  %v1465_v21 = vunpack.c.l.bf16 %v9346_v17 }
  0x61   : > { %10417 = vrot.lane.b32.xlu1 %v10416_v13, %s10838_s28  ;;  %1145 = vst.msk [vmem:[#allocation2 + $0x118] sm:$0x3] %vm546_vm5, %v1136_v62  ;;  %v1291_v13 = vunpack.c.l.bf16 %v9338_v8  ;;  %v1386_v62 = vcombine.high %v1379_v50, %v1379_v50  ;;  %v1525_v8 = vunpack.c.h.bf16 %v9349_v51  ;;  %v1611_v33 = vcombine.high %v11092_v15, %v11092_v15 }
  0x62   : > { %v1212_v27 = vcombine.high %v1205_v10, %v1205_v10  ;;  %1445 = vst.msk [vmem:[#allocation2 + $0x178] sm:$0xc0] %vm447_vm0, %v1439_v4  ;;  %1474 = vst [vmem:[#allocation2 + $0x188] sm:$0x70] %v1465_v21  ;;  %v1579_v34 = vunpack.c.h.bf16 %v11083_v7  ;;  %v1469_v37 = vcombine.low %v1465_v21, %v1465_v21  ;;  %v1482_v39 = vrot.slane %v1477_v6, 1 }
  0x63   : > { %1300 = vst [vmem:[#allocation2 + $0x140] sm:$0x70] %v1291_v13  ;;  %v1295_v24 = vcombine.low %v1291_v13, %v1291_v13  ;;  %1448 = vst.msk [vmem:[#allocation2 + $0x190] sm:$0x1] %vm451_vm1, %v1439_v4  ;;  %v10521_v12 = vpack.i.bf16 %v1386_v62, %v1379_v50  ;;  %v1496_v13 = vunpack.c.h.bf16 %v9348_v55  ;;  %v10536_v30 = vpack.i.bf16 %v1525_v8, %v1528_v9  ;;  %v11135_v50 = vld [vmem:[%s10914_s19 + $0xc] sm:$0x3f] }
  0x64   : > { %10422 = vrot.lane.b32.xlu0 %v10421_v19, %s10836_s26  ;;  %v1264_v19 = vrot.slane %v1262_v11, 2  ;;  %v10481_v38 = vpack.i.bf16 %v1212_v27, %v1205_v10  ;;  %v1481_v11 = vcombine.high %v1477_v6, %v1477_v6  ;;  %v1466_v27 = vunpack.c.h.bf16 %v9346_v17  ;;  %1473 = vst [vmem:[#allocation2 + $0x180] sm:$0x70] %v1469_v37  ;;  %1488 = vst [vmem:[#allocation2 + $0x198] ss:$-20 sps:$4 sm:$0x83] %v1482_v39  }
  0x65   : > { %10427 = vrot.lane.b32.xlu1 %v10426_v23, %s10838_s28  ;;  %1299 = vst [vmem:[#allocation2 + $0x138] sm:$0x70] %v1295_v24  ;;  %v10546_v51 = vpack.i.bf16 %v11071_v58, %v11073_v63 }
  0x66   : > { %1270 = vst [vmem:[#allocation2 + $0x140] ss:$-20 sps:$4 sm:$0xc1] %v1264_v19   ;;  %v11100_v19 = vunpack.c.l.bf16 %v11083_v7  ;;  %v1483_v22 = vrot.slane %v1481_v11, 1  ;;  %v1470_v41 = vcombine.low %v1466_v27, %v1466_v27 }
  0x68   : > { %10432 = vrot.lane.b32.xlu0 %v10431_v28, %s10837_s27  ;;  %1489 = vst [vmem:[#allocation2 + $0x1a0] ss:$-20 sps:$4 sm:$0x83] %v1483_v22   ;;  %1475 = vst.msk [vmem:[#allocation2 + $0x190] sm:$0x70] %vm512_vm3, %v1470_v41 }
  0x69   : > { %10437 = vrot.lane.b32.xlu1 %v10426_v23, %s10839_s29  ;;  %v1309_v23 = vrot.slane %v1307_v16, 1  ;;  %v11095_v16 = vld [vmem:[%s10914_s19 + $0xc] sm:$0x3f] }
  0x6a   : > { %v11106_v24 = vunpack.c.l.bf16 %v11095_v16 }
  0x6b   : > { %1315 = vst [vmem:[#allocation2 + $0x158] ss:$-20 sps:$4 sm:$0x83] %v1309_v23  }
  0x6c   : > { %10442 = vrot.lane.b32.xlu0 %v10441_v43, %s10836_s26  ;;  %v1354_v43 = vcombine.high %v1350_v32, %v1350_v32  ;;  %v1608_v32 = vunpack.c.h.bf16 %v11079_v3 }
  0x6d   : > { %10447 = vrot.lane.b32.xlu1 %v10431_v28, %s10836_s26  ;;  %v1277_v28 = vunpack.c.h.bf16 %v9337_v0  ;;  %v9345_v0 = vld [vmem:[%s10914_s19 + $0x4e] sm:$0x3f] }
  0x6e   : > { %v10496_v46 = vpack.i.bf16 %v1351_v42, %v1354_v43  ;;  %v1451_v26 = vunpack.c.h.bf16 %v9345_v0  ;;  %v1670_v43 = vunpack.c.h.bf16 %v11095_v16 }
  0x6f   : > { %v1283_v35 = vrot.slane %v1277_v28, 7  ;;  %v1478_v28 = vunpack.c.h.bf16 %v9347_v1 }
  0x70   : > { %10452 = vrot.lane.b32.xlu0 %v10451_v53, %s10838_s28  ;;  %v1380_v53 = vunpack.c.h.bf16 %v9342_v47  ;;  %v1457_v40 = vrot.slane %v1451_v26, 7 }
  0x71   : > { %10457 = vrot.lane.b32.xlu1 %v10456_v59, %s10838_s28  ;;  %1289 = vst.msk [vmem:[#allocation2 + $0x148] sm:$0xe] %vm482_vm2, %v1283_v35  ;;  %v1438_v59 = vrot.slane %v1436_v56, 2  ;;  %v1582_v35 = vcombine.high %v11100_v19, %v11100_v19  ;;  %v1484_v45 = vrot.slane %v1478_v28, 1 }
  0x72   : > { %v10511_v2 = vpack.i.bf16 %v1380_v53, %v1404_v54  ;;  %1463 = vst.msk [vmem:[#allocation2 + $0x190] sm:$0xe] %vm482_vm2, %v1457_v40  ;;  %v1641_v53 = vunpack.c.h.bf16 %v11109_v25  ;;  %v11144_v54 = vld [vmem:[%s10914_s19 + $0x12] sm:$0x3f] }
  0x73   : > { %1444 = vst [vmem:[#allocation2 + $0x188] ss:$-20 sps:$4 sm:$0xc1] %v1438_v59   ;;  %1490 = vst.msk [vmem:[#allocation2 + $0x190] sm:$0x80] %vm542_vm4, %v1484_v45  ;;  %v11168_v4 = vunpack.c.l.bf16 %v11144_v54  ;;  %v1699_v8 = vunpack.c.h.bf16 %v11144_v54 }
  0x74   : > { %10462 = vrot.lane.b32.xlu0 %v10461_v5, %s10838_s28  ;;  %1493 = vst.msk [vmem:[#allocation2 + $0x1a8] sm:$0x3] %vm546_vm5, %v1484_v45 }
  0x75   : > { %10467 = vrot.lane.b32.xlu1 %v10461_v5, %s10839_s29  ;;  %v1450_v5 = vunpack.c.l.bf16 %v9345_v0 }
  0x77   : > { %v1454_v10 = vcombine.high %v1450_v5, %v1450_v5  ;;  %v1455_v36 = vrot.slane %v1450_v5, 7 }
  0x78   : > { %10472 = vrot.lane.b32.xlu0 %v10471_v14, %s10836_s26  ;;  %v1499_v14 = vcombine.high %v11073_v63, %v11073_v63  ;;  %v11160_v63 = vunpack.c.l.bf16 %v11135_v50 }
  0x79   : > { %10477 = vrot.lane.b32.xlu1 %v10476_v31, %s10837_s27  ;;  %v1456_v20 = vrot.slane %v1454_v10, 7  ;;  %1461 = vst [vmem:[#allocation2 + $0x180] sm:$0xe] %v1455_v36 }
  0x7b   : > { %1462 = vst [vmem:[#allocation2 + $0x188] sm:$0xe] %v1456_v20 }
  0x7c   : > { %10482 = vrot.lane.b32.xlu0 %v10481_v38, %s10836_s26  ;;  %v11122_v38 = vunpack.c.l.bf16 %v11109_v25 }
  0x7d   : > { %10487 = vrot.lane.b32.xlu1 %v10476_v31, %s10836_s26  ;;  %v10531_v31 = vpack.i.bf16 %v1496_v13, %v1499_v14 }
  0x7e   : > { %v1644_v58 = vcombine.high %v11122_v38, %v11122_v38 }
  0x80   : > { %10492 = vrot.lane.b32.xlu0 %v10491_v44, %s10838_s28  ;;  %v1673_v44 = vcombine.high %v11106_v24, %v11106_v24 }
  0x81   : > { %10497 = vrot.lane.b32.xlu1 %v10496_v46, %s10838_s28 }
  0x82   : > { %v11157_v62 = vpack.i.bf16 %v1670_v43, %v1673_v44 }
  0x84   : > { %10502 = vrot.lane.b32.xlu0 %v10501_v52, %s10836_s26  ;;  %v10556_v52 = vpack.i.bf16 %v1608_v32, %v1611_v33 }
  0x85   : > { %10507 = vrot.lane.b32.xlu1 %v10506_v57, %s10838_s28 }
  0x88   : > { %10512 = vrot.lane.b32.xlu0 %v10511_v2, %s10837_s27 }
  0x89   : > { %10517 = vrot.lane.b32.xlu1 %v10506_v57, %s10839_s29  ;;  %v10551_v57 = vpack.i.bf16 %v1579_v34, %v1582_v35  ;;  %v1557_v35 = vcombine.high %v11160_v63, %v11160_v63 }
  0x8a   : > { %v11103_v23 = vpop.permute.xlu0 %10237 }
  0x8b   : > { %v11111_v29 = vpop.permute.xlu1 %10232  ;;  %v10239_v0 = vunpack.i.l.bf16 %v11103_v23  ;;  %v10240_v5 = vunpack.i.h.bf16 %v11103_v23  ;;  %v10576_v54 = vpack.i.bf16 %v1557_v35, %v11100_v19 }
  0x8c   : > { %10522 = vrot.lane.b32.xlu0 %v10521_v12, %s10836_s26  ;;  %v10234_v46 = vunpack.i.l.bf16 %v11111_v29  ;;  %v10561_v12 = vpack.i.bf16 %v1641_v53, %v1644_v58  ;;  %v10235_v32 = vunpack.i.h.bf16 %v11111_v29 }
  0x8d   : > { %10527 = vrot.lane.b32.xlu1 %v10511_v2, %s10836_s26 }
  0x8e   : > { %v11124_v42 = vpop.permute.xlu0 %10247 }
  0x8f   : > { %v10250_v47 = vunpack.i.h.bf16 %v11124_v42  ;;  %v10249_v48 = vunpack.i.l.bf16 %v11124_v42  ;;  %v11132_v49 = vpop.permute.xlu1 %10242  ;;  %v11221_v42 = vpack.i.bf16 %v11122_v38, %v11092_v15  ;;  %v10596_v15 = vpack.i.bf16 %v11160_v63, %v11100_v19  ;;  %v11239_v38 = vld [vmem:[%s10914_s19] sm:$0x3f] }
  0x90   : > { %10532 = vrot.lane.b32.xlu0 %v10531_v31, %s10838_s28  ;;  %v10245_v9 = vunpack.i.h.bf16 %v11132_v49  ;;  %v10244_v27 = vunpack.i.l.bf16 %v11132_v49  ;;  %v1702_v31 = vcombine.high %v11168_v4, %v11168_v4 }
  0x91   : > { %v402_v55 = vsel %vm375_vm6, %v10249_v48, %v10250_v47  ;;  %v405_v56 = vsel %vm375_vm6, %v10234_v46, %v10249_v48  ;;  %10537 = vrot.lane.b32.xlu1 %v10536_v30, %s10838_s28 }
  0x92   : > { %v407_v59 = vrot.slane %v405_v56, 5  ;;  %v408_v60 = vrot.slane %v402_v55, 5  ;;  %v11155_v61 = vpop.permute.xlu0 %10252 }
  0x93   : > { %v10255_v1 = vunpack.i.h.bf16 %v11155_v61  ;;  %v10254_v2 = vunpack.i.l.bf16 %v11155_v61  ;;  %v11165_v3 = vpop.permute.xlu1 %10257 }
  0x94   : > { %413 = vst [vmem:[#allocation2] sm:$0x38] %v407_v59  ;;  %414 = vst [vmem:[#allocation2 + $0x8] sm:$0x38] %v408_v60  ;;  %v10260_v6 = vunpack.i.h.bf16 %v11165_v3  ;;  %v10259_v7 = vunpack.i.l.bf16 %v11165_v3  ;;  %10542 = vrot.lane.b32.xlu0 %v10546_v51, %s10838_s28 }
  0x95   : > { %v434_v10 = vsel %vm433_vm7, %v10254_v2, %v10255_v1  ;;  %v437_v11 = vsel %vm433_vm7, %v10239_v0, %v10254_v2  ;;  %10547 = vrot.lane.b32.xlu1 %v10546_v51, %s10839_s29  ;;  %v10571_v51 = vpack.i.bf16 %v1699_v8, %v1702_v31  ;;  %v11234_v8 = vpack.i.bf16 %v11168_v4, %v11106_v24 }
  0x96   : > { %v439_v13 = vrot.slane %v437_v11, 2  ;;  %v440_v14 = vrot.slane %v434_v10, 2  ;;  %v469_v16 = vsel %vm433_vm7, %v10259_v7, %v10260_v6  ;;  %v472_v17 = vsel %vm433_vm7, %v10240_v5, %v10259_v7  ;;  %v11185_v20 = vpop.permute.xlu0 %10267 }
  0x97   : > { %v474_v21 = vrot.slane %v472_v17, 7  ;;  %v475_v22 = vrot.slane %v469_v16, 7  ;;  %v10270_v23 = vunpack.i.h.bf16 %v11185_v20  ;;  %v10269_v25 = vunpack.i.l.bf16 %v11185_v20  ;;  %v11189_v26 = vpop.permute.xlu1 %10262  ;;  %v11266_v20 = vld [vmem:[%s10914_s19 + $0x18] sm:$0x3f] }
  0x98   : > { %445 = vst [vmem:[#allocation2 + $0x18] ss:$-20 sps:$4 sm:$0xc1] %v439_v13   ;;  %446 = vst [vmem:[#allocation2 + $0x20] ss:$-20 sps:$4 sm:$0xc1] %v440_v14   ;;  %v10265_v28 = vunpack.i.h.bf16 %v11189_v26  ;;  %v10264_v30 = vunpack.i.l.bf16 %v11189_v26  ;;  %10552 = vrot.lane.b32.xlu0 %v10551_v57, %s10829_s20  ;;  %v11263_v17 = vunpack.c.l.bf16 %v11239_v38 }
  0x99   : > { %480 = vst [vmem:[#allocation2 + $0x18] sm:$0xe] %v474_v21  ;;  %481 = vst [vmem:[#allocation2 + $0x20] sm:$0xe] %v475_v22  ;;  %v529_v33 = vsel %vm433_vm7, %v10269_v25, %v10270_v23  ;;  %v532_v34 = vsel %vm433_vm7, %v10245_v9, %v10269_v25  ;;  %10557 = vrot.lane.b32.xlu1 %v10556_v52, %s10834_s25  ;;  %v11248_v9 = vld [vmem:[%s10914_s19 + $0x6] sm:$0x3f] }
  0x9a   : > { %v534_v36 = vrot.slane %v532_v34, 1  ;;  %v535_v37 = vrot.slane %v529_v33, 1  ;;  %v499_v39 = vsel %vm433_vm7, %v10264_v30, %v10265_v28  ;;  %v502_v40 = vsel %vm433_vm7, %v10244_v27, %v10264_v30  ;;  %v10273_v29 = vpop.permute.xlu0 %10272  ;;  %v11269_v21 = vld [vmem:[%s10914_s19 + $0x2a] sm:$0x3f] }
  0x9b   : > { %v504_v41 = vrot.slane %v502_v40, 4  ;;  %v505_v43 = vrot.slane %v499_v39, 4  ;;  %v10278_v44 = vpop.permute.xlu1 %10277  ;;  %v10275_v45 = vunpack.i.h.bf16 %v10273_v29  ;;  %v10274_v46 = vunpack.i.l.bf16 %v10273_v29 }
  0x9c   : > { %540 = vst [vmem:[#allocation2 + $0x30] ss:$-20 sps:$4 sm:$0x83] %v534_v36   ;;  %541 = vst [vmem:[#allocation2 + $0x38] ss:$-20 sps:$4 sm:$0x83] %v535_v37   ;;  %v10280_v48 = vunpack.i.h.bf16 %v10278_v44  ;;  %v10279_v49 = vunpack.i.l.bf16 %v10278_v44  ;;  %10562 = vrot.lane.b32.xlu0 %v10561_v12, %s10834_s25  ;;  %v11282_v26 = vunpack.c.l.bf16 %v11248_v9  ;;  %v1731_v27 = vunpack.c.h.bf16 %v11239_v38 }
  0x9d   : > { %510 = vst [vmem:[#allocation2 + $0x18] sm:$0x70] %v504_v41  ;;  %511 = vst [vmem:[#allocation2 + $0x20] sm:$0x70] %v505_v43  ;;  %v376_v52 = vsel %vm375_vm6, %v10274_v46, %v10275_v45  ;;  %v381_v53 = vsel %vm375_vm6, %v10235_v32, %v10274_v46  ;;  %10567 = vrot.lane.b32.xlu1 %v11157_v62, %s10834_s25  ;;  %v11295_v39 = vunpack.c.l.bf16 %v11266_v20  ;;  %v11303_v43 = vunpack.c.l.bf16 %v11269_v21 }
  0x9e   : > { %v403_v55 = vsel %vm375_vm6, %v10250_v47, %v10279_v49  ;;  %v377_v56 = vsel %vm375_vm6, %v10275_v45, %v10280_v48  ;;  %382 = vst [vmem:[#allocation2] sm:$0x7] %v381_v53  ;;  %383 = vst [vmem:[#allocation2 + $0x8] sm:$0x7] %v376_v52  ;;  %v10283_v57 = vpop.permute.xlu0 %10282  ;;  %v1554_v47 = vunpack.c.h.bf16 %v11135_v50  ;;  %v1734_v41 = vcombine.high %v11263_v17, %v11263_v17  ;;  %v11313_v48 = vld [vmem:[%s10914_s19 + $0x24] sm:$0x3f] }
  0x9f   : > { %v409_v58 = vrot.slane %v403_v55, 5  ;;  %385 = vst.msk [vmem:[#allocation2 + $0x10] sm:$0x7] %vm384_vm8, %v377_v56  ;;  %v10288_v59 = vpop.permute.xlu1 %10287  ;;  %v10285_v60 = vunpack.i.h.bf16 %v10283_v57  ;;  %v10284_v0 = vunpack.i.l.bf16 %v10283_v57  ;;  %v1762_v45 = vunpack.c.h.bf16 %v11248_v9 }
  0xa0   : > { %v10290_v62 = vunpack.i.h.bf16 %v10288_v59  ;;  %v10289_v2 = vunpack.i.l.bf16 %v10288_v59  ;;  %10572 = vrot.lane.b32.xlu0 %v10571_v51, %s10834_s25  ;;  %v10591_v14 = vpack.i.bf16 %v11160_v63, %v1554_v47  ;;  %v1765_v46 = vcombine.high %v11282_v26, %v11282_v26 }
  0xa1   : > { %416 = vst.msk [vmem:[#allocation2 + $0x10] sm:$0x38] %vm415_vm9, %v409_v58  ;;  %v470_v5 = vsel %vm433_vm7, %v10260_v6, %v10285_v60  ;;  %v435_v7 = vsel %vm433_vm7, %v10255_v1, %v10284_v0  ;;  %10577 = vrot.lane.b32.xlu1 %v10576_v54, %s10829_s20  ;;  %v1844_v53 = vunpack.c.h.bf16 %v11266_v20  ;;  %v1815_v54 = vunpack.c.h.bf16 %v11269_v21 }
  0xa2   : > { %v530_v50 = vsel %vm433_vm7, %v10270_v23, %v10290_v62  ;;  %v500_v3 = vsel %vm433_vm7, %v10265_v28, %v10289_v2  ;;  %v476_v61 = vrot.slane %v470_v5, 7  ;;  %v441_v6 = vrot.slane %v435_v7, 2  ;;  %v11245_v1 = vpop.permute.xlu0 %10292 }
  0xa3   : > { %v536_v24 = vrot.slane %v530_v50, 1  ;;  %v506_v4 = vrot.slane %v500_v3, 4  ;;  %v11250_v10 = vpop.permute.xlu1 %10297  ;;  %v10295_v19 = vunpack.i.h.bf16 %v11245_v1  ;;  %v10294_v11 = vunpack.i.l.bf16 %v11245_v1  ;;  %v11339_v50 = vld [vmem:[%s10914_s19 + $0x1e] sm:$0x3f] }
  0xa4   : > { %483 = vst.msk [vmem:[#allocation2 + $0x28] sm:$0xe] %vm482_vm2, %v476_v61  ;;  %v10300_v12 = vunpack.i.h.bf16 %v11250_v10  ;;  %v10299_v13 = vunpack.i.l.bf16 %v11250_v10  ;;  %10582 = vrot.lane.b32.xlu0 %v11221_v42, %s10834_s25  ;;  %v2058_v16 = vld [vmem:[#allocation2 + $0x20] sm:$0xff]  ;;  %v2057_v25 = vld [vmem:[#allocation2 + $0x18] sm:$0xff]  ;;  %v1847_v60 = vcombine.high %v11295_v39, %v11295_v39  ;;  %v10611_v2 = vpack.i.bf16 %v1731_v27, %v1734_v41 }
  0xa5   : > { %448 = vst.msk [vmem:[#allocation2 + $0x10] sm:$0xc0] %vm447_vm0, %v441_v6  ;;  %v564_v63 = vsel %vm563_vm10, %v10294_v11, %v10295_v19  ;;  %10587 = vrot.lane.b32.xlu1 %v11234_v8, %s10834_s25  ;;  %v2055_v22 = vld [vmem:[#allocation2 + $0x8] sm:$0xff]  ;;  %v2054_v23 = vld [vmem:[#allocation2] sm:$0xff]  ;;  %v1818_v47 = vcombine.high %v11303_v43, %v11303_v43  ;;  %v11330_v5 = vunpack.c.l.bf16 %v11313_v48  ;;  %v10631_v1 = vpack.i.bf16 %v11282_v26, %v11263_v17 }
  0xa6   : > { %452 = vst.msk [vmem:[#allocation2 + $0x28] sm:$0x1] %vm451_vm1, %v441_v6  ;;  %v594_v28 = vsel %vm563_vm10, %v10299_v13, %v10300_v12  ;;  %v570_v30 = vrot.slane %v564_v63, 6  ;;  %v11288_v31 = vpop.permute.xlu0 %10302  ;;  %v2127_v32 = vpack.c.bf16 %v2058_v16, %v2055_v22  ;;  %v2126_v33 = vpack.c.bf16 %v2057_v25, %v2054_v23 }
  0xa7   : > { %543 = vst.msk [vmem:[#allocation2 + $0x28] sm:$0x80] %vm542_vm4, %v536_v24  ;;  %v600_v34 = vrot.slane %v594_v28, 3  ;;  %v11290_v35 = vpop.permute.xlu1 %10307  ;;  %v10305_v36 = vunpack.i.h.bf16 %v11288_v31  ;;  %v10304_v37 = vunpack.i.l.bf16 %v11288_v31  ;;  %v11347_v16 = vunpack.c.l.bf16 %v11339_v50 }
  0xa8   : > { %547 = vst.msk [vmem:[#allocation2 + $0x40] sm:$0x3] %vm546_vm5, %v536_v24  ;;  %576 = vst [vmem:[#allocation2 + $0x38] sm:$0x1c] %v570_v30  ;;  %v10310_v40 = vunpack.i.h.bf16 %v11290_v35  ;;  %v10309_v29 = vunpack.i.l.bf16 %v11290_v35  ;;  %10592 = vrot.lane.b32.xlu0 %v10591_v14, %s10829_s20  ;;  %2355 = vmatprep.subr.bf16.mxu0 %v2127_v32  ;;  %v10621_v14 = vpack.i.bf16 %v1815_v54, %v1818_v47 }
  0xa9   : > { %513 = vst.msk [vmem:[#allocation2 + $0x28] sm:$0x70] %vm512_vm3, %v506_v4  ;;  %606 = vst [vmem:[#allocation2 + $0x38] sm:$0xe0] %v600_v34  ;;  %v650_v44 = vsel %vm375_vm6, %v10304_v37, %v10305_v36  ;;  %10597 = vrot.lane.b32.xlu1 %v10596_v15, %s10832_s23  ;;  %2356 = vmatpush1.bf16.msra.mxu0 %v2126_v33  ;;  %v10626_v21 = vpack.i.bf16 %v1844_v53, %v1847_v60 }
  0xaa   : > { %v680_v49 = vsel %vm433_vm7, %v10309_v29, %v10310_v40  ;;  %v656_v51 = vrot.slane %v650_v44, 5  ;;  %v10313_v52 = vpop.permute.xlu0 %10312  ;;  %v1794_v63 = vcombine.high %v11330_v5, %v11330_v5  ;;  %v1879_v10 = vcombine.high %v11347_v16, %v11347_v16 }
  0xab   : > { %v686_v55 = vrot.slane %v680_v49, 2  ;;  %v11320_v56 = vpop.permute.xlu1 %10317  ;;  %v10315_v57 = vunpack.i.h.bf16 %v10313_v52  ;;  %v10314_v58 = vunpack.i.l.bf16 %v10313_v52  ;;  %v11379_v49 = vld [vmem:[%s10914_s19 + $0x24] sm:$0x3f]  ;;  %v10661_v35 = vpack.i.bf16 %v11347_v16, %v11295_v39 }
  0xac   : > { %v2056_v59 = vld [vmem:[#allocation2 + $0x10] sm:$0xff]  ;;  %662 = vst [vmem:[#allocation2 + $0x50] sm:$0x38] %v656_v51  ;;  %v10319_v0 = vunpack.i.l.bf16 %v11320_v56  ;;  %10602 = vrot.lane.b32.xlu0 %v11221_v42, %s10833_s24  ;;  %v10616_v42 = vpack.i.bf16 %v1762_v45, %v1765_v46  ;;  %v10320_v22 = vunpack.i.h.bf16 %v11320_v56  ;;  %v10636_v44 = vpack.i.bf16 %v1794_v63, %v11303_v43  ;;  %v11382_v51 = vld [vmem:[%s10914_s19 + $0x2a] sm:$0x3f] }
  0xad   : > { %692 = vst [vmem:[#allocation2 + $0x68] ss:$-20 sps:$4 sm:$0xc1] %v686_v55   ;;  %v597_v7 = vsel %vm563_vm10, %v10315_v57, %v10299_v13  ;;  %v567_v15 = vsel %vm563_vm10, %v10314_v58, %v10294_v11  ;;  %10607 = vrot.lane.b32.xlu1 %v11234_v8, %s10833_s24  ;;  %v10656_v46 = vpack.i.bf16 %v11330_v5, %v11303_v43  ;;  %v1791_v57 = vunpack.c.h.bf16 %v11313_v48 }
  0xae   : > { %v653_v3 = vsel %vm375_vm6, %v10319_v0, %v10304_v37  ;;  %v599_v61 = vrot.slane %v597_v7, 3  ;;  %v569_v6 = vrot.slane %v567_v15, 6  ;;  %v11342_v9 = vpop.permute.xlu0 %10322  ;;  %v10641_v56 = vpack.i.bf16 %v1879_v10, %v11295_v39 }
  0xaf   : > { %v655_v24 = vrot.slane %v653_v3, 5  ;;  %v10328_v4 = vpop.permute.xlu1 %10327  ;;  %v10324_v13 = vunpack.i.l.bf16 %v11342_v9  ;;  %v10325_v52 = vunpack.i.h.bf16 %v11342_v9  ;;  %v1876_v58 = vunpack.c.h.bf16 %v11339_v50 }
  0xb0   : > { %v2059_v62 = vld [vmem:[#allocation2 + $0x28] sm:$0xff]  ;;  %605 = vst [vmem:[#allocation2 + $0x30] sm:$0xe0] %v599_v61  ;;  %575 = vst [vmem:[#allocation2 + $0x30] sm:$0x1c] %v569_v6  ;;  %v10330_v11 = vunpack.i.h.bf16 %v10328_v4  ;;  %v10329_v8 = vunpack.i.l.bf16 %v10328_v4  ;;  %10612 = vrot.lane.b32.xlu0 %v10611_v2, %s10840_s30  ;;  %v11400_v0 = vunpack.c.l.bf16 %v11379_v49  ;;  %v10651_v6 = vpack.i.bf16 %v11330_v5, %v1791_v57 }
  0xb1   : > { %v2128_v38 = vpack.c.bf16 %v2059_v62, %v2056_v59  ;;  %661 = vst [vmem:[#allocation2 + $0x48] sm:$0x38] %v655_v24  ;;  %v683_v20 = vsel %vm433_vm7, %v10324_v13, %v10309_v29  ;;  %10617 = vrot.lane.b32.xlu1 %v10616_v42, %s10840_s30  ;;  %v11403_v62 = vunpack.c.l.bf16 %v11382_v51  ;;  %v1934_v9 = vunpack.c.h.bf16 %v11382_v51  ;;  %v11423_v24 = vld [vmem:[%s10914_s19 + $0x18] sm:$0x3f] }
  0xb2   : > { %v565_v23 = vsel %vm563_vm10, %v10295_v19, %v10329_v8  ;;  %v595_v25 = vsel %vm563_vm10, %v10300_v12, %v10330_v11  ;;  %v685_v27 = vrot.slane %v683_v20, 2  ;;  %v10333_v28 = vpop.permute.xlu0 %10332  ;;  %v2061_v13 = vld [vmem:[#allocation2 + $0x38] sm:$0xff]  ;;  %v1905_v20 = vunpack.c.h.bf16 %v11379_v49 }
  0xb3   : > { %2549 = vmatpush1.bf16.msra.mxu1 %v2128_v38  ;;  %v571_v30 = vrot.slane %v565_v23, 6  ;;  %v601_v32 = vrot.slane %v595_v25, 3  ;;  %v10338_v33 = vpop.permute.xlu1 %10337  ;;  %v10335_v34 = vunpack.i.h.bf16 %v10333_v28  ;;  %v10334_v37 = vunpack.i.l.bf16 %v10333_v28  ;;  %v11445_v28 = vld [vmem:[%s10914_s19 + $0x1e] sm:$0x3f]  ;;  %s357_s19 = scalar_lea.vmem %s14636_s10, %s14692_s16 }
  0xb4   : > { %2550 = vmatprep.subr.bf16.mxu1 %v10835_v18  ;;  %691 = vst [vmem:[#allocation2 + $0x60] ss:$-20 sps:$4 sm:$0xc1] %v685_v27   ;;  %v10340_v29 = vunpack.i.h.bf16 %v10338_v33  ;;  %v10339_v41 = vunpack.i.l.bf16 %v10338_v33  ;;  %10622 = vrot.lane.b32.xlu0 %v10621_v14, %s10829_s20  ;;  %v1908_v14 = vcombine.high %v11400_v0, %v11400_v0  ;;  %v10676_v51 = vpack.i.bf16 %v11347_v16, %v1934_v9 }
  0xb5   : > { %578 = vst.msk [vmem:[#allocation2 + $0x40] sm:$0x1c] %vm577_vm11, %v571_v30  ;;  %v625_v19 = vsel %vm375_vm6, %v10334_v37, %v10335_v34  ;;  %v630_v12 = vsel %vm375_vm6, %v10320_v22, %v10334_v37  ;;  %10627 = vrot.lane.b32.xlu1 %v10626_v21, %s10834_s25  ;;  %v1937_v21 = vcombine.high %v11403_v62, %v11403_v62 }
  0xb6   : > { %608 = vst.msk [vmem:[#allocation2 + $0x40] sm:$0xe0] %vm607_vm12, %v601_v32  ;;  %v651_v45 = vsel %vm375_vm6, %v10305_v36, %v10339_v41  ;;  %v626_v17 = vsel %vm375_vm6, %v10335_v34, %v10340_v29  ;;  %631 = vst [vmem:[#allocation2 + $0x48] sm:$0x7] %v630_v12  ;;  %v10343_v26 = vpop.permute.xlu0 %10342  ;;  %vm14639_vm6 = vcmask 261120  }
  0xb7   : > { %632 = vst [vmem:[#allocation2 + $0x50] sm:$0x7] %v625_v19  ;;  %v657_v53 = vrot.slane %v651_v45, 5  ;;  %633 = vst.msk [vmem:[#allocation2 + $0x58] sm:$0x7] %vm384_vm8, %v626_v17  ;;  %v11386_v31 = vpop.permute.xlu1 %10347  ;;  %v10345_v36 = vunpack.i.h.bf16 %v10343_v26  ;;  %v10344_v54 = vunpack.i.l.bf16 %v10343_v26  ;;  %v2060_v29 = vld [vmem:[#allocation2 + $0x30] sm:$0xff]  ;;  %v11455_v19 = vunpack.c.l.bf16 %v11423_v24 }
  0xb8   : > { %v10349_v55 = vunpack.i.l.bf16 %v11386_v31  ;;  %10632 = vrot.lane.b32.xlu0 %v10631_v1, %s10840_s30  ;;  %v11466_v45 = vunpack.c.l.bf16 %v11445_v28 }
  0xb9   : > { %663 = vst.msk [vmem:[#allocation2 + $0x58] sm:$0x38] %vm415_vm9, %v657_v53  ;;  %v681_v59 = vsel %vm433_vm7, %v10310_v40, %v10344_v54  ;;  %v716_v60 = vsel %vm433_vm7, %v10325_v52, %v10345_v36  ;;  %10637 = vrot.lane.b32.xlu1 %v10636_v44, %s10829_s20  ;;  %v10350_v40 = vunpack.i.h.bf16 %v11386_v31  ;;  %v10666_v44 = vpack.i.bf16 %v1908_v14, %v1876_v58 }
  0xba   : > { %v713_v48 = vsel %vm433_vm7, %v10345_v36, %v10349_v55  ;;  %v687_v2 = vrot.slane %v681_v59, 2  ;;  %v718_v47 = vrot.slane %v716_v60, 7  ;;  %v11406_v7 = vpop.permute.xlu0 %10352  ;;  %v1966_v52 = vunpack.c.h.bf16 %v11423_v24 }
  0xbb   : > { %v719_v15 = vrot.slane %v713_v48, 7  ;;  %v11411_v38 = vpop.permute.xlu1 %10357  ;;  %v10355_v42 = vunpack.i.h.bf16 %v11406_v7  ;;  %v10354_v50 = vunpack.i.l.bf16 %v11406_v7  ;;  %v1969_v59 = vcombine.high %v11455_v19, %v11455_v19 }
  0xbc   : > { %693 = vst.msk [vmem:[#allocation2 + $0x58] sm:$0xc0] %vm447_vm0, %v687_v2  ;;  %724 = vst [vmem:[#allocation2 + $0x60] sm:$0xe] %v718_v47  ;;  %v10360_v3 = vunpack.i.h.bf16 %v11411_v38  ;;  %v10359_v61 = vunpack.i.l.bf16 %v11411_v38  ;;  %10642 = vrot.lane.b32.xlu0 %v10641_v56, %s10834_s25  ;;  %v1998_v39 = vcombine.high %v11466_v45, %v11466_v45 }
  0xbd   : > { %696 = vst.msk [vmem:[#allocation2 + $0x70] sm:$0x1] %vm451_vm1, %v687_v2  ;;  %725 = vst [vmem:[#allocation2 + $0x68] sm:$0xe] %v719_v15  ;;  %v742_v4 = vsel %vm433_vm7, %v10350_v40, %v10354_v50  ;;  %10647 = vrot.lane.b32.xlu1 %v10631_v1, %s10841_s11  ;;  %v2063_v8 = vld [vmem:[#allocation2 + $0x48] sm:$0xff]  ;;  %v2062_v5 = vld [vmem:[#allocation2 + $0x40] sm:$0xff]  ;;  %v1995_v2 = vunpack.c.h.bf16 %v11445_v28 }
  0xbe   : > { %v2064_v11 = vld [vmem:[#allocation2 + $0x50] sm:$0xff]  ;;  %v714_v63 = vsel %vm433_vm7, %v10349_v55, %v10360_v3  ;;  %v771_v22 = vsel %vm433_vm7, %v10355_v42, %v10359_v61  ;;  %v748_v23 = vrot.slane %v742_v4, 4  ;;  %v11442_v25 = vpop.permute.xlu0 %10362  ;;  %v2129_v10 = vpack.c.bf16 %v2063_v8, %v2060_v29 }
  0xbf   : > { %v2130_v27 = vpack.c.bf16 %v2064_v11, %v2061_v13  ;;  %v720_v30 = vrot.slane %v714_v63, 7  ;;  %v777_v32 = vrot.slane %v771_v22, 1  ;;  %v11447_v33 = vpop.permute.xlu1 %10367  ;;  %v10365_v34 = vunpack.i.h.bf16 %v11442_v25 }
  0xc0   : > { %v10364_v37 = vunpack.i.l.bf16 %v11442_v25  ;;  %754 = vst [vmem:[#allocation2 + $0x68] sm:$0x70] %v748_v23  ;;  %v10370_v41 = vunpack.i.h.bf16 %v11447_v33  ;;  %v10369_v1 = vunpack.i.l.bf16 %v11447_v33  ;;  %10652 = vrot.lane.b32.xlu0 %v10651_v6, %s10829_s20  ;;  %v10671_v55 = vpack.i.bf16 %v1937_v21, %v1905_v20 }
  0xc1   : > { %2357 = vmatprep.subr.bf16.mxu0 %v2130_v27  ;;  %726 = vst.msk [vmem:[#allocation2 + $0x70] sm:$0xe] %vm482_vm2, %v720_v30  ;;  %783 = vst [vmem:[#allocation2 + $0x80] ss:$-20 sps:$4 sm:$0x83] %v777_v32   ;;  %10657 = vrot.lane.b32.xlu1 %v10656_v46, %s10832_s23  ;;  %v10681_v13 = vpack.i.bf16 %v1966_v52, %v1969_v59  ;;  %v10686_v14 = vpack.i.bf16 %v1995_v2, %v1998_v39 }
  0xc2   : > { %v803_v12 = vsel %vm563_vm10, %v10364_v37, %v10365_v34  ;;  %v832_v17 = vsel %vm563_vm10, %v10369_v1, %v10370_v41  ;;  %2358 = vmatpush1.bf16.msra.mxu0 %v2129_v10  ;;  %v10373_v49 = vpop.permute.xlu0 %10372  ;;  %v10691_v32 = vpack.i.bf16 %v11403_v62, %v11400_v0 }
  0xc3   : > { %v809_v26 = vrot.slane %v803_v12, 6  ;;  %v838_v53 = vrot.slane %v832_v17, 3  ;;  %v10378_v36 = vpop.permute.xlu1 %10377  ;;  %v10375_v54 = vunpack.i.h.bf16 %v10373_v49  ;;  %v10374_v43 = vunpack.i.l.bf16 %v10373_v49  ;;  %v2065_v46 = vld [vmem:[#allocation2 + $0x58] sm:$0xff] }
  0xc4   : > { %v10380_v56 = vunpack.i.h.bf16 %v10378_v36  ;;  %v10379_v57 = vunpack.i.l.bf16 %v10378_v36  ;;  %10662 = vrot.lane.b32.xlu0 %v10661_v35, %s10833_s24  ;;  %v2131_v58 = vpack.c.bf16 %v2065_v46, %v2062_v5 }
  0xc5   : > { %815 = vst [vmem:[#allocation2 + $0x80] sm:$0x1c] %v809_v26  ;;  %844 = vst [vmem:[#allocation2 + $0x80] sm:$0xe0] %v838_v53  ;;  %v745_v60 = vsel %vm433_vm7, %v10374_v43, %v10350_v40  ;;  %v774_v48 = vsel %vm433_vm7, %v10375_v54, %v10355_v42  ;;  %10667 = vrot.lane.b32.xlu1 %v10666_v44, %s10834_s25 }
  0xc6   : > { %v806_v16 = vsel %vm563_vm10, %v10379_v57, %v10364_v37  ;;  %v835_v47 = vsel %vm563_vm10, %v10380_v56, %v10369_v1  ;;  %v747_v35 = vrot.slane %v745_v60, 4  ;;  %v776_v15 = vrot.slane %v774_v48, 1  ;;  %v10383_v31 = vpop.permute.xlu0 %10382  ;;  %2551 = vmatpush1.bf16.msra.mxu1 %v2131_v58  ;;  %v10715_v57 = vld [vmem:[%s14627_s1 + $0x4] ss:$8 sps:$4 sm:$0xff]  }
  0xc7   : > { %v808_v40 = vrot.slane %v806_v16, 6  ;;  %v837_v3 = vrot.slane %v835_v47, 3  ;;  %v10388_v6 = vpop.permute.xlu1 %10387  ;;  %v10385_v9 = vunpack.i.h.bf16 %v10383_v31  ;;  %v10384_v42 = vunpack.i.l.bf16 %v10383_v31  ;;  %2552 = vmatprep.subr.bf16.mxu1 %v10835_v18  ;;  %9396 = vmatprep.mubr.msk.bf16.mxu0 %vm14637_vm15, %v10715_v57 }
  0xc8   : > { %753 = vst [vmem:[#allocation2 + $0x60] sm:$0x70] %v747_v35  ;;  %782 = vst [vmem:[#allocation2 + $0x78] ss:$-20 sps:$4 sm:$0x83] %v776_v15   ;;  %v10390_v24 = vunpack.i.h.bf16 %v10388_v6  ;;  %v10389_v4 = vunpack.i.l.bf16 %v10388_v6  ;;  %10672 = vrot.lane.b32.xlu0 %v10671_v55, %s10834_s25  ;;  %v2067_v28 = vld [vmem:[#allocation2 + $0x68] sm:$0xff]  ;;  %v10696_v37 = vpack.i.bf16 %v11466_v45, %v11455_v19  ;;  %9412 = vmatprep.mubr.msk.bf16.mxu1 %vm14637_vm15, %v10715_v57 }
  0xc9   : > { %814 = vst [vmem:[#allocation2 + $0x78] sm:$0x1c] %v808_v40  ;;  %843 = vst [vmem:[#allocation2 + $0x78] sm:$0xe0] %v837_v3  ;;  %v772_v11 = vsel %vm433_vm7, %v10359_v61, %v10385_v9  ;;  %v743_v8 = vsel %vm433_vm7, %v10354_v50, %v10384_v42  ;;  %10677 = vrot.lane.b32.xlu1 %v10676_v51, %s10834_s25  ;;  %v2076_v3 = vld [vmem:[#allocation2 + $0xb0] sm:$0xff]  ;;  %vm1564_vm15 = vcmask 916480  }
  0xca   : > { %v804_v20 = vsel %vm563_vm10, %v10365_v34, %v10389_v4  ;;  %v833_v21 = vsel %vm563_vm10, %v10370_v41, %v10390_v24  ;;  %v778_v63 = vrot.slane %v772_v11, 1  ;;  %v749_v38 = vrot.slane %v743_v8, 4  ;;  %v10393_v22 = vpop.permute.xlu0 %10392 }
  0xcb   : > { %v810_v61 = vrot.slane %v804_v20, 6  ;;  %v839_v23 = vrot.slane %v833_v21, 3  ;;  %v10398_v7 = vpop.permute.xlu1 %10397  ;;  %v10395_v27 = vunpack.i.h.bf16 %v10393_v22  ;;  %v10394_v50 = vunpack.i.l.bf16 %v10393_v22 }
  0xcc   : > { %784 = vst.msk [vmem:[#allocation2 + $0x70] sm:$0x80] %vm542_vm4, %v778_v63  ;;  %v10399_v25 = vunpack.i.l.bf16 %v10398_v7  ;;  %10682 = vrot.lane.b32.xlu0 %v10681_v13, %s10840_s30  ;;  %v2070_v30 = vld [vmem:[#allocation2 + $0x80] sm:$0xff]  ;;  %v10400_v10 = vunpack.i.h.bf16 %v10398_v7  ;;  %v2075_v13 = vld [vmem:[#allocation2 + $0xa8] sm:$0xff] }
  0xcd   : > { %787 = vst.msk [vmem:[#allocation2 + $0x88] sm:$0x3] %vm546_vm5, %v778_v63  ;;  %v888_v33 = vsel %vm862_vm13, %v10394_v50, %v10395_v27  ;;  %10687 = vrot.lane.b32.xlu1 %v10686_v14, %s10840_s30  ;;  %v2133_v34 = vpack.c.bf16 %v2070_v30, %v2067_v28  ;;  %v2077_v63 = vld [vmem:[#allocation2 + $0xb8] sm:$0xff] }
  0xce   : > { %755 = vst.msk [vmem:[#allocation2 + $0x70] sm:$0x70] %vm512_vm3, %v749_v38  ;;  %v891_v29 = vsel %vm862_vm13, %v10399_v25, %v10394_v50  ;;  %v894_v41 = vrot.slane %v888_v33, 5  ;;  %v10403_v1 = vpop.permute.xlu0 %10402 }
  0xcf   : > { %816 = vst.msk [vmem:[#allocation2 + $0x88] sm:$0x1c] %vm577_vm11, %v810_v61  ;;  %v893_v12 = vrot.slane %v891_v29, 5  ;;  %v10408_v44 = vpop.permute.xlu1 %10407  ;;  %v10405_v0 = vunpack.i.h.bf16 %v10403_v1  ;;  %v10404_v62 = vunpack.i.l.bf16 %v10403_v1  ;;  %2359 = vmatprep.subr.bf16.mxu0 %v2133_v34  ;;  %v2066_v17 = vld [vmem:[#allocation2 + $0x60] sm:$0xff] }
  0xd0   : > { %845 = vst.msk [vmem:[#allocation2 + $0x88] sm:$0xe0] %vm607_vm12, %v839_v23  ;;  %900 = vst [vmem:[#allocation2 + $0x98] sm:$0x38] %v894_v41  ;;  %v10410_v26 = vunpack.i.h.bf16 %v10408_v44  ;;  %v10409_v49 = vunpack.i.l.bf16 %v10408_v44  ;;  %10692 = vrot.lane.b32.xlu0 %v10691_v32, %s10834_s25  ;;  %v2069_v51 = vld [vmem:[#allocation2 + $0x78] sm:$0xff] }
  0xd1   : > { %899 = vst [vmem:[#allocation2 + $0x90] sm:$0x38] %v893_v12  ;;  %v863_v19 = vsel %vm862_vm13, %v10404_v62, %v10405_v0  ;;  %v868_v45 = vsel %vm862_vm13, %v10400_v10, %v10404_v62  ;;  %10697 = vrot.lane.b32.xlu1 %v10696_v37, %s10840_s30  ;;  %v2132_v52 = vpack.c.bf16 %v2069_v51, %v2066_v17 }
  0xd2   : > { %v889_v53 = vsel %vm862_vm13, %v10395_v27, %v10409_v49  ;;  %v864_v36 = vsel %vm862_vm13, %v10405_v0, %v10410_v26  ;;  %869 = vst [vmem:[#allocation2 + $0x90] sm:$0x7] %v868_v45  ;;  %870 = vst [vmem:[#allocation2 + $0x98] sm:$0x7] %v863_v19  ;;  %v10413_v54 = vpop.permute.xlu0 %10412 }
  0xd3   : > { %v895_v43 = vrot.slane %v889_v53, 5  ;;  %871 = vst.msk [vmem:[#allocation2 + $0xa0] sm:$0x7] %vm384_vm8, %v864_v36  ;;  %v10418_v5 = vpop.permute.xlu1 %10417  ;;  %v10415_v46 = vunpack.i.h.bf16 %v10413_v54  ;;  %v10414_v55 = vunpack.i.l.bf16 %v10413_v54  ;;  %2360 = vmatpush1.bf16.msra.mxu0 %v2132_v52 }
  0xd4   : > { %v10420_v58 = vunpack.i.h.bf16 %v10418_v5  ;;  %v10419_v59 = vunpack.i.l.bf16 %v10418_v5  ;;  %10702 = vrot.lane.b32.xlu0 %v10691_v32, %s10833_s24 }
  0xd5   : > { %v2068_v56 = vld [vmem:[#allocation2 + $0x70] sm:$0xff]  ;;  %901 = vst.msk [vmem:[#allocation2 + $0xa0] sm:$0x38] %vm415_vm9, %v895_v43  ;;  %v980_v48 = vsel %vm14638_vm14, %v10414_v55, %v10415_v46  ;;  %10707 = vrot.lane.b32.xlu1 %v10696_v37, %s10841_s11 }
  0xd6   : > { %v1010_v39 = vsel %vm14638_vm14, %v10419_v59, %v10420_v58  ;;  %v989_v16 = vrot.slane %v980_v48, 6  ;;  %v10423_v47 = vpop.permute.xlu0 %10422 }
  0xd7   : > { %v2071_v60 = vld [vmem:[#allocation2 + $0x88] sm:$0xff]  ;;  %v1018_v35 = vrot.slane %v1010_v39, 3  ;;  %v10428_v15 = vpop.permute.xlu1 %10427  ;;  %v10425_v31 = vunpack.i.h.bf16 %v10423_v47  ;;  %v10424_v40 = vunpack.i.l.bf16 %v10423_v47 }
  0xd8   : > { %v2134_v2 = vpack.c.bf16 %v2071_v60, %v2068_v56  ;;  %995 = vst [vmem:[#allocation2 + $0xc8] sm:$0x1c] %v989_v16  ;;  %v10430_v6 = vunpack.i.h.bf16 %v10428_v15  ;;  %v10429_v9 = vunpack.i.l.bf16 %v10428_v15 }
  0xd9   : > { %1024 = vst [vmem:[#allocation2 + $0xc8] sm:$0xe0] %v1018_v35  ;;  %v1067_v42 = vsel %vm862_vm13, %v10424_v40, %v10425_v31  ;;  %v2073_v24 = vld [vmem:[#allocation2 + $0x98] sm:$0xff]  ;;  %v2072_v4 = vld [vmem:[#allocation2 + $0x90] sm:$0xff] }
  0xda   : > { %2553 = vmatpush1.bf16.msra.mxu1 %v2134_v2  ;;  %v979_v11 = vsel %vm14638_vm14, %v10429_v9, %v10414_v55  ;;  %v1009_v8 = vsel %vm14638_vm14, %v10430_v6, %v10419_v59  ;;  %v1073_v14 = vrot.slane %v1067_v42, 5  ;;  %v10433_v20 = vpop.permute.xlu0 %10432  ;;  %v2136_v21 = vpack.c.bf16 %v2076_v3, %v2073_v24 }
  0xdb   : > { %2554 = vmatprep.subr.bf16.mxu1 %v10835_v18  ;;  %v988_v38 = vrot.slane %v979_v11, 6  ;;  %v1017_v22 = vrot.slane %v1009_v8, 3  ;;  %v10438_v61 = vpop.permute.xlu1 %10437  ;;  %v10434_v23 = vunpack.i.l.bf16 %v10433_v20  ;;  %v2135_v50 = vpack.c.bf16 %v2075_v13, %v2072_v4 }
  0xdc   : > { %1079 = vst [vmem:[#allocation2 + $0xe0] sm:$0x38] %v1073_v14  ;;  %v10440_v7 = vunpack.i.h.bf16 %v10438_v61  ;;  %v10439_v27 = vunpack.i.l.bf16 %v10438_v61  ;;  %2361 = vmatprep.subr.bf16.mxu0 %v2136_v21  ;;  %v2074_v25 = vld [vmem:[#allocation2 + $0xa0] sm:$0xff]  ;;  %v10435_v34 = vunpack.i.h.bf16 %v10433_v20 }
  0xdd   : > { %994 = vst [vmem:[#allocation2 + $0xc0] sm:$0x1c] %v988_v38  ;;  %1023 = vst [vmem:[#allocation2 + $0xc0] sm:$0xe0] %v1017_v22  ;;  %v1070_v28 = vsel %vm862_vm13, %v10434_v23, %v10424_v40  ;;  %v2137_v30 = vpack.c.bf16 %v2077_v63, %v2074_v25  ;;  %2362 = vmatpush1.bf16.msra.mxu0 %v2135_v50  ;;  %v2085_v50 = vld [vmem:[#allocation2 + $0xf8] sm:$0xff] }
  0xde   : > { %v986_v32 = vsel %vm14639_vm6, %v10415_v46, %v10439_v27  ;;  %v1015_v33 = vsel %vm14639_vm6, %v10420_v58, %v10440_v7  ;;  %v1072_v37 = vrot.slane %v1070_v28, 5  ;;  %v10443_v29 = vpop.permute.xlu0 %10442 }
  0xdf   : > { %v990_v41 = vrot.slane %v986_v32, 6  ;;  %v1019_v1 = vrot.slane %v1015_v33, 3  ;;  %v10448_v10 = vpop.permute.xlu1 %10447  ;;  %v10445_v12 = vunpack.i.h.bf16 %v10443_v29  ;;  %v10444_v44 = vunpack.i.l.bf16 %v10443_v29  ;;  %2555 = vmatpush1.bf16.msra.mxu1 %v2137_v30 }
  0xe0   : > { %1078 = vst [vmem:[#allocation2 + $0xd8] sm:$0x38] %v1072_v37  ;;  %v10450_v0 = vunpack.i.h.bf16 %v10448_v10  ;;  %v10449_v62 = vunpack.i.l.bf16 %v10448_v10  ;;  %2556 = vmatprep.subr.bf16.mxu1 %v10835_v18  ;;  %v2079_v11 = vld [vmem:[#allocation2 + $0xc8] sm:$0xff] }
  0xe1   : > { %996 = vst.msk [vmem:[#allocation2 + $0xd0] sm:$0x1c] %vm577_vm11, %v990_v41  ;;  %v1042_v17 = vsel %vm862_vm13, %v10444_v44, %v10445_v12  ;;  %v1047_v26 = vsel %vm862_vm13, %v10435_v34, %v10444_v44 }
  0xe2   : > { %1025 = vst.msk [vmem:[#allocation2 + $0xd0] sm:$0xe0] %vm607_vm12, %v1019_v1  ;;  %v1068_v49 = vsel %vm862_vm13, %v10425_v31, %v10449_v62  ;;  %v1043_v51 = vsel %vm862_vm13, %v10445_v12, %v10450_v0  ;;  %1048 = vst [vmem:[#allocation2 + $0xd8] sm:$0x7] %v1047_v26  ;;  %v10453_v19 = vpop.permute.xlu0 %10452  ;;  %v2084_v12 = vld [vmem:[#allocation2 + $0xf0] sm:$0xff] }
  0xe3   : > { %1049 = vst [vmem:[#allocation2 + $0xe0] sm:$0x7] %v1042_v17  ;;  %v1074_v45 = vrot.slane %v1068_v49, 5  ;;  %1050 = vst.msk [vmem:[#allocation2 + $0xe8] sm:$0x7] %vm384_vm8, %v1043_v51  ;;  %v10458_v52 = vpop.permute.xlu1 %10457  ;;  %v10455_v53 = vunpack.i.h.bf16 %v10453_v19  ;;  %v10454_v36 = vunpack.i.l.bf16 %v10453_v19  ;;  %v2086_v17 = vld [vmem:[#allocation2 + $0x100] sm:$0xff] }
  0xe4   : > { %v10460_v54 = vunpack.i.h.bf16 %v10458_v52  ;;  %v10459_v43 = vunpack.i.l.bf16 %v10458_v52  ;;  %v2078_v8 = vld [vmem:[#allocation2 + $0xc0] sm:$0xff] }
  0xe5   : > { %1080 = vst.msk [vmem:[#allocation2 + $0xe8] sm:$0x38] %vm415_vm9, %v1074_v45  ;;  %v1159_v5 = vsel %vm14638_vm14, %v10454_v36, %v10455_v53 }
  0xe6   : > { %v1188_v46 = vsel %vm14638_vm14, %v10459_v43, %v10460_v54  ;;  %v1167_v55 = vrot.slane %v1159_v5, 6  ;;  %v10463_v56 = vpop.permute.xlu0 %10462 }
  0xe7   : > { %v1196_v57 = vrot.slane %v1188_v46, 3  ;;  %v10468_v58 = vpop.permute.xlu1 %10467  ;;  %v10465_v59 = vunpack.i.h.bf16 %v10463_v56  ;;  %v10464_v60 = vunpack.i.l.bf16 %v10463_v56 }
  0xe8   : > { %1173 = vst [vmem:[#allocation2 + $0x110] sm:$0x1c] %v1167_v55  ;;  %v10470_v48 = vunpack.i.h.bf16 %v10468_v58  ;;  %v10469_v2 = vunpack.i.l.bf16 %v10468_v58 }
  0xe9   : > { %1202 = vst [vmem:[#allocation2 + $0x110] sm:$0xe0] %v1196_v57  ;;  %v1187_v39 = vsel %vm14638_vm14, %v10465_v59, %v10459_v43  ;;  %v1158_v16 = vsel %vm14638_vm14, %v10464_v60, %v10454_v36  ;;  %v2081_v35 = vld [vmem:[#allocation2 + $0xd8] sm:$0xff]  ;;  %v2080_v63 = vld [vmem:[#allocation2 + $0xd0] sm:$0xff] }
  0xea   : > { %v2082_v47 = vld [vmem:[#allocation2 + $0xe0] sm:$0xff]  ;;  %v1164_v15 = vsel %vm14639_vm6, %v10455_v53, %v10469_v2  ;;  %v1193_v31 = vsel %vm14639_vm6, %v10460_v54, %v10470_v48  ;;  %v1195_v40 = vrot.slane %v1187_v39, 3  ;;  %v1166_v3 = vrot.slane %v1158_v16, 6  ;;  %v10473_v6 = vpop.permute.xlu0 %10472 }
  0xeb   : > { %v1168_v9 = vrot.slane %v1164_v15, 6  ;;  %v1197_v42 = vrot.slane %v1193_v31, 3  ;;  %v10478_v24 = vpop.permute.xlu1 %10477  ;;  %v10475_v4 = vunpack.i.h.bf16 %v10473_v6  ;;  %v10474_v13 = vunpack.i.l.bf16 %v10473_v6  ;;  %v2094_v48 = vld [vmem:[#allocation2 + $0x140] sm:$0xff]  ;;  %v2093_v15 = vld [vmem:[#allocation2 + $0x138] sm:$0xff] }
  0xec   : > { %1201 = vst [vmem:[#allocation2 + $0x108] sm:$0xe0] %v1195_v40  ;;  %1172 = vst [vmem:[#allocation2 + $0x108] sm:$0x1c] %v1166_v3  ;;  %v10479_v14 = vunpack.i.l.bf16 %v10478_v24  ;;  %v2139_v20 = vpack.c.bf16 %v2082_v47, %v2079_v11  ;;  %v2138_v21 = vpack.c.bf16 %v2081_v35, %v2078_v8  ;;  %v2083_v38 = vld [vmem:[#allocation2 + $0xe8] sm:$0xff]  ;;  %v10480_v25 = vunpack.i.h.bf16 %v10478_v24 }
  0xed   : > { %1174 = vst.msk [vmem:[#allocation2 + $0x118] sm:$0x1c] %vm577_vm11, %v1168_v9  ;;  %v1243_v22 = vsel %vm862_vm13, %v10474_v13, %v10475_v4  ;;  %v2140_v61 = vpack.c.bf16 %v2083_v38, %v2080_v63 }
  0xee   : > { %1203 = vst.msk [vmem:[#allocation2 + $0x118] sm:$0xe0] %vm607_vm12, %v1197_v42  ;;  %v1246_v23 = vsel %vm862_vm13, %v10479_v14, %v10474_v13  ;;  %v1249_v7 = vrot.slane %v1243_v22, 5  ;;  %2363 = vmatprep.subr.bf16.mxu0 %v2139_v20  ;;  %v10483_v27 = vpop.permute.xlu0 %10482  ;;  %v2095_v42 = vld [vmem:[#allocation2 + $0x148] sm:$0xff] }
  0xef   : > { %v1248_v28 = vrot.slane %v1246_v23, 5  ;;  %2364 = vmatpush1.bf16.msra.mxu0 %v2138_v21  ;;  %v10488_v30 = vpop.permute.xlu1 %10487  ;;  %v10485_v32 = vunpack.i.h.bf16 %v10483_v27  ;;  %v10484_v33 = vunpack.i.l.bf16 %v10483_v27  ;;  %2557 = vmatpush1.bf16.msra.mxu1 %v2140_v61 }
  0xf0   : > { %1255 = vst [vmem:[#allocation2 + $0x128] sm:$0x38] %v1249_v7  ;;  %v10490_v34 = vunpack.i.h.bf16 %v10488_v30  ;;  %v10489_v37 = vunpack.i.l.bf16 %v10488_v30  ;;  %v2088_v29 = vld [vmem:[#allocation2 + $0x110] sm:$0xff]  ;;  %2558 = vmatprep.subr.bf16.mxu1 %v10835_v18 }
  0xf1   : > { %1254 = vst [vmem:[#allocation2 + $0x120] sm:$0x38] %v1248_v28  ;;  %v1219_v41 = vsel %vm862_vm13, %v10484_v33, %v10485_v32  ;;  %v1224_v1 = vsel %vm862_vm13, %v10480_v25, %v10484_v33  ;;  %v2142_v10 = vpack.c.bf16 %v2088_v29, %v2085_v50 }
  0xf2   : > { %v1244_v44 = vsel %vm862_vm13, %v10475_v4, %v10489_v37  ;;  %v1220_v0 = vsel %vm862_vm13, %v10485_v32, %v10490_v34  ;;  %1225 = vst [vmem:[#allocation2 + $0x120] sm:$0x7] %v1224_v1  ;;  %1226 = vst [vmem:[#allocation2 + $0x128] sm:$0x7] %v1219_v41  ;;  %v10493_v62 = vpop.permute.xlu0 %10492 }
  0xf3   : > { %v1250_v26 = vrot.slane %v1244_v44, 5  ;;  %1227 = vst.msk [vmem:[#allocation2 + $0x130] sm:$0x7] %vm384_vm8, %v1220_v0  ;;  %v10498_v49 = vpop.permute.xlu1 %10497  ;;  %v10495_v51 = vunpack.i.h.bf16 %v10493_v62  ;;  %v10494_v19 = vunpack.i.l.bf16 %v10493_v62  ;;  %2365 = vmatprep.subr.bf16.mxu0 %v2142_v10  ;;  %v2087_v45 = vld [vmem:[#allocation2 + $0x108] sm:$0xff] }
  0xf4   : > { %v10500_v52 = vunpack.i.h.bf16 %v10498_v49  ;;  %v10499_v53 = vunpack.i.l.bf16 %v10498_v49  ;;  %v2141_v36 = vpack.c.bf16 %v2087_v45, %v2084_v12 }
  0xf5   : > { %v2089_v54 = vld [vmem:[#allocation2 + $0x118] sm:$0xff]  ;;  %1256 = vst.msk [vmem:[#allocation2 + $0x130] sm:$0x38] %vm415_vm9, %v1250_v26  ;;  %v1333_v43 = vsel %vm14638_vm14, %v10494_v19, %v10495_v51 }
  0xf6   : > { %v2143_v5 = vpack.c.bf16 %v2089_v54, %v2086_v17  ;;  %v1362_v46 = vsel %vm14638_vm14, %v10499_v53, %v10500_v52  ;;  %v1341_v55 = vrot.slane %v1333_v43, 6  ;;  %v10503_v56 = vpop.permute.xlu0 %10502  ;;  %2366 = vmatpush1.bf16.msra.mxu0 %v2141_v36 }
  0xf7   : > { %v1370_v57 = vrot.slane %v1362_v46, 3  ;;  %v10508_v58 = vpop.permute.xlu1 %10507  ;;  %v10505_v59 = vunpack.i.h.bf16 %v10503_v56  ;;  %v10504_v60 = vunpack.i.l.bf16 %v10503_v56 }
  0xf8   : > { %2559 = vmatpush1.bf16.msra.mxu1 %v2143_v5  ;;  %1347 = vst [vmem:[#allocation2 + $0x158] sm:$0x1c] %v1341_v55  ;;  %v10510_v2 = vunpack.i.h.bf16 %v10508_v58  ;;  %v10509_v39 = vunpack.i.l.bf16 %v10508_v58 }
  0xf9   : > { %2560 = vmatprep.subr.bf16.mxu1 %v10835_v18  ;;  %1376 = vst [vmem:[#allocation2 + $0x158] sm:$0xe0] %v1370_v57  ;;  %v1417_v16 = vsel %vm862_vm13, %v10504_v60, %v10505_v59  ;;  %v2091_v47 = vld [vmem:[#allocation2 + $0x128] sm:$0xff]  ;;  %v2090_v35 = vld [vmem:[#allocation2 + $0x120] sm:$0xff] }
  0xfa   : > { %v1332_v31 = vsel %vm14638_vm14, %v10509_v39, %v10494_v19  ;;  %v1361_v40 = vsel %vm14638_vm14, %v10510_v2, %v10499_v53  ;;  %v1423_v3 = vrot.slane %v1417_v16, 5  ;;  %v10513_v6 = vpop.permute.xlu0 %10512  ;;  %v2145_v9 = vpack.c.bf16 %v2094_v48, %v2091_v47 }
  0xfb   : > { %v1340_v24 = vrot.slane %v1332_v31, 6  ;;  %v1369_v4 = vrot.slane %v1361_v40, 3  ;;  %v10518_v13 = vpop.permute.xlu1 %10517  ;;  %v10514_v11 = vunpack.i.l.bf16 %v10513_v6  ;;  %v2144_v20 = vpack.c.bf16 %v2093_v15, %v2090_v35 }
  0xfc   : > { %1429 = vst [vmem:[#allocation2 + $0x170] sm:$0x38] %v1423_v3  ;;  %v10520_v8 = vunpack.i.h.bf16 %v10518_v13  ;;  %v10519_v14 = vunpack.i.l.bf16 %v10518_v13  ;;  %2367 = vmatprep.subr.bf16.mxu0 %v2145_v9  ;;  %v2092_v21 = vld [vmem:[#allocation2 + $0x130] sm:$0xff]  ;;  %v10515_v23 = vunpack.i.h.bf16 %v10513_v6 }
  0xfd   : > { %1346 = vst [vmem:[#allocation2 + $0x150] sm:$0x1c] %v1340_v24  ;;  %1375 = vst [vmem:[#allocation2 + $0x150] sm:$0xe0] %v1369_v4  ;;  %v1420_v63 = vsel %vm862_vm13, %v10514_v11, %v10504_v60  ;;  %v2146_v38 = vpack.c.bf16 %v2095_v42, %v2092_v21  ;;  %2368 = vmatpush1.bf16.msra.mxu0 %v2144_v20  ;;  %v2103_v21 = vld [vmem:[#allocation2 + $0x188] sm:$0xff] }
  0xfe   : > { %v1338_v22 = vsel %vm14639_vm6, %v10495_v51, %v10519_v14  ;;  %v1367_v61 = vsel %vm14639_vm6, %v10500_v52, %v10520_v8  ;;  %v1422_v7 = vrot.slane %v1420_v63, 5  ;;  %v10523_v27 = vpop.permute.xlu0 %10522 }
  0xff   : > { %v1342_v50 = vrot.slane %v1338_v22, 6  ;;  %v1371_v25 = vrot.slane %v1367_v61, 3  ;;  %v10528_v28 = vpop.permute.xlu1 %10527  ;;  %v10525_v30 = vunpack.i.h.bf16 %v10523_v27  ;;  %v10524_v32 = vunpack.i.l.bf16 %v10523_v27  ;;  %2561 = vmatpush1.bf16.msra.mxu1 %v2146_v38 }
 0x100   : > { %1428 = vst [vmem:[#allocation2 + $0x168] sm:$0x38] %v1422_v7  ;;  %v10530_v33 = vunpack.i.h.bf16 %v10528_v28  ;;  %v10529_v34 = vunpack.i.l.bf16 %v10528_v28  ;;  %2562 = vmatprep.subr.bf16.mxu1 %v10835_v18  ;;  %v2097_v31 = vld [vmem:[#allocation2 + $0x158] sm:$0xff]  ;;  %v2102_v28 = vld [vmem:[#allocation2 + $0x180] sm:$0xff] }
 0x101   : > { %1348 = vst.msk [vmem:[#allocation2 + $0x160] sm:$0x1c] %vm577_vm11, %v1342_v50  ;;  %v1393_v37 = vsel %vm862_vm13, %v10524_v32, %v10525_v30  ;;  %v1398_v29 = vsel %vm862_vm13, %v10515_v23, %v10524_v32 }
 0x102   : > { %1377 = vst.msk [vmem:[#allocation2 + $0x160] sm:$0xe0] %vm607_vm12, %v1371_v25  ;;  %v1418_v41 = vsel %vm862_vm13, %v10505_v59, %v10529_v34  ;;  %v1394_v1 = vsel %vm862_vm13, %v10525_v30, %v10530_v33  ;;  %1399 = vst [vmem:[#allocation2 + $0x168] sm:$0x7] %v1398_v29  ;;  %v10533_v10 = vpop.permute.xlu0 %10532  ;;  %vm1618_vm13 = vcmask 908288   ;;  %v2104_v34 = vld [vmem:[#allocation2 + $0x190] sm:$0xff] }
 0x103   : > { %1400 = vst [vmem:[#allocation2 + $0x170] sm:$0x7] %v1393_v37  ;;  %v1424_v12 = vrot.slane %v1418_v41, 5  ;;  %1401 = vst.msk [vmem:[#allocation2 + $0x178] sm:$0x7] %vm384_vm8, %v1394_v1  ;;  %v10538_v44 = vpop.permute.xlu1 %10537  ;;  %v10535_v0 = vunpack.i.h.bf16 %v10533_v10  ;;  %v10534_v62 = vunpack.i.l.bf16 %v10533_v10 }
 0x104   : > { %v10540_v17 = vunpack.i.h.bf16 %v10538_v44  ;;  %v10539_v26 = vunpack.i.l.bf16 %v10538_v44  ;;  %v2096_v40 = vld [vmem:[#allocation2 + $0x150] sm:$0xff] }
 0x105   : > { %1430 = vst.msk [vmem:[#allocation2 + $0x178] sm:$0x38] %vm415_vm9, %v1424_v12  ;;  %v1507_v49 = vsel %vm14638_vm14, %v10534_v62, %v10535_v0 }
 0x106   : > { %v1536_v51 = vsel %vm14638_vm14, %v10539_v26, %v10540_v17  ;;  %v1515_v19 = vrot.slane %v1507_v49, 6  ;;  %v10543_v45 = vpop.permute.xlu0 %10542 }
 0x107   : > { %v1544_v52 = vrot.slane %v1536_v51, 3  ;;  %v10548_v53 = vpop.permute.xlu1 %10547  ;;  %v10545_v36 = vunpack.i.h.bf16 %v10543_v45  ;;  %v10544_v54 = vunpack.i.l.bf16 %v10543_v45 }
 0x108   : > { %1521 = vst [vmem:[#allocation2 + $0x1a0] sm:$0x1c] %v1515_v19  ;;  %v10550_v43 = vunpack.i.h.bf16 %v10548_v53  ;;  %v10549_v5 = vunpack.i.l.bf16 %v10548_v53 }
 0x109   : > { %1550 = vst [vmem:[#allocation2 + $0x1a0] sm:$0xe0] %v1544_v52  ;;  %v1535_v46 = vsel %vm14638_vm14, %v10545_v36, %v10539_v26  ;;  %v1506_v55 = vsel %vm14638_vm14, %v10544_v54, %v10534_v62  ;;  %v2099_v57 = vld [vmem:[#allocation2 + $0x168] sm:$0xff]  ;;  %v2098_v24 = vld [vmem:[#allocation2 + $0x160] sm:$0xff]  ;;  %vm1741_vm14 = vcmask 900096  }
 0x10a   : > { %v2100_v56 = vld [vmem:[#allocation2 + $0x170] sm:$0xff]  ;;  %v1512_v58 = vsel %vm14639_vm6, %v10535_v0, %v10549_v5  ;;  %v1541_v59 = vsel %vm14639_vm6, %v10540_v17, %v10550_v43  ;;  %v1543_v60 = vrot.slane %v1535_v46, 3  ;;  %v1514_v48 = vrot.slane %v1506_v55, 6  ;;  %v11593_v2 = vpop.permute.xlu0 %10552 }
 0x10b   : > { %v1516_v39 = vrot.slane %v1512_v58, 6  ;;  %v1545_v16 = vrot.slane %v1541_v59, 3  ;;  %v11595_v47 = vpop.permute.xlu1 %10557  ;;  %v10555_v35 = vunpack.i.h.bf16 %v11593_v2  ;;  %v10554_v15 = vunpack.i.l.bf16 %v11593_v2 }
 0x10c   : > { %1549 = vst [vmem:[#allocation2 + $0x198] sm:$0xe0] %v1543_v60  ;;  %1520 = vst [vmem:[#allocation2 + $0x198] sm:$0x1c] %v1514_v48  ;;  %v10560_v3 = vunpack.i.h.bf16 %v11595_v47  ;;  %v10559_v6 = vunpack.i.l.bf16 %v11595_v47  ;;  %v2148_v9 = vpack.c.bf16 %v2100_v56, %v2097_v31  ;;  %v2147_v42 = vpack.c.bf16 %v2099_v57, %v2096_v40  ;;  %v2101_v4 = vld [vmem:[#allocation2 + $0x178] sm:$0xff] }
 0x10d   : > { %1522 = vst.msk [vmem:[#allocation2 + $0x1a8] sm:$0x1c] %vm577_vm11, %v1516_v39  ;;  %v1590_v13 = vsel %vm1564_vm15, %v10554_v15, %v10555_v35  ;;  %v2149_v11 = vpack.c.bf16 %v2101_v4, %v2098_v24  ;;  %vm1748_vm6 = vcmask 121856  }
 0x10e   : > { %1551 = vst.msk [vmem:[#allocation2 + $0x1a8] sm:$0xe0] %vm607_vm12, %v1545_v16  ;;  %v1620_v8 = vsel %vm1618_vm13, %v10559_v6, %v10560_v3  ;;  %v1598_v14 = vrot.slane %v1590_v13, 5  ;;  %2369 = vmatprep.subr.bf16.mxu0 %v2148_v9  ;;  %v11609_v20 = vpop.permute.xlu0 %10562 }
 0x10f   : > { %v1628_v63 = vrot.slane %v1620_v8, 2  ;;  %2370 = vmatpush1.bf16.msra.mxu0 %v2147_v42  ;;  %v11611_v38 = vpop.permute.xlu1 %10567  ;;  %v10565_v22 = vunpack.i.h.bf16 %v11609_v20  ;;  %v10564_v61 = vunpack.i.l.bf16 %v11609_v20  ;;  %2563 = vmatpush1.bf16.msra.mxu1 %v2149_v11 }
 0x110   : > { %1604 = vst [vmem:[#allocation2 + $0x1b8] sm:$0x38] %v1598_v14  ;;  %v10570_v23 = vunpack.i.h.bf16 %v11611_v38  ;;  %v10569_v7 = vunpack.i.l.bf16 %v11611_v38  ;;  %v2106_v27 = vld [vmem:[#allocation2 + $0x1a0] sm:$0xff]  ;;  %2564 = vmatprep.subr.bf16.mxu1 %v10835_v18 }
 0x111   : > { %1634 = vst [vmem:[#allocation2 + $0x1d0] ss:$-20 sps:$4 sm:$0xc1] %v1628_v63   ;;  %v1652_v50 = vsel %vm1618_vm13, %v10564_v61, %v10565_v22  ;;  %v2151_v25 = vpack.c.bf16 %v2106_v27, %v2103_v21 }
 0x112   : > { %v1681_v30 = vsel %vm1618_vm13, %v10569_v7, %v10570_v23  ;;  %v1660_v32 = vrot.slane %v1652_v50, 7  ;;  %v11624_v33 = vpop.permute.xlu0 %10572 }
 0x113   : > { %v1689_v37 = vrot.slane %v1681_v30, 4  ;;  %v10578_v29 = vpop.permute.xlu1 %10577  ;;  %v10575_v41 = vunpack.i.h.bf16 %v11624_v33  ;;  %v10574_v1 = vunpack.i.l.bf16 %v11624_v33  ;;  %2371 = vmatprep.subr.bf16.mxu0 %v2151_v25  ;;  %v2105_v10 = vld [vmem:[#allocation2 + $0x198] sm:$0xff] }
 0x114   : > { %1666 = vst [vmem:[#allocation2 + $0x1d0] sm:$0xe] %v1660_v32  ;;  %v10579_v12 = vunpack.i.l.bf16 %v10578_v29  ;;  %v2150_v44 = vpack.c.bf16 %v2105_v10, %v2102_v28  ;;  %v10580_v43 = vunpack.i.h.bf16 %v10578_v29 }
 0x115   : > { %v2107_v0 = vld [vmem:[#allocation2 + $0x1a8] sm:$0xff]  ;;  %1695 = vst [vmem:[#allocation2 + $0x1d0] sm:$0x70] %v1689_v37  ;;  %v1710_v62 = vsel %vm1618_vm13, %v10574_v1, %v10575_v41 }
 0x116   : > { %v2152_v17 = vpack.c.bf16 %v2107_v0, %v2104_v34  ;;  %v1589_v26 = vsel %vm1564_vm15, %v10579_v12, %v10554_v15  ;;  %v1718_v49 = vrot.slane %v1710_v62, 1  ;;  %v10583_v51 = vpop.permute.xlu0 %10582  ;;  %2372 = vmatpush1.bf16.msra.mxu0 %v2150_v44 }
 0x117   : > { %v1597_v19 = vrot.slane %v1589_v26, 5  ;;  %v10588_v45 = vpop.permute.xlu1 %10587  ;;  %v10585_v52 = vunpack.i.h.bf16 %v10583_v51  ;;  %v10584_v53 = vunpack.i.l.bf16 %v10583_v51 }
 0x118   : > { %2565 = vmatpush1.bf16.msra.mxu1 %v2152_v17  ;;  %1724 = vst [vmem:[#allocation2 + $0x1e8] ss:$-20 sps:$4 sm:$0x83] %v1718_v49   ;;  %v10590_v36 = vunpack.i.h.bf16 %v10588_v45  ;;  %v10589_v54 = vunpack.i.l.bf16 %v10588_v45 }
 0x119   : > { %2566 = vmatprep.subr.bf16.mxu1 %v10835_v18  ;;  %1603 = vst [vmem:[#allocation2 + $0x1b0] sm:$0x38] %v1597_v19  ;;  %v1619_v5 = vsel %vm1618_vm13, %v10584_v53, %v10559_v6  ;;  %v1651_v46 = vsel %vm1618_vm13, %v10585_v52, %v10564_v61 }
 0x11a   : > { %v1680_v55 = vsel %vm1618_vm13, %v10589_v54, %v10569_v7  ;;  %v1709_v56 = vsel %vm1618_vm13, %v10590_v36, %v10574_v1  ;;  %v1627_v57 = vrot.slane %v1619_v5, 2  ;;  %v1659_v58 = vrot.slane %v1651_v46, 7  ;;  %v10593_v59 = vpop.permute.xlu0 %10592 }
 0x11b   : > { %v1688_v60 = vrot.slane %v1680_v55, 4  ;;  %v1717_v48 = vrot.slane %v1709_v56, 1  ;;  %v10598_v39 = vpop.permute.xlu1 %10597  ;;  %v10595_v16 = vunpack.i.h.bf16 %v10593_v59  ;;  %v10594_v15 = vunpack.i.l.bf16 %v10593_v59 }
 0x11c   : > { %1633 = vst [vmem:[#allocation2 + $0x1c8] ss:$-20 sps:$4 sm:$0xc1] %v1627_v57   ;;  %1665 = vst [vmem:[#allocation2 + $0x1c8] sm:$0xe] %v1659_v58  ;;  %v10600_v31 = vunpack.i.h.bf16 %v10598_v39  ;;  %v10599_v40 = vunpack.i.l.bf16 %v10598_v39 }
 0x11d   : > { %1694 = vst [vmem:[#allocation2 + $0x1c8] sm:$0x70] %v1688_v60  ;;  %1723 = vst [vmem:[#allocation2 + $0x1e0] ss:$-20 sps:$4 sm:$0x83] %v1717_v48   ;;  %v1565_v6 = vsel %vm1564_vm15, %v10595_v16, %v10580_v43  ;;  %v1566_v9 = vsel %vm1564_vm15, %v10580_v43, %v10594_v15 }
 0x11e   : > { %v1595_v42 = vsel %vm433_vm7, %v10555_v35, %v10599_v40  ;;  %1574 = vst [vmem:[#allocation2 + $0x1b0] sm:$0x7] %v1565_v6  ;;  %v1573_v24 = vsel %vm433_vm7, %v10594_v15, %v10600_v31  ;;  %1575 = vst [vmem:[#allocation2 + $0x1b8] sm:$0x7] %v1566_v9  ;;  %v10603_v4 = vpop.permute.xlu0 %10602 }
 0x11f   : > { %v1599_v13 = vrot.slane %v1595_v42, 5  ;;  %1576 = vst.msk [vmem:[#allocation2 + $0x1c0] sm:$0x7] %vm384_vm8, %v1573_v24  ;;  %v10608_v11 = vpop.permute.xlu1 %10607  ;;  %v10605_v8 = vunpack.i.h.bf16 %v10603_v4  ;;  %v10604_v14 = vunpack.i.l.bf16 %v10603_v4  ;;  %v2112_v30 = vld [vmem:[#allocation2 + $0x1d0] sm:$0xff] }
 0x120   : > { %v10610_v21 = vunpack.i.h.bf16 %v10608_v11  ;;  %v10609_v63 = vunpack.i.l.bf16 %v10608_v11 }
 0x121   : > { %1605 = vst.msk [vmem:[#allocation2 + $0x1c0] sm:$0x38] %vm415_vm9, %v1599_v13  ;;  %v1625_v2 = vsel %vm563_vm10, %v10560_v3, %v10604_v14  ;;  %v1657_v35 = vsel %vm563_vm10, %v10565_v22, %v10605_v8 }
 0x122   : > { %v1686_v61 = vsel %vm563_vm10, %v10570_v23, %v10609_v63  ;;  %v1715_v7 = vsel %vm563_vm10, %v10575_v41, %v10610_v21  ;;  %v1629_v27 = vrot.slane %v1625_v2, 2  ;;  %v1661_v50 = vrot.slane %v1657_v35, 7  ;;  %v11657_v25 = vpop.permute.xlu0 %10612 }
 0x123   : > { %v1690_v47 = vrot.slane %v1686_v61, 4  ;;  %v1719_v28 = vrot.slane %v1715_v7, 1  ;;  %v11659_v3 = vpop.permute.xlu1 %10617  ;;  %v10615_v20 = vunpack.i.h.bf16 %v11657_v25  ;;  %v10614_v22 = vunpack.i.l.bf16 %v11657_v25 }
 0x124   : > { %1635 = vst.msk [vmem:[#allocation2 + $0x1c0] sm:$0xc0] %vm447_vm0, %v1629_v27  ;;  %v10620_v38 = vunpack.i.h.bf16 %v11659_v3  ;;  %v10619_v23 = vunpack.i.l.bf16 %v11659_v3  ;;  %v2111_v37 = vld [vmem:[#allocation2 + $0x1c8] sm:$0xff] }
 0x125   : > { %1638 = vst.msk [vmem:[#allocation2 + $0x1d8] sm:$0x1] %vm451_vm1, %v1629_v27  ;;  %v1743_v32 = vsel %vm1741_vm14, %v10614_v22, %v10615_v20  ;;  %v2109_v33 = vld [vmem:[#allocation2 + $0x1b8] sm:$0xff]  ;;  %v2108_v34 = vld [vmem:[#allocation2 + $0x1b0] sm:$0xff] }
 0x126   : > { %1667 = vst.msk [vmem:[#allocation2 + $0x1d8] sm:$0xe] %vm482_vm2, %v1661_v50  ;;  %v1773_v29 = vsel %vm1741_vm14, %v10619_v23, %v10620_v38  ;;  %v1752_v41 = vrot.slane %v1743_v32, 6  ;;  %v11675_v1 = vpop.permute.xlu0 %10622  ;;  %v2154_v10 = vpack.c.bf16 %v2112_v30, %v2109_v33  ;;  %v2153_v12 = vpack.c.bf16 %v2111_v37, %v2108_v34 }
 0x127   : > { %1696 = vst.msk [vmem:[#allocation2 + $0x1d8] sm:$0x70] %vm512_vm3, %v1690_v47  ;;  %v1781_v44 = vrot.slane %v1773_v29, 3  ;;  %v11677_v0 = vpop.permute.xlu1 %10627  ;;  %v10625_v62 = vunpack.i.h.bf16 %v11675_v1  ;;  %v10624_v17 = vunpack.i.l.bf16 %v11675_v1 }
 0x128   : > { %1725 = vst.msk [vmem:[#allocation2 + $0x1d8] sm:$0x80] %vm542_vm4, %v1719_v28  ;;  %1758 = vst [vmem:[#allocation2 + $0x1e8] sm:$0x1c] %v1752_v41  ;;  %v10630_v26 = vunpack.i.h.bf16 %v11677_v0  ;;  %v10629_v49 = vunpack.i.l.bf16 %v11677_v0  ;;  %2373 = vmatprep.subr.bf16.mxu0 %v2154_v10 }
 0x129   : > { %1728 = vst.msk [vmem:[#allocation2 + $0x1f0] sm:$0x3] %vm546_vm5, %v1719_v28  ;;  %1787 = vst [vmem:[#allocation2 + $0x1e8] sm:$0xe0] %v1781_v44  ;;  %v1826_v51 = vsel %vm1564_vm15, %v10624_v17, %v10625_v62  ;;  %2374 = vmatpush1.bf16.msra.mxu0 %v2153_v12 }
 0x12a   : > { %v1855_v19 = vsel %vm1618_vm13, %v10629_v49, %v10630_v26  ;;  %v1834_v45 = vrot.slane %v1826_v51, 5  ;;  %v10633_v52 = vpop.permute.xlu0 %10632 }
 0x12b   : > { %v1863_v53 = vrot.slane %v1855_v19, 2  ;;  %v10638_v36 = vpop.permute.xlu1 %10637  ;;  %v10635_v54 = vunpack.i.h.bf16 %v10633_v52  ;;  %v10634_v43 = vunpack.i.l.bf16 %v10633_v52  ;;  %v2110_v5 = vld [vmem:[#allocation2 + $0x1c0] sm:$0xff] }
 0x12c   : > { %1840 = vst [vmem:[#allocation2 + $0x200] sm:$0x38] %v1834_v45  ;;  %v10639_v46 = vunpack.i.l.bf16 %v10638_v36  ;;  %v10640_v42 = vunpack.i.h.bf16 %v10638_v36 }
 0x12d   : > { %1869 = vst [vmem:[#allocation2 + $0x218] ss:$-20 sps:$4 sm:$0xc1] %v1863_v53   ;;  %v1772_v56 = vsel %vm1741_vm14, %v10635_v54, %v10619_v23  ;;  %v1742_v57 = vsel %vm1741_vm14, %v10634_v43, %v10614_v22 }
 0x12e   : > { %v1825_v59 = vsel %vm1564_vm15, %v10639_v46, %v10624_v17  ;;  %v1780_v60 = vrot.slane %v1772_v56, 3  ;;  %v1751_v48 = vrot.slane %v1742_v57, 6  ;;  %v11690_v39 = vpop.permute.xlu0 %10642 }
 0x12f   : > { %v2113_v55 = vld [vmem:[#allocation2 + $0x1d8] sm:$0xff]  ;;  %v1833_v16 = vrot.slane %v1825_v59, 5  ;;  %v10648_v15 = vpop.permute.xlu1 %10647  ;;  %v10644_v31 = vunpack.i.l.bf16 %v11690_v39 }
 0x130   : > { %v2155_v58 = vpack.c.bf16 %v2113_v55, %v2110_v5  ;;  %1786 = vst [vmem:[#allocation2 + $0x1e0] sm:$0xe0] %v1780_v60  ;;  %1757 = vst [vmem:[#allocation2 + $0x1e0] sm:$0x1c] %v1751_v48  ;;  %v10650_v40 = vunpack.i.h.bf16 %v10648_v15  ;;  %v10649_v6 = vunpack.i.l.bf16 %v10648_v15  ;;  %v2709_v15 = vld [vmem:[%s14628_s2] sm:$0xff] }
 0x131   : > { %1839 = vst [vmem:[#allocation2 + $0x1f8] sm:$0x38] %v1833_v16  ;;  %v1854_v9 = vsel %vm1618_vm13, %v10644_v31, %v10629_v49  ;;  %2731 = vperm.xlu0 %10711, %v2709_v15   ;;  %v10746_v15 = vld [vmem:[%s14627_s1 + $0xb4] ss:$8 sps:$4 sm:$0xff]  }
 0x132   : > { %2567 = vmatpush1.bf16.msra.mxu1 %v2155_v58  ;;  %v1749_v24 = vsel %vm1748_vm6, %v10615_v20, %v10649_v6  ;;  %v1778_v4 = vsel %vm1748_vm6, %v10620_v38, %v10650_v40  ;;  %v1862_v13 = vrot.slane %v1854_v9, 2  ;;  %v10653_v11 = vpop.permute.xlu0 %10652  ;;  %v10645_v38 = vunpack.i.h.bf16 %v11690_v39 }
 0x133   : > { %2568 = vmatprep.subr.bf16.mxu1 %v10835_v18  ;;  %v1753_v8 = vrot.slane %v1749_v24, 6  ;;  %v1782_v14 = vrot.slane %v1778_v4, 3  ;;  %v10658_v21 = vpop.permute.xlu1 %10657  ;;  %v10655_v63 = vunpack.i.h.bf16 %v10653_v11  ;;  %v10654_v2 = vunpack.i.l.bf16 %v10653_v11 }
 0x134   : > { %1868 = vst [vmem:[#allocation2 + $0x210] ss:$-20 sps:$4 sm:$0xc1] %v1862_v13   ;;  %v10660_v35 = vunpack.i.h.bf16 %v10658_v21  ;;  %v10659_v61 = vunpack.i.l.bf16 %v10658_v21 }
 0x135   : > { %1759 = vst.msk [vmem:[#allocation2 + $0x1f0] sm:$0x1c] %vm577_vm11, %v1753_v8  ;;  %v1801_v7 = vsel %vm1564_vm15, %v10655_v63, %v10640_v42  ;;  %v1802_v27 = vsel %vm1564_vm15, %v10640_v42, %v10654_v2 }
 0x136   : > { %1788 = vst.msk [vmem:[#allocation2 + $0x1f0] sm:$0xe0] %vm607_vm12, %v1782_v14  ;;  %v1831_v50 = vsel %vm433_vm7, %v10625_v62, %v10659_v61  ;;  %1810 = vst [vmem:[#allocation2 + $0x1f8] sm:$0x7] %v1801_v7  ;;  %v1809_v25 = vsel %vm433_vm7, %v10654_v2, %v10660_v35  ;;  %v10663_v47 = vpop.permute.xlu0 %10662  ;;  %v2710_v7 = vld [vmem:[%s14628_s2 + $0x8] sm:$0xff] }
 0x137   : > { %1811 = vst [vmem:[#allocation2 + $0x200] sm:$0x7] %v1802_v27  ;;  %v1835_v28 = vrot.slane %v1831_v50, 5  ;;  %1812 = vst.msk [vmem:[#allocation2 + $0x208] sm:$0x7] %vm384_vm8, %v1809_v25  ;;  %v11706_v3 = vpop.permute.xlu1 %10667  ;;  %v10665_v20 = vunpack.i.h.bf16 %v10663_v47  ;;  %v10664_v22 = vunpack.i.l.bf16 %v10663_v47  ;;  %v2114_v56 = vld [vmem:[#allocation2 + $0x1e0] sm:$0xff]  ;;  %2736 = vperm.xlu1 %10712, %v2710_v7  }
 0x138   : > { %v10669_v23 = vunpack.i.l.bf16 %v11706_v3  ;;  %v10670_v32 = vunpack.i.h.bf16 %v11706_v3 }
 0x139   : > { %1841 = vst.msk [vmem:[#allocation2 + $0x208] sm:$0x38] %vm415_vm9, %v1835_v28  ;;  %v1860_v30 = vsel %vm563_vm10, %v10630_v26, %v10664_v22  ;;  %v2115_v26 = vld [vmem:[#allocation2 + $0x1e8] sm:$0xff] }
 0x13a   : > { %v1887_v33 = vsel %vm1618_vm13, %v10645_v38, %v10669_v23  ;;  %v1892_v34 = vsel %vm563_vm10, %v10669_v23, %v10665_v20  ;;  %v1864_v37 = vrot.slane %v1860_v30, 2  ;;  %v11717_v29 = vpop.permute.xlu0 %10672 }
 0x13b   : > { %v1895_v41 = vrot.slane %v1887_v33, 7  ;;  %v1896_v1 = vrot.slane %v1892_v34, 7  ;;  %v11719_v10 = vpop.permute.xlu1 %10677  ;;  %v10675_v12 = vunpack.i.h.bf16 %v11717_v29  ;;  %v10674_v44 = vunpack.i.l.bf16 %v11717_v29 }
 0x13c   : > { %1870 = vst.msk [vmem:[#allocation2 + $0x208] sm:$0xc0] %vm447_vm0, %v1864_v37  ;;  %v10680_v0 = vunpack.i.h.bf16 %v11719_v10  ;;  %v10679_v62 = vunpack.i.l.bf16 %v11719_v10  ;;  %vm14640_vm0 = vcmask 523264  }
 0x13d   : > { %1873 = vst.msk [vmem:[#allocation2 + $0x220] sm:$0x1] %vm451_vm1, %v1864_v37  ;;  %1901 = vst [vmem:[#allocation2 + $0x218] sm:$0xe] %v1895_v41  ;;  %v1916_v17 = vsel %vm1618_vm13, %v10670_v32, %v10674_v44  ;;  %v2117_v51 = vld [vmem:[#allocation2 + $0x1f8] sm:$0xff]  ;;  %v2116_v42 = vld [vmem:[#allocation2 + $0x1f0] sm:$0xff] }
 0x13e   : > { %1902 = vst.msk [vmem:[#allocation2 + $0x220] sm:$0xe] %vm482_vm2, %v1896_v1  ;;  %v2118_v49 = vld [vmem:[#allocation2 + $0x200] sm:$0xff]  ;;  %v1886_v19 = vsel %vm1618_vm13, %v10680_v0, %v10645_v38  ;;  %v1945_v45 = vsel %vm1618_vm13, %v10675_v12, %v10679_v62  ;;  %v1924_v52 = vrot.slane %v1916_v17, 4  ;;  %v10683_v53 = vpop.permute.xlu0 %10682  ;;  %v2156_v59 = vpack.c.bf16 %v2117_v51, %v2114_v56  ;;  %v10716_v17 = vld [vmem:[%s14627_s1 + $0x14] ss:$8 sps:$4 sm:$0xff]   ;;  %vm14641_vm1 = vmmov %vm14640_vm0 }
 0x13f   : > { %v2157_v36 = vpack.c.bf16 %v2118_v49, %v2115_v26  ;;  %v1894_v54 = vrot.slane %v1886_v19, 7  ;;  %v1953_v43 = vrot.slane %v1945_v45, 1  ;;  %v10688_v5 = vpop.permute.xlu1 %10687  ;;  %v10685_v46 = vunpack.i.h.bf16 %v10683_v53  ;;  %v10713_v0 = vld [vmem:[%s14627_s1] ss:$8 sps:$4 sm:$0xff]   ;;  %v10718_v51 = vld [vmem:[%s14627_s1 + $0x10] ss:$8 sps:$4 sm:$0xff]   ;;  %vm14642_vm2 = vmmov %vm14640_vm0 }
 0x140   : > { %v10684_v55 = vunpack.i.l.bf16 %v10683_v53  ;;  %1930 = vst [vmem:[#allocation2 + $0x218] sm:$0x70] %v1924_v52  ;;  %v10690_v57 = vunpack.i.h.bf16 %v10688_v5  ;;  %v10689_v58 = vunpack.i.l.bf16 %v10688_v5  ;;  %v10719_v19 = vld [vmem:[%s14627_s1 + $0x24] ss:$8 sps:$4 sm:$0xff]   ;;  %v10721_v45 = vld [vmem:[%s14627_s1 + $0x20] ss:$8 sps:$4 sm:$0xff]   ;;  %vm14646_vm7 = vmmov %vm14640_vm0 }
 0x141   : > { %2375 = vmatprep.subr.bf16.mxu0 %v2157_v36  ;;  %1900 = vst [vmem:[#allocation2 + $0x210] sm:$0xe] %v1894_v54  ;;  %1959 = vst [vmem:[#allocation2 + $0x230] ss:$-20 sps:$4 sm:$0x83] %v1953_v43  }
 0x142   : > { %v1977_v60 = vsel %vm1741_vm14, %v10684_v55, %v10685_v46  ;;  %v2006_v48 = vsel %vm1741_vm14, %v10689_v58, %v10690_v57  ;;  %2376 = vmatpush1.bf16.msra.mxu0 %v2156_v59  ;;  %v10693_v16 = vpop.permute.xlu0 %10692  ;;  %v10722_v52 = vld [vmem:[%s14627_s1 + $0x34] ss:$8 sps:$4 sm:$0xff]   ;;  %v10724_v53 = vld [vmem:[%s14627_s1 + $0x30] ss:$8 sps:$4 sm:$0xff]   ;;  %v10725_v36 = vld [vmem:[%s14627_s1 + $0x44] ss:$8 sps:$4 sm:$0xff]  }
 0x143   : > { %v1985_v39 = vrot.slane %v1977_v60, 6  ;;  %v2014_v31 = vrot.slane %v2006_v48, 3  ;;  %v10698_v40 = vpop.permute.xlu1 %10697  ;;  %v10695_v6 = vunpack.i.h.bf16 %v10693_v16  ;;  %v10694_v9 = vunpack.i.l.bf16 %v10693_v16  ;;  %v2119_v24 = vld [vmem:[#allocation2 + $0x208] sm:$0xff]  ;;  %vm14647_vm8 = vmmov %vm14640_vm0  ;;  %v10728_v43 = vld [vmem:[%s14627_s1 + $0x54] ss:$8 sps:$4 sm:$0xff]  }
 0x144   : > { %v10700_v4 = vunpack.i.h.bf16 %v10698_v40  ;;  %v10699_v13 = vunpack.i.l.bf16 %v10698_v40  ;;  %v2158_v11 = vpack.c.bf16 %v2119_v24, %v2116_v42  ;;  %v10727_v54 = vld [vmem:[%s14627_s1 + $0x40] ss:$8 sps:$4 sm:$0xff]   ;;  %vm14648_vm9 = vmmov %vm14640_vm0  ;;  %v10730_v5 = vld [vmem:[%s14627_s1 + $0x50] ss:$8 sps:$4 sm:$0xff]  }
 0x145   : > { %1991 = vst [vmem:[#allocation2 + $0x230] sm:$0x1c] %v1985_v39  ;;  %2020 = vst [vmem:[#allocation2 + $0x230] sm:$0xe0] %v2014_v31  ;;  %v1915_v8 = vsel %vm1618_vm13, %v10694_v9, %v10670_v32  ;;  %v1944_v14 = vsel %vm1618_vm13, %v10695_v6, %v10675_v12  ;;  %v10734_v56 = vld [vmem:[%s14627_s1 + $0x74] ss:$8 sps:$4 sm:$0xff]  }
 0x146   : > { %v1976_v21 = vsel %vm1741_vm14, %v10699_v13, %v10684_v55  ;;  %v2005_v63 = vsel %vm1741_vm14, %v10700_v4, %v10689_v58  ;;  %v1923_v2 = vrot.slane %v1915_v8, 4  ;;  %v1952_v35 = vrot.slane %v1944_v14, 1  ;;  %v10703_v61 = vpop.permute.xlu0 %10702  ;;  %2569 = vmatpush1.bf16.msra.mxu1 %v2158_v11  ;;  %v10733_v55 = vld [vmem:[%s14627_s1 + $0x60] ss:$8 sps:$4 sm:$0xff]   ;;  %vm14651_vm15 = vmmov %vm14640_vm0  ;;  %v10737_v58 = vld [vmem:[%s14627_s1 + $0x84] ss:$8 sps:$4 sm:$0xff]  }
 0x147   : > { %v1984_v27 = vrot.slane %v1976_v21, 6  ;;  %v2013_v50 = vrot.slane %v2005_v63, 3  ;;  %v10708_v25 = vpop.permute.xlu1 %10707  ;;  %v10705_v47 = vunpack.i.h.bf16 %v10703_v61  ;;  %v10704_v28 = vunpack.i.l.bf16 %v10703_v61  ;;  %2570 = vmatprep.subr.bf16.mxu1 %v10835_v18  ;;  %v10739_v59 = vld [vmem:[%s14627_s1 + $0x80] ss:$8 sps:$4 sm:$0xff]   ;;  %v10740_v60 = vld [vmem:[%s14627_s1 + $0x94] ss:$8 sps:$4 sm:$0xff]  }
 0x148   : > { %1929 = vst [vmem:[#allocation2 + $0x210] sm:$0x70] %v1923_v2  ;;  %1958 = vst [vmem:[#allocation2 + $0x228] ss:$-20 sps:$4 sm:$0x83] %v1952_v35   ;;  %v10710_v3 = vunpack.i.h.bf16 %v10708_v25  ;;  %v10709_v20 = vunpack.i.l.bf16 %v10708_v25  ;;  %v2121_v41 = vld [vmem:[#allocation2 + $0x218] sm:$0xff] }
 0x149   : > { %1990 = vst [vmem:[#allocation2 + $0x228] sm:$0x1c] %v1984_v27  ;;  %2019 = vst [vmem:[#allocation2 + $0x228] sm:$0xe0] %v2013_v50  ;;  %v1950_v22 = vsel %vm563_vm10, %v10679_v62, %v10705_v47  ;;  %v1921_v38 = vsel %vm563_vm10, %v10674_v44, %v10704_v28  ;;  %v10742_v48 = vld [vmem:[%s14627_s1 + $0x90] ss:$8 sps:$4 sm:$0xff]  }
 0x14a   : > { %v1982_v23 = vsel %vm1748_vm6, %v10685_v46, %v10709_v20  ;;  %v2011_v30 = vsel %vm1748_vm6, %v10690_v57, %v10710_v3  ;;  %v1954_v32 = vrot.slane %v1950_v22, 1  ;;  %v1925_v33 = vrot.slane %v1921_v38, 4  ;;  %v10731_v46 = vld [vmem:[%s14627_s1 + $0x64] ss:$8 sps:$4 sm:$0xff]   ;;  %v10736_v57 = vld [vmem:[%s14627_s1 + $0x70] ss:$8 sps:$4 sm:$0xff]  }
 0x14b   : > { %v1986_v34 = vrot.slane %v1982_v23, 6  ;;  %v2015_v37 = vrot.slane %v2011_v30, 3  ;;  %v10743_v39 = vld [vmem:[%s14627_s1 + $0xa4] ss:$8 sps:$4 sm:$0xff]   ;;  %v10745_v16 = vld [vmem:[%s14627_s1 + $0xa0] ss:$8 sps:$4 sm:$0xff]  }
 0x14c   : > { %1960 = vst.msk [vmem:[#allocation2 + $0x220] sm:$0x80] %vm542_vm4, %v1954_v32  ;;  %v2124_v1 = vld [vmem:[#allocation2 + $0x230] sm:$0xff]  ;;  %vm14644_vm4 = vmmov %vm14640_vm0  ;;  %v10749_v40 = vld [vmem:[%s14627_s1 + $0xc4] ss:$8 sps:$4 sm:$0xff]  }
 0x14d   : > { %1963 = vst.msk [vmem:[#allocation2 + $0x238] sm:$0x3] %vm546_vm5, %v1954_v32  ;;  %v2160_v29 = vpack.c.bf16 %v2124_v1, %v2121_v41  ;;  %vm14645_vm5 = vmmov %vm14640_vm0  ;;  %v10748_v31 = vld [vmem:[%s14627_s1 + $0xb0] ss:$8 sps:$4 sm:$0xff]   ;;  %v10751_v6 = vld [vmem:[%s14627_s1 + $0xc0] ss:$8 sps:$4 sm:$0xff]  }
 0x14e   : > { %1931 = vst.msk [vmem:[#allocation2 + $0x220] sm:$0x70] %vm512_vm3, %v1925_v33  ;;  %vm14643_vm3 = vmmov %vm14640_vm0  ;;  %v10752_v9 = vld [vmem:[%s14627_s1 + $0xd4] ss:$8 sps:$4 sm:$0xff]   ;;  %v10754_v42 = vld [vmem:[%s14627_s1 + $0xd0] ss:$8 sps:$4 sm:$0xff]  }
 0x14f   : > { %1992 = vst.msk [vmem:[#allocation2 + $0x238] sm:$0x1c] %vm577_vm11, %v1986_v34  ;;  %2377 = vmatprep.subr.bf16.mxu0 %v2160_v29  ;;  %v2120_v10 = vld [vmem:[#allocation2 + $0x210] sm:$0xff]  ;;  %vm14649_vm11 = vmmov %vm14640_vm0  ;;  %v10755_v24 = vld [vmem:[%s14627_s1 + $0xe4] ss:$8 sps:$4 sm:$0xff]  }
 0x150   : > { %2021 = vst.msk [vmem:[#allocation2 + $0x238] sm:$0xe0] %vm607_vm12, %v2015_v37  ;;  %v2123_v12 = vld [vmem:[#allocation2 + $0x228] sm:$0xff]  ;;  %vm14650_vm12 = vmmov %vm14640_vm0  ;;  %v10758_v13 = vld [vmem:[%s14627_s1 + $0xf4] ss:$8 sps:$4 sm:$0xff]   ;;  %v2753_v37 = vlaneseq }
 0x151   : > { %v2159_v44 = vpack.c.bf16 %v2123_v12, %v2120_v10  ;;  %v10757_v4 = vld [vmem:[%s14627_s1 + $0xe0] ss:$8 sps:$4 sm:$0xff]   ;;  %v10760_v11 = vld [vmem:[%s14627_s1 + $0xf0] ss:$8 sps:$4 sm:$0xff]  }
 0x153   : > { %2378 = vmatpush1.bf16.msra.mxu0 %v2159_v44 }
 0x155   : > { %v2122_v62 = vld [vmem:[#allocation2 + $0x220] sm:$0xff] }
 0x156   : > { %2388 = vmatmul.mubr.bf16.vlgmr.msra.gmra.mrb[0].mxu0 %v10713_v0 }
 0x157   : > { %v2125_v26 = vld [vmem:[#allocation2 + $0x238] sm:$0xff]  ;;  %9397 = vmatprep.mubr.msk.bf16.mxu0 %vm14640_vm0, %v10716_v17 }
 0x158   : > { %v2161_v49 = vpack.c.bf16 %v2125_v26, %v2122_v62  ;;  %v2754_v62 = vshrl.u32 %v2753_v37, 7 }
 0x15a   : > { %2571 = vmatpush1.bf16.msra.mxu1 %v2161_v49 }
 0x15d   : > { %2581 = vmatmul.mubr.bf16.vlgmr.msra.gmra.mrb[0].mxu1 %v10713_v0 }
 0x15e   : > { %9413 = vmatprep.mubr.msk.bf16.mxu1 %vm14641_vm1, %v10716_v17  ;;  %2398 = vmatmul.mubr.bf16.gmra.mrb[4].mxu0 %v10718_v51  ;;  %vm14652_vm1 = vmmov %vm14640_vm0 }
 0x15f   : > { %9398 = vmatprep.mubr.msk.bf16.mxu0 %vm14642_vm2, %v10719_v19  ;;  %vm14653_vm2 = vmmov %vm14640_vm0 }
 0x165   : > { %2589 = vmatmul.mubr.bf16.gmra.mrb[4].mxu1 %v10718_v51 }
 0x166   : > { %9414 = vmatprep.mubr.msk.bf16.mxu1 %vm14643_vm3, %v10719_v19  ;;  %2408 = vmatmul.mubr.bf16.gmra.mrb[8].mxu0 %v10721_v45  ;;  %vm14654_vm3 = vmmov %vm14640_vm0 }
 0x167   : > { %9399 = vmatprep.mubr.msk.bf16.mxu0 %vm14644_vm4, %v10722_v52  ;;  %vm14655_vm4 = vmmov %vm14640_vm0 }
 0x16d   : > { %2597 = vmatmul.mubr.bf16.gmra.mrb[8].mxu1 %v10721_v45 }
 0x16e   : > { %9415 = vmatprep.mubr.msk.bf16.mxu1 %vm14645_vm5, %v10722_v52  ;;  %2418 = vmatmul.mubr.bf16.gmra.mrb[12].mxu0 %v10724_v53  ;;  %vm14656_vm5 = vmmov %vm14640_vm0 }
 0x16f   : > { %9400 = vmatprep.mubr.msk.bf16.mxu0 %vm14646_vm7, %v10725_v36  ;;  %vm14657_vm7 = vmmov %vm14640_vm0 }
 0x175   : > { %2605 = vmatmul.mubr.bf16.gmra.mrb[12].mxu1 %v10724_v53  ;;  %v11884_v53 = vsub.s32 0, %v2754_v62 }
 0x176   : > { %9416 = vmatprep.mubr.msk.bf16.mxu1 %vm14647_vm8, %v10725_v36  ;;  %2428 = vmatmul.mubr.bf16.gmra.mrb[16].mxu0 %v10727_v54  ;;  %vm14658_vm8 = vmmov %vm14640_vm0 }
 0x177   : > { %9401 = vmatprep.mubr.msk.bf16.mxu0 %vm14648_vm9, %v10728_v43  ;;  %vm14659_vm9 = vmmov %vm14640_vm0 }
 0x17d   : > { %2613 = vmatmul.mubr.bf16.gmra.mrb[16].mxu1 %v10727_v54 }
 0x17e   : > { %9417 = vmatprep.mubr.msk.bf16.mxu1 %vm14649_vm11, %v10728_v43  ;;  %2438 = vmatmul.mubr.bf16.gmra.mrb[20].mxu0 %v10730_v5  ;;  %vm14660_vm11 = vmmov %vm14640_vm0  ;;  %v2751_v43 = vld [vmem:[%s14629_s3] sm:$0x7] }
 0x17f   : > { %9402 = vmatprep.mubr.msk.bf16.mxu0 %vm14650_vm12, %v10731_v46  ;;  %vm14661_vm12 = vmmov %vm14640_vm0 }
 0x185   : > { %2621 = vmatmul.mubr.bf16.gmra.mrb[20].mxu1 %v10730_v5  ;;  %v11891_v5 = vsub.s32 1, %v2754_v62 }
 0x186   : > { %9418 = vmatprep.mubr.msk.bf16.mxu1 %vm14651_vm15, %v10731_v46  ;;  %2448 = vmatmul.mubr.bf16.gmra.mrb[24].mxu0 %v10733_v55  ;;  %vm14662_vm15 = vmmov %vm14640_vm0 }
 0x187   : > { %9403 = vmatprep.mubr.msk.bf16.mxu0 %vm14640_vm0, %v10734_v56 }
 0x18d   : > { %2629 = vmatmul.mubr.bf16.gmra.mrb[24].mxu1 %v10733_v55 }
 0x18e   : > { %9419 = vmatprep.mubr.msk.bf16.mxu1 %vm14652_vm1, %v10734_v56  ;;  %2458 = vmatmul.mubr.bf16.gmra.mrb[28].mxu0 %v10736_v57  ;;  %vm14663_vm1 = vmmov %vm14640_vm0 }
 0x18f   : > { %9404 = vmatprep.mubr.msk.bf16.mxu0 %vm14653_vm2, %v10737_v58  ;;  %vm14664_vm2 = vmmov %vm14640_vm0 }
 0x195   : > { %2637 = vmatmul.mubr.bf16.gmra.mrb[28].mxu1 %v10736_v57 }
 0x196   : > { %9420 = vmatprep.mubr.msk.bf16.mxu1 %vm14654_vm3, %v10737_v58  ;;  %2468 = vmatmul.mubr.bf16.gmra.mrb[32].mxu0 %v10739_v59  ;;  %vm14665_vm3 = vmmov %vm14640_vm0  ;;  %v11893_v58 = vsub.s32 2, %v2754_v62 }
 0x197   : > { %9405 = vmatprep.mubr.msk.bf16.mxu0 %vm14655_vm4, %v10740_v60  ;;  %vm14666_vm4 = vmmov %vm14640_vm0 }
 0x19d   : > { %2645 = vmatmul.mubr.bf16.gmra.mrb[32].mxu1 %v10739_v59 }
 0x19e   : > { %9421 = vmatprep.mubr.msk.bf16.mxu1 %vm14656_vm5, %v10740_v60  ;;  %2478 = vmatmul.mubr.bf16.gmra.mrb[36].mxu0 %v10742_v48  ;;  %vm14667_vm5 = vmmov %vm14640_vm0 }
 0x19f   : > { %9406 = vmatprep.mubr.msk.bf16.mxu0 %vm14657_vm7, %v10743_v39  ;;  %vm2776_vm7 = vcmask 269312  }
 0x1a5   : > { %2653 = vmatmul.mubr.bf16.gmra.mrb[36].mxu1 %v10742_v48 }
 0x1a6   : > { %9422 = vmatprep.mubr.msk.bf16.mxu1 %vm14658_vm8, %v10743_v39  ;;  %2488 = vmatmul.mubr.bf16.gmra.mrb[40].mxu0 %v10745_v16  ;;  %vm14668_vm8 = vcmask 261120  }
 0x1a7   : > { %9407 = vmatprep.mubr.msk.bf16.mxu0 %vm14659_vm9, %v10746_v15  ;;  %vm14669_vm9 = vcmask 1039360  }
 0x1ad   : > { %2661 = vmatmul.mubr.bf16.gmra.mrb[40].mxu1 %v10745_v16  ;;  %v2756_v16 = vrot.slane %v2751_v43, %v11884_v53 }
 0x1ae   : > { %9423 = vmatprep.mubr.msk.bf16.mxu1 %vm14660_vm11, %v10746_v15  ;;  %2498 = vmatmul.mubr.bf16.gmra.mrb[44].mxu0 %v10748_v31  ;;  %vm14670_vm11 = vmmov %vm14669_vm9 }
 0x1af   : > { %9408 = vmatprep.mubr.msk.bf16.mxu0 %vm14661_vm12, %v10749_v40  ;;  %vm14671_vm12 = vmmov %vm14669_vm9 }
 0x1b0   : > { %v11886_v54 = vpop.permute.xlu0 %2731 }
 0x1b5   : > { %2669 = vmatmul.mubr.bf16.gmra.mrb[44].mxu1 %v10748_v31 }
 0x1b6   : > { %9424 = vmatprep.mubr.msk.bf16.mxu1 %vm14662_vm15, %v10749_v40  ;;  %2508 = vmatmul.mubr.bf16.gmra.mrb[48].mxu0 %v10751_v6  ;;  %v11895_v59 = vpop.permute.xlu1 %2736  ;;  %vm14672_vm15 = vmmov %vm14669_vm9 }
 0x1b7   : > { %9409 = vmatprep.mubr.msk.bf16.mxu0 %vm14640_vm0, %v10752_v9  ;;  %vm14673_vm0 = vmmov %vm14668_vm8 }
 0x1bd   : > { %2677 = vmatmul.mubr.bf16.gmra.mrb[48].mxu1 %v10751_v6  ;;  %v2760_v6 = vrot.slane %v2751_v43, %v11891_v5 }
 0x1be   : > { %9425 = vmatprep.mubr.msk.bf16.mxu1 %vm14663_vm1, %v10752_v9  ;;  %2518 = vmatmul.mubr.bf16.gmra.mrb[52].mxu0 %v10754_v42  ;;  %vm14674_vm1 = vmmov %vm14673_vm0 }
 0x1bf   : > { %9410 = vmatprep.mubr.msk.bf16.mxu0 %vm14664_vm2, %v10755_v24  ;;  %vm14675_vm2 = vmmov %vm14669_vm9 }
 0x1c5   : > { %2685 = vmatmul.mubr.bf16.gmra.mrb[52].mxu1 %v10754_v42 }
 0x1c6   : > { %9426 = vmatprep.mubr.msk.bf16.mxu1 %vm14665_vm3, %v10755_v24  ;;  %2528 = vmatmul.mubr.bf16.gmra.mrb[56].mxu0 %v10757_v4  ;;  %vm14676_vm3 = vmmov %vm14675_vm2 }
 0x1c7   : > { %9411 = vmatprep.mubr.msk.bf16.mxu0 %vm14666_vm4, %v10758_v13  ;;  %vm14677_vm4 = vmmov %vm14675_vm2 }
 0x1cd   : > { %2693 = vmatmul.mubr.bf16.gmra.mrb[56].mxu1 %v10757_v4 }
 0x1ce   : > { %9427 = vmatprep.mubr.msk.bf16.mxu1 %vm14667_vm5, %v10758_v13  ;;  %2538 = vmatmul.mubr.bf16.gmra.mrb[60].mxu0 %v10760_v11  ;;  %vm14678_vm5 = vmmov %vm14675_vm2 }
 0x1d5   : > { %2701 = vmatmul.mubr.bf16.gmra.mrb[60].mxu1 %v10760_v11  ;;  %v2764_v11 = vrot.slane %v2751_v43, %v11893_v58 }
 0x229   : > { %v2389_v8 = vpop.f32.mrb[0].mxu0 }
 0x22a   : > { %v2391_v14 = vpop.f32.mrb[1].mxu0 }
 0x22b   : > { %v2393_v21 = vpop.f32.mrb[2].mxu0 }
 0x22c   : > { %v2395_v63 = vpop.f32.mrb[3].mxu0 }
 0x230   : > { %v2582_v2 = vpop.f32.mrb[0].mxu1 }
 0x231   : > { %v2584_v35 = vpop.f32.mrb[1].mxu1  ;;  %v2399_v27 = vpop.f32.mrb[4].mxu0 }
 0x232   : > { %v2585_v61 = vpop.f32.mrb[2].mxu1  ;;  %v2711_v50 = vmax.f32 %v2389_v8, %v2399_v27  ;;  %v2401_v25 = vpop.f32.mrb[5].mxu0 }
 0x233   : > { %v2587_v7 = vpop.f32.mrb[3].mxu1  ;;  %v2712_v47 = vmax.f32 %v2391_v14, %v2401_v25  ;;  %v2403_v28 = vpop.f32.mrb[6].mxu0 }
 0x234   : > { %v2714_v3 = vmax.f32 %v2393_v21, %v2403_v28  ;;  %v2405_v20 = vpop.f32.mrb[7].mxu0 }
 0x235   : > { %v2715_v38 = vmax.f32 %v2395_v63, %v2405_v20 }
 0x238   : > { %v2590_v22 = vpop.f32.mrb[4].mxu1 }
 0x239   : > { %v2713_v23 = vmax.f32 %v2582_v2, %v2590_v22  ;;  %v2592_v30 = vpop.f32.mrb[5].mxu1  ;;  %v2409_v41 = vpop.f32.mrb[8].mxu0 }
 0x23a   : > { %v2593_v32 = vpop.f32.mrb[6].mxu1  ;;  %v2717_v1 = vmax.f32 %v2711_v50, %v2409_v41  ;;  %v2411_v29 = vpop.f32.mrb[9].mxu0 }
 0x23b   : > { %v2716_v33 = vmax.f32 %v2585_v61, %v2593_v32  ;;  %v2595_v34 = vpop.f32.mrb[7].mxu1  ;;  %v2718_v10 = vmax.f32 %v2712_v47, %v2411_v29  ;;  %v2413_v12 = vpop.f32.mrb[10].mxu0 }
 0x23c   : > { %v2720_v44 = vmax.f32 %v2714_v3, %v2413_v12  ;;  %v2415_v0 = vpop.f32.mrb[11].mxu0 }
 0x23d   : > { %v2721_v26 = vmax.f32 %v2715_v38, %v2415_v0 }
 0x240   : > { %v2598_v17 = vpop.f32.mrb[8].mxu1 }
 0x241   : > { %v2719_v49 = vmax.f32 %v2713_v23, %v2598_v17  ;;  %v2600_v51 = vpop.f32.mrb[9].mxu1  ;;  %v2419_v36 = vpop.f32.mrb[12].mxu0 }
 0x242   : > { %v2601_v19 = vpop.f32.mrb[10].mxu1  ;;  %v2723_v46 = vmax.f32 %v2717_v1, %v2419_v36  ;;  %v2421_v55 = vpop.f32.mrb[13].mxu0 }
 0x243   : > { %v2722_v45 = vmax.f32 %v2716_v33, %v2601_v19  ;;  %v2603_v52 = vpop.f32.mrb[11].mxu1  ;;  %v2724_v56 = vmax.f32 %v2718_v10, %v2421_v55  ;;  %v2423_v57 = vpop.f32.mrb[14].mxu0 }
 0x244   : > { %v2726_v60 = vmax.f32 %v2720_v44, %v2423_v57  ;;  %v2425_v48 = vpop.f32.mrb[15].mxu0  ;;  %v2739_v39 = vadd.f32 %v11886_v54, %v2723_v46 }
 0x245   : > { %v2727_v15 = vmax.f32 %v2721_v26, %v2425_v48  ;;  %v2740_v40 = vadd.f32 %v11886_v54, %v2724_v56 }
 0x246   : > { %v2745_v42 = vmax.f32 %v2739_v39, 0.0  ;;  %v2742_v24 = vadd.f32 %v11895_v59, %v2726_v60 }
 0x247   : > { %v2746_v13 = vmax.f32 %v2740_v40, 0.0  ;;  %v2743_v14 = vadd.f32 %v11895_v59, %v2727_v15 }
 0x248   : > { %v2606_v31 = vpop.f32.mrb[12].mxu1  ;;  %v11905_v63 = vmul.f32 %v2756_v16, %v2745_v42  ;;  %v2748_v2 = vmax.f32 %v2742_v24, 0.0 }
 0x249   : > { %v2725_v9 = vmax.f32 %v2719_v49, %v2606_v31  ;;  %v2608_v4 = vpop.f32.mrb[13].mxu1  ;;  %v11907_v7 = vmul.f32 %v2760_v6, %v2746_v13  ;;  %v2429_v27 = vpop.f32.mrb[16].mxu0  ;;  %v2749_v50 = vmax.f32 %v2743_v14, 0.0 }
 0x24a   : > { %v2609_v8 = vpop.f32.mrb[14].mxu1  ;;  %v11909_v47 = vmul.f32 %v2756_v16, %v2748_v2  ;;  %2787 = vrot.lane.b32.xlu1 %v11905_v63, %s10838_s28  ;;  %v2431_v3 = vpop.f32.mrb[17].mxu0  ;;  %v9428_v4 = vld [vmem:[%s14629_s3 + $0x3] sm:$0x7] }
 0x24b   : > { %v2741_v21 = vadd.f32 %v11886_v54, %v2725_v9  ;;  %v2728_v35 = vmax.f32 %v2722_v45, %v2609_v8  ;;  %v2611_v61 = vpop.f32.mrb[15].mxu1  ;;  %v2433_v20 = vpop.f32.mrb[18].mxu0  ;;  %v11914_v22 = vmul.f32 %v2760_v6, %v2749_v50  ;;  %v2931_v2 = vrot.slane %v9428_v4, %v11884_v53 }
 0x24c   : > { %v2435_v30 = vpop.f32.mrb[19].mxu0  ;;  %v3529_v41 = vpack.c.bf16 %v11909_v47, %v11905_v63  ;;  %v2935_v50 = vrot.slane %v9428_v4, %v11891_v5 }
 0x24d   : > { %v2747_v25 = vmax.f32 %v2741_v21, 0.0  ;;  %v2744_v28 = vadd.f32 %v11895_v59, %v2728_v35  ;;  %v3530_v33 = vpack.c.bf16 %v11914_v22, %v11907_v7 }
 0x24e   : > { %2823 = vrot.lane.b32.xlu1 %v11905_v63, %s10834_s25 }
 0x24f   : > { %v2770_v38 = vmul.f32 %v2764_v11, %v2747_v25  ;;  %v2750_v23 = vmax.f32 %v2744_v28, 0.0  ;;  %3657 = vmatprep.subr.bf16.mxu0 %v3530_v33  ;;  %v2939_v33 = vrot.slane %v9428_v4, %v11893_v58 }
 0x250   : > { %v2614_v32 = vpop.f32.mrb[16].mxu1  ;;  %3658 = vmatpush1.bf16.msra.mxu0 %v3529_v41 }
 0x251   : > { %2777 = vst.msk [vmem:[#allocation3 + $0x10] sm:$0xff] %vm2776_vm7, %v2770_v38  ;;  %v2773_v34 = vmul.f32 %v2764_v11, %v2750_v23  ;;  %2791 = vrot.lane.b32.xlu0 %v2770_v38, %s10838_s28  ;;  %v2616_v37 = vpop.f32.mrb[17].mxu1  ;;  %v2439_v10 = vpop.f32.mrb[20].mxu0 }
 0x252   : > { %v2617_v1 = vpop.f32.mrb[18].mxu1  ;;  %2859 = vrot.lane.b32.xlu1 %v11905_v63, %s10840_s30  ;;  %v2895_v12 = vmax.f32 %v2429_v27, %v2439_v10  ;;  %v2441_v44 = vpop.f32.mrb[21].mxu0 }
 0x253   : > { %2780 = vst.msk [vmem:[#allocation3 + $0x28] sm:$0xff] %vm2776_vm7, %v2773_v34  ;;  %v2619_v29 = vpop.f32.mrb[19].mxu1  ;;  %v2896_v0 = vmax.f32 %v2431_v3, %v2441_v44  ;;  %v2443_v62 = vpop.f32.mrb[22].mxu0 }
 0x254   : > { %v2898_v17 = vmax.f32 %v2433_v20, %v2443_v62  ;;  %v2445_v26 = vpop.f32.mrb[23].mxu0 }
 0x255   : > { %2827 = vrot.lane.b32.xlu0 %v2770_v38, %s10834_s25  ;;  %v2899_v51 = vmax.f32 %v2435_v30, %v2445_v26 }
 0x256   : > { %2809 = vrot.lane.b32.xlu1 %v11905_v63, %s10839_s29 }
 0x258   : > { %v2622_v49 = vpop.f32.mrb[20].mxu1 }
 0x259   : > { %2863 = vrot.lane.b32.xlu0 %v2770_v38, %s10840_s30  ;;  %v2897_v19 = vmax.f32 %v2614_v32, %v2622_v49  ;;  %v2624_v45 = vpop.f32.mrb[21].mxu1  ;;  %v2449_v46 = vpop.f32.mrb[24].mxu0 }
 0x25a   : > { %v2625_v52 = vpop.f32.mrb[22].mxu1  ;;  %2845 = vrot.lane.b32.xlu1 %v11905_v63, %s10833_s24  ;;  %v2901_v55 = vmax.f32 %v2895_v12, %v2449_v46  ;;  %v2451_v56 = vpop.f32.mrb[25].mxu0 }
 0x25b   : > { %v2900_v36 = vmax.f32 %v2617_v1, %v2625_v52  ;;  %v2627_v43 = vpop.f32.mrb[23].mxu1  ;;  %v2902_v57 = vmax.f32 %v2896_v0, %v2451_v56  ;;  %v2453_v60 = vpop.f32.mrb[26].mxu0 }
 0x25c   : > { %v2904_v48 = vmax.f32 %v2898_v17, %v2453_v60  ;;  %v2455_v39 = vpop.f32.mrb[27].mxu0 }
 0x25d   : > { %2797 = vrot.lane.b32.xlu0 %v2773_v34, %s10838_s28  ;;  %v2905_v15 = vmax.f32 %v2899_v51, %v2455_v39 }
 0x25e   : > { %2789 = vrot.lane.b32.xlu1 %v11907_v7, %s10838_s28 }
 0x260   : > { %v2630_v16 = vpop.f32.mrb[24].mxu1 }
 0x261   : > { %v2903_v31 = vmax.f32 %v2897_v19, %v2630_v16  ;;  %2833 = vrot.lane.b32.xlu0 %v2773_v34, %s10834_s25  ;;  %v2632_v40 = vpop.f32.mrb[25].mxu1  ;;  %v2459_v24 = vpop.f32.mrb[28].mxu0 }
 0x262   : > { %v2633_v6 = vpop.f32.mrb[26].mxu1  ;;  %v2907_v13 = vmax.f32 %v2901_v55, %v2459_v24  ;;  %2825 = vrot.lane.b32.xlu1 %v11907_v7, %s10834_s25  ;;  %v2461_v11 = vpop.f32.mrb[29].mxu0 }
 0x263   : > { %v2906_v9 = vmax.f32 %v2900_v36, %v2633_v6  ;;  %v2635_v42 = vpop.f32.mrb[27].mxu1  ;;  %v2908_v8 = vmax.f32 %v2902_v57, %v2461_v11  ;;  %v2463_v14 = vpop.f32.mrb[30].mxu0 }
 0x264   : > { %v2913_v21 = vadd.f32 %v2907_v13, %v11886_v54  ;;  %v2910_v35 = vmax.f32 %v2904_v48, %v2463_v14  ;;  %v2465_v61 = vpop.f32.mrb[31].mxu0 }
 0x265   : > { %2869 = vrot.lane.b32.xlu0 %v2773_v34, %s10840_s30  ;;  %v2914_v27 = vadd.f32 %v2908_v8, %v11886_v54  ;;  %v2911_v25 = vmax.f32 %v2905_v15, %v2465_v61 }
 0x266   : > { %v2919_v3 = vmax.f32 %v2913_v21, 0.0  ;;  %v2916_v20 = vadd.f32 %v2910_v35, %v11895_v59  ;;  %2861 = vrot.lane.b32.xlu1 %v11907_v7, %s10840_s30 }
 0x267   : > { %v2920_v30 = vmax.f32 %v2914_v27, 0.0  ;;  %v2917_v32 = vadd.f32 %v2911_v25, %v11895_v59 }
 0x268   : > { %v2638_v28 = vpop.f32.mrb[28].mxu1  ;;  %v11954_v37 = vmul.f32 %v2931_v2, %v2919_v3  ;;  %v2922_v41 = vmax.f32 %v2916_v20, 0.0 }
 0x269   : > { %v2909_v38 = vmax.f32 %v2903_v31, %v2638_v28  ;;  %v2640_v23 = vpop.f32.mrb[29].mxu1  ;;  %2793 = vrot.lane.b32.xlu0 %v11909_v47, %s10838_s28  ;;  %v11957_v12 = vmul.f32 %v2935_v50, %v2920_v30  ;;  %v2923_v44 = vmax.f32 %v2917_v32, 0.0  ;;  %v2469_v7 = vpop.f32.mrb[32].mxu0  ;;  %v9429_v30 = vld [vmem:[%s14629_s3 + $0x6] sm:$0x7] }
 0x26a   : > { %v2641_v34 = vpop.f32.mrb[30].mxu1  ;;  %v11959_v0 = vmul.f32 %v2931_v2, %v2922_v41  ;;  %2795 = vrot.lane.b32.xlu1 %v11914_v22, %s10838_s28  ;;  %v2471_v26 = vpop.f32.mrb[33].mxu0 }
 0x26b   : > { %v2915_v1 = vadd.f32 %v2909_v38, %v11886_v54  ;;  %v2912_v29 = vmax.f32 %v2906_v9, %v2641_v34  ;;  %v2643_v10 = vpop.f32.mrb[31].mxu1  ;;  %v11966_v49 = vmul.f32 %v2935_v50, %v2923_v44  ;;  %v2473_v51 = vpop.f32.mrb[34].mxu0 }
 0x26c   : > { %v2475_v52 = vpop.f32.mrb[35].mxu0 }
 0x26d   : > { %v2921_v62 = vmax.f32 %v2915_v1, 0.0  ;;  %v2918_v17 = vadd.f32 %v2912_v29, %v11895_v59  ;;  %2829 = vrot.lane.b32.xlu0 %v11909_v47, %s10834_s25  ;;  %v3536_v43 = vpack.c.bf16 %v11966_v49, %v11957_v12  ;;  %v3105_v29 = vrot.slane %v9429_v30, %v11884_v53 }
 0x26e   : > { %2831 = vrot.lane.b32.xlu1 %v11914_v22, %s10834_s25 }
 0x26f   : > { %v2945_v19 = vmul.f32 %v2939_v33, %v2921_v62  ;;  %v2924_v45 = vmax.f32 %v2918_v17, 0.0  ;;  %v3109_v62 = vrot.slane %v9429_v30, %v11891_v5 }
 0x270   : > { %v2646_v36 = vpop.f32.mrb[32].mxu1 }
 0x271   : > { %2951 = vst.msk [vmem:[#allocation3 + $0x70] sm:$0xff] %vm2776_vm7, %v2945_v19  ;;  %v11971_v46 = vmul.f32 %v2939_v33, %v2924_v45  ;;  %2865 = vrot.lane.b32.xlu0 %v11909_v47, %s10840_s30  ;;  %v2648_v55 = vpop.f32.mrb[33].mxu1  ;;  %v2479_v60 = vpop.f32.mrb[36].mxu0 }
 0x272   : > { %v2649_v56 = vpop.f32.mrb[34].mxu1  ;;  %2867 = vrot.lane.b32.xlu1 %v11914_v22, %s10840_s30  ;;  %v3069_v48 = vmax.f32 %v2469_v7, %v2479_v60  ;;  %v2481_v39 = vpop.f32.mrb[37].mxu0 }
 0x273   : > { %2954 = vst.msk [vmem:[#allocation3 + $0x88] sm:$0xff] %vm2776_vm7, %v11971_v46  ;;  %v2651_v57 = vpop.f32.mrb[35].mxu1  ;;  %v3070_v16 = vmax.f32 %v2471_v26, %v2481_v39  ;;  %v2483_v15 = vpop.f32.mrb[38].mxu0 }
 0x274   : > { %v3072_v31 = vmax.f32 %v2473_v51, %v2483_v15  ;;  %v2485_v40 = vpop.f32.mrb[39].mxu0 }
 0x275   : > { %2811 = vrot.lane.b32.xlu0 %v11909_v47, %s10839_s29  ;;  %v3073_v6 = vmax.f32 %v2475_v52, %v2485_v40 }
 0x276   : > { %2961 = vrot.lane.b32.xlu1 %v11954_v37, %s10838_s28 }
 0x278   : > { %v2654_v9 = vpop.f32.mrb[36].mxu1 }
 0x279   : > { %2847 = vrot.lane.b32.xlu0 %v11909_v47, %s10833_s24  ;;  %v3071_v42 = vmax.f32 %v2646_v36, %v2654_v9  ;;  %v2656_v24 = vpop.f32.mrb[37].mxu1  ;;  %v2489_v22 = vpop.f32.mrb[40].mxu0 }
 0x27a   : > { %v2657_v4 = vpop.f32.mrb[38].mxu1  ;;  %2997 = vrot.lane.b32.xlu1 %v11954_v37, %s10834_s25  ;;  %v3075_v8 = vmax.f32 %v3069_v48, %v2489_v22  ;;  %v2491_v14 = vpop.f32.mrb[41].mxu0 }
 0x27b   : > { %v3074_v13 = vmax.f32 %v2649_v56, %v2657_v4  ;;  %v2659_v11 = vpop.f32.mrb[39].mxu1  ;;  %v3076_v21 = vmax.f32 %v3070_v16, %v2491_v14  ;;  %v2493_v2 = vpop.f32.mrb[42].mxu0  ;;  %v3113_v56 = vrot.slane %v9429_v30, %v11893_v58 }
 0x27c   : > { %v3078_v35 = vmax.f32 %v3072_v31, %v2493_v2  ;;  %v2495_v61 = vpop.f32.mrb[43].mxu0 }
 0x27d   : > { %2965 = vrot.lane.b32.xlu0 %v2945_v19, %s10838_s28  ;;  %v3079_v27 = vmax.f32 %v3073_v6, %v2495_v61 }
 0x27e   : > { %3033 = vrot.lane.b32.xlu1 %v11954_v37, %s10840_s30 }
 0x280   : > { %v2662_v50 = vpop.f32.mrb[40].mxu1 }
 0x281   : > { %3001 = vrot.lane.b32.xlu0 %v2945_v19, %s10834_s25  ;;  %v3077_v25 = vmax.f32 %v3071_v42, %v2662_v50  ;;  %v2664_v28 = vpop.f32.mrb[41].mxu1  ;;  %v2499_v23 = vpop.f32.mrb[44].mxu0 }
 0x282   : > { %v2665_v3 = vpop.f32.mrb[42].mxu1  ;;  %v3081_v32 = vmax.f32 %v3075_v8, %v2499_v23  ;;  %2983 = vrot.lane.b32.xlu1 %v11954_v37, %s10839_s29  ;;  %v2501_v33 = vpop.f32.mrb[45].mxu0 }
 0x283   : > { %v3080_v20 = vmax.f32 %v3074_v13, %v2665_v3  ;;  %v2667_v38 = vpop.f32.mrb[43].mxu1  ;;  %v3082_v34 = vmax.f32 %v3076_v21, %v2501_v33  ;;  %v2503_v41 = vpop.f32.mrb[46].mxu0  ;;  %v3438_v33 = vld [vmem:[#allocation3 + $0x28] sm:$0xff] }
 0x284   : > { %v3087_v1 = vadd.f32 %v3081_v32, %v11886_v54  ;;  %v3084_v10 = vmax.f32 %v3078_v35, %v2503_v41  ;;  %v2505_v44 = vpop.f32.mrb[47].mxu0 }
 0x285   : > { %3037 = vrot.lane.b32.xlu0 %v2945_v19, %s10840_s30  ;;  %v3088_v7 = vadd.f32 %v3082_v34, %v11886_v54  ;;  %v3085_v17 = vmax.f32 %v3079_v27, %v2505_v44 }
 0x286   : > { %v3093_v51 = vmax.f32 %v3087_v1, 0.0  ;;  %v3090_v19 = vadd.f32 %v3084_v10, %v11895_v59  ;;  %2963 = vrot.lane.b32.xlu1 %v11957_v12, %s10838_s28 }
 0x287   : > { %v3094_v36 = vmax.f32 %v3088_v7, 0.0  ;;  %v3091_v55 = vadd.f32 %v3085_v17, %v11895_v59  ;;  %v3435_v7 = vld [vmem:[#allocation3 + $0x10] sm:$0xff] }
 0x288   : > { %v2670_v26 = vpop.f32.mrb[44].mxu1  ;;  %v12010_v60 = vmul.f32 %v3105_v29, %v3093_v51  ;;  %v3096_v48 = vmax.f32 %v3090_v19, 0.0 }
 0x289   : > { %v3083_v45 = vmax.f32 %v3077_v25, %v2670_v26  ;;  %v2672_v52 = vpop.f32.mrb[45].mxu1  ;;  %2971 = vrot.lane.b32.xlu0 %v11971_v46, %s10838_s28  ;;  %v12013_v31 = vmul.f32 %v3109_v62, %v3094_v36  ;;  %v3097_v40 = vmax.f32 %v3091_v55, 0.0  ;;  %v2509_v6 = vpop.f32.mrb[48].mxu0  ;;  %v3531_v26 = vpack.c.bf16 %v3438_v33, %v3435_v7 }
 0x28a   : > { %v2673_v57 = vpop.f32.mrb[46].mxu1  ;;  %v12015_v9 = vmul.f32 %v3105_v29, %v3096_v48  ;;  %2999 = vrot.lane.b32.xlu1 %v11957_v12, %s10834_s25  ;;  %v2511_v4 = vpop.f32.mrb[49].mxu0 }
 0x28b   : > { %v3089_v39 = vadd.f32 %v3083_v45, %v11886_v54  ;;  %v3086_v16 = vmax.f32 %v3080_v20, %v2673_v57  ;;  %v2675_v15 = vpop.f32.mrb[47].mxu1  ;;  %v12022_v13 = vmul.f32 %v3109_v62, %v3097_v40  ;;  %v2513_v11 = vpop.f32.mrb[50].mxu0 }
 0x28c   : > { %v2515_v14 = vpop.f32.mrb[51].mxu0 }
 0x28d   : > { %v3095_v42 = vmax.f32 %v3089_v39, 0.0  ;;  %v3092_v24 = vadd.f32 %v3086_v16, %v11895_v59  ;;  %3007 = vrot.lane.b32.xlu0 %v11971_v46, %s10834_s25  ;;  %v3554_v2 = vpack.c.bf16 %v12022_v13, %v12013_v31 }
 0x28e   : > { %3035 = vrot.lane.b32.xlu1 %v11957_v12, %s10840_s30 }
 0x28f   : > { %v12024_v22 = vmul.f32 %v3113_v56, %v3095_v42  ;;  %v3098_v8 = vmax.f32 %v3092_v24, 0.0  ;;  %v9430_v24 = vld [vmem:[%s14629_s3 + $0x9] sm:$0x7] }
 0x290   : > { %v2678_v21 = vpop.f32.mrb[48].mxu1 }
 0x291   : > { %3125 = vst.msk [vmem:[#allocation3 + $0x190] sm:$0xff] %vm2776_vm7, %v12024_v22  ;;  %v12030_v35 = vmul.f32 %v3113_v56, %v3098_v8  ;;  %3043 = vrot.lane.b32.xlu0 %v11971_v46, %s10840_s30  ;;  %v2680_v61 = vpop.f32.mrb[49].mxu1  ;;  %v2519_v25 = vpop.f32.mrb[52].mxu0 }
 0x292   : > { %v2681_v27 = vpop.f32.mrb[50].mxu1  ;;  %2969 = vrot.lane.b32.xlu1 %v11966_v49, %s10838_s28  ;;  %v3243_v28 = vmax.f32 %v2509_v6, %v2519_v25  ;;  %v2521_v3 = vpop.f32.mrb[53].mxu0  ;;  %v3279_v61 = vrot.slane %v9430_v24, %v11884_v53  ;;  %v3287_v53 = vrot.slane %v9430_v24, %v11893_v58 }
 0x293   : > { %3128 = vst.msk [vmem:[#allocation3 + $0x1a8] sm:$0xff] %vm2776_vm7, %v12030_v35  ;;  %v2683_v50 = vpop.f32.mrb[51].mxu1  ;;  %v3244_v20 = vmax.f32 %v2511_v4, %v2521_v3  ;;  %v2523_v46 = vpop.f32.mrb[54].mxu0 }
 0x294   : > { %v3246_v38 = vmax.f32 %v2513_v11, %v2523_v46  ;;  %v2525_v23 = vpop.f32.mrb[55].mxu0 }
 0x295   : > { %2967 = vrot.lane.b32.xlu0 %v11959_v0, %s10838_s28  ;;  %v3247_v30 = vmax.f32 %v2515_v14, %v2525_v23 }
 0x296   : > { %3005 = vrot.lane.b32.xlu1 %v11966_v49, %s10834_s25 }
 0x298   : > { %v2686_v32 = vpop.f32.mrb[52].mxu1  ;;  %v3483_v1 = vld [vmem:[#allocation3 + $0x190] sm:$0xff] }
 0x299   : > { %3003 = vrot.lane.b32.xlu0 %v11959_v0, %s10834_s25  ;;  %v3245_v34 = vmax.f32 %v2678_v21, %v2686_v32  ;;  %v2688_v41 = vpop.f32.mrb[53].mxu1  ;;  %v2529_v51 = vpop.f32.mrb[56].mxu0 }
 0x29a   : > { %v3486_v29 = vld [vmem:[#allocation3 + $0x1a8] sm:$0xff]  ;;  %v2689_v10 = vpop.f32.mrb[54].mxu1  ;;  %v3249_v19 = vmax.f32 %v3243_v28, %v2529_v51  ;;  %v2531_v45 = vpop.f32.mrb[57].mxu0  ;;  %3041 = vrot.lane.b32.xlu1 %v11966_v49, %s10840_s30  ;;  %v3283_v28 = vrot.slane %v9430_v24, %v11891_v5 }
 0x29b   : > { %v3555_v44 = vpack.c.bf16 %v3486_v29, %v3483_v1  ;;  %v3248_v62 = vmax.f32 %v2681_v27, %v2689_v10  ;;  %v2691_v17 = vpop.f32.mrb[55].mxu1  ;;  %v3250_v52 = vmax.f32 %v3244_v20, %v2531_v45  ;;  %v2533_v36 = vpop.f32.mrb[58].mxu0 }
 0x29c   : > { %v3252_v55 = vmax.f32 %v3246_v38, %v2533_v36  ;;  %v2535_v56 = vpop.f32.mrb[59].mxu0 }
 0x29d   : > { %10089 = vmatprep.subr.bf16.mxu1 %v3555_v44  ;;  %3039 = vrot.lane.b32.xlu0 %v11959_v0, %s10840_s30  ;;  %v3253_v57 = vmax.f32 %v3247_v30, %v2535_v56 }
 0x29e   : > { %10090 = vmatpush3.bf16.msra.mxu1 %v3531_v26  ;;  %3135 = vrot.lane.b32.xlu1 %v12010_v60, %s10838_s28 }
 0x2a0   : > { %v2694_v48 = vpop.f32.mrb[56].mxu1 }
 0x2a1   : > { %2985 = vrot.lane.b32.xlu0 %v11959_v0, %s10839_s29  ;;  %v3251_v39 = vmax.f32 %v3245_v34, %v2694_v48  ;;  %v2696_v16 = vpop.f32.mrb[57].mxu1  ;;  %v2539_v42 = vpop.f32.mrb[60].mxu0 }
 0x2a2   : > { %v2697_v15 = vpop.f32.mrb[58].mxu1  ;;  %v3255_v4 = vmax.f32 %v3249_v19, %v2539_v42  ;;  %v2541_v11 = vpop.f32.mrb[61].mxu0  ;;  %3171 = vrot.lane.b32.xlu1 %v12010_v60, %s10834_s25 }
 0x2a3   : > { %v3254_v40 = vmax.f32 %v3248_v62, %v2697_v15  ;;  %v2699_v6 = vpop.f32.mrb[59].mxu1  ;;  %v3256_v8 = vmax.f32 %v3250_v52, %v2541_v11  ;;  %v2543_v14 = vpop.f32.mrb[62].mxu0 }
 0x2a4   : > { %v3261_v21 = vadd.f32 %v3255_v4, %v11886_v54  ;;  %v3258_v27 = vmax.f32 %v3252_v55, %v2543_v14  ;;  %v2545_v50 = vpop.f32.mrb[63].mxu0 }
 0x2a5   : > { %3139 = vrot.lane.b32.xlu0 %v12024_v22, %s10838_s28  ;;  %v3262_v25 = vadd.f32 %v3256_v8, %v11886_v54  ;;  %v3259_v3 = vmax.f32 %v3253_v57, %v2545_v50 }
 0x2a6   : > { %v3267_v46 = vmax.f32 %v3261_v21, 0.0  ;;  %v3264_v38 = vadd.f32 %v3258_v27, %v11895_v59  ;;  %3157 = vrot.lane.b32.xlu1 %v12010_v60, %s10839_s29 }
 0x2a7   : > { %v3268_v32 = vmax.f32 %v3262_v25, 0.0  ;;  %v3265_v33 = vadd.f32 %v3259_v3, %v11895_v59 }
 0x2a8   : > { %v2702_v20 = vpop.f32.mrb[60].mxu1  ;;  %v12072_v5 = vmul.f32 %v3279_v61, %v3267_v46  ;;  %v3270_v41 = vmax.f32 %v3264_v38, 0.0 }
 0x2a9   : > { %v3257_v23 = vmax.f32 %v3251_v39, %v2702_v20  ;;  %v2704_v30 = vpop.f32.mrb[61].mxu1  ;;  %3175 = vrot.lane.b32.xlu0 %v12024_v22, %s10834_s25  ;;  %v12075_v44 = vmul.f32 %v3283_v28, %v3268_v32  ;;  %v3271_v7 = vmax.f32 %v3265_v33, 0.0  ;;  %v3535_v32 = vpack.c.bf16 %v11959_v0, %v11954_v37 }
 0x2aa   : > { %v2705_v34 = vpop.f32.mrb[62].mxu1  ;;  %v12077_v62 = vmul.f32 %v3279_v61, %v3270_v41  ;;  %3207 = vrot.lane.b32.xlu1 %v12010_v60, %s10840_s30 }
 0x2ab   : > { %v3263_v1 = vadd.f32 %v3257_v23, %v11886_v54  ;;  %v3260_v29 = vmax.f32 %v3254_v40, %v2705_v34  ;;  %v2707_v10 = vpop.f32.mrb[63].mxu1  ;;  %v12082_v58 = vmul.f32 %v3283_v28, %v3271_v7  ;;  %v10763_v7 = vld [vmem:[%s14630_s4 + $0x4] ss:$8 sps:$4 sm:$0xff]  }
 0x2ac   : > { %3689 = vmatprep.mubr.bf16.mxu0 %v10763_v7  ;;  %3802 = vmatprep.mubr.bf16.mxu1 %v10763_v7 }
 0x2ad   : > { %v3269_v17 = vmax.f32 %v3263_v1, 0.0  ;;  %v3266_v26 = vadd.f32 %v3260_v29, %v11895_v59  ;;  %3211 = vrot.lane.b32.xlu0 %v12024_v22, %s10840_s30 }
 0x2ae   : > { %3193 = vrot.lane.b32.xlu1 %v12010_v60, %s10833_s24 }
 0x2af   : > { %v3293_v51 = vmul.f32 %v3287_v53, %v3269_v17  ;;  %v3272_v54 = vmax.f32 %v3266_v26, 0.0 }
 0x2b1   : > { %3299 = vst.msk [vmem:[#allocation3 + $0x1f0] sm:$0xff] %vm2776_vm7, %v3293_v51  ;;  %v12087_v19 = vmul.f32 %v3287_v53, %v3272_v54  ;;  %3145 = vrot.lane.b32.xlu0 %v12030_v35, %s10838_s28 }
 0x2b2   : > { %3137 = vrot.lane.b32.xlu1 %v12013_v31, %s10838_s28 }
 0x2b3   : > { %3302 = vst.msk [vmem:[#allocation3 + $0x208] sm:$0xff] %vm2776_vm7, %v12087_v19 }
 0x2b5   : > { %3181 = vrot.lane.b32.xlu0 %v12030_v35, %s10834_s25 }
 0x2b6   : > { %3173 = vrot.lane.b32.xlu1 %v12013_v31, %s10834_s25 }
 0x2b9   : > { %3217 = vrot.lane.b32.xlu0 %v12030_v35, %s10840_s30 }
 0x2ba   : > { %3209 = vrot.lane.b32.xlu1 %v12013_v31, %s10840_s30 }
 0x2bc   : > { %v2788_v59 = vpop.permute.xlu1 %2787 }
 0x2bd   : > { %3141 = vrot.lane.b32.xlu0 %v12015_v9, %s10838_s28 }
 0x2be   : > { %3143 = vrot.lane.b32.xlu1 %v12022_v13, %s10838_s28 }
 0x2c0   : > { %v2824_v45 = vpop.permute.xlu1 %2823 }
 0x2c1   : > { %3177 = vrot.lane.b32.xlu0 %v12015_v9, %s10834_s25 }
 0x2c2   : > { %3179 = vrot.lane.b32.xlu1 %v12022_v13, %s10834_s25 }
 0x2c3   : > { %v2792_v22 = vpop.permute.xlu0 %2791 }
 0x2c4   : > { %v2860_v52 = vpop.permute.xlu1 %2859 }
 0x2c5   : > { %3159 = vrot.lane.b32.xlu0 %v12015_v9, %s10839_s29 }
 0x2c6   : > { %3215 = vrot.lane.b32.xlu1 %v12022_v13, %s10840_s30 }
 0x2c7   : > { %v2828_v35 = vpop.permute.xlu0 %2827 }
 0x2c8   : > { %v2810_v55 = vpop.permute.xlu1 %2809 }
 0x2c9   : > { %3213 = vrot.lane.b32.xlu0 %v12015_v9, %s10840_s30  ;;  %v2815_v56 = vsel %vm14668_vm8, %v2792_v22, %v2810_v55  ;;  %vm14679_vm8 = vmmov %vm14673_vm0 }
 0x2ca   : > { %2819 = vst.msk [vmem:[#allocation3 + $0x40] sm:$0xff] %vm2776_vm7, %v2815_v56  ;;  %3309 = vrot.lane.b32.xlu1 %v12072_v5, %s10838_s28 }
 0x2cb   : > { %v12119_v36 = vpop.permute.xlu0 %2863 }
 0x2cc   : > { %v2846_v48 = vpop.permute.xlu1 %2845 }
 0x2cd   : > { %3195 = vrot.lane.b32.xlu0 %v12015_v9, %s10833_s24  ;;  %v2851_v39 = vsel %vm563_vm10, %v2828_v35, %v2846_v48 }
 0x2ce   : > { %2855 = vst.msk [vmem:[#allocation3 + $0xd0] sm:$0xff] %vm2776_vm7, %v2851_v39  ;;  %3345 = vrot.lane.b32.xlu1 %v12072_v5, %s10834_s25 }
 0x2cf   : > { %v2798_v57 = vpop.permute.xlu0 %2797 }
 0x2d0   : > { %v2790_v15 = vpop.permute.xlu1 %2789 }
 0x2d1   : > { %3313 = vrot.lane.b32.xlu0 %v3293_v51, %s10838_s28  ;;  %v2799_v40 = vsel %vm14669_vm9, %v2788_v59, %v2790_v15  ;;  %v2800_v6 = vsel %vm14670_vm11, %v2790_v15, %v2792_v22  ;;  %vm14680_vm9 = vmmov %vm14673_vm0 }
 0x2d2   : > { %3331 = vrot.lane.b32.xlu1 %v12072_v5, %s10839_s29  ;;  %vm14681_vm11 = vmmov %vm14675_vm2 }
 0x2d3   : > { %v2834_v16 = vpop.permute.xlu0 %2833 }
 0x2d4   : > { %v2826_v24 = vpop.permute.xlu1 %2825 }
 0x2d5   : > { %3349 = vrot.lane.b32.xlu0 %v3293_v51, %s10834_s25  ;;  %v12140_v4 = vsel %vm1618_vm13, %v2824_v45, %v2826_v24  ;;  %v12143_v11 = vsel %vm1618_vm13, %v2826_v24, %v2828_v35 }
 0x2d6   : > { %3381 = vrot.lane.b32.xlu1 %v12072_v5, %s10840_s30 }
 0x2d7   : > { %v12137_v42 = vpop.permute.xlu0 %2869 }
 0x2d8   : > { %v2862_v8 = vpop.permute.xlu1 %2861 }
 0x2d9   : > { %3385 = vrot.lane.b32.xlu0 %v3293_v51, %s10840_s30  ;;  %v12149_v21 = vsel %vm1741_vm14, %v2860_v52, %v2862_v8  ;;  %v12153_v61 = vsel %vm1741_vm14, %v2862_v8, %v12119_v36 }
 0x2da   : > { %3311 = vrot.lane.b32.xlu1 %v12075_v44, %s10838_s28 }
 0x2db   : > { %v2794_v14 = vpop.permute.xlu0 %2793 }
 0x2dc   : > { %v2796_v50 = vpop.permute.xlu1 %2795 }
 0x2dd   : > { %3319 = vrot.lane.b32.xlu0 %v12087_v19, %s10838_s28  ;;  %v2801_v25 = vsel %vm14671_vm12, %v2794_v14, %v2796_v50  ;;  %v2802_v28 = vsel %vm14672_vm15, %v2796_v50, %v2798_v57  ;;  %v3903_v50 = vld [vmem:[%s14631_s5] sm:$0xff]  ;;  %vm14682_vm12 = vmmov %vm14675_vm2 }
 0x2de   : > { %v3533_v3 = vpack.c.bf16 %v2802_v28, %v2800_v6  ;;  %v3532_v20 = vpack.c.bf16 %v2801_v25, %v2799_v40  ;;  %3347 = vrot.lane.b32.xlu1 %v12075_v44, %s10834_s25  ;;  %vm14683_vm15 = vmmov %vm14675_vm2 }
 0x2df   : > { %v2830_v27 = vpop.permute.xlu0 %2829 }
 0x2e0   : > { %v2832_v38 = vpop.permute.xlu1 %2831  ;;  %3659 = vmatprep.subr.bf16.mxu0 %v3533_v3 }
 0x2e1   : > { %3355 = vrot.lane.b32.xlu0 %v12087_v19, %s10834_s25  ;;  %v12166_v23 = vsel %vm1618_vm13, %v2830_v27, %v2832_v38  ;;  %v12169_v30 = vsel %vm1618_vm13, %v2832_v38, %v2834_v16  ;;  %3660 = vmatpush1.bf16.msra.mxu0 %v3532_v20 }
 0x2e2   : > { %3661 = vmatprep.subr.bf16.mxu0 %v3536_v43  ;;  %3383 = vrot.lane.b32.xlu1 %v12075_v44, %s10840_s30  ;;  %v3542_v25 = vpack.c.bf16 %v12169_v30, %v12143_v11  ;;  %v3541_v20 = vpack.c.bf16 %v12166_v23, %v12140_v4  ;;  %v3905_v11 = vld [vmem:[%s14631_s5 + $0x10] sm:$0xff]  ;;  %v3906_v4 = vld [vmem:[%s14631_s5 + $0x18] sm:$0xff] }
 0x2e3   : > { %v2866_v46 = vpop.permute.xlu0 %2865 }
 0x2e4   : > { %v2868_v53 = vpop.permute.xlu1 %2867 }
 0x2e5   : > { %3391 = vrot.lane.b32.xlu0 %v12087_v19, %s10840_s30  ;;  %v12182_v41 = vsel %vm1741_vm14, %v2866_v46, %v2868_v53  ;;  %v12186_v1 = vsel %vm1741_vm14, %v2868_v53, %v12137_v42  ;;  %3662 = vmatpush1.bf16.msra.mxu0 %v3535_v32 }
 0x2e6   : > { %3317 = vrot.lane.b32.xlu1 %v12082_v58, %s10838_s28  ;;  %v3545_v38 = vpack.c.bf16 %v12186_v1, %v12153_v61  ;;  %v3544_v23 = vpack.c.bf16 %v12182_v41, %v12149_v21  ;;  %v3553_v41 = vpack.c.bf16 %v12015_v9, %v12010_v60 }
 0x2e7   : > { %v2812_v33 = vpop.permute.xlu0 %2811 }
 0x2e8   : > { %v2816_v34 = vsel %vm14673_vm0, %v2798_v57, %v2812_v33  ;;  %v2962_v49 = vpop.permute.xlu1 %2961  ;;  %vm14684_vm0 = vmmov %vm14675_vm2 }
 0x2e9   : > { %2822 = vst.msk [vmem:[#allocation3 + $0x58] sm:$0xff] %vm2776_vm7, %v2816_v34  ;;  %3315 = vrot.lane.b32.xlu0 %v12077_v62, %s10838_s28 }
 0x2ea   : > { %3229 = vrot.lane.b32.xlu1 %v12010_v60, %s10841_s11 }
 0x2eb   : > { %v2848_v12 = vpop.permute.xlu0 %2847 }
 0x2ec   : > { %v2852_v43 = vsel %vm563_vm10, %v2834_v16, %v2848_v12  ;;  %v2998_v10 = vpop.permute.xlu1 %2997 }
 0x2ed   : > { %2858 = vst.msk [vmem:[#allocation3 + $0xe8] sm:$0xff] %vm2776_vm7, %v2852_v43  ;;  %3351 = vrot.lane.b32.xlu0 %v12077_v62, %s10834_s25 }
 0x2ee   : > { %2881 = vrot.lane.b32.xlu1 %v11905_v63, %s10841_s11 }
 0x2ef   : > { %v2966_v29 = vpop.permute.xlu0 %2965 }
 0x2f0   : > { %v3034_v26 = vpop.permute.xlu1 %3033 }
 0x2f1   : > { %3333 = vrot.lane.b32.xlu0 %v12077_v62, %s10839_s29 }
 0x2f2   : > { %3353 = vrot.lane.b32.xlu1 %v12082_v58, %s10834_s25 }
 0x2f3   : > { %v12206_v17 = vpop.permute.xlu0 %3001 }
 0x2f4   : > { %v2984_v54 = vpop.permute.xlu1 %2983 }
 0x2f5   : > { %3387 = vrot.lane.b32.xlu0 %v12077_v62, %s10840_s30  ;;  %v2989_v19 = vsel %vm14674_vm1, %v2966_v29, %v2984_v54 }
 0x2f6   : > { %2993 = vst.msk [vmem:[#allocation3 + $0xa0] sm:$0xff] %vm2776_vm7, %v2989_v19  ;;  %3389 = vrot.lane.b32.xlu1 %v12082_v58, %s10840_s30 }
 0x2f7   : > { %v12212_v51 = vpop.permute.xlu0 %3037 }
 0x2f8   : > { %v2964_v59 = vpop.permute.xlu1 %2963 }
 0x2f9   : > { %3231 = vrot.lane.b32.xlu0 %v12015_v9, %s10841_s11  ;;  %v2973_v22 = vsel %vm14675_vm2, %v2962_v49, %v2964_v59  ;;  %v2974_v45 = vsel %vm14676_vm3, %v2964_v59, %v2966_v29  ;;  %vm14685_vm2 = vmmov %vm14674_vm1 }
 0x2fa   : > { %3367 = vrot.lane.b32.xlu1 %v12072_v5, %s10833_s24  ;;  %vm14686_vm3 = vmmov %vm14684_vm0 }
 0x2fb   : > { %v2972_v63 = vpop.permute.xlu0 %2971 }
 0x2fc   : > { %v3000_v52 = vpop.permute.xlu1 %2999 }
 0x2fd   : > { %2883 = vrot.lane.b32.xlu0 %v11909_v47, %s10841_s11  ;;  %v3009_v55 = vsel %vm1618_vm13, %v2998_v10, %v3000_v52  ;;  %v3010_v56 = vsel %vm1618_vm13, %v3000_v52, %v12206_v17 }
 0x2fe   : > { %3019 = vrot.lane.b32.xlu1 %v11954_v37, %s10833_s24 }
 0x2ff   : > { %v12226_v35 = vpop.permute.xlu0 %3007 }
 0x300   : > { %v3036_v47 = vpop.permute.xlu1 %3035 }
 0x301   : > { %3369 = vrot.lane.b32.xlu0 %v12077_v62, %s10833_s24  ;;  %v3045_v48 = vsel %vm1741_vm14, %v3034_v26, %v3036_v47  ;;  %v3046_v39 = vsel %vm1741_vm14, %v3036_v47, %v12212_v51 }
 0x302   : > { %3403 = vrot.lane.b32.xlu1 %v12072_v5, %s10841_s11 }
 0x303   : > { %v12235_v57 = vpop.permute.xlu0 %3043 }
 0x304   : > { %v2970_v15 = vpop.permute.xlu1 %2969 }
 0x305   : > { %3021 = vrot.lane.b32.xlu0 %v11959_v0, %s10833_s24  ;;  %v2976_v6 = vsel %vm14678_vm5, %v2970_v15, %v2972_v63  ;;  %vm14688_vm5 = vmmov %vm14684_vm0 }
 0x306   : > { %v3539_v24 = vpack.c.bf16 %v2976_v6, %v2974_v45  ;;  %3055 = vrot.lane.b32.xlu1 %v11954_v37, %s10841_s11  ;;  %v3904_v37 = vld [vmem:[%s14631_s5 + $0x8] sm:$0xff] }
 0x307   : > { %v2968_v16 = vpop.permute.xlu0 %2967 }
 0x308   : > { %v2975_v40 = vsel %vm14677_vm4, %v2968_v16, %v2970_v15  ;;  %v3006_v27 = vpop.permute.xlu1 %3005  ;;  %3663 = vmatprep.subr.bf16.mxu0 %v3539_v24  ;;  %vm14687_vm4 = vmmov %vm14684_vm0 }
 0x309   : > { %3405 = vrot.lane.b32.xlu0 %v12077_v62, %s10841_s11  ;;  %v3538_v8 = vpack.c.bf16 %v2975_v40, %v2973_v22  ;;  %v3012_v3 = vsel %vm1618_vm13, %v3006_v27, %v12226_v35 }
 0x30a   : > { %3909 = vperm.xlu1 %10712, %v3903_v50   ;;  %v3548_v53 = vpack.c.bf16 %v3012_v3, %v3010_v56  ;;  %v3560_v50 = vpack.c.bf16 %v12082_v58, %v12075_v44 }
 0x30b   : > { %v3004_v14 = vpop.permute.xlu0 %3003  ;;  %3664 = vmatpush1.bf16.msra.mxu0 %v3538_v8 }
 0x30c   : > { %v3011_v28 = vsel %vm1618_vm13, %v3004_v14, %v3006_v27  ;;  %3665 = vmatprep.subr.bf16.mxu0 %v3542_v25  ;;  %v3042_v30 = vpop.permute.xlu1 %3041 }
 0x30d   : > { %3057 = vrot.lane.b32.xlu0 %v11959_v0, %s10841_s11  ;;  %v3048_v32 = vsel %vm1741_vm14, %v3042_v30, %v12235_v57  ;;  %v3547_v1 = vpack.c.bf16 %v3011_v28, %v3009_v55 }
 0x30e   : > { %3919 = vperm.xlu1 %10712, %v3905_v11   ;;  %v3551_v49 = vpack.c.bf16 %v3048_v32, %v3046_v39  ;;  %v3444_v11 = vld [vmem:[#allocation3 + $0x58] sm:$0xff] }
 0x30f   : > { %v3040_v46 = vpop.permute.xlu0 %3039  ;;  %3666 = vmatpush1.bf16.msra.mxu0 %v3541_v20 }
 0x310   : > { %v3047_v0 = vsel %vm1741_vm14, %v3040_v46, %v3042_v30  ;;  %3667 = vmatprep.subr.bf16.mxu0 %v3545_v38  ;;  %v3136_v34 = vpop.permute.xlu1 %3135 }
 0x311   : > { %3914 = vperm.xlu0 %10711, %v3904_v37   ;;  %v3550_v29 = vpack.c.bf16 %v3047_v0, %v3045_v48  ;;  %v3559_v37 = vpack.c.bf16 %v12077_v62, %v12072_v5  ;;  %v3441_v62 = vld [vmem:[#allocation3 + $0x40] sm:$0xff] }
 0x313   : > { %v2986_v33 = vpop.permute.xlu0 %2985  ;;  %3668 = vmatpush1.bf16.msra.mxu0 %v3544_v23  ;;  %v3534_v23 = vpack.c.bf16 %v3444_v11, %v3441_v62 }
 0x314   : > { %v2990_v61 = vsel %vm14679_vm8, %v2972_v63, %v2986_v33  ;;  %3669 = vmatprep.subr.bf16.mxu0 %v3548_v53  ;;  %v3172_v43 = vpop.permute.xlu1 %3171  ;;  %v3495_v33 = vld [vmem:[#allocation3 + $0x1f0] sm:$0xff]  ;;  %vm14689_vm8 = vmmov %vm14684_vm0 }
 0x315   : > { %2996 = vst.msk [vmem:[#allocation3 + $0xb8] sm:$0xff] %vm2776_vm7, %v2990_v61  ;;  %3924 = vperm.xlu0 %10711, %v3906_v4   ;;  %v3498_v4 = vld [vmem:[#allocation3 + $0x208] sm:$0xff] }
 0x316   : > { %v3561_v61 = vpack.c.bf16 %v3498_v4, %v3495_v33 }
 0x317   : > { %v3140_v12 = vpop.permute.xlu0 %3139  ;;  %3670 = vmatpush1.bf16.msra.mxu0 %v3547_v1 }
 0x318   : > { %3671 = vmatprep.subr.bf16.mxu0 %v3551_v49  ;;  %v3158_v7 = vpop.permute.xlu1 %3157 }
 0x319   : > { %v3163_v21 = vsel %vm14680_vm9, %v3140_v12, %v3158_v7  ;;  %vm14690_vm9 = vmmov %vm14674_vm1 }
 0x31a   : > { %3167 = vst.msk [vmem:[#allocation3 + $0x1c0] sm:$0xff] %vm2776_vm7, %v3163_v21 }
 0x31b   : > { %v3176_v10 = vpop.permute.xlu0 %3175  ;;  %3672 = vmatpush1.bf16.msra.mxu0 %v3550_v29 }
 0x31c   : > { %3673 = vmatprep.subr.bf16.mxu0 %v3554_v2  ;;  %v3208_v54 = vpop.permute.xlu1 %3207 }
 0x31f   : > { %v12287_v26 = vpop.permute.xlu0 %3211  ;;  %3674 = vmatpush1.bf16.msra.mxu0 %v3553_v41 }
 0x320   : > { %v3194_v63 = vpop.permute.xlu1 %3193 }
 0x321   : > { %v3199_v59 = vsel %vm563_vm10, %v3176_v10, %v3194_v63  ;;  %v3489_v0 = vld [vmem:[#allocation3 + $0x1c0] sm:$0xff] }
 0x322   : > { %3203 = vst.msk [vmem:[#allocation3 + $0x250] sm:$0xff] %vm2776_vm7, %v3199_v59 }
 0x323   : > { %v3146_v19 = vpop.permute.xlu0 %3145 }
 0x324   : > { %v3138_v45 = vpop.permute.xlu1 %3137 }
 0x325   : > { %v3147_v31 = vsel %vm14681_vm11, %v3136_v34, %v3138_v45  ;;  %v3148_v13 = vsel %vm14682_vm12, %v3138_v45, %v3140_v12  ;;  %v3450_v34 = vld [vmem:[#allocation3 + $0x88] sm:$0xff]  ;;  %v3447_v12 = vld [vmem:[#allocation3 + $0x70] sm:$0xff] }
 0x326   : > { %v3537_v49 = vpack.c.bf16 %v3450_v34, %v3447_v12 }
 0x327   : > { %v3182_v22 = vpop.permute.xlu0 %3181 }
 0x328   : > { %v3174_v52 = vpop.permute.xlu1 %3173 }
 0x329   : > { %v12296_v60 = vsel %vm1618_vm13, %v3172_v43, %v3174_v52  ;;  %v12299_v9 = vsel %vm1618_vm13, %v3174_v52, %v3176_v10 }
 0x32b   : > { %v12293_v2 = vpop.permute.xlu0 %3217 }
 0x32c   : > { %v3210_v56 = vpop.permute.xlu1 %3209 }
 0x32d   : > { %v12302_v47 = vsel %vm1741_vm14, %v3208_v54, %v3210_v56  ;;  %v12306_v48 = vsel %vm1741_vm14, %v3210_v56, %v12287_v26 }
 0x32f   : > { %v3142_v55 = vpop.permute.xlu0 %3141 }
 0x330   : > { %v3144_v16 = vpop.permute.xlu1 %3143 }
 0x331   : > { %v3149_v15 = vsel %vm14683_vm15, %v3142_v55, %v3144_v16  ;;  %v3150_v40 = vsel %vm14684_vm0, %v3144_v16, %v3146_v19 }
 0x332   : > { %v3557_v6 = vpack.c.bf16 %v3150_v40, %v3148_v13  ;;  %v3556_v24 = vpack.c.bf16 %v3149_v15, %v3147_v31 }
 0x333   : > { %v3178_v39 = vpop.permute.xlu0 %3177 }
 0x334   : > { %v3180_v27 = vpop.permute.xlu1 %3179  ;;  %3675 = vmatprep.subr.bf16.mxu0 %v3557_v6 }
 0x335   : > { %v12315_v25 = vsel %vm1618_vm13, %v3178_v39, %v3180_v27  ;;  %v3186_v28 = vsel %vm1618_vm13, %v3180_v27, %v3182_v22  ;;  %3676 = vmatpush1.bf16.msra.mxu0 %v3556_v24 }
 0x336   : > { %3677 = vmatprep.subr.bf16.mxu0 %v3560_v50  ;;  %v3566_v27 = vpack.c.bf16 %v3186_v28, %v12299_v9 }
 0x337   : > { %v3160_v8 = vpop.permute.xlu0 %3159 }
 0x338   : > { %v3164_v14 = vsel %vm14674_vm1, %v3146_v19, %v3160_v8  ;;  %v3216_v20 = vpop.permute.xlu1 %3215 }
 0x339   : > { %3170 = vst.msk [vmem:[#allocation3 + $0x1d8] sm:$0xff] %vm2776_vm7, %v3164_v14  ;;  %v12325_v44 = vsel %vm1741_vm14, %v3216_v20, %v12293_v2  ;;  %3678 = vmatpush1.bf16.msra.mxu0 %v3559_v37  ;;  %v3565_v37 = vpack.c.bf16 %v12315_v25, %v12296_v60 }
 0x33a   : > { %v3569_v11 = vpack.c.bf16 %v12325_v44, %v12306_v48 }
 0x33b   : > { %v3214_v3 = vpop.permute.xlu0 %3213 }
 0x33c   : > { %v12321_v46 = vsel %vm1741_vm14, %v3214_v3, %v3216_v20  ;;  %v3310_v30 = vpop.permute.xlu1 %3309 }
 0x33d   : > { %v3568_v28 = vpack.c.bf16 %v12321_v46, %v12302_v47 }
 0x33f   : > { %v3196_v58 = vpop.permute.xlu0 %3195 }
 0x340   : > { %v3200_v38 = vsel %vm563_vm10, %v3182_v22, %v3196_v58  ;;  %v3492_v32 = vld [vmem:[#allocation3 + $0x1d8] sm:$0xff]  ;;  %v3346_v1 = vpop.permute.xlu1 %3345 }
 0x341   : > { %3206 = vst.msk [vmem:[#allocation3 + $0x268] sm:$0xff] %vm2776_vm7, %v3200_v38  ;;  %v3558_v5 = vpack.c.bf16 %v3492_v32, %v3489_v0  ;;  %v3456_v0 = vld [vmem:[#allocation3 + $0xb8] sm:$0xff]  ;;  %v3974_v32 = vld [vmem:[%s14632_s6 + $0x88] sm:$0xff] }
 0x343   : > { %10091 = vmatprep.subr.bf16.mxu1 %v3558_v5  ;;  %v3314_v53 = vpop.permute.xlu0 %3313 }
 0x344   : > { %10092 = vmatpush3.bf16.msra.mxu1 %v3534_v23  ;;  %v3332_v29 = vpop.permute.xlu1 %3331 }
 0x345   : > { %10093 = vmatprep.subr.bf16.mxu1 %v3561_v61  ;;  %v3337_v10 = vsel %vm14685_vm2, %v3314_v53, %v3332_v29  ;;  %v3453_v61 = vld [vmem:[#allocation3 + $0xa0] sm:$0xff] }
 0x346   : > { %3341 = vst.msk [vmem:[#allocation3 + $0x220] sm:$0xff] %vm2776_vm7, %v3337_v10  ;;  %v3540_v34 = vpack.c.bf16 %v3456_v0, %v3453_v61 }
 0x347   : > { %v12329_v43 = vpop.permute.xlu0 %3349 }
 0x348   : > { %10094 = vmatpush3.bf16.msra.mxu1 %v3537_v49  ;;  %v3382_v21 = vpop.permute.xlu1 %3381  ;;  %v3510_v62 = vld [vmem:[#allocation3 + $0x268] sm:$0xff] }
 0x34b   : > { %v12333_v7 = vpop.permute.xlu0 %3385 }
 0x34c   : > { %v3312_v54 = vpop.permute.xlu1 %3311 }
 0x34d   : > { %v3321_v19 = vsel %vm14686_vm3, %v3310_v30, %v3312_v54  ;;  %v3322_v63 = vsel %vm14687_vm4, %v3312_v54, %v3314_v53  ;;  %v3501_v4 = vld [vmem:[#allocation3 + $0x220] sm:$0xff]  ;;  %v4006_v54 = vld [vmem:[%s14632_s6 + $0x188] sm:$0xff] }
 0x34f   : > { %v3320_v41 = vpop.permute.xlu0 %3319 }
 0x350   : > { %v3348_v22 = vpop.permute.xlu1 %3347 }
 0x351   : > { %v3357_v45 = vsel %vm1618_vm13, %v3346_v1, %v3348_v22  ;;  %v3358_v31 = vsel %vm1618_vm13, %v3348_v22, %v12329_v43  ;;  %v3507_v1 = vld [vmem:[#allocation3 + $0x250] sm:$0xff]  ;;  %v12396_v22 = vld [vmem:[%s14630_s4] ss:$8 sps:$4 sm:$0xff]  }
 0x352   : > { %v3567_v10 = vpack.c.bf16 %v3510_v62, %v3507_v1  ;;  %v4134_v62 = vld [vmem:[%s14632_s6 + $0x588] sm:$0xff] }
 0x353   : > { %v12337_v59 = vpop.permute.xlu0 %3355 }
 0x354   : > { %v3384_v52 = vpop.permute.xlu1 %3383 }
 0x355   : > { %v12345_v55 = vsel %vm1741_vm14, %v3382_v21, %v3384_v52  ;;  %v12349_v56 = vsel %vm1741_vm14, %v3384_v52, %v12333_v7  ;;  %v3462_v21 = vld [vmem:[#allocation3 + $0xe8] sm:$0xff] }
 0x357   : > { %v12342_v13 = vpop.permute.xlu0 %3391 }
 0x358   : > { %v3318_v16 = vpop.permute.xlu1 %3317 }
 0x359   : > { %v3324_v40 = vsel %vm14689_vm8, %v3318_v16, %v3320_v41 }
 0x35a   : > { %v3563_v6 = vpack.c.bf16 %v3324_v40, %v3322_v63 }
 0x35b   : > { %v3316_v39 = vpop.permute.xlu0 %3315 }
 0x35c   : > { %v3323_v15 = vsel %vm14688_vm5, %v3316_v39, %v3318_v16  ;;  %v3230_v14 = vpop.permute.xlu1 %3229  ;;  %3679 = vmatprep.subr.bf16.mxu0 %v3563_v6  ;;  %v4022_v16 = vld [vmem:[%s14632_s6 + $0x208] sm:$0xff] }
 0x35d   : > { %v3562_v24 = vpack.c.bf16 %v3323_v15, %v3321_v19  ;;  %v3235_v50 = vsel %vm1748_vm6, %v12287_v26, %v3230_v14 }
 0x35e   : > { %3239 = vst.msk [vmem:[#allocation3 + $0x280] sm:$0xff] %vm2776_vm7, %v3235_v50 }
 0x35f   : > { %v3352_v8 = vpop.permute.xlu0 %3351  ;;  %3680 = vmatpush1.bf16.msra.mxu0 %v3562_v24 }
 0x360   : > { %3681 = vmatprep.subr.bf16.mxu0 %v3566_v27  ;;  %v2882_v58 = vpop.permute.xlu1 %2881 }
 0x361   : > { %v2887_v9 = vsel %vm1748_vm6, %v12119_v36, %v2882_v58  ;;  %v3958_v36 = vld [vmem:[%s14632_s6 + $0x8] sm:$0xff] }
 0x362   : > { %2891 = vst.msk [vmem:[#allocation3 + $0x100] sm:$0xff] %vm2776_vm7, %v2887_v9  ;;  %v9450_v49 = vcombine.high %v3958_v36, %v3974_v32  ;;  %v9449_v52 = vcombine.low %v3958_v36, %v3974_v32  ;;  %v12432_v9 = vld [vmem:[%s14630_s4 + $0x10] ss:$8 sps:$4 sm:$0xff]  }
 0x363   : > { %v3334_v3 = vpop.permute.xlu0 %3333  ;;  %3682 = vmatpush1.bf16.msra.mxu0 %v3565_v37  ;;  %v4070_v37 = vld [vmem:[%s14632_s6 + $0x388] sm:$0xff] }
 0x364   : > { %v3338_v20 = vsel %vm14690_vm9, %v3320_v41, %v3334_v3  ;;  %3683 = vmatprep.subr.bf16.mxu0 %v3569_v11  ;;  %v3354_v60 = vpop.permute.xlu1 %3353  ;;  %v3990_v41 = vld [vmem:[%s14632_s6 + $0x108] sm:$0xff] }
 0x365   : > { %3344 = vst.msk [vmem:[#allocation3 + $0x238] sm:$0xff] %vm2776_vm7, %v3338_v20  ;;  %v3359_v25 = vsel %vm1618_vm13, %v3352_v8, %v3354_v60  ;;  %v3360_v38 = vsel %vm1618_vm13, %v3354_v60, %v12337_v59  ;;  %v3513_v6 = vld [vmem:[#allocation3 + $0x280] sm:$0xff]  ;;  %v9481_v27 = vcombine.low %v3990_v41, %v4006_v54  ;;  %v4054_v3 = vld [vmem:[%s14632_s6 + $0x308] sm:$0xff] }
 0x366   : > { %v3572_v48 = vpack.c.bf16 %v3360_v38, %v3358_v31  ;;  %v3571_v44 = vpack.c.bf16 %v3359_v25, %v3357_v45  ;;  %v3459_v31 = vld [vmem:[#allocation3 + $0xd0] sm:$0xff]  ;;  %v12440_v60 = vld [vmem:[%s14630_s4 + $0x24] ss:$8 sps:$4 sm:$0xff]   ;;  %v9546_v25 = vcombine.high %v4054_v3, %v4070_v37 }
 0x367   : > { %v3388_v26 = vpop.permute.xlu0 %3387  ;;  %3684 = vmatpush1.bf16.msra.mxu0 %v3568_v28 }
 0x368   : > { %v3390_v46 = vpop.permute.xlu1 %3389  ;;  %3685 = vmatprep.subr.bf16.mxu0 %v3572_v48  ;;  %v4086_v48 = vld [vmem:[%s14632_s6 + $0x408] sm:$0xff] }
 0x369   : > { %v3395_v23 = vsel %vm1741_vm14, %v3388_v26, %v3390_v46  ;;  %v3396_v33 = vsel %vm1741_vm14, %v3390_v46, %v12342_v13  ;;  %v3465_v58 = vld [vmem:[#allocation3 + $0x100] sm:$0xff]  ;;  %v9545_v46 = vcombine.low %v4054_v3, %v4070_v37  ;;  %vm9249_vm14 = vcmask 0  }
 0x36a   : > { %v3575_v12 = vpack.c.bf16 %v3396_v33, %v12349_v56  ;;  %v9482_v56 = vcombine.high %v3990_v41, %v4006_v54  ;;  %v3973_v41 = vld [vmem:[%s14632_s6 + $0x80] sm:$0xff] }
 0x36b   : > { %v3232_v30 = vpop.permute.xlu0 %3231  ;;  %3686 = vmatpush1.bf16.msra.mxu0 %v3571_v44  ;;  %v4085_v37 = vld [vmem:[%s14632_s6 + $0x400] sm:$0xff] }
 0x36c   : > { %v3236_v47 = vsel %vm1748_vm6, %v12293_v2, %v3232_v30  ;;  %v3504_v5 = vld [vmem:[#allocation3 + $0x238] sm:$0xff]  ;;  %v3574_v2 = vpack.c.bf16 %v3395_v23, %v12345_v55  ;;  %v3368_v63 = vpop.permute.xlu1 %3367  ;;  %3687 = vmatprep.subr.bf16.mxu0 %v3575_v12  ;;  %v3543_v55 = vpack.c.bf16 %v3462_v21, %v3459_v31  ;;  %v3957_v21 = vld [vmem:[%s14632_s6] sm:$0xff] }
 0x36d   : > { %3242 = vst.msk [vmem:[#allocation3 + $0x298] sm:$0xff] %vm2776_vm7, %v3236_v47  ;;  %v3564_v53 = vpack.c.bf16 %v3504_v5, %v3501_v4  ;;  %v3373_v45 = vsel %vm563_vm10, %v12329_v43, %v3368_v63  ;;  %v4038_v43 = vld [vmem:[%s14632_s6 + $0x288] sm:$0xff]  ;;  %v12493_v31 = vld [vmem:[%s14630_s4 + $0x30] ss:$8 sps:$4 sm:$0xff]  }
 0x36e   : > { %3377 = vst.msk [vmem:[#allocation3 + $0x2b0] sm:$0xff] %vm2776_vm7, %v3373_v45  ;;  %v4118_v5 = vld [vmem:[%s14632_s6 + $0x508] sm:$0xff] }
 0x36f   : > { %10095 = vmatprep.subr.bf16.mxu1 %v3564_v53  ;;  %v2884_v29 = vpop.permute.xlu0 %2883  ;;  %3688 = vmatpush1.bf16.msra.mxu0 %v3574_v2  ;;  %v12468_v53 = vld [vmem:[%s14630_s4 + $0x20] ss:$8 sps:$4 sm:$0xff]   ;;  %v9610_v12 = vcombine.high %v4118_v5, %v4134_v62  ;;  %v9609_v54 = vcombine.low %v4118_v5, %v4134_v62 }
 0x370   : > { %v2888_v19 = vsel %vm1748_vm6, %v12137_v42, %v2884_v29  ;;  %10096 = vmatpush3.bf16.msra.mxu1 %v3540_v34  ;;  %v12404_v42 = vld [vmem:[%s14630_s4 + $0x14] ss:$8 sps:$4 sm:$0xff]   ;;  %7708 = vmatprep.subr.bf16.mxu0 %v9450_v49  ;;  %v3020_v40 = vpop.permute.xlu1 %3019  ;;  %v4166_v2 = vld [vmem:[%s14632_s6 + $0x688] sm:$0xff] }
 0x371   : > { %2894 = vst.msk [vmem:[#allocation3 + $0x118] sm:$0xff] %vm2776_vm7, %v2888_v19  ;;  %10097 = vmatprep.subr.bf16.mxu1 %v3567_v10  ;;  %v3025_v8 = vsel %vm563_vm10, %v12206_v17, %v3020_v40  ;;  %v12474_v34 = vld [vmem:[%s14630_s4 + $0x34] ss:$8 sps:$4 sm:$0xff]   ;;  %v4198_v5 = vld [vmem:[%s14632_s6 + $0x788] sm:$0xff] }
 0x372   : > { %3690 = vmatmul.mubr.bf16.vlgmr.msra.gmra.mrb[64].mxu0 %v12396_v22  ;;  %3029 = vst.msk [vmem:[#allocation3 + $0x130] sm:$0xff] %vm2776_vm7, %v3025_v8 }
 0x373   : > { %v3370_v39 = vpop.permute.xlu0 %3369  ;;  %3699 = vmatprep.mubr.bf16.mxu0 %v12404_v42  ;;  %7709 = vmatpush1.bf16.msra.mxu0 %v9449_v52  ;;  %v9448_v52 = vcombine.high %v3957_v21, %v3973_v41 }
 0x374   : > { %v3374_v15 = vsel %vm563_vm10, %v12337_v59, %v3370_v39  ;;  %10098 = vmatpush3.bf16.msra.mxu1 %v3543_v55  ;;  %v3516_v24 = vld [vmem:[#allocation3 + $0x298] sm:$0xff]  ;;  %7710 = vmatprep.subr.bf16.mxu0 %v9482_v56  ;;  %v9514_v59 = vcombine.high %v4022_v16, %v4038_v43  ;;  %v3404_v20 = vpop.permute.xlu1 %3403  ;;  %v12498_v56 = vld [vmem:[%s14630_s4 + $0x44] ss:$8 sps:$4 sm:$0xff]  }
 0x375   : > { %3380 = vst.msk [vmem:[#allocation3 + $0x2c8] sm:$0xff] %vm2776_vm7, %v3374_v15  ;;  %v3570_v14 = vpack.c.bf16 %v3516_v24, %v3513_v6  ;;  %v3409_v26 = vsel %vm1748_vm6, %v12333_v7, %v3404_v20  ;;  %v4102_v7 = vld [vmem:[%s14632_s6 + $0x488] sm:$0xff]  ;;  %v3519_v0 = vld [vmem:[#allocation3 + $0x2b0] sm:$0xff]  ;;  %v3989_v39 = vld [vmem:[%s14632_s6 + $0x100] sm:$0xff]  ;;  %v9447_v15 = vcombine.low %v3957_v21, %v3973_v41 }
 0x376   : > { %3413 = vst.msk [vmem:[#allocation3 + $0x2e0] sm:$0xff] %vm2776_vm7, %v3409_v26  ;;  %v9578_v4 = vcombine.high %v4086_v48, %v4102_v7  ;;  %v9577_v1 = vcombine.low %v4086_v48, %v4102_v7  ;;  %v4021_v6 = vld [vmem:[%s14632_s6 + $0x200] sm:$0xff]  ;;  %v4262_v41 = vld [vmem:[%s14632_s6 + $0x988] sm:$0xff] }
 0x377   : > { %v3022_v50 = vpop.permute.xlu0 %3021  ;;  %10099 = vmatprep.subr.bf16.mxu1 %v3570_v14  ;;  %7711 = vmatpush1.bf16.msra.mxu0 %v9481_v27  ;;  %v4037_v24 = vld [vmem:[%s14632_s6 + $0x280] sm:$0xff] }
 0x378   : > { %v3026_v17 = vsel %vm563_vm10, %v12226_v35, %v3022_v50  ;;  %v3468_v11 = vld [vmem:[#allocation3 + $0x118] sm:$0xff]  ;;  %v9513_v35 = vcombine.low %v4022_v16, %v4038_v43  ;;  %7712 = vmatprep.subr.bf16.mxu0 %v9514_v59  ;;  %v3056_v30 = vpop.permute.xlu1 %3055  ;;  %v4005_v16 = vld [vmem:[%s14632_s6 + $0x180] sm:$0xff]  ;;  %v9512_v27 = vcombine.high %v4021_v6, %v4037_v24  ;;  %vm7515_vm10 = vcmask 1040384  }
 0x379   : > { %3032 = vst.msk [vmem:[#allocation3 + $0x148] sm:$0xff] %vm2776_vm7, %v3026_v17  ;;  %v3546_v28 = vpack.c.bf16 %v3468_v11, %v3465_v58  ;;  %v3061_v32 = vsel %vm1748_vm6, %v12212_v51, %v3056_v30  ;;  %v3471_v23 = vld [vmem:[#allocation3 + $0x130] sm:$0xff]  ;;  %v9480_v40 = vcombine.high %v3989_v39, %v4005_v16  ;;  %v9479_v8 = vcombine.low %v3989_v39, %v4005_v16  ;;  %v10775_v14 = vld [vmem:[%s14630_s4 + $0x40] ss:$8 sps:$4 sm:$0xff]   ;;  %v10779_v26 = vld [vmem:[%s14630_s4 + $0x64] ss:$8 sps:$4 sm:$0xff]  }
 0x37a   : > { %3700 = vmatmul.mubr.bf16.gmra.mrb[68].mxu0 %v12432_v9  ;;  %3065 = vst.msk [vmem:[#allocation3 + $0x160] sm:$0xff] %vm2776_vm7, %v3061_v32  ;;  %v10776_v59 = vld [vmem:[%s14630_s4 + $0x54] ss:$8 sps:$4 sm:$0xff]   ;;  %v4053_v50 = vld [vmem:[%s14632_s6 + $0x300] sm:$0xff]  ;;  %v10778_v58 = vld [vmem:[%s14630_s4 + $0x50] ss:$8 sps:$4 sm:$0xff]  }
 0x37b   : > { %v3406_v38 = vpop.permute.xlu0 %3405  ;;  %10100 = vmatpush3.bf16.msra.mxu1 %v3546_v28  ;;  %3709 = vmatprep.mubr.bf16.mxu0 %v12440_v60  ;;  %v4101_v17 = vld [vmem:[%s14632_s6 + $0x480] sm:$0xff]  ;;  %v10782_v30 = vld [vmem:[%s14630_s4 + $0x74] ss:$8 sps:$4 sm:$0xff]  }
 0x37c   : > { %v3410_v44 = vsel %vm1748_vm6, %v12342_v13, %v3406_v38  ;;  %v3522_v36 = vld [vmem:[#allocation3 + $0x2c8] sm:$0xff]  ;;  %7713 = vmatpush1.bf16.msra.mxu0 %v9513_v35  ;;  %v9576_v11 = vcombine.high %v4085_v37, %v4101_v17  ;;  %v4117_v28 = vld [vmem:[%s14632_s6 + $0x500] sm:$0xff] }
 0x37d   : > { %3416 = vst.msk [vmem:[#allocation3 + $0x2f8] sm:$0xff] %vm2776_vm7, %v3410_v44  ;;  %v3573_v47 = vpack.c.bf16 %v3522_v36, %v3519_v0  ;;  %7714 = vmatprep.subr.bf16.mxu0 %v9546_v25  ;;  %v3525_v49 = vld [vmem:[#allocation3 + $0x2e0] sm:$0xff]  ;;  %v10784_v36 = vld [vmem:[%s14630_s4 + $0x70] ss:$8 sps:$4 sm:$0xff]  }
 0x37e   : > { %v4149_v25 = vld [vmem:[%s14632_s6 + $0x600] sm:$0xff] }
 0x37f   : > { %v3058_v13 = vpop.permute.xlu0 %3057  ;;  %10101 = vmatprep.subr.bf16.mxu1 %v3573_v47  ;;  %v4165_v38 = vld [vmem:[%s14632_s6 + $0x680] sm:$0xff] }
 0x380   : > { %v3062_v51 = vsel %vm1748_vm6, %v12235_v57, %v3058_v13  ;;  %v3474_v33 = vld [vmem:[#allocation3 + $0x148] sm:$0xff]  ;;  %7715 = vmatpush1.bf16.msra.mxu0 %v9545_v46  ;;  %v9640_v44 = vcombine.high %v4149_v25, %v4165_v38  ;;  %v9639_v0 = vcombine.low %v4149_v25, %v4165_v38  ;;  %v4181_v32 = vld [vmem:[%s14632_s6 + $0x700] sm:$0xff] }
 0x381   : > { %3068 = vst.msk [vmem:[#allocation3 + $0x178] sm:$0xff] %vm2776_vm7, %v3062_v51  ;;  %v3549_v61 = vpack.c.bf16 %v3474_v33, %v3471_v23  ;;  %7716 = vmatprep.subr.bf16.mxu0 %v9578_v4  ;;  %v4150_v57 = vld [vmem:[%s14632_s6 + $0x608] sm:$0xff]  ;;  %v3477_v63 = vld [vmem:[#allocation3 + $0x160] sm:$0xff] }
 0x382   : > { %3710 = vmatmul.mubr.bf16.gmra.mrb[72].mxu0 %v12468_v53  ;;  %v9642_v19 = vcombine.high %v4150_v57, %v4166_v2  ;;  %v9641_v43 = vcombine.low %v4150_v57, %v4166_v2  ;;  %v10781_v7 = vld [vmem:[%s14630_s4 + $0x60] ss:$8 sps:$4 sm:$0xff]  }
 0x383   : > { %10102 = vmatpush3.bf16.msra.mxu1 %v3549_v61  ;;  %3719 = vmatprep.mubr.bf16.mxu0 %v12474_v34  ;;  %v4197_v47 = vld [vmem:[%s14632_s6 + $0x780] sm:$0xff]  ;;  %v4182_v46 = vld [vmem:[%s14632_s6 + $0x708] sm:$0xff] }
 0x384   : > { %v3528_v29 = vld [vmem:[#allocation3 + $0x2f8] sm:$0xff]  ;;  %7717 = vmatpush1.bf16.msra.mxu0 %v9577_v1  ;;  %v9671_v4 = vcombine.low %v4181_v32, %v4197_v47  ;;  %v9672_v13 = vcombine.high %v4181_v32, %v4197_v47  ;;  %v9673_v62 = vcombine.low %v4182_v46, %v4198_v5  ;;  %v9674_v51 = vcombine.high %v4182_v46, %v4198_v5  ;;  %v4213_v23 = vld [vmem:[%s14632_s6 + $0x800] sm:$0xff]  ;;  %v4230_v1 = vld [vmem:[%s14632_s6 + $0x888] sm:$0xff] }
 0x385   : > { %v3576_v10 = vpack.c.bf16 %v3528_v29, %v3525_v49  ;;  %7718 = vmatprep.subr.bf16.mxu0 %v9610_v12  ;;  %v4229_v33 = vld [vmem:[%s14632_s6 + $0x880] sm:$0xff]  ;;  %v4246_v29 = vld [vmem:[%s14632_s6 + $0x908] sm:$0xff] }
 0x386   : > { %v9703_v61 = vcombine.low %v4213_v23, %v4229_v33  ;;  %v4245_v2 = vld [vmem:[%s14632_s6 + $0x900] sm:$0xff]  ;;  %v4454_v5 = vld [vmem:[%s14632_s6 + $0xf88] sm:$0xff] }
 0x387   : > { %10103 = vmatprep.subr.bf16.mxu1 %v3576_v10  ;;  %v4261_v49 = vld [vmem:[%s14632_s6 + $0x980] sm:$0xff] }
 0x388   : > { %v3480_v45 = vld [vmem:[#allocation3 + $0x178] sm:$0xff]  ;;  %7719 = vmatpush1.bf16.msra.mxu0 %v9609_v54  ;;  %v9735_v10 = vcombine.low %v4245_v2, %v4261_v49  ;;  %v9736_v21 = vcombine.high %v4245_v2, %v4261_v49  ;;  %v9737_v54 = vcombine.low %v4246_v29, %v4262_v41  ;;  %v4405_v38 = vld [vmem:[%s14632_s6 + $0xe00] sm:$0xff] }
 0x389   : > { %v3552_v55 = vpack.c.bf16 %v3480_v45, %v3477_v63  ;;  %7720 = vmatprep.subr.bf16.mxu0 %v9642_v19  ;;  %v9738_v19 = vcombine.high %v4246_v29, %v4262_v41  ;;  %v4277_v63 = vld [vmem:[%s14632_s6 + $0xa00] sm:$0xff] }
 0x38a   : > { %3720 = vmatmul.mubr.bf16.gmra.mrb[76].mxu0 %v12493_v31  ;;  %v4293_v45 = vld [vmem:[%s14632_s6 + $0xa80] sm:$0xff] }
 0x38b   : > { %10104 = vmatpush3.bf16.msra.mxu1 %v3552_v55  ;;  %3729 = vmatprep.mubr.bf16.mxu0 %v12498_v56  ;;  %v9768_v55 = vcombine.high %v4277_v63, %v4293_v45  ;;  %v4437_v47 = vld [vmem:[%s14632_s6 + $0xf00] sm:$0xff] }
 0x38c   : > { %7614 = vmatprep.subr.bf16.mxu1 %v9448_v52  ;;  %7721 = vmatpush1.bf16.msra.mxu0 %v9641_v43  ;;  %v9767_v52 = vcombine.low %v4277_v63, %v4293_v45  ;;  %v4309_v43 = vld [vmem:[%s14632_s6 + $0xb00] sm:$0xff] }
 0x38d   : > { %7722 = vmatprep.subr.bf16.mxu0 %v9674_v51  ;;  %v4453_v46 = vld [vmem:[%s14632_s6 + $0xf80] sm:$0xff] }
 0x38e   : > { %3803 = vmatmul.mubr.bf16.vlgmr.msra.gmra.mrb[64].mxu1 %v12396_v22  ;;  %v4069_v22 = vld [vmem:[%s14632_s6 + $0x380] sm:$0xff] }
 0x38f   : > { %3810 = vmatprep.mubr.bf16.mxu1 %v12404_v42  ;;  %7615 = vmatpush1.bf16.msra.mxu1 %v9447_v15  ;;  %v9511_v42 = vcombine.low %v4021_v6, %v4037_v24  ;;  %v9544_v3 = vcombine.high %v4053_v50, %v4069_v22  ;;  %v9543_v20 = vcombine.low %v4053_v50, %v4069_v22  ;;  %v4325_v15 = vld [vmem:[%s14632_s6 + $0xb80] sm:$0xff]  ;;  %v4342_v22 = vld [vmem:[%s14632_s6 + $0xc08] sm:$0xff] }
 0x390   : > { %7616 = vmatprep.subr.bf16.mxu1 %v9480_v40  ;;  %7723 = vmatpush1.bf16.msra.mxu0 %v9673_v62  ;;  %v4310_v40 = vld [vmem:[%s14632_s6 + $0xb08] sm:$0xff]  ;;  %v9799_v6 = vcombine.low %v4309_v43, %v4325_v15  ;;  %v9800_v24 = vcombine.high %v4309_v43, %v4325_v15  ;;  %v4357_v50 = vld [vmem:[%s14632_s6 + $0xc80] sm:$0xff]  ;;  %v9927_v62 = vcombine.low %v4437_v47, %v4453_v46 }
 0x392   : > { %3730 = vmatmul.mubr.bf16.gmra.mrb[80].mxu0 %v10775_v14 }
 0x393   : > { %7617 = vmatpush1.bf16.msra.mxu1 %v9479_v8  ;;  %3739 = vmatprep.mubr.bf16.mxu0 %v10776_v59  ;;  %v4326_v8 = vld [vmem:[%s14632_s6 + $0xb88] sm:$0xff] }
 0x394   : > { %7618 = vmatprep.subr.bf16.mxu1 %v9512_v27  ;;  %v9802_v27 = vcombine.high %v4310_v40, %v4326_v8 }
 0x396   : > { %3811 = vmatmul.mubr.bf16.gmra.mrb[68].mxu1 %v12432_v9  ;;  %v4133_v9 = vld [vmem:[%s14632_s6 + $0x580] sm:$0xff] }
 0x397   : > { %3818 = vmatprep.mubr.bf16.mxu1 %v12440_v60  ;;  %7619 = vmatpush1.bf16.msra.mxu1 %v9511_v42  ;;  %v9575_v60 = vcombine.low %v4085_v37, %v4101_v17  ;;  %v9608_v35 = vcombine.high %v4117_v28, %v4133_v9  ;;  %v9607_v48 = vcombine.low %v4117_v28, %v4133_v9  ;;  %v4358_v37 = vld [vmem:[%s14632_s6 + $0xc88] sm:$0xff] }
 0x398   : > { %7620 = vmatprep.subr.bf16.mxu1 %v9544_v3  ;;  %v9833_v17 = vcombine.low %v4342_v22, %v4358_v37  ;;  %v4390_v9 = vld [vmem:[%s14632_s6 + $0xd88] sm:$0xff] }
 0x39a   : > { %3740 = vmatmul.mubr.bf16.gmra.mrb[84].mxu0 %v10778_v58 }
 0x39b   : > { %7621 = vmatpush1.bf16.msra.mxu1 %v9543_v20  ;;  %3749 = vmatprep.mubr.bf16.mxu0 %v10779_v26  ;;  %v9834_v20 = vcombine.high %v4342_v22, %v4358_v37 }
 0x39c   : > { %7622 = vmatprep.subr.bf16.mxu1 %v9576_v11  ;;  %v4389_v11 = vld [vmem:[%s14632_s6 + $0xd80] sm:$0xff] }
 0x39e   : > { %3819 = vmatmul.mubr.bf16.gmra.mrb[72].mxu1 %v12468_v53  ;;  %v4214_v53 = vld [vmem:[%s14632_s6 + $0x808] sm:$0xff] }
 0x39f   : > { %3826 = vmatprep.mubr.bf16.mxu1 %v12474_v34  ;;  %7623 = vmatpush1.bf16.msra.mxu1 %v9575_v60  ;;  %v9704_v34 = vcombine.high %v4213_v23, %v4229_v33  ;;  %v9705_v12 = vcombine.low %v4214_v53, %v4230_v1  ;;  %v9706_v57 = vcombine.high %v4214_v53, %v4230_v1  ;;  %v12678_v33 = vld [vmem:[%s14632_s6 + $0x1000] sm:$0xff]  ;;  %v12695_v1 = vld [vmem:[%s14632_s6 + $0x1088] sm:$0xff] }
 0x3a0   : > { %7624 = vmatprep.subr.bf16.mxu1 %v9608_v35  ;;  %v12683_v53 = vld [vmem:[%s14632_s6 + $0x1080] sm:$0xff] }
 0x3a1   : > { %7724 = vmatprep.subr.bf16.mxu0 %v9706_v57 }
 0x3a2   : > { %3750 = vmatmul.mubr.bf16.gmra.mrb[88].mxu0 %v10781_v7 }
 0x3a3   : > { %7625 = vmatpush1.bf16.msra.mxu1 %v9607_v48  ;;  %3759 = vmatprep.mubr.bf16.mxu0 %v10782_v30  ;;  %v4421_v48 = vld [vmem:[%s14632_s6 + $0xe80] sm:$0xff] }
 0x3a4   : > { %7626 = vmatprep.subr.bf16.mxu1 %v9640_v44  ;;  %7725 = vmatpush1.bf16.msra.mxu0 %v9705_v12  ;;  %v9896_v44 = vcombine.high %v4405_v38, %v4421_v48  ;;  %v9959_v12 = vcombine.low %v12678_v33, %v12683_v53 }
 0x3a5   : > { %7726 = vmatprep.subr.bf16.mxu0 %v9738_v19 }
 0x3a6   : > { %3827 = vmatmul.mubr.bf16.gmra.mrb[76].mxu1 %v12493_v31  ;;  %v4278_v31 = vld [vmem:[%s14632_s6 + $0xa08] sm:$0xff] }
 0x3a7   : > { %3834 = vmatprep.mubr.bf16.mxu1 %v12498_v56  ;;  %7627 = vmatpush1.bf16.msra.mxu1 %v9639_v0  ;;  %v4294_v56 = vld [vmem:[%s14632_s6 + $0xa88] sm:$0xff]  ;;  %v9895_v0 = vcombine.low %v4405_v38, %v4421_v48 }
 0x3a8   : > { %7628 = vmatprep.subr.bf16.mxu1 %v9672_v13  ;;  %7727 = vmatpush1.bf16.msra.mxu0 %v9737_v54  ;;  %v9769_v39 = vcombine.low %v4278_v31, %v4294_v56  ;;  %v9770_v16 = vcombine.high %v4278_v31, %v4294_v56  ;;  %v9928_v13 = vcombine.high %v4437_v47, %v4453_v46 }
 0x3aa   : > { %3760 = vmatmul.mubr.bf16.gmra.mrb[92].mxu0 %v10784_v36  ;;  %7728 = vmatprep.subr.bf16.mxu0 %v9770_v16 }
 0x3ab   : > { %7629 = vmatpush1.bf16.msra.mxu1 %v9671_v4  ;;  %v4438_v4 = vld [vmem:[%s14632_s6 + $0xf08] sm:$0xff] }
 0x3ac   : > { %7630 = vmatprep.subr.bf16.mxu1 %v9704_v34  ;;  %7729 = vmatpush1.bf16.msra.mxu0 %v9769_v39  ;;  %v9929_v51 = vcombine.low %v4438_v4, %v4454_v5  ;;  %v9930_v23 = vcombine.high %v4438_v4, %v4454_v5  ;;  %v9960_v34 = vcombine.high %v12678_v33, %v12683_v53  ;;  %v12817_v33 = vld [vmem:[%s14632_s6 + $0x10] sm:$0xff] }
 0x3ad   : > { %7730 = vmatprep.subr.bf16.mxu0 %v9802_v27 }
 0x3ae   : > { %3835 = vmatmul.mubr.bf16.gmra.mrb[80].mxu1 %v10775_v14  ;;  %v9801_v14 = vcombine.low %v4310_v40, %v4326_v8 }
 0x3af   : > { %3842 = vmatprep.mubr.bf16.mxu1 %v10776_v59  ;;  %7631 = vmatpush1.bf16.msra.mxu1 %v9703_v61  ;;  %v4341_v59 = vld [vmem:[%s14632_s6 + $0xc00] sm:$0xff]  ;;  %v12688_v61 = vld [vmem:[%s14632_s6 + $0x1008] sm:$0xff] }
 0x3b0   : > { %7632 = vmatprep.subr.bf16.mxu1 %v9736_v21  ;;  %7731 = vmatpush1.bf16.msra.mxu0 %v9801_v14  ;;  %v9831_v42 = vcombine.low %v4341_v59, %v4357_v50  ;;  %v9832_v3 = vcombine.high %v4341_v59, %v4357_v50  ;;  %v9961_v57 = vcombine.low %v12688_v61, %v12695_v1 }
 0x3b1   : > { %7732 = vmatprep.subr.bf16.mxu0 %v9834_v20  ;;  %v9962_v2 = vcombine.high %v12688_v61, %v12695_v1  ;;  %v12824_v61 = vld [vmem:[%s14632_s6 + $0x90] sm:$0xff]  ;;  %v12829_v1 = vld [vmem:[%s14632_s6 + $0x18] sm:$0xff] }
 0x3b3   : > { %7633 = vmatpush1.bf16.msra.mxu1 %v9735_v10 }
 0x3b4   : > { %7634 = vmatprep.subr.bf16.mxu1 %v9768_v55  ;;  %7733 = vmatpush1.bf16.msra.mxu0 %v9833_v17 }
 0x3b6   : > { %3843 = vmatmul.mubr.bf16.gmra.mrb[84].mxu1 %v10778_v58  ;;  %v4373_v58 = vld [vmem:[%s14632_s6 + $0xd00] sm:$0xff] }
 0x3b7   : > { %3850 = vmatprep.mubr.bf16.mxu1 %v10779_v26  ;;  %7635 = vmatpush1.bf16.msra.mxu1 %v9767_v52  ;;  %v4374_v26 = vld [vmem:[%s14632_s6 + $0xd08] sm:$0xff]  ;;  %v9864_v28 = vcombine.high %v4373_v58, %v4389_v11  ;;  %v9863_v60 = vcombine.low %v4373_v58, %v4389_v11 }
 0x3b8   : > { %7636 = vmatprep.subr.bf16.mxu1 %v9800_v24  ;;  %v9865_v35 = vcombine.low %v4374_v26, %v4390_v9  ;;  %v9866_v25 = vcombine.high %v4374_v26, %v4390_v9 }
 0x3ba   : > { %7734 = vmatprep.subr.bf16.mxu0 %v9866_v25 }
 0x3bb   : > { %7637 = vmatpush1.bf16.msra.mxu1 %v9799_v6  ;;  %7735 = vmatpush1.bf16.msra.mxu0 %v9865_v35 }
 0x3bc   : > { %7638 = vmatprep.subr.bf16.mxu1 %v9832_v3 }
 0x3be   : > { %3851 = vmatmul.mubr.bf16.gmra.mrb[88].mxu1 %v10781_v7  ;;  %v4406_v7 = vld [vmem:[%s14632_s6 + $0xe08] sm:$0xff] }
 0x3bf   : > { %3858 = vmatprep.mubr.bf16.mxu1 %v10782_v30  ;;  %7639 = vmatpush1.bf16.msra.mxu1 %v9831_v42  ;;  %v4422_v30 = vld [vmem:[%s14632_s6 + $0xe88] sm:$0xff] }
 0x3c0   : > { %7640 = vmatprep.subr.bf16.mxu1 %v9864_v28  ;;  %v9898_v32 = vcombine.high %v4406_v7, %v4422_v30 }
 0x3c2   : > { %7736 = vmatprep.subr.bf16.mxu0 %v9898_v32 }
 0x3c3   : > { %7641 = vmatpush1.bf16.msra.mxu1 %v9863_v60 }
 0x3c4   : > { %7642 = vmatprep.subr.bf16.mxu1 %v9896_v44 }
 0x3c6   : > { %3859 = vmatmul.mubr.bf16.gmra.mrb[92].mxu1 %v10784_v36  ;;  %v9897_v36 = vcombine.low %v4406_v7, %v4422_v30 }
 0x3c7   : > { %7643 = vmatpush1.bf16.msra.mxu1 %v9895_v0 }
 0x3c8   : > { %7737 = vmatpush1.bf16.msra.mxu0 %v9897_v36  ;;  %7644 = vmatprep.subr.bf16.mxu1 %v9928_v13 }
 0x3c9   : > { %7738 = vmatprep.subr.bf16.mxu0 %v9930_v23 }
 0x3cb   : > { %7645 = vmatpush1.bf16.msra.mxu1 %v9927_v62 }
 0x3cc   : > { %7739 = vmatpush1.bf16.msra.mxu0 %v9929_v51  ;;  %7661 = vmatprep.subr.bf16.mxu1 %v9960_v34 }
 0x3cd   : > { %7755 = vmatprep.subr.bf16.mxu0 %v9962_v2 }
 0x445   : > { %v3691_v49 = vpop.f32.mrb[64].mxu0 }
 0x446   : > { %v3693_v29 = vpop.f32.mrb[65].mxu0 }
 0x447   : > { %v3695_v10 = vpop.f32.mrb[66].mxu0 }
 0x448   : > { %v3697_v21 = vpop.f32.mrb[67].mxu0 }
 0x44d   : > { %v3701_v41 = vpop.f32.mrb[68].mxu0 }
 0x44e   : > { %v3703_v54 = vpop.f32.mrb[69].mxu0 }
 0x44f   : > { %v3705_v19 = vpop.f32.mrb[70].mxu0 }
 0x450   : > { %v3707_v63 = vpop.f32.mrb[71].mxu0 }
 0x455   : > { %v3711_v45 = vpop.f32.mrb[72].mxu0 }
 0x456   : > { %v3867_v31 = vmax.f32 %v3691_v49, %v3711_v45  ;;  %v3713_v52 = vpop.f32.mrb[73].mxu0 }
 0x457   : > { %v3868_v55 = vmax.f32 %v3693_v29, %v3713_v52  ;;  %v3715_v56 = vpop.f32.mrb[74].mxu0 }
 0x458   : > { %v3870_v39 = vmax.f32 %v3695_v10, %v3715_v56  ;;  %v3717_v16 = vpop.f32.mrb[75].mxu0 }
 0x459   : > { %v3871_v43 = vmax.f32 %v3697_v21, %v3717_v16  ;;  %v12728_v16 = vpop.permute.xlu0 %3914 }
 0x45d   : > { %v3721_v15 = vpop.f32.mrb[76].mxu0 }
 0x45e   : > { %v3873_v40 = vmax.f32 %v3701_v41, %v3721_v15  ;;  %v3723_v6 = vpop.f32.mrb[77].mxu0  ;;  %v12725_v41 = vpop.permute.xlu1 %3909 }
 0x45f   : > { %v3874_v24 = vmax.f32 %v3703_v54, %v3723_v6  ;;  %v3725_v8 = vpop.f32.mrb[78].mxu0 }
 0x460   : > { %v3876_v27 = vmax.f32 %v3705_v19, %v3725_v8  ;;  %v3727_v59 = vpop.f32.mrb[79].mxu0 }
 0x461   : > { %v10105_v14 = vpop.f32.mrb[64].mxu1  ;;  %v3877_v22 = vmax.f32 %v3707_v63, %v3727_v59 }
 0x462   : > { %v10106_v50 = vpop.f32.mrb[65].mxu1 }
 0x463   : > { %v12703_v42 = vadd.f32 %v10106_v50, %v10105_v14  ;;  %v10108_v3 = vpop.f32.mrb[66].mxu1  ;;  %v12737_v14 = vld [vmem:[%s14632_s6 + $0x1100] sm:$0xff] }
 0x464   : > { %v10109_v37 = vpop.f32.mrb[67].mxu1 }
 0x465   : > { %v12705_v17 = vadd.f32 %v10109_v37, %v10108_v3  ;;  %v3731_v20 = vpop.f32.mrb[80].mxu0 }
 0x466   : > { %v3879_v58 = vmax.f32 %v3867_v31, %v3731_v20  ;;  %v3733_v11 = vpop.f32.mrb[81].mxu0  ;;  %v12752_v20 = vld [vmem:[%s14632_s6 + $0x1108] sm:$0xff] }
 0x467   : > { %v3880_v26 = vmax.f32 %v3868_v55, %v3733_v11  ;;  %v3735_v28 = vpop.f32.mrb[82].mxu0  ;;  %v12760_v11 = vld [vmem:[%s14632_s6 + $0x1200] sm:$0x11] }
 0x468   : > { %v3882_v60 = vmax.f32 %v3870_v39, %v3735_v28  ;;  %v3737_v35 = vpop.f32.mrb[83].mxu0 }
 0x469   : > { %v10111_v9 = vpop.f32.mrb[68].mxu1  ;;  %v3883_v38 = vmax.f32 %v3871_v43, %v3737_v35 }
 0x46a   : > { %v10112_v25 = vpop.f32.mrb[69].mxu1 }
 0x46b   : > { %v12707_v48 = vadd.f32 %v10112_v25, %v10111_v9  ;;  %v10114_v7 = vpop.f32.mrb[70].mxu1  ;;  %v4534_v25 = vld [vmem:[%s14632_s6 + $0x1208] sm:$0x11] }
 0x46c   : > { %v10115_v44 = vpop.f32.mrb[71].mxu1 }
 0x46d   : > { %v12709_v30 = vadd.f32 %v10115_v44, %v10114_v7  ;;  %v3741_v0 = vpop.f32.mrb[84].mxu0 }
 0x46e   : > { %v3885_v36 = vmax.f32 %v3873_v40, %v3741_v0  ;;  %v3743_v32 = vpop.f32.mrb[85].mxu0 }
 0x46f   : > { %v12711_v47 = vmax.f32 %v3874_v24, %v3743_v32  ;;  %v3745_v46 = vpop.f32.mrb[86].mxu0 }
 0x470   : > { %v12713_v13 = vmax.f32 %v3876_v27, %v3745_v46  ;;  %v3747_v5 = vpop.f32.mrb[87].mxu0  ;;  %v12742_v27 = vld [vmem:[%s14632_s6 + $0x1180] sm:$0xff] }
 0x471   : > { %v10117_v4 = vpop.f32.mrb[72].mxu1  ;;  %v12715_v51 = vmax.f32 %v3877_v22, %v3747_v5  ;;  %v9992_v35 = vcombine.high %v12737_v14, %v12742_v27  ;;  %v9991_v32 = vcombine.low %v12737_v14, %v12742_v27 }
 0x472   : > { %v10118_v62 = vpop.f32.mrb[73].mxu1 }
 0x473   : > { %v12717_v23 = vadd.f32 %v10118_v62, %v10117_v4  ;;  %v10120_v34 = vpop.f32.mrb[74].mxu1 }
 0x474   : > { %v10121_v2 = vpop.f32.mrb[75].mxu1 }
 0x475   : > { %v3869_v49 = vmax.f32 %v12703_v42, %v12717_v23  ;;  %v12721_v29 = vadd.f32 %v10121_v2, %v10120_v34  ;;  %v3751_v10 = vpop.f32.mrb[88].mxu0 }
 0x476   : > { %v3891_v54 = vmax.f32 %v3879_v58, %v3751_v10  ;;  %v3753_v19 = vpop.f32.mrb[89].mxu0  ;;  %v4518_v58 = vld [vmem:[%s14632_s6 + $0x1188] sm:$0xff] }
 0x477   : > { %v3872_v21 = vmax.f32 %v12705_v17, %v12721_v29  ;;  %v3892_v63 = vmax.f32 %v3880_v26, %v3753_v19  ;;  %v3755_v45 = vpop.f32.mrb[90].mxu0  ;;  %v9993_v34 = vcombine.low %v12752_v20, %v4518_v58  ;;  %v9994_v2 = vcombine.high %v12752_v20, %v4518_v58 }
 0x478   : > { %v3927_v52 = vadd.f32 %v12725_v41, %v3891_v54  ;;  %v3894_v55 = vmax.f32 %v3882_v60, %v3755_v45  ;;  %v3757_v56 = vpop.f32.mrb[91].mxu0  ;;  %v10026_v45 = vcombine.high %v4534_v25, %v4534_v25 }
 0x479   : > { %v10123_v31 = vpop.f32.mrb[76].mxu1  ;;  %v3928_v43 = vadd.f32 %v12725_v41, %v3892_v63  ;;  %v3895_v15 = vmax.f32 %v3883_v38, %v3757_v56  ;;  %v12769_v38 = vpop.permute.xlu1 %3919  ;;  %v10024_v63 = vcombine.high %v12760_v11, %v12760_v11 }
 0x47a   : > { %v10124_v39 = vpop.f32.mrb[77].mxu1  ;;  %v3930_v24 = vadd.f32 %v12728_v16, %v3894_v55  ;;  %v3939_v3 = vmax.f32 %v3927_v52, 0.0 }
 0x47b   : > { %v12731_v40 = vadd.f32 %v10124_v39, %v10123_v31  ;;  %v10126_v6 = vpop.f32.mrb[78].mxu1  ;;  %v3931_v59 = vadd.f32 %v12728_v16, %v3895_v15  ;;  %v3940_v26 = vmax.f32 %v3928_v43, 0.0  ;;  %v12784_v31 = vpop.permute.xlu0 %3924  ;;  %v10025_v15 = vcombine.low %v4534_v25, %v4534_v25 }
 0x47c   : > { %v10127_v8 = vpop.f32.mrb[79].mxu1  ;;  %v3942_v37 = vmax.f32 %v3930_v24, 0.0 }
 0x47d   : > { %v3875_v50 = vmax.f32 %v12707_v48, %v12731_v40  ;;  %v12747_v22 = vadd.f32 %v10127_v8, %v10126_v6  ;;  %v3943_v28 = vmax.f32 %v3931_v59, 0.0  ;;  %v3761_v9 = vpop.f32.mrb[92].mxu0 }
 0x47e   : > { %v12771_v7 = vpack.c.bf16 %v3942_v37, %v3939_v3  ;;  %v3897_v44 = vmax.f32 %v3885_v36, %v3761_v9  ;;  %v3763_v0 = vpop.f32.mrb[93].mxu0 }
 0x47f   : > { %v3878_v60 = vmax.f32 %v12709_v30, %v12747_v22  ;;  %v12775_v46 = vpack.c.bf16 %v3943_v28, %v3940_v26  ;;  %v3898_v4 = vmax.f32 %v12711_v47, %v3763_v0  ;;  %v3765_v5 = vpop.f32.mrb[94].mxu0  ;;  %v3991_v30 = vld [vmem:[%s14632_s6 + $0x110] sm:$0xff] }
 0x480   : > { %v3933_v10 = vadd.f32 %v12769_v38, %v3897_v44  ;;  %v3900_v54 = vmax.f32 %v12713_v13, %v3765_v5  ;;  %v3767_v36 = vpop.f32.mrb[95].mxu0  ;;  %v12792_v13 = vsel %vm7515_vm10, 65535, %v10835_v18  ;;  %v4007_v22 = vld [vmem:[%s14632_s6 + $0x190] sm:$0xff] }
 0x481   : > { %v10129_v62 = vpop.f32.mrb[80].mxu1  ;;  %v3934_v47 = vadd.f32 %v12769_v38, %v3898_v4  ;;  %v3901_v52 = vmax.f32 %v12715_v51, %v3767_v36  ;;  %7646 = vmatprep.mubr.bf16.mxu1 %v12775_v46  ;;  %7740 = vmatprep.mubr.bf16.mxu0 %v12775_v46  ;;  %v10023_v51 = vcombine.low %v12760_v11, %v12760_v11 }
 0x482   : > { %v10130_v19 = vpop.f32.mrb[81].mxu1  ;;  %v3936_v39 = vadd.f32 %v12784_v31, %v3900_v54  ;;  %7647 = vmatmul.mubr.bf16.vlgmr.msra.gmra.mrb[96].mxu1 %v12771_v7  ;;  %7741 = vmatmul.mubr.bf16.vlgmr.msra.gmra.mrb[96].mxu0 %v12771_v7  ;;  %v3945_v14 = vmax.f32 %v3933_v10, 0.0  ;;  %v7522_v59 = vand.u32 %v10024_v63, %v12792_v13  ;;  %v7528_v3 = vand.u32 %v10026_v45, %v12792_v13  ;;  %v3992_v10 = vld [vmem:[%s14632_s6 + $0x118] sm:$0xff] }
 0x483   : > { %v10131_v55 = vadd.f32 %v10130_v19, %v10129_v62  ;;  %v10132_v56 = vpop.f32.mrb[82].mxu1  ;;  %v3937_v6 = vadd.f32 %v12784_v31, %v3901_v52  ;;  %7662 = vmatpush1.bf16.msra.mxu1 %v9959_v12  ;;  %7756 = vmatpush1.bf16.msra.mxu0 %v9961_v57  ;;  %v3946_v37 = vmax.f32 %v3934_v47, 0.0  ;;  %v12834_v12 = vld [vmem:[%s14632_s6 + $0x98] sm:$0xff]  ;;  %v7525_v29 = vand.u32 %v10025_v15, %v12792_v13  ;;  %v4039_v15 = vld [vmem:[%s14632_s6 + $0x290] sm:$0xff] }
 0x484   : > { %v10133_v43 = vpop.f32.mrb[83].mxu1  ;;  %v3948_v27 = vmax.f32 %v3936_v39, 0.0  ;;  %7663 = vmatprep.subr.bf16.mxu1 %v9992_v35  ;;  %7757 = vmatprep.subr.bf16.mxu0 %v9994_v2  ;;  %v9452_v11 = vcombine.high %v12817_v33, %v12824_v61  ;;  %v9454_v26 = vcombine.high %v12829_v1, %v12834_v12  ;;  %v9451_v45 = vcombine.low %v12817_v33, %v12824_v61  ;;  %v4071_v61 = vld [vmem:[%s14632_s6 + $0x390] sm:$0xff] }
 0x485   : > { %v3881_v24 = vmax.f32 %v3869_v49, %v10131_v55  ;;  %v10134_v8 = vadd.f32 %v10133_v43, %v10132_v56  ;;  %v3949_v42 = vmax.f32 %v3937_v6, 0.0  ;;  %v7519_v49 = vand.u32 %v10023_v51, %v12792_v13  ;;  %v4023_v51 = vld [vmem:[%s14632_s6 + $0x210] sm:$0xff]  ;;  %v4024_v6 = vld [vmem:[%s14632_s6 + $0x218] sm:$0xff] }
 0x486   : > { %v12819_v53 = vpack.c.bf16 %v3948_v27, %v3945_v14  ;;  %v9453_v47 = vcombine.low %v12829_v1, %v12834_v12  ;;  %v9484_v52 = vcombine.high %v3991_v30, %v4007_v22  ;;  %v9483_v27 = vcombine.low %v3991_v30, %v4007_v22  ;;  %v4072_v1 = vld [vmem:[%s14632_s6 + $0x398] sm:$0xff] }
 0x487   : > { %v3884_v23 = vmax.f32 %v3872_v21, %v10134_v8  ;;  %v12836_v57 = vpack.c.bf16 %v3949_v42, %v3946_v37  ;;  %7664 = vmatpush1.bf16.msra.mxu1 %v9991_v32  ;;  %7758 = vmatpush1.bf16.msra.mxu0 %v9993_v34  ;;  %v9516_v37 = vcombine.high %v4023_v51, %v4039_v15  ;;  %v4168_v30 = vld [vmem:[%s14632_s6 + $0x698] sm:$0xff] }
 0x488   : > { %7665 = vmatprep.subr.bf16.mxu1 %v7522_v59  ;;  %7759 = vmatprep.subr.bf16.mxu0 %v7528_v3  ;;  %v9515_v12 = vcombine.low %v4023_v51, %v4039_v15  ;;  %v4232_v51 = vld [vmem:[%s14632_s6 + $0x898] sm:$0xff] }
 0x489   : > { %v10135_v17 = vpop.f32.mrb[84].mxu1  ;;  %7654 = vmatprep.mubr.bf16.mxu1 %v12836_v57  ;;  %7748 = vmatprep.mubr.bf16.mxu0 %v12836_v57 }
 0x48a   : > { %v10136_v21 = vpop.f32.mrb[85].mxu1  ;;  %7655 = vmatmul.mubr.bf16.gmra.mrb[100].mxu1 %v12819_v53  ;;  %7749 = vmatmul.mubr.bf16.gmra.mrb[100].mxu0 %v12819_v53 }
 0x48b   : > { %v10137_v20 = vadd.f32 %v10136_v21, %v10135_v17  ;;  %v10138_v58 = vpop.f32.mrb[86].mxu1  ;;  %7666 = vmatpush1.bf16.msra.mxu1 %v7519_v49  ;;  %7760 = vmatpush1.bf16.msra.mxu0 %v7525_v29  ;;  %v4087_v29 = vld [vmem:[%s14632_s6 + $0x410] sm:$0xff] }
 0x48c   : > { %v10139_v28 = vpop.f32.mrb[87].mxu1  ;;  %7693 = vmatprep.mubr.bf16.mxu1 %v10835_v18  ;;  %7787 = vmatprep.mubr.bf16.mxu0 %v10835_v18 }
 0x48d   : > { %v3887_v9 = vmax.f32 %v3875_v50, %v10137_v20  ;;  %v10140_v35 = vadd.f32 %v10139_v28, %v10138_v58  ;;  %7802 = vmatprep.subr.bf16.mxu1 %v9452_v11  ;;  %7896 = vmatprep.subr.bf16.mxu0 %v9454_v26  ;;  %v4103_v58 = vld [vmem:[%s14632_s6 + $0x490] sm:$0xff]  ;;  %v4088_v11 = vld [vmem:[%s14632_s6 + $0x418] sm:$0xff] }
 0x48e   : > { %v4104_v26 = vld [vmem:[%s14632_s6 + $0x498] sm:$0xff] }
 0x48f   : > { %v3890_v25 = vmax.f32 %v3878_v60, %v10140_v35  ;;  %v9580_v35 = vcombine.high %v4087_v29, %v4103_v58 }
 0x491   : > { %v10141_v44 = vpop.f32.mrb[88].mxu1 }
 0x492   : > { %v10142_v0 = vpop.f32.mrb[89].mxu1 }
 0x493   : > { %v10143_v32 = vadd.f32 %v10142_v0, %v10141_v44  ;;  %v10144_v4 = vpop.f32.mrb[90].mxu1  ;;  %v4119_v44 = vld [vmem:[%s14632_s6 + $0x510] sm:$0xff] }
 0x494   : > { %v10145_v5 = vpop.f32.mrb[91].mxu1  ;;  %v4135_v0 = vld [vmem:[%s14632_s6 + $0x590] sm:$0xff] }
 0x495   : > { %v3893_v48 = vmax.f32 %v3881_v24, %v10143_v32  ;;  %v10146_v40 = vadd.f32 %v10145_v5, %v10144_v4  ;;  %v4040_v24 = vld [vmem:[%s14632_s6 + $0x298] sm:$0xff]  ;;  %v9579_v5 = vcombine.low %v4087_v29, %v4103_v58  ;;  %v9611_v22 = vcombine.low %v4119_v44, %v4135_v0  ;;  %v4327_v58 = vld [vmem:[%s14632_s6 + $0xb90] sm:$0xff] }
 0x496   : > { %v9518_v42 = vcombine.high %v4024_v6, %v4040_v24  ;;  %v9517_v17 = vcombine.low %v4024_v6, %v4040_v24  ;;  %v4120_v32 = vld [vmem:[%s14632_s6 + $0x518] sm:$0xff] }
 0x497   : > { %v3929_v50 = vadd.f32 %v12725_v41, %v3893_v48  ;;  %v3896_v62 = vmax.f32 %v3884_v23, %v10146_v40  ;;  %v4008_v41 = vld [vmem:[%s14632_s6 + $0x198] sm:$0xff]  ;;  %v9581_v48 = vcombine.low %v4088_v11, %v4104_v26  ;;  %v9612_v40 = vcombine.high %v4119_v44, %v4135_v0  ;;  %v4343_v44 = vld [vmem:[%s14632_s6 + $0xc10] sm:$0xff] }
 0x498   : > { %v9486_v43 = vcombine.high %v3992_v10, %v4008_v41  ;;  %v9485_v59 = vcombine.low %v3992_v10, %v4008_v41  ;;  %v4136_v4 = vld [vmem:[%s14632_s6 + $0x598] sm:$0xff]  ;;  %v4359_v0 = vld [vmem:[%s14632_s6 + $0xc90] sm:$0xff] }
 0x499   : > { %v3932_v34 = vadd.f32 %v12728_v16, %v3896_v62  ;;  %v10147_v2 = vpop.f32.mrb[92].mxu1  ;;  %v3941_v54 = vmax.f32 %v3929_v50, 0.0  ;;  %v9614_v50 = vcombine.high %v4120_v32, %v4136_v4  ;;  %v4151_v62 = vld [vmem:[%s14632_s6 + $0x610] sm:$0xff] }
 0x49a   : > { %v10148_v60 = vpop.f32.mrb[93].mxu1 }
 0x49b   : > { %v3944_v16 = vmax.f32 %v3932_v34, 0.0  ;;  %v10149_v36 = vadd.f32 %v10148_v60, %v10147_v2  ;;  %v10150_v19 = vpop.f32.mrb[94].mxu1  ;;  %v4167_v34 = vld [vmem:[%s14632_s6 + $0x690] sm:$0xff]  ;;  %v4152_v2 = vld [vmem:[%s14632_s6 + $0x618] sm:$0xff]  ;;  %v9613_v60 = vcombine.low %v4120_v32, %v4136_v4 }
 0x49c   : > { %v10151_v63 = vpop.f32.mrb[95].mxu1  ;;  %v9644_v10 = vcombine.high %v4151_v62, %v4167_v34  ;;  %v9646_v41 = vcombine.high %v4152_v2, %v4168_v30  ;;  %v4344_v32 = vld [vmem:[%s14632_s6 + $0xc18] sm:$0xff] }
 0x49d   : > { %v12874_v55 = vpack.c.bf16 %v3944_v16, %v3941_v54  ;;  %v3899_v56 = vmax.f32 %v3887_v9, %v10149_v36  ;;  %v10152_v39 = vadd.f32 %v10151_v63, %v10150_v19  ;;  %v4183_v54 = vld [vmem:[%s14632_s6 + $0x710] sm:$0xff]  ;;  %v4184_v36 = vld [vmem:[%s14632_s6 + $0x718] sm:$0xff]  ;;  %v9643_v63 = vcombine.low %v4151_v62, %v4167_v34 }
 0x49e   : > { %v4199_v16 = vld [vmem:[%s14632_s6 + $0x790] sm:$0xff]  ;;  %v4200_v19 = vld [vmem:[%s14632_s6 + $0x798] sm:$0xff] }
 0x49f   : > { %v3935_v8 = vadd.f32 %v12769_v38, %v3899_v56  ;;  %v3902_v14 = vmax.f32 %v3890_v25, %v10152_v39  ;;  %10055 = vmatmul.mubr.msk.bf16.vlgmr.msra.gmra.mrb[104].mxu1 %vm2776_vm7, %v12874_v55  ;;  %10057 = vmatmul.mubr.msk.bf16.vlgmr.msra.gmra.mrb[96].mxu0 %vm2776_vm7, %v12874_v55  ;;  %v4055_v38 = vld [vmem:[%s14632_s6 + $0x310] sm:$0xff]  ;;  %v9582_v25 = vcombine.high %v4088_v11, %v4104_v26  ;;  %v4312_v11 = vld [vmem:[%s14632_s6 + $0xb18] sm:$0xff] }
 0x4a0   : > { %7803 = vmatpush1.bf16.msra.mxu1 %v9451_v45  ;;  %7897 = vmatpush1.bf16.msra.mxu0 %v9453_v47  ;;  %v9548_v21 = vcombine.high %v4055_v38, %v4071_v61  ;;  %v9547_v28 = vcombine.low %v4055_v38, %v4071_v61  ;;  %v9645_v45 = vcombine.low %v4152_v2, %v4168_v30  ;;  %v4215_v56 = vld [vmem:[%s14632_s6 + $0x810] sm:$0xff]  ;;  %v4328_v26 = vld [vmem:[%s14632_s6 + $0xb98] sm:$0xff] }
 0x4a1   : > { %v3938_v3 = vadd.f32 %v12784_v31, %v3902_v14  ;;  %7804 = vmatprep.subr.bf16.mxu1 %v9484_v52  ;;  %7898 = vmatprep.subr.bf16.mxu0 %v9486_v43  ;;  %v3947_v23 = vmax.f32 %v3935_v8, 0.0  ;;  %v4056_v31 = vld [vmem:[%s14632_s6 + $0x318] sm:$0xff]  ;;  %v9676_v47 = vcombine.high %v4183_v54, %v4199_v16  ;;  %v9678_v52 = vcombine.high %v4184_v36, %v4200_v19  ;;  %v4231_v39 = vld [vmem:[%s14632_s6 + $0x890] sm:$0xff] }
 0x4a2   : > { %7701 = vmatprep.mubr.bf16.mxu1 %v10835_v18  ;;  %7795 = vmatprep.mubr.bf16.mxu0 %v10835_v18  ;;  %v9550_v20 = vcombine.high %v4056_v31, %v4072_v1  ;;  %v9549_v9 = vcombine.low %v4056_v31, %v4072_v1  ;;  %v4216_v43 = vld [vmem:[%s14632_s6 + $0x818] sm:$0xff]  ;;  %v9675_v15 = vcombine.low %v4183_v54, %v4199_v16  ;;  %v4247_v14 = vld [vmem:[%s14632_s6 + $0x910] sm:$0xff] }
 0x4a3   : > { %v3950_v33 = vmax.f32 %v3938_v3, 0.0  ;;  %v9677_v6 = vcombine.low %v4184_v36, %v4200_v19  ;;  %v9708_v24 = vcombine.high %v4215_v56, %v4231_v39  ;;  %v9710_v8 = vcombine.high %v4216_v43, %v4232_v51  ;;  %v4264_v3 = vld [vmem:[%s14632_s6 + $0x998] sm:$0xff]  ;;  %v4295_v61 = vld [vmem:[%s14632_s6 + $0xa90] sm:$0xff] }
 0x4a4   : > { %7805 = vmatpush1.bf16.msra.mxu1 %v9483_v27  ;;  %7899 = vmatpush1.bf16.msra.mxu0 %v9485_v59  ;;  %v4263_v27 = vld [vmem:[%s14632_s6 + $0x990] sm:$0xff]  ;;  %v4248_v59 = vld [vmem:[%s14632_s6 + $0x918] sm:$0xff] }
 0x4a5   : > { %v12908_v49 = vpack.c.bf16 %v3950_v33, %v3947_v23  ;;  %7806 = vmatprep.subr.bf16.mxu1 %v9516_v37  ;;  %7900 = vmatprep.subr.bf16.mxu0 %v9518_v42  ;;  %v9707_v37 = vcombine.low %v4215_v56, %v4231_v39  ;;  %v9709_v42 = vcombine.low %v4216_v43, %v4232_v51  ;;  %v4279_v33 = vld [vmem:[%s14632_s6 + $0xa10] sm:$0xff]  ;;  %v4280_v31 = vld [vmem:[%s14632_s6 + $0xa18] sm:$0xff] }
 0x4a6   : > { %v9740_v38 = vcombine.high %v4247_v14, %v4263_v27  ;;  %v9742_v23 = vcombine.high %v4248_v59, %v4264_v3  ;;  %v4296_v1 = vld [vmem:[%s14632_s6 + $0xa98] sm:$0xff]  ;;  %v9772_v29 = vcombine.high %v4279_v33, %v4295_v61  ;;  %v4375_v62 = vld [vmem:[%s14632_s6 + $0xd10] sm:$0xff] }
 0x4a7   : > { %10056 = vmatmul.mubr.msk.bf16.gmra.mrb[108].mxu1 %vm2776_vm7, %v12908_v49  ;;  %10058 = vmatmul.mubr.msk.bf16.gmra.mrb[104].mxu0 %vm2776_vm7, %v12908_v49  ;;  %v4360_v4 = vld [vmem:[%s14632_s6 + $0xc98] sm:$0xff]  ;;  %v4391_v34 = vld [vmem:[%s14632_s6 + $0xd90] sm:$0xff] }
 0x4a8   : > { %7807 = vmatpush1.bf16.msra.mxu1 %v9515_v12  ;;  %7901 = vmatpush1.bf16.msra.mxu0 %v9517_v17  ;;  %v9739_v12 = vcombine.low %v4247_v14, %v4263_v27  ;;  %v9741_v17 = vcombine.low %v4248_v59, %v4264_v3  ;;  %v4376_v2 = vld [vmem:[%s14632_s6 + $0xd18] sm:$0xff]  ;;  %v4407_v54 = vld [vmem:[%s14632_s6 + $0xe10] sm:$0xff] }
 0x4a9   : > { %7834 = vmatprep.mubr.bf16.mxu1 %v12775_v46  ;;  %7928 = vmatprep.mubr.bf16.mxu0 %v12775_v46  ;;  %v4392_v30 = vld [vmem:[%s14632_s6 + $0xd98] sm:$0xff]  ;;  %v4423_v16 = vld [vmem:[%s14632_s6 + $0xe90] sm:$0xff] }
 0x4aa   : > { %7808 = vmatprep.subr.bf16.mxu1 %v9548_v21  ;;  %7902 = vmatprep.subr.bf16.mxu0 %v9550_v20  ;;  %v9774_v21 = vcombine.high %v4280_v31, %v4296_v1  ;;  %v4311_v20 = vld [vmem:[%s14632_s6 + $0xb10] sm:$0xff]  ;;  %v4408_v36 = vld [vmem:[%s14632_s6 + $0xe18] sm:$0xff] }
 0x4ab   : > { %v4424_v19 = vld [vmem:[%s14632_s6 + $0xe98] sm:$0xff]  ;;  %v4439_v56 = vld [vmem:[%s14632_s6 + $0xf10] sm:$0xff] }
 0x4ac   : > { %7809 = vmatpush1.bf16.msra.mxu1 %v9547_v28  ;;  %7903 = vmatpush1.bf16.msra.mxu0 %v9549_v9  ;;  %v9771_v28 = vcombine.low %v4279_v33, %v4295_v61  ;;  %v9773_v9 = vcombine.low %v4280_v31, %v4296_v1  ;;  %v4455_v39 = vld [vmem:[%s14632_s6 + $0xf90] sm:$0xff]  ;;  %v4440_v43 = vld [vmem:[%s14632_s6 + $0xf18] sm:$0xff] }
 0x4ad   : > { %7810 = vmatprep.subr.bf16.mxu1 %v9580_v35  ;;  %7904 = vmatprep.subr.bf16.mxu0 %v9582_v25  ;;  %v9804_v35 = vcombine.high %v4311_v20, %v4327_v58  ;;  %v9806_v25 = vcombine.high %v4312_v11, %v4328_v26  ;;  %v4456_v51 = vld [vmem:[%s14632_s6 + $0xf98] sm:$0xff]  ;;  %v4471_v14 = vld [vmem:[%s14632_s6 + $0x1010] sm:$0xff] }
 0x4ae   : > { %v4487_v27 = vld [vmem:[%s14632_s6 + $0x1090] sm:$0xff]  ;;  %v4472_v59 = vld [vmem:[%s14632_s6 + $0x1018] sm:$0xff] }
 0x4af   : > { %v4488_v3 = vld [vmem:[%s14632_s6 + $0x1098] sm:$0xff]  ;;  %v4503_v33 = vld [vmem:[%s14632_s6 + $0x1110] sm:$0xff] }
 0x4b0   : > { %7811 = vmatpush1.bf16.msra.mxu1 %v9579_v5  ;;  %7905 = vmatpush1.bf16.msra.mxu0 %v9581_v48  ;;  %v9803_v5 = vcombine.low %v4311_v20, %v4327_v58  ;;  %v9805_v48 = vcombine.low %v4312_v11, %v4328_v26  ;;  %v4519_v61 = vld [vmem:[%s14632_s6 + $0x1190] sm:$0xff]  ;;  %v4504_v31 = vld [vmem:[%s14632_s6 + $0x1118] sm:$0xff] }
 0x4b1   : > { %7812 = vmatprep.subr.bf16.mxu1 %v9612_v40  ;;  %7906 = vmatprep.subr.bf16.mxu0 %v9614_v50  ;;  %v9836_v40 = vcombine.high %v4343_v44, %v4359_v0  ;;  %v9838_v50 = vcombine.high %v4344_v32, %v4360_v4  ;;  %v4520_v1 = vld [vmem:[%s14632_s6 + $0x1198] sm:$0xff]  ;;  %v9996_v20 = vcombine.high %v4503_v33, %v4519_v61 }
 0x4b2   : > { %v9998_v58 = vcombine.high %v4504_v31, %v4520_v1 }
 0x4b4   : > { %7813 = vmatpush1.bf16.msra.mxu1 %v9611_v22  ;;  %7907 = vmatpush1.bf16.msra.mxu0 %v9613_v60  ;;  %v9835_v22 = vcombine.low %v4343_v44, %v4359_v0  ;;  %v9837_v60 = vcombine.low %v4344_v32, %v4360_v4  ;;  %v3961_v32 = vld [vmem:[%s14632_s6 + $0x20] sm:$0xff] }
 0x4b5   : > { %7814 = vmatprep.subr.bf16.mxu1 %v9644_v10  ;;  %7908 = vmatprep.subr.bf16.mxu0 %v9646_v41  ;;  %v9868_v10 = vcombine.high %v4375_v62, %v4391_v34  ;;  %v9870_v41 = vcombine.high %v4376_v2, %v4392_v30  ;;  %v3977_v4 = vld [vmem:[%s14632_s6 + $0xa0] sm:$0xff] }
 0x4b8   : > { %7815 = vmatpush1.bf16.msra.mxu1 %v9643_v63  ;;  %7909 = vmatpush1.bf16.msra.mxu0 %v9645_v45  ;;  %v9867_v63 = vcombine.low %v4375_v62, %v4391_v34  ;;  %v9869_v45 = vcombine.low %v4376_v2, %v4392_v30  ;;  %v9456_v62 = vcombine.high %v3961_v32, %v3977_v4  ;;  %v3993_v2 = vld [vmem:[%s14632_s6 + $0x120] sm:$0xff] }
 0x4b9   : > { %7816 = vmatprep.subr.bf16.mxu1 %v9676_v47  ;;  %7910 = vmatprep.subr.bf16.mxu0 %v9678_v52  ;;  %v9900_v47 = vcombine.high %v4407_v54, %v4423_v16  ;;  %v9902_v52 = vcombine.high %v4408_v36, %v4424_v19  ;;  %v4009_v30 = vld [vmem:[%s14632_s6 + $0x1a0] sm:$0xff] }
 0x4bc   : > { %7817 = vmatpush1.bf16.msra.mxu1 %v9675_v15  ;;  %7911 = vmatpush1.bf16.msra.mxu0 %v9677_v6  ;;  %v9899_v15 = vcombine.low %v4407_v54, %v4423_v16  ;;  %v9901_v6 = vcombine.low %v4408_v36, %v4424_v19  ;;  %v9488_v54 = vcombine.high %v3993_v2, %v4009_v30  ;;  %v4025_v36 = vld [vmem:[%s14632_s6 + $0x220] sm:$0xff] }
 0x4bd   : > { %7818 = vmatprep.subr.bf16.mxu1 %v9708_v24  ;;  %7912 = vmatprep.subr.bf16.mxu0 %v9710_v8  ;;  %v9932_v24 = vcombine.high %v4439_v56, %v4455_v39  ;;  %v9934_v8 = vcombine.high %v4440_v43, %v4456_v51  ;;  %v4041_v19 = vld [vmem:[%s14632_s6 + $0x2a0] sm:$0xff] }
 0x4c0   : > { %7819 = vmatpush1.bf16.msra.mxu1 %v9707_v37  ;;  %7913 = vmatpush1.bf16.msra.mxu0 %v9709_v42  ;;  %v9931_v37 = vcombine.low %v4439_v56, %v4455_v39  ;;  %v9933_v42 = vcombine.low %v4440_v43, %v4456_v51  ;;  %v9520_v56 = vcombine.high %v4025_v36, %v4041_v19  ;;  %v4057_v43 = vld [vmem:[%s14632_s6 + $0x320] sm:$0xff] }
 0x4c1   : > { %7820 = vmatprep.subr.bf16.mxu1 %v9740_v38  ;;  %7914 = vmatprep.subr.bf16.mxu0 %v9742_v23  ;;  %v9964_v38 = vcombine.high %v4471_v14, %v4487_v27  ;;  %v9966_v23 = vcombine.high %v4472_v59, %v4488_v3  ;;  %v4073_v51 = vld [vmem:[%s14632_s6 + $0x3a0] sm:$0xff] }
 0x4c4   : > { %7821 = vmatpush1.bf16.msra.mxu1 %v9739_v12  ;;  %7915 = vmatpush1.bf16.msra.mxu0 %v9741_v17  ;;  %v4535_v12 = vld [vmem:[%s14632_s6 + $0x1210] sm:$0x11]  ;;  %v4536_v17 = vld [vmem:[%s14632_s6 + $0x1218] sm:$0x11] }
 0x4c5   : > { %7822 = vmatprep.subr.bf16.mxu1 %v9772_v29  ;;  %7916 = vmatprep.subr.bf16.mxu0 %v9774_v21  ;;  %v9963_v29 = vcombine.low %v4471_v14, %v4487_v27  ;;  %v9965_v21 = vcombine.low %v4472_v59, %v4488_v3  ;;  %v10028_v11 = vcombine.high %v4535_v12, %v4535_v12  ;;  %v4089_v14 = vld [vmem:[%s14632_s6 + $0x420] sm:$0xff] }
 0x4c6   : > { %v10030_v26 = vcombine.high %v4536_v17, %v4536_v17  ;;  %v9552_v27 = vcombine.high %v4057_v43, %v4073_v51  ;;  %v4105_v3 = vld [vmem:[%s14632_s6 + $0x4a0] sm:$0xff] }
 0x4c7   : > { %v7534_v44 = vand.u32 %v10028_v11, %v12792_v13  ;;  %v4153_v11 = vld [vmem:[%s14632_s6 + $0x620] sm:$0xff] }
 0x4c8   : > { %7823 = vmatpush1.bf16.msra.mxu1 %v9771_v28  ;;  %7917 = vmatpush1.bf16.msra.mxu0 %v9773_v9  ;;  %v9995_v28 = vcombine.low %v4503_v33, %v4519_v61  ;;  %v9997_v9 = vcombine.low %v4504_v31, %v4520_v1  ;;  %v7540_v0 = vand.u32 %v10030_v26, %v12792_v13  ;;  %v4121_v31 = vld [vmem:[%s14632_s6 + $0x520] sm:$0xff] }
 0x4c9   : > { %7824 = vmatprep.subr.bf16.mxu1 %v9804_v35  ;;  %7918 = vmatprep.subr.bf16.mxu0 %v9806_v25  ;;  %v10027_v35 = vcombine.low %v4535_v12, %v4535_v12  ;;  %v10029_v25 = vcombine.low %v4536_v17, %v4536_v17  ;;  %v9584_v33 = vcombine.high %v4089_v14, %v4105_v3  ;;  %v4137_v1 = vld [vmem:[%s14632_s6 + $0x5a0] sm:$0xff]  ;;  %v4122_v12 = vld [vmem:[%s14632_s6 + $0x528] sm:$0xff] }
 0x4ca   : > { %v4138_v17 = vld [vmem:[%s14632_s6 + $0x5a8] sm:$0xff]  ;;  %v4169_v26 = vld [vmem:[%s14632_s6 + $0x6a0] sm:$0xff] }
 0x4cc   : > { %7825 = vmatpush1.bf16.msra.mxu1 %v9803_v5  ;;  %7919 = vmatpush1.bf16.msra.mxu0 %v9805_v48  ;;  %v3962_v5 = vld [vmem:[%s14632_s6 + $0x28] sm:$0xff] }
 0x4cd   : > { %7826 = vmatprep.subr.bf16.mxu1 %v9836_v40  ;;  %7920 = vmatprep.subr.bf16.mxu0 %v9838_v50  ;;  %v3978_v48 = vld [vmem:[%s14632_s6 + $0xa8] sm:$0xff]  ;;  %v7531_v40 = vand.u32 %v10027_v35, %v12792_v13  ;;  %v7537_v50 = vand.u32 %v10029_v25, %v12792_v13  ;;  %v9615_v35 = vcombine.low %v4121_v31, %v4137_v1 }
 0x4ce   : > { %v9458_v34 = vcombine.high %v3962_v5, %v3978_v48  ;;  %v9617_v25 = vcombine.low %v4122_v12, %v4138_v17 }
 0x4d0   : > { %7827 = vmatpush1.bf16.msra.mxu1 %v9835_v22  ;;  %7921 = vmatpush1.bf16.msra.mxu0 %v9837_v60  ;;  %v3994_v22 = vld [vmem:[%s14632_s6 + $0x128] sm:$0xff] }
 0x4d1   : > { %7828 = vmatprep.subr.bf16.mxu1 %v9868_v10  ;;  %7922 = vmatprep.subr.bf16.mxu0 %v9870_v41  ;;  %v4010_v60 = vld [vmem:[%s14632_s6 + $0x1a8] sm:$0xff]  ;;  %v9455_v10 = vcombine.low %v3961_v32, %v3977_v4  ;;  %v9457_v41 = vcombine.low %v3962_v5, %v3978_v48  ;;  %v4185_v32 = vld [vmem:[%s14632_s6 + $0x720] sm:$0xff] }
 0x4d2   : > { %v9490_v16 = vcombine.high %v3994_v22, %v4010_v60  ;;  %v4201_v4 = vld [vmem:[%s14632_s6 + $0x7a0] sm:$0xff]  ;;  %v4186_v5 = vld [vmem:[%s14632_s6 + $0x728] sm:$0xff] }
 0x4d3   : > { %v4202_v48 = vld [vmem:[%s14632_s6 + $0x7a8] sm:$0xff] }
 0x4d4   : > { %7829 = vmatpush1.bf16.msra.mxu1 %v9867_v63  ;;  %7923 = vmatpush1.bf16.msra.mxu0 %v9869_v45  ;;  %v4026_v63 = vld [vmem:[%s14632_s6 + $0x228] sm:$0xff] }
 0x4d5   : > { %7830 = vmatprep.subr.bf16.mxu1 %v9900_v47  ;;  %7924 = vmatprep.subr.bf16.mxu0 %v9902_v52  ;;  %v4042_v45 = vld [vmem:[%s14632_s6 + $0x2a8] sm:$0xff]  ;;  %v9487_v47 = vcombine.low %v3993_v2, %v4009_v30  ;;  %v9489_v52 = vcombine.low %v3994_v22, %v4010_v60  ;;  %v4217_v2 = vld [vmem:[%s14632_s6 + $0x820] sm:$0xff] }
 0x4d6   : > { %v9522_v39 = vcombine.high %v4026_v63, %v4042_v45  ;;  %v4233_v30 = vld [vmem:[%s14632_s6 + $0x8a0] sm:$0xff]  ;;  %v4218_v22 = vld [vmem:[%s14632_s6 + $0x828] sm:$0xff] }
 0x4d7   : > { %v4234_v60 = vld [vmem:[%s14632_s6 + $0x8a8] sm:$0xff] }
 0x4d8   : > { %7831 = vmatpush1.bf16.msra.mxu1 %v9899_v15  ;;  %7925 = vmatpush1.bf16.msra.mxu0 %v9901_v6  ;;  %v4058_v15 = vld [vmem:[%s14632_s6 + $0x328] sm:$0xff] }
 0x4d9   : > { %7832 = vmatprep.subr.bf16.mxu1 %v9932_v24  ;;  %7926 = vmatprep.subr.bf16.mxu0 %v9934_v8  ;;  %v4074_v6 = vld [vmem:[%s14632_s6 + $0x3a8] sm:$0xff]  ;;  %v9519_v24 = vcombine.low %v4025_v36, %v4041_v19  ;;  %v9521_v8 = vcombine.low %v4026_v63, %v4042_v45  ;;  %v4249_v36 = vld [vmem:[%s14632_s6 + $0x920] sm:$0xff] }
 0x4da   : > { %v9554_v59 = vcombine.high %v4058_v15, %v4074_v6  ;;  %v4265_v19 = vld [vmem:[%s14632_s6 + $0x9a0] sm:$0xff]  ;;  %v4250_v63 = vld [vmem:[%s14632_s6 + $0x928] sm:$0xff] }
 0x4db   : > { %v4266_v45 = vld [vmem:[%s14632_s6 + $0x9a8] sm:$0xff] }
 0x4dc   : > { %7833 = vmatpush1.bf16.msra.mxu1 %v9931_v37  ;;  %7927 = vmatpush1.bf16.msra.mxu0 %v9933_v42  ;;  %v4090_v37 = vld [vmem:[%s14632_s6 + $0x428] sm:$0xff] }
 0x4dd   : > { %7849 = vmatprep.subr.bf16.mxu1 %v9964_v38  ;;  %7943 = vmatprep.subr.bf16.mxu0 %v9966_v23  ;;  %v4106_v42 = vld [vmem:[%s14632_s6 + $0x4a8] sm:$0xff]  ;;  %v9551_v38 = vcombine.low %v4057_v43, %v4073_v51  ;;  %v9553_v23 = vcombine.low %v4058_v15, %v4074_v6  ;;  %v4281_v43 = vld [vmem:[%s14632_s6 + $0xa20] sm:$0xff] }
 0x4de   : > { %v9586_v61 = vcombine.high %v4090_v37, %v4106_v42  ;;  %v4297_v51 = vld [vmem:[%s14632_s6 + $0xaa0] sm:$0xff]  ;;  %v4282_v15 = vld [vmem:[%s14632_s6 + $0xa28] sm:$0xff] }
 0x4df   : > { %7835 = vmatmul.mubr.bf16.vlgmr.msra.gmra.mrb[112].mxu1 %v12771_v7  ;;  %7929 = vmatmul.mubr.bf16.vlgmr.msra.gmra.mrb[108].mxu0 %v12771_v7  ;;  %v4298_v6 = vld [vmem:[%s14632_s6 + $0xaa8] sm:$0xff] }
 0x4e0   : > { %7842 = vmatprep.mubr.bf16.mxu1 %v12836_v57  ;;  %7936 = vmatprep.mubr.bf16.mxu0 %v12836_v57 }
 0x4e1   : > { %7850 = vmatpush1.bf16.msra.mxu1 %v9963_v29  ;;  %7944 = vmatpush1.bf16.msra.mxu0 %v9965_v21  ;;  %v9583_v29 = vcombine.low %v4089_v14, %v4105_v3  ;;  %v9585_v21 = vcombine.low %v4090_v37, %v4106_v42  ;;  %v9776_v14 = vcombine.high %v4281_v43, %v4297_v51  ;;  %v4329_v3 = vld [vmem:[%s14632_s6 + $0xba0] sm:$0xff]  ;;  %v4314_v37 = vld [vmem:[%s14632_s6 + $0xb28] sm:$0xff] }
 0x4e2   : > { %7851 = vmatprep.subr.bf16.mxu1 %v9996_v20  ;;  %7945 = vmatprep.subr.bf16.mxu0 %v9998_v58  ;;  %v9616_v20 = vcombine.high %v4121_v31, %v4137_v1  ;;  %v9618_v58 = vcombine.high %v4122_v12, %v4138_v17  ;;  %v4330_v42 = vld [vmem:[%s14632_s6 + $0xba8] sm:$0xff]  ;;  %v4345_v31 = vld [vmem:[%s14632_s6 + $0xc20] sm:$0xff] }
 0x4e3   : > { %v4361_v1 = vld [vmem:[%s14632_s6 + $0xca0] sm:$0xff]  ;;  %v4346_v12 = vld [vmem:[%s14632_s6 + $0xc28] sm:$0xff] }
 0x4e4   : > { %v4362_v17 = vld [vmem:[%s14632_s6 + $0xca8] sm:$0xff] }
 0x4e5   : > { %7852 = vmatpush1.bf16.msra.mxu1 %v9995_v28  ;;  %7946 = vmatpush1.bf16.msra.mxu0 %v9997_v9  ;;  %v4154_v28 = vld [vmem:[%s14632_s6 + $0x628] sm:$0xff] }
 0x4e6   : > { %7853 = vmatprep.subr.bf16.mxu1 %v7534_v44  ;;  %7947 = vmatprep.subr.bf16.mxu0 %v7540_v0  ;;  %v4170_v9 = vld [vmem:[%s14632_s6 + $0x6a8] sm:$0xff]  ;;  %v9648_v44 = vcombine.high %v4153_v11, %v4169_v26 }
 0x4e7   : > { %7843 = vmatmul.mubr.bf16.gmra.mrb[116].mxu1 %v12819_v53  ;;  %7937 = vmatmul.mubr.bf16.gmra.mrb[112].mxu0 %v12819_v53  ;;  %v9650_v0 = vcombine.high %v4154_v28, %v4170_v9 }
 0x4e8   : > { %7881 = vmatprep.mubr.bf16.mxu1 %v10835_v18  ;;  %7975 = vmatprep.mubr.bf16.mxu0 %v10835_v18 }
 0x4e9   : > { %7854 = vmatpush1.bf16.msra.mxu1 %v7531_v40  ;;  %7948 = vmatpush1.bf16.msra.mxu0 %v7537_v50  ;;  %v9647_v40 = vcombine.low %v4153_v11, %v4169_v26  ;;  %v9649_v50 = vcombine.low %v4154_v28, %v4170_v9  ;;  %v4377_v11 = vld [vmem:[%s14632_s6 + $0xd20] sm:$0xff]  ;;  %v4378_v28 = vld [vmem:[%s14632_s6 + $0xd28] sm:$0xff] }
 0x4ea   : > { %7990 = vmatprep.subr.bf16.mxu1 %v9456_v62  ;;  %8084 = vmatprep.subr.bf16.mxu0 %v9458_v34  ;;  %v9680_v62 = vcombine.high %v4185_v32, %v4201_v4  ;;  %v9682_v34 = vcombine.high %v4186_v5, %v4202_v48  ;;  %v4393_v26 = vld [vmem:[%s14632_s6 + $0xda0] sm:$0xff]  ;;  %v4394_v9 = vld [vmem:[%s14632_s6 + $0xda8] sm:$0xff] }
 0x4ef   : > { %10059 = vmatmul.mubr.msk.bf16.vlgmr.msra.gmra.mrb[112].mxu1 %vm2776_vm7, %v12874_v55  ;;  %10061 = vmatmul.mubr.msk.bf16.vlgmr.msra.gmra.mrb[108].mxu0 %vm2776_vm7, %v12874_v55 }
 0x4f0   : > { %7991 = vmatpush1.bf16.msra.mxu1 %v9455_v10  ;;  %8085 = vmatpush1.bf16.msra.mxu0 %v9457_v41  ;;  %v9679_v10 = vcombine.low %v4185_v32, %v4201_v4  ;;  %v9681_v41 = vcombine.low %v4186_v5, %v4202_v48  ;;  %v4409_v32 = vld [vmem:[%s14632_s6 + $0xe20] sm:$0xff]  ;;  %v4410_v5 = vld [vmem:[%s14632_s6 + $0xe28] sm:$0xff] }
 0x4f1   : > { %7992 = vmatprep.subr.bf16.mxu1 %v9488_v54  ;;  %8086 = vmatprep.subr.bf16.mxu0 %v9490_v16  ;;  %v9712_v54 = vcombine.high %v4217_v2, %v4233_v30  ;;  %v9714_v16 = vcombine.high %v4218_v22, %v4234_v60  ;;  %v4425_v4 = vld [vmem:[%s14632_s6 + $0xea0] sm:$0xff]  ;;  %v4426_v48 = vld [vmem:[%s14632_s6 + $0xea8] sm:$0xff] }
 0x4f2   : > { %7889 = vmatprep.mubr.bf16.mxu1 %v10835_v18  ;;  %7983 = vmatprep.mubr.bf16.mxu0 %v10835_v18 }
 0x4f4   : > { %7993 = vmatpush1.bf16.msra.mxu1 %v9487_v47  ;;  %8087 = vmatpush1.bf16.msra.mxu0 %v9489_v52  ;;  %v9711_v47 = vcombine.low %v4217_v2, %v4233_v30  ;;  %v9713_v52 = vcombine.low %v4218_v22, %v4234_v60  ;;  %v4441_v2 = vld [vmem:[%s14632_s6 + $0xf20] sm:$0xff]  ;;  %v4442_v22 = vld [vmem:[%s14632_s6 + $0xf28] sm:$0xff] }
 0x4f5   : > { %7994 = vmatprep.subr.bf16.mxu1 %v9520_v56  ;;  %8088 = vmatprep.subr.bf16.mxu0 %v9522_v39  ;;  %v9744_v56 = vcombine.high %v4249_v36, %v4265_v19  ;;  %v9746_v39 = vcombine.high %v4250_v63, %v4266_v45  ;;  %v4457_v30 = vld [vmem:[%s14632_s6 + $0xfa0] sm:$0xff]  ;;  %v4458_v60 = vld [vmem:[%s14632_s6 + $0xfa8] sm:$0xff] }
 0x4f7   : > { %10060 = vmatmul.mubr.msk.bf16.gmra.mrb[120].mxu1 %vm2776_vm7, %v12908_v49  ;;  %10062 = vmatmul.mubr.msk.bf16.gmra.mrb[116].mxu0 %vm2776_vm7, %v12908_v49 }
 0x4f8   : > { %7995 = vmatpush1.bf16.msra.mxu1 %v9519_v24  ;;  %8089 = vmatpush1.bf16.msra.mxu0 %v9521_v8  ;;  %v9743_v24 = vcombine.low %v4249_v36, %v4265_v19  ;;  %v9745_v8 = vcombine.low %v4250_v63, %v4266_v45  ;;  %v4473_v36 = vld [vmem:[%s14632_s6 + $0x1020] sm:$0xff]  ;;  %v4474_v63 = vld [vmem:[%s14632_s6 + $0x1028] sm:$0xff] }
 0x4f9   : > { %8022 = vmatprep.mubr.bf16.mxu1 %v12775_v46  ;;  %8116 = vmatprep.mubr.bf16.mxu0 %v12775_v46  ;;  %v4489_v19 = vld [vmem:[%s14632_s6 + $0x10a0] sm:$0xff]  ;;  %v4490_v45 = vld [vmem:[%s14632_s6 + $0x10a8] sm:$0xff] }
 0x4fa   : > { %7996 = vmatprep.subr.bf16.mxu1 %v9552_v27  ;;  %8090 = vmatprep.subr.bf16.mxu0 %v9554_v59  ;;  %v9778_v27 = vcombine.high %v4282_v15, %v4298_v6  ;;  %v4313_v59 = vld [vmem:[%s14632_s6 + $0xb20] sm:$0xff] }
 0x4fc   : > { %7997 = vmatpush1.bf16.msra.mxu1 %v9551_v38  ;;  %8091 = vmatpush1.bf16.msra.mxu0 %v9553_v23  ;;  %v9775_v38 = vcombine.low %v4281_v43, %v4297_v51  ;;  %v9777_v23 = vcombine.low %v4282_v15, %v4298_v6  ;;  %v4505_v43 = vld [vmem:[%s14632_s6 + $0x1120] sm:$0xff]  ;;  %v4506_v15 = vld [vmem:[%s14632_s6 + $0x1128] sm:$0xff] }
 0x4fd   : > { %7998 = vmatprep.subr.bf16.mxu1 %v9584_v33  ;;  %8092 = vmatprep.subr.bf16.mxu0 %v9586_v61  ;;  %v9808_v33 = vcombine.high %v4313_v59, %v4329_v3  ;;  %v9810_v61 = vcombine.high %v4314_v37, %v4330_v42  ;;  %v4521_v51 = vld [vmem:[%s14632_s6 + $0x11a0] sm:$0xff]  ;;  %v4522_v6 = vld [vmem:[%s14632_s6 + $0x11a8] sm:$0xff] }
 0x500   : > { %7999 = vmatpush1.bf16.msra.mxu1 %v9583_v29  ;;  %8093 = vmatpush1.bf16.msra.mxu0 %v9585_v21  ;;  %v9807_v29 = vcombine.low %v4313_v59, %v4329_v3  ;;  %v9809_v21 = vcombine.low %v4314_v37, %v4330_v42  ;;  %v10000_v59 = vcombine.high %v4505_v43, %v4521_v51 }
 0x501   : > { %8000 = vmatprep.subr.bf16.mxu1 %v9616_v20  ;;  %8094 = vmatprep.subr.bf16.mxu0 %v9618_v58  ;;  %v9840_v20 = vcombine.high %v4345_v31, %v4361_v1  ;;  %v9842_v58 = vcombine.high %v4346_v12, %v4362_v17  ;;  %v10002_v3 = vcombine.high %v4506_v15, %v4522_v6 }
 0x504   : > { %8001 = vmatpush1.bf16.msra.mxu1 %v9615_v35  ;;  %8095 = vmatpush1.bf16.msra.mxu0 %v9617_v25  ;;  %v9839_v35 = vcombine.low %v4345_v31, %v4361_v1  ;;  %v9841_v25 = vcombine.low %v4346_v12, %v4362_v17  ;;  %v3963_v12 = vld [vmem:[%s14632_s6 + $0x30] sm:$0xff] }
 0x505   : > { %8002 = vmatprep.subr.bf16.mxu1 %v9648_v44  ;;  %8096 = vmatprep.subr.bf16.mxu0 %v9650_v0  ;;  %v9872_v44 = vcombine.high %v4377_v11, %v4393_v26  ;;  %v9874_v0 = vcombine.high %v4378_v28, %v4394_v9  ;;  %v3979_v17 = vld [vmem:[%s14632_s6 + $0xb0] sm:$0xff] }
 0x508   : > { %8003 = vmatpush1.bf16.msra.mxu1 %v9647_v40  ;;  %8097 = vmatpush1.bf16.msra.mxu0 %v9649_v50  ;;  %v9871_v40 = vcombine.low %v4377_v11, %v4393_v26  ;;  %v9873_v50 = vcombine.low %v4378_v28, %v4394_v9  ;;  %v9460_v11 = vcombine.high %v3963_v12, %v3979_v17  ;;  %v3995_v28 = vld [vmem:[%s14632_s6 + $0x130] sm:$0xff] }
 0x509   : > { %8004 = vmatprep.subr.bf16.mxu1 %v9680_v62  ;;  %8098 = vmatprep.subr.bf16.mxu0 %v9682_v34  ;;  %v9904_v62 = vcombine.high %v4409_v32, %v4425_v4  ;;  %v9906_v34 = vcombine.high %v4410_v5, %v4426_v48  ;;  %v4011_v9 = vld [vmem:[%s14632_s6 + $0x1b0] sm:$0xff] }
 0x50c   : > { %8005 = vmatpush1.bf16.msra.mxu1 %v9679_v10  ;;  %8099 = vmatpush1.bf16.msra.mxu0 %v9681_v41  ;;  %v9903_v10 = vcombine.low %v4409_v32, %v4425_v4  ;;  %v9905_v41 = vcombine.low %v4410_v5, %v4426_v48  ;;  %v9492_v32 = vcombine.high %v3995_v28, %v4011_v9  ;;  %v4027_v5 = vld [vmem:[%s14632_s6 + $0x230] sm:$0xff] }
 0x50d   : > { %8006 = vmatprep.subr.bf16.mxu1 %v9712_v54  ;;  %8100 = vmatprep.subr.bf16.mxu0 %v9714_v16  ;;  %v9936_v54 = vcombine.high %v4441_v2, %v4457_v30  ;;  %v9938_v16 = vcombine.high %v4442_v22, %v4458_v60  ;;  %v4043_v48 = vld [vmem:[%s14632_s6 + $0x2b0] sm:$0xff] }
 0x510   : > { %8007 = vmatpush1.bf16.msra.mxu1 %v9711_v47  ;;  %8101 = vmatpush1.bf16.msra.mxu0 %v9713_v52  ;;  %v9935_v47 = vcombine.low %v4441_v2, %v4457_v30  ;;  %v9937_v52 = vcombine.low %v4442_v22, %v4458_v60  ;;  %v9524_v2 = vcombine.high %v4027_v5, %v4043_v48  ;;  %v4059_v22 = vld [vmem:[%s14632_s6 + $0x330] sm:$0xff] }
 0x511   : > { %8008 = vmatprep.subr.bf16.mxu1 %v9744_v56  ;;  %8102 = vmatprep.subr.bf16.mxu0 %v9746_v39  ;;  %v9968_v56 = vcombine.high %v4473_v36, %v4489_v19  ;;  %v9970_v39 = vcombine.high %v4474_v63, %v4490_v45  ;;  %v4075_v60 = vld [vmem:[%s14632_s6 + $0x3b0] sm:$0xff] }
 0x514   : > { %8009 = vmatpush1.bf16.msra.mxu1 %v9743_v24  ;;  %8103 = vmatpush1.bf16.msra.mxu0 %v9745_v8  ;;  %v4537_v24 = vld [vmem:[%s14632_s6 + $0x1220] sm:$0x11]  ;;  %v4538_v8 = vld [vmem:[%s14632_s6 + $0x1228] sm:$0x11] }
 0x515   : > { %8010 = vmatprep.subr.bf16.mxu1 %v9776_v14  ;;  %8104 = vmatprep.subr.bf16.mxu0 %v9778_v27  ;;  %v9967_v14 = vcombine.low %v4473_v36, %v4489_v19  ;;  %v9969_v27 = vcombine.low %v4474_v63, %v4490_v45  ;;  %v10032_v37 = vcombine.high %v4537_v24, %v4537_v24  ;;  %v4091_v36 = vld [vmem:[%s14632_s6 + $0x430] sm:$0xff] }
 0x516   : > { %v10034_v42 = vcombine.high %v4538_v8, %v4538_v8  ;;  %v9556_v19 = vcombine.high %v4059_v22, %v4075_v60  ;;  %v4107_v45 = vld [vmem:[%s14632_s6 + $0x4b0] sm:$0xff] }
 0x517   : > { %v7546_v31 = vand.u32 %v10032_v37, %v12792_v13  ;;  %v4155_v37 = vld [vmem:[%s14632_s6 + $0x630] sm:$0xff] }
 0x518   : > { %8011 = vmatpush1.bf16.msra.mxu1 %v9775_v38  ;;  %8105 = vmatpush1.bf16.msra.mxu0 %v9777_v23  ;;  %v9999_v38 = vcombine.low %v4505_v43, %v4521_v51  ;;  %v10001_v23 = vcombine.low %v4506_v15, %v4522_v6  ;;  %v7552_v1 = vand.u32 %v10034_v42, %v12792_v13  ;;  %v4123_v15 = vld [vmem:[%s14632_s6 + $0x530] sm:$0xff] }
 0x519   : > { %8012 = vmatprep.subr.bf16.mxu1 %v9808_v33  ;;  %8106 = vmatprep.subr.bf16.mxu0 %v9810_v61  ;;  %v10031_v33 = vcombine.low %v4537_v24, %v4537_v24  ;;  %v10033_v61 = vcombine.low %v4538_v8, %v4538_v8  ;;  %v9588_v43 = vcombine.high %v4091_v36, %v4107_v45  ;;  %v4139_v6 = vld [vmem:[%s14632_s6 + $0x5b0] sm:$0xff]  ;;  %v4124_v24 = vld [vmem:[%s14632_s6 + $0x538] sm:$0xff] }
 0x51a   : > { %v4140_v8 = vld [vmem:[%s14632_s6 + $0x5b8] sm:$0xff]  ;;  %v4171_v42 = vld [vmem:[%s14632_s6 + $0x6b0] sm:$0xff] }
 0x51c   : > { %8013 = vmatpush1.bf16.msra.mxu1 %v9807_v29  ;;  %8107 = vmatpush1.bf16.msra.mxu0 %v9809_v21  ;;  %v3964_v29 = vld [vmem:[%s14632_s6 + $0x38] sm:$0xff] }
 0x51d   : > { %8014 = vmatprep.subr.bf16.mxu1 %v9840_v20  ;;  %8108 = vmatprep.subr.bf16.mxu0 %v9842_v58  ;;  %v3980_v21 = vld [vmem:[%s14632_s6 + $0xb8] sm:$0xff]  ;;  %v7543_v20 = vand.u32 %v10031_v33, %v12792_v13  ;;  %v7549_v58 = vand.u32 %v10033_v61, %v12792_v13  ;;  %v9619_v33 = vcombine.low %v4123_v15, %v4139_v6 }
 0x51e   : > { %v9462_v26 = vcombine.high %v3964_v29, %v3980_v21  ;;  %v9621_v61 = vcombine.low %v4124_v24, %v4140_v8 }
 0x520   : > { %8015 = vmatpush1.bf16.msra.mxu1 %v9839_v35  ;;  %8109 = vmatpush1.bf16.msra.mxu0 %v9841_v25  ;;  %v3996_v35 = vld [vmem:[%s14632_s6 + $0x138] sm:$0xff] }
 0x521   : > { %8016 = vmatprep.subr.bf16.mxu1 %v9872_v44  ;;  %8110 = vmatprep.subr.bf16.mxu0 %v9874_v0  ;;  %v4012_v25 = vld [vmem:[%s14632_s6 + $0x1b8] sm:$0xff]  ;;  %v9459_v44 = vcombine.low %v3963_v12, %v3979_v17  ;;  %v9461_v0 = vcombine.low %v3964_v29, %v3980_v21  ;;  %v4187_v12 = vld [vmem:[%s14632_s6 + $0x730] sm:$0xff] }
 0x522   : > { %v9494_v4 = vcombine.high %v3996_v35, %v4012_v25  ;;  %v4203_v17 = vld [vmem:[%s14632_s6 + $0x7b0] sm:$0xff]  ;;  %v4188_v29 = vld [vmem:[%s14632_s6 + $0x738] sm:$0xff] }
 0x523   : > { %v4204_v21 = vld [vmem:[%s14632_s6 + $0x7b8] sm:$0xff] }
 0x524   : > { %8017 = vmatpush1.bf16.msra.mxu1 %v9871_v40  ;;  %8111 = vmatpush1.bf16.msra.mxu0 %v9873_v50  ;;  %v4028_v40 = vld [vmem:[%s14632_s6 + $0x238] sm:$0xff] }
 0x525   : > { %8018 = vmatprep.subr.bf16.mxu1 %v9904_v62  ;;  %8112 = vmatprep.subr.bf16.mxu0 %v9906_v34  ;;  %v4044_v50 = vld [vmem:[%s14632_s6 + $0x2b8] sm:$0xff]  ;;  %v9491_v62 = vcombine.low %v3995_v28, %v4011_v9  ;;  %v9493_v34 = vcombine.low %v3996_v35, %v4012_v25  ;;  %v4219_v28 = vld [vmem:[%s14632_s6 + $0x830] sm:$0xff] }
 0x526   : > { %v9526_v30 = vcombine.high %v4028_v40, %v4044_v50  ;;  %v4235_v9 = vld [vmem:[%s14632_s6 + $0x8b0] sm:$0xff]  ;;  %v4220_v35 = vld [vmem:[%s14632_s6 + $0x838] sm:$0xff] }
 0x527   : > { %v4236_v25 = vld [vmem:[%s14632_s6 + $0x8b8] sm:$0xff] }
 0x528   : > { %8019 = vmatpush1.bf16.msra.mxu1 %v9903_v10  ;;  %8113 = vmatpush1.bf16.msra.mxu0 %v9905_v41  ;;  %v4060_v10 = vld [vmem:[%s14632_s6 + $0x338] sm:$0xff] }
 0x529   : > { %8020 = vmatprep.subr.bf16.mxu1 %v9936_v54  ;;  %8114 = vmatprep.subr.bf16.mxu0 %v9938_v16  ;;  %v4076_v41 = vld [vmem:[%s14632_s6 + $0x3b8] sm:$0xff]  ;;  %v9523_v54 = vcombine.low %v4027_v5, %v4043_v48  ;;  %v9525_v16 = vcombine.low %v4028_v40, %v4044_v50  ;;  %v9716_v5 = vcombine.high %v4219_v28, %v4235_v9  ;;  %v4251_v50 = vld [vmem:[%s14632_s6 + $0x930] sm:$0xff] }
 0x52a   : > { %v9558_v63 = vcombine.high %v4060_v10, %v4076_v41  ;;  %v9718_v48 = vcombine.high %v4220_v35, %v4236_v25 }
 0x52c   : > { %8021 = vmatpush1.bf16.msra.mxu1 %v9935_v47  ;;  %8115 = vmatpush1.bf16.msra.mxu0 %v9937_v52  ;;  %v4092_v47 = vld [vmem:[%s14632_s6 + $0x438] sm:$0xff] }
 0x52d   : > { %8037 = vmatprep.subr.bf16.mxu1 %v9968_v56  ;;  %8131 = vmatprep.subr.bf16.mxu0 %v9970_v39  ;;  %v4108_v52 = vld [vmem:[%s14632_s6 + $0x4b8] sm:$0xff]  ;;  %v9555_v56 = vcombine.low %v4059_v22, %v4075_v60  ;;  %v9557_v39 = vcombine.low %v4060_v10, %v4076_v41  ;;  %v9715_v22 = vcombine.low %v4219_v28, %v4235_v9 }
 0x52e   : > { %v9590_v51 = vcombine.high %v4092_v47, %v4108_v52  ;;  %v9717_v60 = vcombine.low %v4220_v35, %v4236_v25 }
 0x52f   : > { %8023 = vmatmul.mubr.bf16.vlgmr.msra.gmra.mrb[124].mxu1 %v12771_v7  ;;  %8117 = vmatmul.mubr.bf16.vlgmr.msra.gmra.mrb[120].mxu0 %v12771_v7 }
 0x530   : > { %8030 = vmatprep.mubr.bf16.mxu1 %v12836_v57  ;;  %8124 = vmatprep.mubr.bf16.mxu0 %v12836_v57 }
 0x531   : > { %8038 = vmatpush1.bf16.msra.mxu1 %v9967_v14  ;;  %8132 = vmatpush1.bf16.msra.mxu0 %v9969_v27  ;;  %v9587_v14 = vcombine.low %v4091_v36, %v4107_v45  ;;  %v9589_v27 = vcombine.low %v4092_v47, %v4108_v52  ;;  %v4284_v36 = vld [vmem:[%s14632_s6 + $0xa38] sm:$0xff] }
 0x532   : > { %8039 = vmatprep.subr.bf16.mxu1 %v10000_v59  ;;  %8133 = vmatprep.subr.bf16.mxu0 %v10002_v3  ;;  %v9620_v59 = vcombine.high %v4123_v15, %v4139_v6  ;;  %v9622_v3 = vcombine.high %v4124_v24, %v4140_v8  ;;  %v4315_v24 = vld [vmem:[%s14632_s6 + $0xb30] sm:$0xff] }
 0x533   : > { %v4331_v8 = vld [vmem:[%s14632_s6 + $0xbb0] sm:$0xff] }
 0x535   : > { %8040 = vmatpush1.bf16.msra.mxu1 %v9999_v38  ;;  %8134 = vmatpush1.bf16.msra.mxu0 %v10001_v23  ;;  %v4156_v38 = vld [vmem:[%s14632_s6 + $0x638] sm:$0xff] }
 0x536   : > { %8041 = vmatprep.subr.bf16.mxu1 %v7546_v31  ;;  %8135 = vmatprep.subr.bf16.mxu0 %v7552_v1  ;;  %v4172_v23 = vld [vmem:[%s14632_s6 + $0x6b8] sm:$0xff]  ;;  %v9652_v31 = vcombine.high %v4155_v37, %v4171_v42 }
 0x537   : > { %8031 = vmatmul.mubr.bf16.gmra.mrb[128].mxu1 %v12819_v53  ;;  %8125 = vmatmul.mubr.bf16.gmra.mrb[124].mxu0 %v12819_v53  ;;  %v9654_v1 = vcombine.high %v4156_v38, %v4172_v23 }
 0x538   : > { %8069 = vmatprep.mubr.bf16.mxu1 %v10835_v18  ;;  %8163 = vmatprep.mubr.bf16.mxu0 %v10835_v18 }
 0x539   : > { %8042 = vmatpush1.bf16.msra.mxu1 %v7543_v20  ;;  %8136 = vmatpush1.bf16.msra.mxu0 %v7549_v58  ;;  %v9651_v20 = vcombine.low %v4155_v37, %v4171_v42  ;;  %v9653_v58 = vcombine.low %v4156_v38, %v4172_v23  ;;  %v9812_v38 = vcombine.high %v4315_v24, %v4331_v8 }
 0x53a   : > { %8178 = vmatprep.subr.bf16.mxu1 %v9460_v11  ;;  %8272 = vmatprep.subr.bf16.mxu0 %v9462_v26  ;;  %v9684_v11 = vcombine.high %v4187_v12, %v4203_v17  ;;  %v9686_v26 = vcombine.high %v4188_v29, %v4204_v21 }
 0x53f   : > { %10063 = vmatmul.mubr.msk.bf16.vlgmr.msra.gmra.mrb[124].mxu1 %vm2776_vm7, %v12874_v55  ;;  %10065 = vmatmul.mubr.msk.bf16.vlgmr.msra.gmra.mrb[120].mxu0 %vm2776_vm7, %v12874_v55 }
 0x540   : > { %8179 = vmatpush1.bf16.msra.mxu1 %v9459_v44  ;;  %8273 = vmatpush1.bf16.msra.mxu0 %v9461_v0  ;;  %v9683_v0 = vcombine.low %v4187_v12, %v4203_v17  ;;  %v9811_v12 = vcombine.low %v4315_v24, %v4331_v8  ;;  %v4492_v24 = vld [vmem:[%s14632_s6 + $0x10b8] sm:$0xff] }
 0x541   : > { %8180 = vmatprep.subr.bf16.mxu1 %v9492_v32  ;;  %8274 = vmatprep.subr.bf16.mxu0 %v9494_v4  ;;  %v9685_v32 = vcombine.low %v4188_v29, %v4204_v21 }
 0x542   : > { %8077 = vmatprep.mubr.bf16.mxu1 %v10835_v18  ;;  %8171 = vmatprep.mubr.bf16.mxu0 %v10835_v18 }
 0x544   : > { %8181 = vmatpush1.bf16.msra.mxu1 %v9491_v62  ;;  %8275 = vmatpush1.bf16.msra.mxu0 %v9493_v34  ;;  %v4267_v62 = vld [vmem:[%s14632_s6 + $0x9b0] sm:$0xff]  ;;  %v4252_v34 = vld [vmem:[%s14632_s6 + $0x938] sm:$0xff] }
 0x545   : > { %8182 = vmatprep.subr.bf16.mxu1 %v9524_v2  ;;  %8276 = vmatprep.subr.bf16.mxu0 %v9526_v30  ;;  %v4268_v2 = vld [vmem:[%s14632_s6 + $0x9b8] sm:$0xff]  ;;  %v9748_v10 = vcombine.high %v4251_v50, %v4267_v62  ;;  %v9747_v47 = vcombine.low %v4251_v50, %v4267_v62 }
 0x546   : > { %v9750_v41 = vcombine.high %v4252_v34, %v4268_v2  ;;  %v9749_v52 = vcombine.low %v4252_v34, %v4268_v2  ;;  %v4443_v2 = vld [vmem:[%s14632_s6 + $0xf30] sm:$0xff] }
 0x547   : > { %10064 = vmatmul.mubr.msk.bf16.gmra.mrb[132].mxu1 %vm2776_vm7, %v12908_v49  ;;  %10066 = vmatmul.mubr.msk.bf16.gmra.mrb[128].mxu0 %vm2776_vm7, %v12908_v49 }
 0x548   : > { %8183 = vmatpush1.bf16.msra.mxu1 %v9523_v54  ;;  %8277 = vmatpush1.bf16.msra.mxu0 %v9525_v16  ;;  %v4283_v54 = vld [vmem:[%s14632_s6 + $0xa30] sm:$0xff] }
 0x549   : > { %8210 = vmatprep.mubr.bf16.mxu1 %v12775_v46  ;;  %8304 = vmatprep.mubr.bf16.mxu0 %v12775_v46  ;;  %v4299_v16 = vld [vmem:[%s14632_s6 + $0xab0] sm:$0xff] }
 0x54a   : > { %8184 = vmatprep.subr.bf16.mxu1 %v9556_v19  ;;  %8278 = vmatprep.subr.bf16.mxu0 %v9558_v63  ;;  %v4300_v19 = vld [vmem:[%s14632_s6 + $0xab8] sm:$0xff]  ;;  %v9779_v37 = vcombine.low %v4283_v54, %v4299_v16 }
 0x54b   : > { %v9781_v42 = vcombine.low %v4284_v36, %v4300_v19 }
 0x54c   : > { %8185 = vmatpush1.bf16.msra.mxu1 %v9555_v56  ;;  %8279 = vmatpush1.bf16.msra.mxu0 %v9557_v39 }
 0x54d   : > { %8186 = vmatprep.subr.bf16.mxu1 %v9588_v43  ;;  %8280 = vmatprep.subr.bf16.mxu0 %v9590_v51  ;;  %v9780_v43 = vcombine.high %v4283_v54, %v4299_v16  ;;  %v9782_v51 = vcombine.high %v4284_v36, %v4300_v19 }
 0x550   : > { %8187 = vmatpush1.bf16.msra.mxu1 %v9587_v14  ;;  %8281 = vmatpush1.bf16.msra.mxu0 %v9589_v27  ;;  %v4316_v14 = vld [vmem:[%s14632_s6 + $0xb38] sm:$0xff] }
 0x551   : > { %8188 = vmatprep.subr.bf16.mxu1 %v9620_v59  ;;  %8282 = vmatprep.subr.bf16.mxu0 %v9622_v3  ;;  %v4332_v27 = vld [vmem:[%s14632_s6 + $0xbb8] sm:$0xff] }
 0x552   : > { %v9814_v23 = vcombine.high %v4316_v14, %v4332_v27  ;;  %v9813_v17 = vcombine.low %v4316_v14, %v4332_v27 }
 0x554   : > { %8189 = vmatpush1.bf16.msra.mxu1 %v9619_v33  ;;  %8283 = vmatpush1.bf16.msra.mxu0 %v9621_v61  ;;  %v4347_v33 = vld [vmem:[%s14632_s6 + $0xc30] sm:$0xff] }
 0x555   : > { %8190 = vmatprep.subr.bf16.mxu1 %v9652_v31  ;;  %8284 = vmatprep.subr.bf16.mxu0 %v9654_v1  ;;  %v13468_v44 = vpop.f32.mrb[96].mxu1  ;;  %v4363_v61 = vld [vmem:[%s14632_s6 + $0xcb0] sm:$0xff]  ;;  %v4348_v31 = vld [vmem:[%s14632_s6 + $0xc38] sm:$0xff] }
 0x556   : > { %v13470_v4 = vpop.f32.mrb[97].mxu1  ;;  %v4364_v1 = vld [vmem:[%s14632_s6 + $0xcb8] sm:$0xff]  ;;  %v9844_v29 = vcombine.high %v4347_v33, %v4363_v61  ;;  %v9843_v28 = vcombine.low %v4347_v33, %v4363_v61 }
 0x557   : > { %v7652_v40 = vpop.f32.mrb[98].mxu1  ;;  %v9846_v21 = vcombine.high %v4348_v31, %v4364_v1  ;;  %v9845_v9 = vcombine.low %v4348_v31, %v4364_v1  ;;  %v4523_v31 = vld [vmem:[%s14632_s6 + $0x11b0] sm:$0xff]  ;;  %v4508_v1 = vld [vmem:[%s14632_s6 + $0x1138] sm:$0xff] }
 0x558   : > { %8191 = vmatpush1.bf16.msra.mxu1 %v9651_v20  ;;  %8285 = vmatpush1.bf16.msra.mxu0 %v9653_v58  ;;  %v7653_v30 = vpop.f32.mrb[99].mxu1  ;;  %v4379_v20 = vld [vmem:[%s14632_s6 + $0xd30] sm:$0xff] }
 0x559   : > { %8192 = vmatprep.subr.bf16.mxu1 %v9684_v11  ;;  %8286 = vmatprep.subr.bf16.mxu0 %v9686_v26  ;;  %v4395_v58 = vld [vmem:[%s14632_s6 + $0xdb0] sm:$0xff]  ;;  %v4380_v11 = vld [vmem:[%s14632_s6 + $0xd38] sm:$0xff] }
 0x55a   : > { %v4396_v26 = vld [vmem:[%s14632_s6 + $0xdb8] sm:$0xff]  ;;  %v9876_v35 = vcombine.high %v4379_v20, %v4395_v58  ;;  %v9875_v40 = vcombine.low %v4379_v20, %v4395_v58 }
 0x55b   : > { %v9878_v25 = vcombine.high %v4380_v11, %v4396_v26  ;;  %v9877_v50 = vcombine.low %v4380_v11, %v4396_v26  ;;  %v4540_v20 = vld [vmem:[%s14632_s6 + $0x1238] sm:$0x11] }
 0x55c   : > { %8193 = vmatpush1.bf16.msra.mxu1 %v9683_v0  ;;  %8287 = vmatpush1.bf16.msra.mxu0 %v9685_v32  ;;  %v4411_v0 = vld [vmem:[%s14632_s6 + $0xe30] sm:$0xff] }
 0x55d   : > { %8194 = vmatprep.subr.bf16.mxu1 %v9716_v5  ;;  %8288 = vmatprep.subr.bf16.mxu0 %v9718_v48  ;;  %v7656_v63 = vpop.f32.mrb[100].mxu1  ;;  %v7750_v45 = vpop.f32.mrb[100].mxu0  ;;  %v4427_v32 = vld [vmem:[%s14632_s6 + $0xeb0] sm:$0xff]  ;;  %v4412_v5 = vld [vmem:[%s14632_s6 + $0xe38] sm:$0xff] }
 0x55e   : > { %v7657_v56 = vpop.f32.mrb[101].mxu1  ;;  %v7751_v39 = vpop.f32.mrb[101].mxu0  ;;  %v4428_v48 = vld [vmem:[%s14632_s6 + $0xeb8] sm:$0xff]  ;;  %v9908_v62 = vcombine.high %v4411_v0, %v4427_v32 }
 0x55f   : > { %v7658_v15 = vpop.f32.mrb[102].mxu1  ;;  %v7752_v6 = vpop.f32.mrb[102].mxu0  ;;  %v9910_v34 = vcombine.high %v4412_v5, %v4428_v48 }
 0x560   : > { %8195 = vmatpush1.bf16.msra.mxu1 %v9715_v22  ;;  %8289 = vmatpush1.bf16.msra.mxu0 %v9717_v60  ;;  %v7659_v59 = vpop.f32.mrb[103].mxu1  ;;  %v7753_v3 = vpop.f32.mrb[103].mxu0  ;;  %v4459_v60 = vld [vmem:[%s14632_s6 + $0xfb0] sm:$0xff] }
 0x561   : > { %8196 = vmatprep.subr.bf16.mxu1 %v9748_v10  ;;  %8290 = vmatprep.subr.bf16.mxu0 %v9750_v41  ;;  %v4444_v10 = vld [vmem:[%s14632_s6 + $0xf38] sm:$0xff]  ;;  %v4491_v6 = vld [vmem:[%s14632_s6 + $0x10b0] sm:$0xff]  ;;  %v9939_v27 = vcombine.low %v4443_v2, %v4459_v60 }
 0x562   : > { %v4460_v41 = vld [vmem:[%s14632_s6 + $0xfb8] sm:$0xff] }
 0x563   : > { %v9941_v59 = vcombine.low %v4444_v10, %v4460_v41 }
 0x564   : > { %8197 = vmatpush1.bf16.msra.mxu1 %v9747_v47  ;;  %8291 = vmatpush1.bf16.msra.mxu0 %v9749_v52  ;;  %v9907_v47 = vcombine.low %v4411_v0, %v4427_v32  ;;  %v9909_v52 = vcombine.low %v4412_v5, %v4428_v48  ;;  %v10038_v48 = vcombine.high %v4540_v20, %v4540_v20 }
 0x565   : > { %8198 = vmatprep.subr.bf16.mxu1 %v9780_v43  ;;  %8292 = vmatprep.subr.bf16.mxu0 %v9782_v51  ;;  %v9940_v43 = vcombine.high %v4443_v2, %v4459_v60  ;;  %v9942_v51 = vcombine.high %v4444_v10, %v4460_v41  ;;  %v3981_v60 = vld [vmem:[%s14632_s6 + $0xc0] sm:$0xff]  ;;  %v3966_v10 = vld [vmem:[%s14632_s6 + $0x48] sm:$0xff] }
 0x566   : > { %v3982_v41 = vld [vmem:[%s14632_s6 + $0xc8] sm:$0xff] }
 0x568   : > { %8199 = vmatpush1.bf16.msra.mxu1 %v9779_v37  ;;  %8293 = vmatpush1.bf16.msra.mxu0 %v9781_v42  ;;  %v4507_v42 = vld [vmem:[%s14632_s6 + $0x1130] sm:$0xff] }
 0x569   : > { %8200 = vmatprep.subr.bf16.mxu1 %v9812_v38  ;;  %8294 = vmatprep.subr.bf16.mxu0 %v9814_v23  ;;  %v10004_v0 = vcombine.high %v4507_v42, %v4523_v31 }
 0x56c   : > { %8201 = vmatpush1.bf16.msra.mxu1 %v9811_v12  ;;  %8295 = vmatpush1.bf16.msra.mxu0 %v9813_v17  ;;  %v4524_v12 = vld [vmem:[%s14632_s6 + $0x11b8] sm:$0xff] }
 0x56d   : > { %8202 = vmatprep.subr.bf16.mxu1 %v9844_v29  ;;  %8296 = vmatprep.subr.bf16.mxu0 %v9846_v21  ;;  %v4539_v21 = vld [vmem:[%s14632_s6 + $0x1230] sm:$0x11]  ;;  %v10006_v32 = vcombine.high %v4508_v1, %v4524_v12 }
 0x56e   : > { %v10036_v5 = vcombine.high %v4539_v21, %v4539_v21 }
 0x570   : > { %8203 = vmatpush1.bf16.msra.mxu1 %v9843_v28  ;;  %8297 = vmatpush1.bf16.msra.mxu0 %v9845_v9  ;;  %v7558_v2 = vand.u32 %v10036_v5, %v12792_v13 }
 0x571   : > { %8204 = vmatprep.subr.bf16.mxu1 %v9876_v35  ;;  %8298 = vmatprep.subr.bf16.mxu0 %v9878_v25 }
 0x572   : > { %v7695_v30 = vpop.f32.mrb[104].mxu1  ;;  %v7789_v22 = vpop.f32.mrb[96].mxu0 }
 0x573   : > { %v7696_v54 = vadd.f32 %v7695_v30, %v13468_v44  ;;  %v7697_v16 = vpop.f32.mrb[105].mxu1  ;;  %v7791_v36 = vpop.f32.mrb[97].mxu0  ;;  %v4475_v44 = vld [vmem:[%s14632_s6 + $0x1030] sm:$0xff]  ;;  %v9123_v8 = vrot.slane %v7789_v22, 2  ;;  %v7564_v30 = vand.u32 %v10038_v48, %v12792_v13  ;;  %v3965_v22 = vld [vmem:[%s14632_s6 + $0x40] sm:$0xff] }
 0x574   : > { %8205 = vmatpush1.bf16.msra.mxu1 %v9875_v40  ;;  %8299 = vmatpush1.bf16.msra.mxu0 %v9877_v50  ;;  %v7698_v19 = vadd.f32 %v7697_v16, %v13470_v4  ;;  %v7699_v63 = vpop.f32.mrb[106].mxu1  ;;  %v7793_v45 = vpop.f32.mrb[98].mxu0  ;;  %v4476_v4 = vld [vmem:[%s14632_s6 + $0x1038] sm:$0xff]  ;;  %v9972_v3 = vcombine.high %v4475_v44, %v4491_v6  ;;  %v9127_v23 = vrot.slane %v7791_v36, 3  ;;  %v9971_v35 = vcombine.low %v4475_v44, %v4491_v6  ;;  %v4029_v44 = vld [vmem:[%s14632_s6 + $0x240] sm:$0xff]  ;;  %v4030_v6 = vld [vmem:[%s14632_s6 + $0x248] sm:$0xff] }
 0x575   : > { %8206 = vmatprep.subr.bf16.mxu1 %v9908_v62  ;;  %8300 = vmatprep.subr.bf16.mxu0 %v9910_v34  ;;  %v7700_v56 = vpop.f32.mrb[107].mxu1  ;;  %v7794_v39 = vpop.f32.mrb[99].mxu0  ;;  %v9974_v37 = vcombine.high %v4476_v4, %v4492_v24  ;;  %v9973_v25 = vcombine.low %v4476_v4, %v4492_v24  ;;  %v10003_v40 = vcombine.low %v4507_v42, %v4523_v31  ;;  %v3997_v63 = vld [vmem:[%s14632_s6 + $0x140] sm:$0xff]  ;;  %v4046_v4 = vld [vmem:[%s14632_s6 + $0x2c8] sm:$0xff] }
 0x576   : > { %v9119_v15 = vrot.slane %v7698_v19, 1  ;;  %v10005_v50 = vcombine.low %v4508_v1, %v4524_v12  ;;  %v10035_v62 = vcombine.low %v4539_v21, %v4539_v21  ;;  %v10037_v34 = vcombine.low %v4540_v20, %v4540_v20  ;;  %v4013_v45 = vld [vmem:[%s14632_s6 + $0x1c0] sm:$0xff]  ;;  %v4078_v42 = vld [vmem:[%s14632_s6 + $0x3c8] sm:$0xff] }
 0x577   : > { %v9464_v36 = vcombine.high %v3965_v22, %v3981_v60  ;;  %v9466_v19 = vcombine.high %v3966_v10, %v3982_v41  ;;  %v9463_v56 = vcombine.low %v3965_v22, %v3981_v60  ;;  %v9465_v39 = vcombine.low %v3966_v10, %v3982_v41  ;;  %v4109_v1 = vld [vmem:[%s14632_s6 + $0x4c0] sm:$0xff]  ;;  %v4094_v12 = vld [vmem:[%s14632_s6 + $0x448] sm:$0xff] }
 0x578   : > { %v9121_v14 = vadd.f32 %v9119_v15, %v7696_v54  ;;  %8207 = vmatpush1.bf16.msra.mxu1 %v9907_v47  ;;  %8301 = vmatpush1.bf16.msra.mxu0 %v9909_v52  ;;  %v7555_v54 = vand.u32 %v10035_v62, %v12792_v13  ;;  %v7561_v16 = vand.u32 %v10037_v34, %v12792_v13  ;;  %v3998_v47 = vld [vmem:[%s14632_s6 + $0x148] sm:$0xff]  ;;  %v4045_v15 = vld [vmem:[%s14632_s6 + $0x2c0] sm:$0xff] }
 0x579   : > { %8208 = vmatprep.subr.bf16.mxu1 %v9940_v43  ;;  %8302 = vmatprep.subr.bf16.mxu0 %v9942_v51  ;;  %v4014_v52 = vld [vmem:[%s14632_s6 + $0x1c8] sm:$0xff]  ;;  %v9496_v43 = vcombine.high %v3997_v63, %v4013_v45  ;;  %v9495_v24 = vcombine.low %v3997_v63, %v4013_v45  ;;  %v4157_v48 = vld [vmem:[%s14632_s6 + $0x640] sm:$0xff] }
 0x57a   : > { %v9125_v38 = vadd.f32 %v9123_v8, %v9121_v14  ;;  %v7703_v33 = vpop.f32.mrb[108].mxu1  ;;  %v7797_v61 = vpop.f32.mrb[104].mxu0  ;;  %v9498_v51 = vcombine.high %v3998_v47, %v4014_v52  ;;  %v9497_v8 = vcombine.low %v3998_v47, %v4014_v52  ;;  %v9528_v14 = vcombine.high %v4029_v44, %v4045_v15  ;;  %v4174_v62 = vld [vmem:[%s14632_s6 + $0x6c8] sm:$0xff]  ;;  %v4189_v60 = vld [vmem:[%s14632_s6 + $0x740] sm:$0xff] }
 0x57b   : > { %v7704_v17 = vpop.f32.mrb[109].mxu1  ;;  %v7798_v29 = vpop.f32.mrb[105].mxu0  ;;  %v4093_v33 = vld [vmem:[%s14632_s6 + $0x440] sm:$0xff]  ;;  %v4190_v41 = vld [vmem:[%s14632_s6 + $0x748] sm:$0xff] }
 0x57c   : > { %v13588_v58 = vadd.f32 %v9127_v23, %v9125_v38  ;;  %8209 = vmatpush1.bf16.msra.mxu1 %v9939_v27  ;;  %8303 = vmatpush1.bf16.msra.mxu0 %v9941_v59  ;;  %v7705_v11 = vpop.f32.mrb[110].mxu1  ;;  %v7799_v26 = vpop.f32.mrb[106].mxu0  ;;  %v9530_v27 = vcombine.high %v4030_v6, %v4046_v4  ;;  %v4061_v59 = vld [vmem:[%s14632_s6 + $0x340] sm:$0xff]  ;;  %v9527_v38 = vcombine.low %v4029_v44, %v4045_v15  ;;  %v4110_v17 = vld [vmem:[%s14632_s6 + $0x4c8] sm:$0xff] }
 0x57d   : > { %v7706_v28 = vpop.f32.mrb[111].mxu1  ;;  %v7800_v9 = vpop.f32.mrb[107].mxu0  ;;  %8225 = vmatprep.subr.bf16.mxu1 %v9972_v3  ;;  %8319 = vmatprep.subr.bf16.mxu0 %v9974_v37  ;;  %v4077_v3 = vld [vmem:[%s14632_s6 + $0x3c0] sm:$0xff]  ;;  %v4062_v37 = vld [vmem:[%s14632_s6 + $0x348] sm:$0xff]  ;;  %v9529_v23 = vcombine.low %v4030_v6, %v4046_v4  ;;  %v9592_v20 = vcombine.high %v4093_v33, %v4109_v1  ;;  %v9594_v11 = vcombine.high %v4094_v12, %v4110_v17 }
 0x57e   : > { %v9560_v61 = vcombine.high %v4061_v59, %v4077_v3  ;;  %v9562_v31 = vcombine.high %v4062_v37, %v4078_v42  ;;  %v9559_v29 = vcombine.low %v4061_v59, %v4077_v3  ;;  %v9561_v21 = vcombine.low %v4062_v37, %v4078_v42  ;;  %v4125_v26 = vld [vmem:[%s14632_s6 + $0x540] sm:$0xff]  ;;  %v4126_v9 = vld [vmem:[%s14632_s6 + $0x548] sm:$0xff] }
 0x57f   : > { %8211 = vmatmul.mubr.bf16.vlgmr.msra.gmra.mrb[136].mxu1 %v12771_v7  ;;  %8305 = vmatmul.mubr.bf16.vlgmr.msra.gmra.mrb[132].mxu0 %v12771_v7  ;;  %v4141_v28 = vld [vmem:[%s14632_s6 + $0x5c0] sm:$0xff]  ;;  %v4222_v52 = vld [vmem:[%s14632_s6 + $0x848] sm:$0xff] }
 0x580   : > { %8218 = vmatprep.mubr.bf16.mxu1 %v12836_v57  ;;  %8312 = vmatprep.mubr.bf16.mxu0 %v12836_v57  ;;  %v9623_v34 = vcombine.low %v4125_v26, %v4141_v28  ;;  %v4205_v10 = vld [vmem:[%s14632_s6 + $0x7c0] sm:$0xff]  ;;  %v4254_v4 = vld [vmem:[%s14632_s6 + $0x948] sm:$0xff] }
 0x581   : > { %8226 = vmatpush1.bf16.msra.mxu1 %v9971_v35  ;;  %8320 = vmatpush1.bf16.msra.mxu0 %v9973_v25  ;;  %v4142_v35 = vld [vmem:[%s14632_s6 + $0x5c8] sm:$0xff]  ;;  %v9591_v25 = vcombine.low %v4093_v33, %v4109_v1  ;;  %v4221_v45 = vld [vmem:[%s14632_s6 + $0x840] sm:$0xff] }
 0x582   : > { %8227 = vmatprep.subr.bf16.mxu1 %v10004_v0  ;;  %8321 = vmatprep.subr.bf16.mxu0 %v10006_v32  ;;  %v9593_v0 = vcombine.low %v4094_v12, %v4110_v17  ;;  %v9624_v32 = vcombine.high %v4125_v26, %v4141_v28  ;;  %v9626_v5 = vcombine.high %v4126_v9, %v4142_v35  ;;  %v4237_v47 = vld [vmem:[%s14632_s6 + $0x8c0] sm:$0xff]  ;;  %v4286_v42 = vld [vmem:[%s14632_s6 + $0xa48] sm:$0xff] }
 0x583   : > { %v4253_v15 = vld [vmem:[%s14632_s6 + $0x940] sm:$0xff]  ;;  %v4318_v17 = vld [vmem:[%s14632_s6 + $0xb48] sm:$0xff] }
 0x584   : > { %v4269_v6 = vld [vmem:[%s14632_s6 + $0x9c0] sm:$0xff] }
 0x585   : > { %8228 = vmatpush1.bf16.msra.mxu1 %v10003_v40  ;;  %8322 = vmatpush1.bf16.msra.mxu0 %v10005_v50  ;;  %v4173_v40 = vld [vmem:[%s14632_s6 + $0x6c0] sm:$0xff]  ;;  %v4158_v50 = vld [vmem:[%s14632_s6 + $0x648] sm:$0xff] }
 0x586   : > { %8229 = vmatprep.subr.bf16.mxu1 %v7558_v2  ;;  %8323 = vmatprep.subr.bf16.mxu0 %v7564_v30  ;;  %v9625_v2 = vcombine.low %v4126_v9, %v4142_v35  ;;  %v9656_v30 = vcombine.high %v4157_v48, %v4173_v40  ;;  %v9658_v22 = vcombine.high %v4158_v50, %v4174_v62  ;;  %v4285_v3 = vld [vmem:[%s14632_s6 + $0xa40] sm:$0xff]  ;;  %v4350_v35 = vld [vmem:[%s14632_s6 + $0xc48] sm:$0xff] }
 0x587   : > { %8219 = vmatmul.mubr.bf16.gmra.mrb[140].mxu1 %v12819_v53  ;;  %8313 = vmatmul.mubr.bf16.gmra.mrb[136].mxu0 %v12819_v53  ;;  %v4301_v37 = vld [vmem:[%s14632_s6 + $0xac0] sm:$0xff] }
 0x588   : > { %8257 = vmatprep.mubr.bf16.mxu1 %v10835_v18  ;;  %8351 = vmatprep.mubr.bf16.mxu0 %v10835_v18  ;;  %v4317_v1 = vld [vmem:[%s14632_s6 + $0xb40] sm:$0xff] }
 0x589   : > { %8230 = vmatpush1.bf16.msra.mxu1 %v7555_v54  ;;  %8324 = vmatpush1.bf16.msra.mxu0 %v7561_v16  ;;  %v4206_v54 = vld [vmem:[%s14632_s6 + $0x7c8] sm:$0xff]  ;;  %v9655_v16 = vcombine.low %v4157_v48, %v4173_v40  ;;  %v4333_v12 = vld [vmem:[%s14632_s6 + $0xbc0] sm:$0xff] }
 0x58a   : > { %8366 = vmatprep.subr.bf16.mxu1 %v9464_v36  ;;  %8460 = vmatprep.subr.bf16.mxu0 %v9466_v19  ;;  %v9657_v36 = vcombine.low %v4158_v50, %v4174_v62  ;;  %v9688_v19 = vcombine.high %v4189_v60, %v4205_v10  ;;  %v9690_v63 = vcombine.high %v4190_v41, %v4206_v54  ;;  %v4349_v28 = vld [vmem:[%s14632_s6 + $0xc40] sm:$0xff] }
 0x58b   : > { %v4365_v9 = vld [vmem:[%s14632_s6 + $0xcc0] sm:$0xff] }
 0x58c   : > { %v4381_v40 = vld [vmem:[%s14632_s6 + $0xd40] sm:$0xff] }
 0x58f   : > { %10067 = vmatmul.mubr.msk.bf16.vlgmr.msra.gmra.mrb[136].mxu1 %vm2776_vm7, %v12874_v55  ;;  %10069 = vmatmul.mubr.msk.bf16.vlgmr.msra.gmra.mrb[132].mxu0 %vm2776_vm7, %v12874_v55 }
 0x590   : > { %8367 = vmatpush1.bf16.msra.mxu1 %v9463_v56  ;;  %8461 = vmatpush1.bf16.msra.mxu0 %v9465_v39  ;;  %v4238_v56 = vld [vmem:[%s14632_s6 + $0x8c8] sm:$0xff]  ;;  %v9687_v39 = vcombine.low %v4189_v60, %v4205_v10 }
 0x591   : > { %8368 = vmatprep.subr.bf16.mxu1 %v9496_v43  ;;  %8462 = vmatprep.subr.bf16.mxu0 %v9498_v51  ;;  %v9689_v43 = vcombine.low %v4190_v41, %v4206_v54  ;;  %v9720_v51 = vcombine.high %v4221_v45, %v4237_v47  ;;  %v9722_v44 = vcombine.high %v4222_v52, %v4238_v56 }
 0x592   : > { %8265 = vmatprep.mubr.bf16.mxu1 %v10835_v18  ;;  %8359 = vmatprep.mubr.bf16.mxu0 %v10835_v18  ;;  %v9847_v54 = vcombine.low %v4349_v28, %v4365_v9 }
 0x594   : > { %8369 = vmatpush1.bf16.msra.mxu1 %v9495_v24  ;;  %8463 = vmatpush1.bf16.msra.mxu0 %v9497_v8  ;;  %v4270_v24 = vld [vmem:[%s14632_s6 + $0x9c8] sm:$0xff]  ;;  %v9719_v8 = vcombine.low %v4221_v45, %v4237_v47  ;;  %v4413_v47 = vld [vmem:[%s14632_s6 + $0xe40] sm:$0xff] }
 0x595   : > { %8370 = vmatprep.subr.bf16.mxu1 %v9528_v14  ;;  %8464 = vmatprep.subr.bf16.mxu0 %v9530_v27  ;;  %v9721_v14 = vcombine.low %v4222_v52, %v4238_v56  ;;  %v9752_v27 = vcombine.high %v4253_v15, %v4269_v6  ;;  %v9754_v59 = vcombine.high %v4254_v4, %v4270_v24  ;;  %v4429_v52 = vld [vmem:[%s14632_s6 + $0xec0] sm:$0xff]  ;;  %v4414_v56 = vld [vmem:[%s14632_s6 + $0xe48] sm:$0xff] }
 0x596   : > { %v9753_v33 = vcombine.low %v4254_v4, %v4270_v24 }
 0x597   : > { %10068 = vmatmul.mubr.msk.bf16.gmra.mrb[144].mxu1 %vm2776_vm7, %v12908_v49  ;;  %10070 = vmatmul.mubr.msk.bf16.gmra.mrb[140].mxu0 %vm2776_vm7, %v12908_v49 }
 0x598   : > { %8371 = vmatpush1.bf16.msra.mxu1 %v9527_v38  ;;  %8465 = vmatpush1.bf16.msra.mxu0 %v9529_v23  ;;  %v4302_v38 = vld [vmem:[%s14632_s6 + $0xac8] sm:$0xff]  ;;  %v9751_v23 = vcombine.low %v4253_v15, %v4269_v6  ;;  %v4445_v6 = vld [vmem:[%s14632_s6 + $0xf40] sm:$0xff] }
 0x599   : > { %8398 = vmatprep.mubr.bf16.mxu1 %v12775_v46  ;;  %8492 = vmatprep.mubr.bf16.mxu0 %v12775_v46 }
 0x59a   : > { %8372 = vmatprep.subr.bf16.mxu1 %v9560_v61  ;;  %8466 = vmatprep.subr.bf16.mxu0 %v9562_v31  ;;  %v9784_v61 = vcombine.high %v4285_v3, %v4301_v37  ;;  %v9786_v31 = vcombine.high %v4286_v42, %v4302_v38 }
 0x59c   : > { %8373 = vmatpush1.bf16.msra.mxu1 %v9559_v29  ;;  %8467 = vmatpush1.bf16.msra.mxu0 %v9561_v21  ;;  %v4334_v29 = vld [vmem:[%s14632_s6 + $0xbc8] sm:$0xff]  ;;  %v9783_v21 = vcombine.low %v4285_v3, %v4301_v37 }
 0x59d   : > { %8374 = vmatprep.subr.bf16.mxu1 %v9592_v20  ;;  %8468 = vmatprep.subr.bf16.mxu0 %v9594_v11  ;;  %v9785_v20 = vcombine.low %v4286_v42, %v4302_v38  ;;  %v9816_v11 = vcombine.high %v4317_v1, %v4333_v12  ;;  %v9818_v26 = vcombine.high %v4318_v17, %v4334_v29 }
 0x5a0   : > { %8375 = vmatpush1.bf16.msra.mxu1 %v9591_v25  ;;  %8469 = vmatpush1.bf16.msra.mxu0 %v9593_v0  ;;  %v4366_v25 = vld [vmem:[%s14632_s6 + $0xcc8] sm:$0xff]  ;;  %v9815_v0 = vcombine.low %v4317_v1, %v4333_v12 }
 0x5a1   : > { %8376 = vmatprep.subr.bf16.mxu1 %v9624_v32  ;;  %8470 = vmatprep.subr.bf16.mxu0 %v9626_v5  ;;  %v9817_v32 = vcombine.low %v4318_v17, %v4334_v29  ;;  %v9848_v5 = vcombine.high %v4349_v28, %v4365_v9  ;;  %v9850_v48 = vcombine.high %v4350_v35, %v4366_v25 }
 0x5a4   : > { %8377 = vmatpush1.bf16.msra.mxu1 %v9623_v34  ;;  %8471 = vmatpush1.bf16.msra.mxu0 %v9625_v2  ;;  %v4397_v34 = vld [vmem:[%s14632_s6 + $0xdc0] sm:$0xff]  ;;  %v4382_v2 = vld [vmem:[%s14632_s6 + $0xd48] sm:$0xff] }
 0x5a5   : > { %8378 = vmatprep.subr.bf16.mxu1 %v9656_v30  ;;  %8472 = vmatprep.subr.bf16.mxu0 %v9658_v22  ;;  %v4398_v30 = vld [vmem:[%s14632_s6 + $0xdc8] sm:$0xff] }
 0x5a6   : > { %v9882_v45 = vcombine.high %v4382_v2, %v4398_v30 }
 0x5a8   : > { %8379 = vmatpush1.bf16.msra.mxu1 %v9655_v16  ;;  %8473 = vmatpush1.bf16.msra.mxu0 %v9657_v36  ;;  %v9849_v16 = vcombine.low %v4350_v35, %v4366_v25 }
 0x5a9   : > { %8380 = vmatprep.subr.bf16.mxu1 %v9688_v19  ;;  %8474 = vmatprep.subr.bf16.mxu0 %v9690_v63  ;;  %v9880_v63 = vcombine.high %v4381_v40, %v4397_v34 }
 0x5ac   : > { %8381 = vmatpush1.bf16.msra.mxu1 %v9687_v39  ;;  %8475 = vmatpush1.bf16.msra.mxu0 %v9689_v43  ;;  %v4430_v39 = vld [vmem:[%s14632_s6 + $0xec8] sm:$0xff]  ;;  %v9879_v43 = vcombine.low %v4381_v40, %v4397_v34 }
 0x5ad   : > { %8382 = vmatprep.subr.bf16.mxu1 %v9720_v51  ;;  %8476 = vmatprep.subr.bf16.mxu0 %v9722_v44  ;;  %v9881_v51 = vcombine.low %v4382_v2, %v4398_v30  ;;  %v9912_v44 = vcombine.high %v4413_v47, %v4429_v52  ;;  %v9914_v15 = vcombine.high %v4414_v56, %v4430_v39  ;;  %v4510_v34 = vld [vmem:[%s14632_s6 + $0x1148] sm:$0xff] }
 0x5ae   : > { %v4526_v2 = vld [vmem:[%s14632_s6 + $0x11c8] sm:$0xff] }
 0x5b0   : > { %8383 = vmatpush1.bf16.msra.mxu1 %v9719_v8  ;;  %8477 = vmatpush1.bf16.msra.mxu0 %v9721_v14  ;;  %v4461_v8 = vld [vmem:[%s14632_s6 + $0xfc0] sm:$0xff]  ;;  %v4446_v14 = vld [vmem:[%s14632_s6 + $0xf48] sm:$0xff] }
 0x5b1   : > { %8384 = vmatprep.subr.bf16.mxu1 %v9752_v27  ;;  %8478 = vmatprep.subr.bf16.mxu0 %v9754_v59  ;;  %v4462_v27 = vld [vmem:[%s14632_s6 + $0xfc8] sm:$0xff]  ;;  %v9944_v17 = vcombine.high %v4445_v6, %v4461_v8  ;;  %v9943_v9 = vcombine.low %v4445_v6, %v4461_v8  ;;  %v3983_v8 = vld [vmem:[%s14632_s6 + $0xd0] sm:$0xff] }
 0x5b2   : > { %v9946_v29 = vcombine.high %v4446_v14, %v4462_v27  ;;  %v9945_v35 = vcombine.low %v4446_v14, %v4462_v27  ;;  %v3968_v14 = vld [vmem:[%s14632_s6 + $0x58] sm:$0xff] }
 0x5b3   : > { %v3984_v27 = vld [vmem:[%s14632_s6 + $0xd8] sm:$0xff] }
 0x5b4   : > { %8385 = vmatpush1.bf16.msra.mxu1 %v9751_v23  ;;  %8479 = vmatpush1.bf16.msra.mxu0 %v9753_v33  ;;  %v9911_v33 = vcombine.low %v4413_v47, %v4429_v52  ;;  %v10010_v52 = vcombine.high %v4510_v34, %v4526_v2 }
 0x5b5   : > { %8386 = vmatprep.subr.bf16.mxu1 %v9784_v61  ;;  %8480 = vmatprep.subr.bf16.mxu0 %v9786_v31  ;;  %v9913_v61 = vcombine.low %v4414_v56, %v4430_v39 }
 0x5b8   : > { %8387 = vmatpush1.bf16.msra.mxu1 %v9783_v21  ;;  %8481 = vmatpush1.bf16.msra.mxu0 %v9785_v20  ;;  %v4477_v21 = vld [vmem:[%s14632_s6 + $0x1040] sm:$0xff] }
 0x5b9   : > { %8388 = vmatprep.subr.bf16.mxu1 %v9816_v11  ;;  %8482 = vmatprep.subr.bf16.mxu0 %v9818_v26  ;;  %v4493_v20 = vld [vmem:[%s14632_s6 + $0x10c0] sm:$0xff]  ;;  %v4478_v11 = vld [vmem:[%s14632_s6 + $0x1048] sm:$0xff] }
 0x5ba   : > { %v7844_v50 = vpop.f32.mrb[116].mxu1  ;;  %v7938_v62 = vpop.f32.mrb[112].mxu0 }
 0x5bb   : > { %v7845_v22 = vpop.f32.mrb[117].mxu1  ;;  %v7939_v60 = vpop.f32.mrb[113].mxu0  ;;  %v4525_v62 = vld [vmem:[%s14632_s6 + $0x11c0] sm:$0xff] }
 0x5bc   : > { %8389 = vmatpush1.bf16.msra.mxu1 %v9815_v0  ;;  %8483 = vmatpush1.bf16.msra.mxu0 %v9817_v32  ;;  %v7846_v10 = vpop.f32.mrb[118].mxu1  ;;  %v7940_v41 = vpop.f32.mrb[114].mxu0  ;;  %v9976_v0 = vcombine.high %v4477_v21, %v4493_v20  ;;  %v4541_v60 = vld [vmem:[%s14632_s6 + $0x1240] sm:$0x11] }
 0x5bd   : > { %8390 = vmatprep.subr.bf16.mxu1 %v9848_v5  ;;  %8484 = vmatprep.subr.bf16.mxu0 %v9850_v48  ;;  %v7847_v36 = vpop.f32.mrb[119].mxu1  ;;  %v7941_v19 = vpop.f32.mrb[115].mxu0  ;;  %v4509_v5 = vld [vmem:[%s14632_s6 + $0x1140] sm:$0xff]  ;;  %v4542_v10 = vld [vmem:[%s14632_s6 + $0x1248] sm:$0x11]  ;;  %v10040_v56 = vcombine.high %v4541_v60, %v4541_v60 }
 0x5be   : > { %v10008_v47 = vcombine.high %v4509_v5, %v4525_v62  ;;  %v10042_v39 = vcombine.high %v4542_v10, %v4542_v10 }
 0x5bf   : > { %v7570_v6 = vand.u32 %v10040_v56, %v12792_v13 }
 0x5c0   : > { %8391 = vmatpush1.bf16.msra.mxu1 %v9847_v54  ;;  %8485 = vmatpush1.bf16.msra.mxu0 %v9849_v16 }
 0x5c1   : > { %8392 = vmatprep.subr.bf16.mxu1 %v9880_v63  ;;  %8486 = vmatprep.subr.bf16.mxu0 %v9882_v45  ;;  %v9975_v63 = vcombine.low %v4477_v21, %v4493_v20  ;;  %v4047_v21 = vld [vmem:[%s14632_s6 + $0x2d0] sm:$0xff]  ;;  %v4032_v20 = vld [vmem:[%s14632_s6 + $0x258] sm:$0xff] }
 0x5c2   : > { %v7883_v4 = vpop.f32.mrb[112].mxu1  ;;  %v7977_v24 = vpop.f32.mrb[108].mxu0 }
 0x5c3   : > { %v9131_v59 = vrot.slane %v7883_v4, 4  ;;  %v7885_v3 = vpop.f32.mrb[113].mxu1  ;;  %v7979_v37 = vpop.f32.mrb[109].mxu0  ;;  %v9139_v26 = vrot.slane %v7977_v24, 6  ;;  %v7576_v4 = vand.u32 %v10042_v39, %v12792_v13  ;;  %v3967_v24 = vld [vmem:[%s14632_s6 + $0x50] sm:$0xff] }
 0x5c4   : > { %8393 = vmatpush1.bf16.msra.mxu1 %v9879_v43  ;;  %8487 = vmatpush1.bf16.msra.mxu0 %v9881_v51  ;;  %v9135_v42 = vrot.slane %v7885_v3, 5  ;;  %v7887_v38 = vpop.f32.mrb[114].mxu1  ;;  %v7981_v23 = vpop.f32.mrb[110].mxu0  ;;  %v9143_v25 = vrot.slane %v7979_v37, 7  ;;  %v10007_v43 = vcombine.low %v4509_v5, %v4525_v62  ;;  %v10009_v51 = vcombine.low %v4510_v34, %v4526_v2  ;;  %v4111_v34 = vld [vmem:[%s14632_s6 + $0x4d0] sm:$0xff]  ;;  %v4096_v2 = vld [vmem:[%s14632_s6 + $0x458] sm:$0xff] }
 0x5c5   : > { %v9133_v31 = vadd.f32 %v9131_v59, %v13588_v58  ;;  %8394 = vmatprep.subr.bf16.mxu1 %v9912_v44  ;;  %8488 = vmatprep.subr.bf16.mxu0 %v9914_v15  ;;  %v7888_v1 = vpop.f32.mrb[115].mxu1  ;;  %v7982_v12 = vpop.f32.mrb[111].mxu0  ;;  %v4494_v58 = vld [vmem:[%s14632_s6 + $0x10c8] sm:$0xff]  ;;  %v10039_v44 = vcombine.low %v4541_v60, %v4541_v60  ;;  %v10041_v15 = vcombine.low %v4542_v10, %v4542_v10  ;;  %v3999_v38 = vld [vmem:[%s14632_s6 + $0x150] sm:$0xff] }
 0x5c6   : > { %v9978_v32 = vcombine.high %v4478_v11, %v4494_v58  ;;  %v9977_v45 = vcombine.low %v4478_v11, %v4494_v58  ;;  %v9468_v37 = vcombine.high %v3967_v24, %v3983_v8  ;;  %v4015_v23 = vld [vmem:[%s14632_s6 + $0x1d0] sm:$0xff]  ;;  %v9469_v1 = vcombine.low %v3968_v14, %v3984_v27  ;;  %v4048_v11 = vld [vmem:[%s14632_s6 + $0x2d8] sm:$0xff] }
 0x5c7   : > { %v9137_v28 = vadd.f32 %v9135_v42, %v9133_v31  ;;  %v7567_v59 = vand.u32 %v10039_v44, %v12792_v13  ;;  %v7573_v3 = vand.u32 %v10041_v15, %v12792_v13  ;;  %v9470_v42 = vcombine.high %v3968_v14, %v3984_v27  ;;  %v4159_v39 = vld [vmem:[%s14632_s6 + $0x650] sm:$0xff]  ;;  %v4176_v44 = vld [vmem:[%s14632_s6 + $0x6d8] sm:$0xff] }
 0x5c8   : > { %8395 = vmatpush1.bf16.msra.mxu1 %v9911_v33  ;;  %8489 = vmatpush1.bf16.msra.mxu0 %v9913_v61  ;;  %v4000_v33 = vld [vmem:[%s14632_s6 + $0x158] sm:$0xff]  ;;  %v9467_v31 = vcombine.low %v3967_v24, %v3983_v8  ;;  %v9500_v12 = vcombine.high %v3999_v38, %v4015_v23  ;;  %v9499_v58 = vcombine.low %v3999_v38, %v4015_v23  ;;  %v4191_v8 = vld [vmem:[%s14632_s6 + $0x750] sm:$0xff] }
 0x5c9   : > { %8396 = vmatprep.subr.bf16.mxu1 %v9944_v17  ;;  %8490 = vmatprep.subr.bf16.mxu0 %v9946_v29  ;;  %v9141_v48 = vadd.f32 %v9139_v26, %v9137_v28  ;;  %v4016_v61 = vld [vmem:[%s14632_s6 + $0x1d8] sm:$0xff]  ;;  %v4031_v29 = vld [vmem:[%s14632_s6 + $0x250] sm:$0xff] }
 0x5ca   : > { %v7891_v40 = vpop.f32.mrb[120].mxu1  ;;  %v7985_v50 = vpop.f32.mrb[116].mxu0  ;;  %v9502_v17 = vcombine.high %v4000_v33, %v4016_v61  ;;  %v9501_v26 = vcombine.low %v4000_v33, %v4016_v61  ;;  %v9532_v28 = vcombine.high %v4031_v29, %v4047_v21  ;;  %v9531_v5 = vcombine.low %v4031_v29, %v4047_v21  ;;  %v4207_v14 = vld [vmem:[%s14632_s6 + $0x7d0] sm:$0xff]  ;;  %v4192_v27 = vld [vmem:[%s14632_s6 + $0x758] sm:$0xff] }
 0x5cb   : > { %v7892_v30 = vpop.f32.mrb[121].mxu1  ;;  %v7986_v22 = vpop.f32.mrb[117].mxu0  ;;  %v13837_v41 = vadd.f32 %v9143_v25, %v9141_v48  ;;  %v4079_v25 = vld [vmem:[%s14632_s6 + $0x3d0] sm:$0xff]  ;;  %v9533_v48 = vcombine.low %v4032_v20, %v4048_v11  ;;  %v4224_v61 = vld [vmem:[%s14632_s6 + $0x858] sm:$0xff] }
 0x5cc   : > { %8397 = vmatpush1.bf16.msra.mxu1 %v9943_v9  ;;  %8491 = vmatpush1.bf16.msra.mxu0 %v9945_v35  ;;  %v7893_v54 = vpop.f32.mrb[122].mxu1  ;;  %v7987_v16 = vpop.f32.mrb[118].mxu0  ;;  %v9534_v9 = vcombine.high %v4032_v20, %v4048_v11  ;;  %v4063_v35 = vld [vmem:[%s14632_s6 + $0x350] sm:$0xff]  ;;  %v4112_v30 = vld [vmem:[%s14632_s6 + $0x4d8] sm:$0xff] }
 0x5cd   : > { %v7894_v36 = vpop.f32.mrb[123].mxu1  ;;  %v7988_v19 = vpop.f32.mrb[119].mxu0  ;;  %8413 = vmatprep.subr.bf16.mxu1 %v9976_v0  ;;  %8507 = vmatprep.subr.bf16.mxu0 %v9978_v32  ;;  %v4064_v0 = vld [vmem:[%s14632_s6 + $0x358] sm:$0xff]  ;;  %v4095_v40 = vld [vmem:[%s14632_s6 + $0x450] sm:$0xff]  ;;  %v9564_v50 = vcombine.high %v4063_v35, %v4079_v25  ;;  %v9563_v22 = vcombine.low %v4063_v35, %v4079_v25  ;;  %v9598_v54 = vcombine.high %v4096_v2, %v4112_v30 }
 0x5ce   : > { %v4080_v32 = vld [vmem:[%s14632_s6 + $0x3d8] sm:$0xff]  ;;  %v9596_v10 = vcombine.high %v4095_v40, %v4111_v34  ;;  %v4127_v16 = vld [vmem:[%s14632_s6 + $0x550] sm:$0xff] }
 0x5cf   : > { %8399 = vmatmul.mubr.bf16.vlgmr.msra.gmra.mrb[148].mxu1 %v12771_v7  ;;  %8493 = vmatmul.mubr.bf16.vlgmr.msra.gmra.mrb[144].mxu0 %v12771_v7  ;;  %v9566_v62 = vcombine.high %v4064_v0, %v4080_v32  ;;  %v9565_v60 = vcombine.low %v4064_v0, %v4080_v32  ;;  %v4143_v36 = vld [vmem:[%s14632_s6 + $0x5d0] sm:$0xff]  ;;  %v4128_v19 = vld [vmem:[%s14632_s6 + $0x558] sm:$0xff] }
 0x5d0   : > { %8404 = vmatprep.mubr.bf16.mxu1 %v12836_v57  ;;  %8498 = vmatprep.mubr.bf16.mxu0 %v12836_v57  ;;  %v9627_v15 = vcombine.low %v4127_v16, %v4143_v36  ;;  %v4223_v23 = vld [vmem:[%s14632_s6 + $0x850] sm:$0xff]  ;;  %v4256_v11 = vld [vmem:[%s14632_s6 + $0x958] sm:$0xff] }
 0x5d1   : > { %8414 = vmatpush1.bf16.msra.mxu1 %v9975_v63  ;;  %8508 = vmatpush1.bf16.msra.mxu0 %v9977_v45  ;;  %v4144_v63 = vld [vmem:[%s14632_s6 + $0x5d8] sm:$0xff]  ;;  %v9595_v45 = vcombine.low %v4095_v40, %v4111_v34  ;;  %v4239_v33 = vld [vmem:[%s14632_s6 + $0x8d0] sm:$0xff] }
 0x5d2   : > { %8415 = vmatprep.subr.bf16.mxu1 %v10008_v47  ;;  %8509 = vmatprep.subr.bf16.mxu0 %v10010_v52  ;;  %v9597_v47 = vcombine.low %v4096_v2, %v4112_v30  ;;  %v9628_v52 = vcombine.high %v4127_v16, %v4143_v36  ;;  %v9630_v56 = vcombine.high %v4128_v19, %v4144_v63  ;;  %v4255_v21 = vld [vmem:[%s14632_s6 + $0x950] sm:$0xff]  ;;  %v4288_v32 = vld [vmem:[%s14632_s6 + $0xa58] sm:$0xff] }
 0x5d3   : > { %v4271_v20 = vld [vmem:[%s14632_s6 + $0x9d0] sm:$0xff]  ;;  %v4320_v30 = vld [vmem:[%s14632_s6 + $0xb58] sm:$0xff] }
 0x5d4   : > { %v4287_v25 = vld [vmem:[%s14632_s6 + $0xa50] sm:$0xff] }
 0x5d5   : > { %8416 = vmatpush1.bf16.msra.mxu1 %v10007_v43  ;;  %8510 = vmatpush1.bf16.msra.mxu0 %v10009_v51  ;;  %v4175_v43 = vld [vmem:[%s14632_s6 + $0x6d0] sm:$0xff]  ;;  %v4160_v51 = vld [vmem:[%s14632_s6 + $0x658] sm:$0xff] }
 0x5d6   : > { %8417 = vmatprep.subr.bf16.mxu1 %v7570_v6  ;;  %8511 = vmatprep.subr.bf16.mxu0 %v7576_v4  ;;  %v9629_v6 = vcombine.low %v4128_v19, %v4144_v63  ;;  %v9660_v4 = vcombine.high %v4159_v39, %v4175_v43  ;;  %v9662_v24 = vcombine.high %v4160_v51, %v4176_v44  ;;  %v4303_v0 = vld [vmem:[%s14632_s6 + $0xad0] sm:$0xff]  ;;  %v4352_v63 = vld [vmem:[%s14632_s6 + $0xc58] sm:$0xff] }
 0x5d7   : > { %8405 = vmatmul.mubr.bf16.gmra.mrb[152].mxu1 %v12819_v53  ;;  %8499 = vmatmul.mubr.bf16.gmra.mrb[148].mxu0 %v12819_v53  ;;  %v4319_v34 = vld [vmem:[%s14632_s6 + $0xb50] sm:$0xff] }
 0x5d8   : > { %8445 = vmatprep.mubr.bf16.mxu1 %v10835_v18  ;;  %8539 = vmatprep.mubr.bf16.mxu0 %v10835_v18  ;;  %v4335_v2 = vld [vmem:[%s14632_s6 + $0xbd0] sm:$0xff] }
 0x5d9   : > { %8418 = vmatpush1.bf16.msra.mxu1 %v7567_v59  ;;  %8512 = vmatpush1.bf16.msra.mxu0 %v7573_v3  ;;  %v4208_v59 = vld [vmem:[%s14632_s6 + $0x7d8] sm:$0xff]  ;;  %v9659_v3 = vcombine.low %v4159_v39, %v4175_v43  ;;  %v4351_v36 = vld [vmem:[%s14632_s6 + $0xc50] sm:$0xff] }
 0x5da   : > { %8554 = vmatprep.subr.bf16.mxu1 %v9468_v37  ;;  %8648 = vmatprep.subr.bf16.mxu0 %v9470_v42  ;;  %v9661_v37 = vcombine.low %v4160_v51, %v4176_v44  ;;  %v9692_v42 = vcombine.high %v4191_v8, %v4207_v14  ;;  %v9694_v38 = vcombine.high %v4192_v27, %v4208_v59  ;;  %v4367_v19 = vld [vmem:[%s14632_s6 + $0xcd0] sm:$0xff] }
 0x5db   : > { %v4383_v43 = vld [vmem:[%s14632_s6 + $0xd50] sm:$0xff] }
 0x5df   : > { %10071 = vmatmul.mubr.msk.bf16.vlgmr.msra.gmra.mrb[156].mxu1 %vm2776_vm7, %v12874_v55  ;;  %10073 = vmatmul.mubr.msk.bf16.vlgmr.msra.gmra.mrb[152].mxu0 %vm2776_vm7, %v12874_v55 }
 0x5e0   : > { %8555 = vmatpush1.bf16.msra.mxu1 %v9467_v31  ;;  %8649 = vmatpush1.bf16.msra.mxu0 %v9469_v1  ;;  %v4240_v31 = vld [vmem:[%s14632_s6 + $0x8d8] sm:$0xff]  ;;  %v9691_v1 = vcombine.low %v4191_v8, %v4207_v14 }
 0x5e1   : > { %8556 = vmatprep.subr.bf16.mxu1 %v9500_v12  ;;  %8650 = vmatprep.subr.bf16.mxu0 %v9502_v17  ;;  %v9693_v12 = vcombine.low %v4192_v27, %v4208_v59  ;;  %v9724_v17 = vcombine.high %v4223_v23, %v4239_v33  ;;  %v9726_v29 = vcombine.high %v4224_v61, %v4240_v31 }
 0x5e2   : > { %8451 = vmatprep.mubr.bf16.mxu1 %v10835_v18  ;;  %8545 = vmatprep.mubr.bf16.mxu0 %v10835_v18  ;;  %v9851_v59 = vcombine.low %v4351_v36, %v4367_v19 }
 0x5e4   : > { %8557 = vmatpush1.bf16.msra.mxu1 %v9499_v58  ;;  %8651 = vmatpush1.bf16.msra.mxu0 %v9501_v26  ;;  %v4272_v58 = vld [vmem:[%s14632_s6 + $0x9d8] sm:$0xff]  ;;  %v9723_v26 = vcombine.low %v4223_v23, %v4239_v33  ;;  %v4415_v33 = vld [vmem:[%s14632_s6 + $0xe50] sm:$0xff] }
 0x5e5   : > { %8558 = vmatprep.subr.bf16.mxu1 %v9532_v28  ;;  %8652 = vmatprep.subr.bf16.mxu0 %v9534_v9  ;;  %v9725_v28 = vcombine.low %v4224_v61, %v4240_v31  ;;  %v9756_v9 = vcombine.high %v4255_v21, %v4271_v20  ;;  %v9758_v35 = vcombine.high %v4256_v11, %v4272_v58  ;;  %v4431_v61 = vld [vmem:[%s14632_s6 + $0xed0] sm:$0xff]  ;;  %v4416_v31 = vld [vmem:[%s14632_s6 + $0xe58] sm:$0xff] }
 0x5e6   : > { %v9757_v40 = vcombine.low %v4256_v11, %v4272_v58 }
 0x5e7   : > { %10072 = vmatmul.mubr.msk.bf16.gmra.mrb[160].mxu1 %vm2776_vm7, %v12908_v49  ;;  %10074 = vmatmul.mubr.msk.bf16.gmra.mrb[148].mxu0 %vm2776_vm7, %v12908_v49 }
 0x5e8   : > { %8559 = vmatpush1.bf16.msra.mxu1 %v9531_v5  ;;  %8653 = vmatpush1.bf16.msra.mxu0 %v9533_v48  ;;  %v4304_v5 = vld [vmem:[%s14632_s6 + $0xad8] sm:$0xff]  ;;  %v9755_v48 = vcombine.low %v4255_v21, %v4271_v20  ;;  %v4447_v20 = vld [vmem:[%s14632_s6 + $0xf50] sm:$0xff] }
 0x5e9   : > { %8586 = vmatprep.mubr.bf16.mxu1 %v12775_v46  ;;  %8680 = vmatprep.mubr.bf16.mxu0 %v12775_v46 }
 0x5ea   : > { %8560 = vmatprep.subr.bf16.mxu1 %v9564_v50  ;;  %8654 = vmatprep.subr.bf16.mxu0 %v9566_v62  ;;  %v9788_v50 = vcombine.high %v4287_v25, %v4303_v0  ;;  %v9790_v62 = vcombine.high %v4288_v32, %v4304_v5 }
 0x5ec   : > { %8561 = vmatpush1.bf16.msra.mxu1 %v9563_v22  ;;  %8655 = vmatpush1.bf16.msra.mxu0 %v9565_v60  ;;  %v4336_v22 = vld [vmem:[%s14632_s6 + $0xbd8] sm:$0xff]  ;;  %v9787_v60 = vcombine.low %v4287_v25, %v4303_v0 }
 0x5ed   : > { %8562 = vmatprep.subr.bf16.mxu1 %v9596_v10  ;;  %8656 = vmatprep.subr.bf16.mxu0 %v9598_v54  ;;  %v9789_v10 = vcombine.low %v4288_v32, %v4304_v5  ;;  %v9820_v54 = vcombine.high %v4319_v34, %v4335_v2  ;;  %v9822_v16 = vcombine.high %v4320_v30, %v4336_v22 }
 0x5ee   : > { %v9915_v5 = vcombine.low %v4415_v33, %v4431_v61 }
 0x5f0   : > { %8563 = vmatpush1.bf16.msra.mxu1 %v9595_v45  ;;  %8657 = vmatpush1.bf16.msra.mxu0 %v9597_v47  ;;  %v4368_v45 = vld [vmem:[%s14632_s6 + $0xcd8] sm:$0xff]  ;;  %v9819_v47 = vcombine.low %v4319_v34, %v4335_v2 }
 0x5f1   : > { %8564 = vmatprep.subr.bf16.mxu1 %v9628_v52  ;;  %8658 = vmatprep.subr.bf16.mxu0 %v9630_v56  ;;  %v9821_v52 = vcombine.low %v4320_v30, %v4336_v22  ;;  %v9852_v56 = vcombine.high %v4351_v36, %v4367_v19  ;;  %v9854_v39 = vcombine.high %v4352_v63, %v4368_v45  ;;  %v4479_v30 = vld [vmem:[%s14632_s6 + $0x1050] sm:$0xff] }
 0x5f4   : > { %8565 = vmatpush1.bf16.msra.mxu1 %v9627_v15  ;;  %8659 = vmatpush1.bf16.msra.mxu0 %v9629_v6  ;;  %v4399_v15 = vld [vmem:[%s14632_s6 + $0xdd0] sm:$0xff]  ;;  %v4384_v6 = vld [vmem:[%s14632_s6 + $0xd58] sm:$0xff] }
 0x5f5   : > { %8566 = vmatprep.subr.bf16.mxu1 %v9660_v4  ;;  %8660 = vmatprep.subr.bf16.mxu0 %v9662_v24  ;;  %v4400_v4 = vld [vmem:[%s14632_s6 + $0xdd8] sm:$0xff] }
 0x5f6   : > { %v9886_v23 = vcombine.high %v4384_v6, %v4400_v4 }
 0x5f8   : > { %8567 = vmatpush1.bf16.msra.mxu1 %v9659_v3  ;;  %8661 = vmatpush1.bf16.msra.mxu0 %v9661_v37  ;;  %v9853_v3 = vcombine.low %v4352_v63, %v4368_v45 }
 0x5f9   : > { %8568 = vmatprep.subr.bf16.mxu1 %v9692_v42  ;;  %8662 = vmatprep.subr.bf16.mxu0 %v9694_v38  ;;  %v9884_v38 = vcombine.high %v4383_v43, %v4399_v15 }
 0x5fc   : > { %8569 = vmatpush1.bf16.msra.mxu1 %v9691_v1  ;;  %8663 = vmatpush1.bf16.msra.mxu0 %v9693_v12  ;;  %v4432_v1 = vld [vmem:[%s14632_s6 + $0xed8] sm:$0xff]  ;;  %v9883_v12 = vcombine.low %v4383_v43, %v4399_v15 }
 0x5fd   : > { %8570 = vmatprep.subr.bf16.mxu1 %v9724_v17  ;;  %8664 = vmatprep.subr.bf16.mxu0 %v9726_v29  ;;  %v9885_v17 = vcombine.low %v4384_v6, %v4400_v4  ;;  %v9916_v29 = vcombine.high %v4415_v33, %v4431_v61  ;;  %v9918_v21 = vcombine.high %v4416_v31, %v4432_v1  ;;  %v4528_v15 = vld [vmem:[%s14632_s6 + $0x11d8] sm:$0xff] }
 0x600   : > { %8571 = vmatpush1.bf16.msra.mxu1 %v9723_v26  ;;  %8665 = vmatpush1.bf16.msra.mxu0 %v9725_v28  ;;  %v4463_v26 = vld [vmem:[%s14632_s6 + $0xfd0] sm:$0xff]  ;;  %v4448_v28 = vld [vmem:[%s14632_s6 + $0xf58] sm:$0xff] }
 0x601   : > { %8572 = vmatprep.subr.bf16.mxu1 %v9756_v9  ;;  %8666 = vmatprep.subr.bf16.mxu0 %v9758_v35  ;;  %v4464_v9 = vld [vmem:[%s14632_s6 + $0xfd8] sm:$0xff]  ;;  %v9948_v34 = vcombine.high %v4447_v20, %v4463_v26  ;;  %v9947_v36 = vcombine.low %v4447_v20, %v4463_v26  ;;  %v3970_v26 = vld [vmem:[%s14632_s6 + $0x68] sm:$0xff] }
 0x602   : > { %v9950_v2 = vcombine.high %v4448_v28, %v4464_v9  ;;  %v9949_v19 = vcombine.low %v4448_v28, %v4464_v9  ;;  %v3986_v28 = vld [vmem:[%s14632_s6 + $0xe8] sm:$0xff] }
 0x604   : > { %8573 = vmatpush1.bf16.msra.mxu1 %v9755_v48  ;;  %8667 = vmatpush1.bf16.msra.mxu0 %v9757_v40  ;;  %v9917_v48 = vcombine.low %v4416_v31, %v4432_v1 }
 0x605   : > { %8574 = vmatprep.subr.bf16.mxu1 %v9788_v50  ;;  %8668 = vmatprep.subr.bf16.mxu0 %v9790_v62 }
 0x608   : > { %8575 = vmatpush1.bf16.msra.mxu1 %v9787_v60  ;;  %8669 = vmatpush1.bf16.msra.mxu0 %v9789_v10  ;;  %v4495_v60 = vld [vmem:[%s14632_s6 + $0x10d0] sm:$0xff]  ;;  %v4480_v10 = vld [vmem:[%s14632_s6 + $0x1058] sm:$0xff] }
 0x609   : > { %8576 = vmatprep.subr.bf16.mxu1 %v9820_v54  ;;  %8670 = vmatprep.subr.bf16.mxu0 %v9822_v16  ;;  %v9980_v63 = vcombine.high %v4479_v30, %v4495_v60 }
 0x60a   : > { %v8032_v51 = vpop.f32.mrb[128].mxu1  ;;  %v8126_v44 = vpop.f32.mrb[124].mxu0 }
 0x60b   : > { %v8033_v24 = vpop.f32.mrb[129].mxu1  ;;  %v8127_v8 = vpop.f32.mrb[125].mxu0  ;;  %v4527_v51 = vld [vmem:[%s14632_s6 + $0x11d0] sm:$0xff]  ;;  %v4512_v44 = vld [vmem:[%s14632_s6 + $0x1158] sm:$0xff] }
 0x60c   : > { %8577 = vmatpush1.bf16.msra.mxu1 %v9819_v47  ;;  %8671 = vmatpush1.bf16.msra.mxu0 %v9821_v52  ;;  %v8034_v14 = vpop.f32.mrb[130].mxu1  ;;  %v8128_v27 = vpop.f32.mrb[126].mxu0  ;;  %v4511_v47 = vld [vmem:[%s14632_s6 + $0x1150] sm:$0xff]  ;;  %v4544_v8 = vld [vmem:[%s14632_s6 + $0x1258] sm:$0x11]  ;;  %v10014_v33 = vcombine.high %v4512_v44, %v4528_v15 }
 0x60d   : > { %8578 = vmatprep.subr.bf16.mxu1 %v9852_v56  ;;  %8672 = vmatprep.subr.bf16.mxu0 %v9854_v39  ;;  %v8035_v37 = vpop.f32.mrb[131].mxu1  ;;  %v8129_v42 = vpop.f32.mrb[127].mxu0  ;;  %v4543_v24 = vld [vmem:[%s14632_s6 + $0x1250] sm:$0x11]  ;;  %v10046_v31 = vcombine.high %v4544_v8, %v4544_v8  ;;  %v10011_v1 = vcombine.low %v4511_v47, %v4527_v51 }
 0x60e   : > { %v9979_v42 = vcombine.low %v4479_v30, %v4495_v60  ;;  %v10044_v61 = vcombine.high %v4543_v24, %v4543_v24  ;;  %v4033_v30 = vld [vmem:[%s14632_s6 + $0x260] sm:$0xff]  ;;  %v4034_v60 = vld [vmem:[%s14632_s6 + $0x268] sm:$0xff] }
 0x60f   : > { %v7588_v20 = vand.u32 %v10046_v31, %v12792_v13  ;;  %v4161_v31 = vld [vmem:[%s14632_s6 + $0x660] sm:$0xff] }
 0x610   : > { %8579 = vmatpush1.bf16.msra.mxu1 %v9851_v59  ;;  %8673 = vmatpush1.bf16.msra.mxu0 %v9853_v3 }
 0x611   : > { %8580 = vmatprep.subr.bf16.mxu1 %v9884_v38  ;;  %8674 = vmatprep.subr.bf16.mxu0 %v9886_v23  ;;  %v10012_v23 = vcombine.high %v4511_v47, %v4527_v51  ;;  %v4082_v47 = vld [vmem:[%s14632_s6 + $0x3e8] sm:$0xff] }
 0x612   : > { %v8071_v11 = vpop.f32.mrb[124].mxu1  ;;  %v8165_v58 = vpop.f32.mrb[120].mxu0 }
 0x613   : > { %v8072_v35 = vpop.f32.mrb[125].mxu1  ;;  %v8166_v25 = vpop.f32.mrb[121].mxu0  ;;  %v3969_v11 = vld [vmem:[%s14632_s6 + $0x60] sm:$0xff] }
 0x614   : > { %8581 = vmatpush1.bf16.msra.mxu1 %v9883_v12  ;;  %8675 = vmatpush1.bf16.msra.mxu0 %v9885_v17  ;;  %v8073_v0 = vpop.f32.mrb[126].mxu1  ;;  %v8167_v32 = vpop.f32.mrb[122].mxu0  ;;  %v10013_v12 = vcombine.low %v4512_v44, %v4528_v15  ;;  %v10043_v17 = vcombine.low %v4543_v24, %v4543_v24  ;;  %v3985_v58 = vld [vmem:[%s14632_s6 + $0xe0] sm:$0xff]  ;;  %v4098_v15 = vld [vmem:[%s14632_s6 + $0x468] sm:$0xff] }
 0x615   : > { %v9146_v40 = vadd.f32 %v13837_v41, %v8073_v0  ;;  %8582 = vmatprep.subr.bf16.mxu1 %v9916_v29  ;;  %8676 = vmatprep.subr.bf16.mxu0 %v9918_v21  ;;  %v8075_v50 = vpop.f32.mrb[127].mxu1  ;;  %v8169_v62 = vpop.f32.mrb[123].mxu0  ;;  %v4496_v41 = vld [vmem:[%s14632_s6 + $0x10d8] sm:$0xff]  ;;  %v9152_v54 = vrot.slane %v8167_v32, 2  ;;  %v10045_v29 = vcombine.low %v4544_v8, %v4544_v8  ;;  %v7582_v21 = vand.u32 %v10044_v61, %v12792_v13  ;;  %v4001_v32 = vld [vmem:[%s14632_s6 + $0x160] sm:$0xff] }
 0x616   : > { %v9148_v22 = vrot.slane %v8075_v50, 1  ;;  %v9982_v45 = vcombine.high %v4480_v10, %v4496_v41  ;;  %v9156_v56 = vrot.slane %v8169_v62, 3  ;;  %v9981_v38 = vcombine.low %v4480_v10, %v4496_v41  ;;  %v4050_v10 = vld [vmem:[%s14632_s6 + $0x2e8] sm:$0xff]  ;;  %v4113_v44 = vld [vmem:[%s14632_s6 + $0x4e0] sm:$0xff] }
 0x617   : > { %v7579_v9 = vand.u32 %v10043_v17, %v12792_v13  ;;  %v7585_v35 = vand.u32 %v10045_v29, %v12792_v13  ;;  %v9472_v25 = vcombine.high %v3969_v11, %v3985_v58  ;;  %v9474_v0 = vcombine.high %v3970_v26, %v3986_v28  ;;  %v4178_v17 = vld [vmem:[%s14632_s6 + $0x6e8] sm:$0xff] }
 0x618   : > { %v9150_v16 = vadd.f32 %v9148_v22, %v9146_v40  ;;  %8583 = vmatpush1.bf16.msra.mxu1 %v9915_v5  ;;  %8677 = vmatpush1.bf16.msra.mxu0 %v9917_v48  ;;  %v4017_v5 = vld [vmem:[%s14632_s6 + $0x1e0] sm:$0xff]  ;;  %v4002_v48 = vld [vmem:[%s14632_s6 + $0x168] sm:$0xff]  ;;  %v9471_v50 = vcombine.low %v3969_v11, %v3985_v58  ;;  %v9473_v62 = vcombine.low %v3970_v26, %v3986_v28 }
 0x619   : > { %8584 = vmatprep.subr.bf16.mxu1 %v9948_v34  ;;  %8678 = vmatprep.subr.bf16.mxu0 %v9950_v2  ;;  %v4018_v40 = vld [vmem:[%s14632_s6 + $0x1e8] sm:$0xff]  ;;  %v9504_v34 = vcombine.high %v4001_v32, %v4017_v5  ;;  %v4049_v22 = vld [vmem:[%s14632_s6 + $0x2e0] sm:$0xff]  ;;  %v9503_v41 = vcombine.low %v4001_v32, %v4017_v5 }
 0x61a   : > { %v9154_v52 = vadd.f32 %v9152_v54, %v9150_v16  ;;  %v8079_v39 = vpop.f32.mrb[132].mxu1  ;;  %v8173_v43 = vpop.f32.mrb[128].mxu0  ;;  %v9506_v2 = vcombine.high %v4002_v48, %v4018_v40  ;;  %v9505_v54 = vcombine.low %v4002_v48, %v4018_v40  ;;  %v9536_v16 = vcombine.high %v4033_v30, %v4049_v22  ;;  %v4193_v58 = vld [vmem:[%s14632_s6 + $0x760] sm:$0xff]  ;;  %v4194_v28 = vld [vmem:[%s14632_s6 + $0x768] sm:$0xff] }
 0x61b   : > { %v8080_v6 = vpop.f32.mrb[133].mxu1  ;;  %v8174_v4 = vpop.f32.mrb[129].mxu0  ;;  %v4097_v39 = vld [vmem:[%s14632_s6 + $0x460] sm:$0xff]  ;;  %v4226_v40 = vld [vmem:[%s14632_s6 + $0x868] sm:$0xff] }
 0x61c   : > { %v14086_v14 = vadd.f32 %v9156_v56, %v9154_v52  ;;  %8585 = vmatpush1.bf16.msra.mxu1 %v9947_v36  ;;  %8679 = vmatpush1.bf16.msra.mxu0 %v9949_v19  ;;  %v8081_v27 = vpop.f32.mrb[134].mxu1  ;;  %v8175_v59 = vpop.f32.mrb[130].mxu0  ;;  %v9538_v36 = vcombine.high %v4034_v60, %v4050_v10  ;;  %v4065_v19 = vld [vmem:[%s14632_s6 + $0x360] sm:$0xff]  ;;  %v9535_v52 = vcombine.low %v4033_v30, %v4049_v22  ;;  %v4114_v6 = vld [vmem:[%s14632_s6 + $0x4e8] sm:$0xff] }
 0x61d   : > { %v8082_v3 = vpop.f32.mrb[135].mxu1  ;;  %v8176_v37 = vpop.f32.mrb[131].mxu0  ;;  %8601 = vmatprep.subr.bf16.mxu1 %v9980_v63  ;;  %8695 = vmatprep.subr.bf16.mxu0 %v9982_v45  ;;  %v4081_v63 = vld [vmem:[%s14632_s6 + $0x3e0] sm:$0xff]  ;;  %v4066_v45 = vld [vmem:[%s14632_s6 + $0x368] sm:$0xff]  ;;  %v9537_v56 = vcombine.low %v4034_v60, %v4050_v10  ;;  %v9600_v8 = vcombine.high %v4097_v39, %v4113_v44  ;;  %v9602_v27 = vcombine.high %v4098_v15, %v4114_v6 }
 0x61e   : > { %v9568_v43 = vcombine.high %v4065_v19, %v4081_v63  ;;  %v9570_v51 = vcombine.high %v4066_v45, %v4082_v47  ;;  %v9567_v4 = vcombine.low %v4065_v19, %v4081_v63  ;;  %v9569_v24 = vcombine.low %v4066_v45, %v4082_v47  ;;  %v4129_v59 = vld [vmem:[%s14632_s6 + $0x560] sm:$0xff]  ;;  %v4130_v37 = vld [vmem:[%s14632_s6 + $0x568] sm:$0xff] }
 0x61f   : > { %8587 = vmatmul.mubr.bf16.vlgmr.msra.gmra.mrb[164].mxu1 %v12771_v7  ;;  %8681 = vmatmul.mubr.bf16.vlgmr.msra.gmra.mrb[156].mxu0 %v12771_v7  ;;  %v4145_v3 = vld [vmem:[%s14632_s6 + $0x5e0] sm:$0xff]  ;;  %v4258_v10 = vld [vmem:[%s14632_s6 + $0x968] sm:$0xff] }
 0x620   : > { %8592 = vmatprep.mubr.bf16.mxu1 %v12836_v57  ;;  %8686 = vmatprep.mubr.bf16.mxu0 %v12836_v57  ;;  %v9631_v29 = vcombine.low %v4129_v59, %v4145_v3  ;;  %v4209_v26 = vld [vmem:[%s14632_s6 + $0x7e0] sm:$0xff]  ;;  %v4290_v47 = vld [vmem:[%s14632_s6 + $0xa68] sm:$0xff] }
 0x621   : > { %8602 = vmatpush1.bf16.msra.mxu1 %v9979_v42  ;;  %8696 = vmatpush1.bf16.msra.mxu0 %v9981_v38  ;;  %v4146_v42 = vld [vmem:[%s14632_s6 + $0x5e8] sm:$0xff]  ;;  %v9599_v38 = vcombine.low %v4097_v39, %v4113_v44  ;;  %v4225_v5 = vld [vmem:[%s14632_s6 + $0x860] sm:$0xff] }
 0x622   : > { %8603 = vmatprep.subr.bf16.mxu1 %v10012_v23  ;;  %8697 = vmatprep.subr.bf16.mxu0 %v10014_v33  ;;  %v9601_v23 = vcombine.low %v4098_v15, %v4114_v6  ;;  %v9632_v33 = vcombine.high %v4129_v59, %v4145_v3  ;;  %v9634_v61 = vcombine.high %v4130_v37, %v4146_v42  ;;  %v4241_v48 = vld [vmem:[%s14632_s6 + $0x8e0] sm:$0xff]  ;;  %v4322_v6 = vld [vmem:[%s14632_s6 + $0xb68] sm:$0xff] }
 0x623   : > { %v4257_v22 = vld [vmem:[%s14632_s6 + $0x960] sm:$0xff] }
 0x624   : > { %v4273_v60 = vld [vmem:[%s14632_s6 + $0x9e0] sm:$0xff] }
 0x625   : > { %8604 = vmatpush1.bf16.msra.mxu1 %v10011_v1  ;;  %8698 = vmatpush1.bf16.msra.mxu0 %v10013_v12  ;;  %v4177_v1 = vld [vmem:[%s14632_s6 + $0x6e0] sm:$0xff]  ;;  %v4162_v12 = vld [vmem:[%s14632_s6 + $0x668] sm:$0xff] }
 0x626   : > { %8605 = vmatprep.subr.bf16.mxu1 %v7582_v21  ;;  %8699 = vmatprep.subr.bf16.mxu0 %v7588_v20  ;;  %v9633_v21 = vcombine.low %v4130_v37, %v4146_v42  ;;  %v9664_v20 = vcombine.high %v4161_v31, %v4177_v1  ;;  %v9666_v11 = vcombine.high %v4162_v12, %v4178_v17  ;;  %v4289_v63 = vld [vmem:[%s14632_s6 + $0xa60] sm:$0xff]  ;;  %v4354_v42 = vld [vmem:[%s14632_s6 + $0xc68] sm:$0xff] }
 0x627   : > { %8593 = vmatmul.mubr.bf16.gmra.mrb[168].mxu1 %v12819_v53  ;;  %8687 = vmatmul.mubr.bf16.gmra.mrb[160].mxu0 %v12819_v53  ;;  %v4305_v45 = vld [vmem:[%s14632_s6 + $0xae0] sm:$0xff] }
 0x628   : > { %8633 = vmatprep.mubr.bf16.mxu1 %v10835_v18  ;;  %8727 = vmatprep.mubr.bf16.mxu0 %v10835_v18  ;;  %v4321_v44 = vld [vmem:[%s14632_s6 + $0xb60] sm:$0xff] }
 0x629   : > { %8606 = vmatpush1.bf16.msra.mxu1 %v7579_v9  ;;  %8700 = vmatpush1.bf16.msra.mxu0 %v7585_v35  ;;  %v4210_v9 = vld [vmem:[%s14632_s6 + $0x7e8] sm:$0xff]  ;;  %v9663_v35 = vcombine.low %v4161_v31, %v4177_v1  ;;  %v4337_v15 = vld [vmem:[%s14632_s6 + $0xbe0] sm:$0xff] }
 0x62a   : > { %8742 = vmatprep.subr.bf16.mxu1 %v9472_v25  ;;  %8836 = vmatprep.subr.bf16.mxu0 %v9474_v0  ;;  %v9665_v25 = vcombine.low %v4162_v12, %v4178_v17  ;;  %v9696_v0 = vcombine.high %v4193_v58, %v4209_v26  ;;  %v9698_v32 = vcombine.high %v4194_v28, %v4210_v9  ;;  %v4353_v3 = vld [vmem:[%s14632_s6 + $0xc60] sm:$0xff] }
 0x62b   : > { %v4369_v37 = vld [vmem:[%s14632_s6 + $0xce0] sm:$0xff] }
 0x62c   : > { %v4385_v1 = vld [vmem:[%s14632_s6 + $0xd60] sm:$0xff] }
 0x62f   : > { %10075 = vmatmul.mubr.msk.bf16.vlgmr.msra.gmra.mrb[172].mxu1 %vm2776_vm7, %v12874_v55  ;;  %10077 = vmatmul.mubr.msk.bf16.vlgmr.msra.gmra.mrb[164].mxu0 %vm2776_vm7, %v12874_v55 }
 0x630   : > { %8743 = vmatpush1.bf16.msra.mxu1 %v9471_v50  ;;  %8837 = vmatpush1.bf16.msra.mxu0 %v9473_v62  ;;  %v4242_v50 = vld [vmem:[%s14632_s6 + $0x8e8] sm:$0xff]  ;;  %v9695_v62 = vcombine.low %v4193_v58, %v4209_v26 }
 0x631   : > { %8744 = vmatprep.subr.bf16.mxu1 %v9504_v34  ;;  %8838 = vmatprep.subr.bf16.mxu0 %v9506_v2  ;;  %v9697_v34 = vcombine.low %v4194_v28, %v4210_v9  ;;  %v9728_v2 = vcombine.high %v4225_v5, %v4241_v48  ;;  %v9730_v30 = vcombine.high %v4226_v40, %v4242_v50 }
 0x632   : > { %8639 = vmatprep.mubr.bf16.mxu1 %v10835_v18  ;;  %8733 = vmatprep.mubr.bf16.mxu0 %v10835_v18  ;;  %v9855_v9 = vcombine.low %v4353_v3, %v4369_v37 }
 0x634   : > { %8745 = vmatpush1.bf16.msra.mxu1 %v9503_v41  ;;  %8839 = vmatpush1.bf16.msra.mxu0 %v9505_v54  ;;  %v4274_v41 = vld [vmem:[%s14632_s6 + $0x9e8] sm:$0xff]  ;;  %v9727_v54 = vcombine.low %v4225_v5, %v4241_v48  ;;  %v4417_v48 = vld [vmem:[%s14632_s6 + $0xe60] sm:$0xff] }
 0x635   : > { %8746 = vmatprep.subr.bf16.mxu1 %v9536_v16  ;;  %8840 = vmatprep.subr.bf16.mxu0 %v9538_v36  ;;  %v9729_v16 = vcombine.low %v4226_v40, %v4242_v50  ;;  %v9760_v36 = vcombine.high %v4257_v22, %v4273_v60  ;;  %v9762_v19 = vcombine.high %v4258_v10, %v4274_v41  ;;  %v4433_v40 = vld [vmem:[%s14632_s6 + $0xee0] sm:$0xff]  ;;  %v4418_v50 = vld [vmem:[%s14632_s6 + $0xe68] sm:$0xff] }
 0x636   : > { %v9761_v39 = vcombine.low %v4258_v10, %v4274_v41 }
 0x637   : > { %10076 = vmatmul.mubr.msk.bf16.gmra.mrb[168].mxu1 %vm2776_vm7, %v12908_v49  ;;  %10078 = vmatmul.mubr.msk.bf16.gmra.mrb[160].mxu0 %vm2776_vm7, %v12908_v49 }
 0x638   : > { %8747 = vmatpush1.bf16.msra.mxu1 %v9535_v52  ;;  %8841 = vmatpush1.bf16.msra.mxu0 %v9537_v56  ;;  %v4306_v52 = vld [vmem:[%s14632_s6 + $0xae8] sm:$0xff]  ;;  %v9759_v56 = vcombine.low %v4257_v22, %v4273_v60  ;;  %v4449_v60 = vld [vmem:[%s14632_s6 + $0xf60] sm:$0xff] }
 0x639   : > { %8774 = vmatprep.mubr.bf16.mxu1 %v12775_v46  ;;  %8868 = vmatprep.mubr.bf16.mxu0 %v12775_v46 }
 0x63a   : > { %8748 = vmatprep.subr.bf16.mxu1 %v9568_v43  ;;  %8842 = vmatprep.subr.bf16.mxu0 %v9570_v51  ;;  %v9792_v43 = vcombine.high %v4289_v63, %v4305_v45  ;;  %v9794_v51 = vcombine.high %v4290_v47, %v4306_v52 }
 0x63c   : > { %8749 = vmatpush1.bf16.msra.mxu1 %v9567_v4  ;;  %8843 = vmatpush1.bf16.msra.mxu0 %v9569_v24  ;;  %v4338_v4 = vld [vmem:[%s14632_s6 + $0xbe8] sm:$0xff]  ;;  %v9791_v24 = vcombine.low %v4289_v63, %v4305_v45 }
 0x63d   : > { %8750 = vmatprep.subr.bf16.mxu1 %v9600_v8  ;;  %8844 = vmatprep.subr.bf16.mxu0 %v9602_v27  ;;  %v9793_v8 = vcombine.low %v4290_v47, %v4306_v52  ;;  %v9824_v27 = vcombine.high %v4321_v44, %v4337_v15  ;;  %v9826_v59 = vcombine.high %v4322_v6, %v4338_v4 }
 0x63e   : > { %v9919_v52 = vcombine.low %v4417_v48, %v4433_v40 }
 0x640   : > { %8751 = vmatpush1.bf16.msra.mxu1 %v9599_v38  ;;  %8845 = vmatpush1.bf16.msra.mxu0 %v9601_v23  ;;  %v4370_v38 = vld [vmem:[%s14632_s6 + $0xce8] sm:$0xff]  ;;  %v9823_v23 = vcombine.low %v4321_v44, %v4337_v15 }
 0x641   : > { %8752 = vmatprep.subr.bf16.mxu1 %v9632_v33  ;;  %8846 = vmatprep.subr.bf16.mxu0 %v9634_v61  ;;  %v9825_v33 = vcombine.low %v4322_v6, %v4338_v4  ;;  %v9856_v61 = vcombine.high %v4353_v3, %v4369_v37  ;;  %v9858_v31 = vcombine.high %v4354_v42, %v4370_v38  ;;  %v4481_v6 = vld [vmem:[%s14632_s6 + $0x1060] sm:$0xff] }
 0x644   : > { %8753 = vmatpush1.bf16.msra.mxu1 %v9631_v29  ;;  %8847 = vmatpush1.bf16.msra.mxu0 %v9633_v21  ;;  %v4401_v29 = vld [vmem:[%s14632_s6 + $0xde0] sm:$0xff]  ;;  %v4386_v21 = vld [vmem:[%s14632_s6 + $0xd68] sm:$0xff] }
 0x645   : > { %8754 = vmatprep.subr.bf16.mxu1 %v9664_v20  ;;  %8848 = vmatprep.subr.bf16.mxu0 %v9666_v11  ;;  %v4402_v20 = vld [vmem:[%s14632_s6 + $0xde8] sm:$0xff] }
 0x646   : > { %v9890_v5 = vcombine.high %v4386_v21, %v4402_v20 }
 0x648   : > { %8755 = vmatpush1.bf16.msra.mxu1 %v9663_v35  ;;  %8849 = vmatpush1.bf16.msra.mxu0 %v9665_v25  ;;  %v9857_v35 = vcombine.low %v4354_v42, %v4370_v38 }
 0x649   : > { %8756 = vmatprep.subr.bf16.mxu1 %v9696_v0  ;;  %8850 = vmatprep.subr.bf16.mxu0 %v9698_v32  ;;  %v9888_v32 = vcombine.high %v4385_v1, %v4401_v29 }
 0x64c   : > { %8757 = vmatpush1.bf16.msra.mxu1 %v9695_v62  ;;  %8851 = vmatpush1.bf16.msra.mxu0 %v9697_v34  ;;  %v4434_v62 = vld [vmem:[%s14632_s6 + $0xee8] sm:$0xff]  ;;  %v9887_v34 = vcombine.low %v4385_v1, %v4401_v29 }
 0x64d   : > { %8758 = vmatprep.subr.bf16.mxu1 %v9728_v2  ;;  %8852 = vmatprep.subr.bf16.mxu0 %v9730_v30  ;;  %v9889_v2 = vcombine.low %v4386_v21, %v4402_v20  ;;  %v9920_v30 = vcombine.high %v4417_v48, %v4433_v40  ;;  %v9922_v22 = vcombine.high %v4418_v50, %v4434_v62 }
 0x650   : > { %8759 = vmatpush1.bf16.msra.mxu1 %v9727_v54  ;;  %8853 = vmatpush1.bf16.msra.mxu0 %v9729_v16  ;;  %v4465_v54 = vld [vmem:[%s14632_s6 + $0xfe0] sm:$0xff]  ;;  %v4450_v16 = vld [vmem:[%s14632_s6 + $0xf68] sm:$0xff] }
 0x651   : > { %8760 = vmatprep.subr.bf16.mxu1 %v9760_v36  ;;  %8854 = vmatprep.subr.bf16.mxu0 %v9762_v19  ;;  %v4466_v36 = vld [vmem:[%s14632_s6 + $0xfe8] sm:$0xff]  ;;  %v9952_v44 = vcombine.high %v4449_v60, %v4465_v54  ;;  %v9951_v3 = vcombine.low %v4449_v60, %v4465_v54  ;;  %v3987_v54 = vld [vmem:[%s14632_s6 + $0xf0] sm:$0xff] }
 0x652   : > { %v9954_v15 = vcombine.high %v4450_v16, %v4466_v36  ;;  %v9953_v37 = vcombine.low %v4450_v16, %v4466_v36  ;;  %v3972_v16 = vld [vmem:[%s14632_s6 + $0x78] sm:$0xff] }
 0x653   : > { %v3988_v36 = vld [vmem:[%s14632_s6 + $0xf8] sm:$0xff] }
 0x654   : > { %8761 = vmatpush1.bf16.msra.mxu1 %v9759_v56  ;;  %8855 = vmatpush1.bf16.msra.mxu0 %v9761_v39  ;;  %v9921_v56 = vcombine.low %v4418_v50, %v4434_v62 }
 0x655   : > { %8762 = vmatprep.subr.bf16.mxu1 %v9792_v43  ;;  %8856 = vmatprep.subr.bf16.mxu0 %v9794_v51 }
 0x658   : > { %8763 = vmatpush1.bf16.msra.mxu1 %v9791_v24  ;;  %8857 = vmatpush1.bf16.msra.mxu0 %v9793_v8  ;;  %v4497_v24 = vld [vmem:[%s14632_s6 + $0x10e0] sm:$0xff]  ;;  %v4482_v8 = vld [vmem:[%s14632_s6 + $0x1068] sm:$0xff] }
 0x659   : > { %8764 = vmatprep.subr.bf16.mxu1 %v9824_v27  ;;  %8858 = vmatprep.subr.bf16.mxu0 %v9826_v59  ;;  %v4498_v27 = vld [vmem:[%s14632_s6 + $0x10e8] sm:$0xff] }
 0x65a   : > { %v8220_v12 = vpop.f32.mrb[140].mxu1  ;;  %v8314_v17 = vpop.f32.mrb[136].mxu0 }
 0x65b   : > { %v8221_v11 = vpop.f32.mrb[141].mxu1  ;;  %v8315_v58 = vpop.f32.mrb[137].mxu0  ;;  %v4514_v12 = vld [vmem:[%s14632_s6 + $0x1168] sm:$0xff]  ;;  %v4545_v17 = vld [vmem:[%s14632_s6 + $0x1260] sm:$0x11] }
 0x65c   : > { %8765 = vmatpush1.bf16.msra.mxu1 %v9823_v23  ;;  %8859 = vmatpush1.bf16.msra.mxu0 %v9825_v33  ;;  %v8222_v26 = vpop.f32.mrb[142].mxu1  ;;  %v8316_v28 = vpop.f32.mrb[138].mxu0  ;;  %v9984_v23 = vcombine.high %v4481_v6, %v4497_v24  ;;  %v9986_v33 = vcombine.high %v4482_v8, %v4498_v27  ;;  %v4530_v58 = vld [vmem:[%s14632_s6 + $0x11e8] sm:$0xff]  ;;  %v10048_v50 = vcombine.high %v4545_v17, %v4545_v17 }
 0x65d   : > { %8766 = vmatprep.subr.bf16.mxu1 %v9856_v61  ;;  %8860 = vmatprep.subr.bf16.mxu0 %v9858_v31  ;;  %v8223_v25 = vpop.f32.mrb[143].mxu1  ;;  %v8317_v0 = vpop.f32.mrb[139].mxu0  ;;  %v4513_v61 = vld [vmem:[%s14632_s6 + $0x1160] sm:$0xff]  ;;  %v4546_v26 = vld [vmem:[%s14632_s6 + $0x1268] sm:$0x11]  ;;  %v10018_v40 = vcombine.high %v4514_v12, %v4530_v58 }
 0x65e   : > { %v10050_v62 = vcombine.high %v4546_v26, %v4546_v26  ;;  %v7594_v60 = vand.u32 %v10048_v50, %v12792_v13  ;;  %v4163_v50 = vld [vmem:[%s14632_s6 + $0x670] sm:$0xff] }
 0x660   : > { %8767 = vmatpush1.bf16.msra.mxu1 %v9855_v9  ;;  %8861 = vmatpush1.bf16.msra.mxu0 %v9857_v35 }
 0x661   : > { %8768 = vmatprep.subr.bf16.mxu1 %v9888_v32  ;;  %8862 = vmatprep.subr.bf16.mxu0 %v9890_v5  ;;  %v9983_v32 = vcombine.low %v4481_v6, %v4497_v24  ;;  %v9985_v5 = vcombine.low %v4482_v8, %v4498_v27  ;;  %v4051_v24 = vld [vmem:[%s14632_s6 + $0x2f0] sm:$0xff]  ;;  %v4036_v8 = vld [vmem:[%s14632_s6 + $0x278] sm:$0xff] }
 0x662   : > { %v8259_v10 = vpop.f32.mrb[136].mxu1  ;;  %v8353_v41 = vpop.f32.mrb[132].mxu0  ;;  %v4052_v27 = vld [vmem:[%s14632_s6 + $0x2f8] sm:$0xff] }
 0x663   : > { %v8260_v19 = vpop.f32.mrb[137].mxu1  ;;  %v8354_v63 = vpop.f32.mrb[133].mxu0  ;;  %v7600_v10 = vand.u32 %v10050_v62, %v12792_v13  ;;  %v3971_v41 = vld [vmem:[%s14632_s6 + $0x70] sm:$0xff] }
 0x664   : > { %8769 = vmatpush1.bf16.msra.mxu1 %v9887_v34  ;;  %8863 = vmatpush1.bf16.msra.mxu0 %v9889_v2  ;;  %v8261_v45 = vpop.f32.mrb[138].mxu1  ;;  %v8355_v47 = vpop.f32.mrb[134].mxu0  ;;  %v10017_v2 = vcombine.low %v4514_v12, %v4530_v58  ;;  %v4179_v62 = vld [vmem:[%s14632_s6 + $0x6f0] sm:$0xff] }
 0x665   : > { %v9160_v39 = vrot.slane %v8261_v45, 4  ;;  %8770 = vmatprep.subr.bf16.mxu1 %v9920_v30  ;;  %8864 = vmatprep.subr.bf16.mxu0 %v9922_v22  ;;  %v8263_v43 = vpop.f32.mrb[139].mxu1  ;;  %v8357_v51 = vpop.f32.mrb[135].mxu0  ;;  %v9168_v42 = vrot.slane %v8355_v47, 6  ;;  %v10047_v30 = vcombine.low %v4545_v17, %v4545_v17  ;;  %v10049_v22 = vcombine.low %v4546_v26, %v4546_v26 }
 0x666   : > { %v9164_v4 = vrot.slane %v8263_v43, 5  ;;  %v9172_v21 = vrot.slane %v8357_v51, 7  ;;  %v9476_v45 = vcombine.high %v3971_v41, %v3987_v54  ;;  %v9478_v47 = vcombine.high %v3972_v16, %v3988_v36  ;;  %v4020_v43 = vld [vmem:[%s14632_s6 + $0x1f8] sm:$0xff] }
 0x667   : > { %v9162_v59 = vadd.f32 %v9160_v39, %v14086_v14  ;;  %v4529_v14 = vld [vmem:[%s14632_s6 + $0x11e0] sm:$0xff]  ;;  %v7591_v19 = vand.u32 %v10047_v30, %v12792_v13  ;;  %v7597_v63 = vand.u32 %v10049_v22, %v12792_v13  ;;  %v4004_v39 = vld [vmem:[%s14632_s6 + $0x178] sm:$0xff]  ;;  %v9475_v51 = vcombine.low %v3971_v41, %v3987_v54  ;;  %v4195_v41 = vld [vmem:[%s14632_s6 + $0x770] sm:$0xff] }
 0x668   : > { %8771 = vmatpush1.bf16.msra.mxu1 %v9919_v52  ;;  %8865 = vmatpush1.bf16.msra.mxu0 %v9921_v56  ;;  %v10016_v48 = vcombine.high %v4513_v61, %v4529_v14  ;;  %v10015_v34 = vcombine.low %v4513_v61, %v4529_v14  ;;  %v4003_v52 = vld [vmem:[%s14632_s6 + $0x170] sm:$0xff]  ;;  %v9510_v6 = vcombine.high %v4004_v39, %v4020_v43  ;;  %v4084_v61 = vld [vmem:[%s14632_s6 + $0x3f8] sm:$0xff] }
 0x669   : > { %v9166_v38 = vadd.f32 %v9164_v4, %v9162_v59  ;;  %8772 = vmatprep.subr.bf16.mxu1 %v9952_v44  ;;  %8866 = vmatprep.subr.bf16.mxu0 %v9954_v15  ;;  %v4019_v56 = vld [vmem:[%s14632_s6 + $0x1f0] sm:$0xff]  ;;  %v9477_v44 = vcombine.low %v3972_v16, %v3988_v36  ;;  %v4196_v16 = vld [vmem:[%s14632_s6 + $0x778] sm:$0xff] }
 0x66a   : > { %v8267_v31 = vpop.f32.mrb[144].mxu1  ;;  %v8361_v1 = vpop.f32.mrb[140].mxu0  ;;  %v9508_v15 = vcombine.high %v4003_v52, %v4019_v56  ;;  %v4035_v4 = vld [vmem:[%s14632_s6 + $0x270] sm:$0xff]  ;;  %v9507_v59 = vcombine.low %v4003_v52, %v4019_v56  ;;  %v4212_v36 = vld [vmem:[%s14632_s6 + $0x7f8] sm:$0xff] }
 0x66b   : > { %v9170_v29 = vadd.f32 %v9168_v42, %v9166_v38  ;;  %v8268_v20 = vpop.f32.mrb[145].mxu1  ;;  %v8362_v11 = vpop.f32.mrb[141].mxu0  ;;  %v9542_v42 = vcombine.high %v4036_v8, %v4052_v27  ;;  %v4067_v38 = vld [vmem:[%s14632_s6 + $0x370] sm:$0xff]  ;;  %v9539_v31 = vcombine.low %v4035_v4, %v4051_v24  ;;  %v9541_v1 = vcombine.low %v4036_v8, %v4052_v27  ;;  %v4260_v8 = vld [vmem:[%s14632_s6 + $0x978] sm:$0xff] }
 0x66c   : > { %8773 = vmatpush1.bf16.msra.mxu1 %v9951_v3  ;;  %8867 = vmatpush1.bf16.msra.mxu0 %v9953_v37  ;;  %v8269_v28 = vpop.f32.mrb[146].mxu1  ;;  %v8363_v9 = vpop.f32.mrb[142].mxu0  ;;  %v9509_v3 = vcombine.low %v4004_v39, %v4020_v43  ;;  %v9540_v37 = vcombine.high %v4035_v4, %v4051_v24  ;;  %v4099_v14 = vld [vmem:[%s14632_s6 + $0x470] sm:$0xff]  ;;  %v4116_v20 = vld [vmem:[%s14632_s6 + $0x4f8] sm:$0xff] }
 0x66d   : > { %v14335_v35 = vadd.f32 %v9172_v21, %v9170_v29  ;;  %v8270_v25 = vpop.f32.mrb[147].mxu1  ;;  %v8364_v0 = vpop.f32.mrb[143].mxu0  ;;  %8789 = vmatprep.subr.bf16.mxu1 %v9984_v23  ;;  %8883 = vmatprep.subr.bf16.mxu0 %v9986_v33  ;;  %v4083_v23 = vld [vmem:[%s14632_s6 + $0x3f0] sm:$0xff]  ;;  %v4068_v33 = vld [vmem:[%s14632_s6 + $0x378] sm:$0xff] }
 0x66e   : > { %v9572_v12 = vcombine.high %v4067_v38, %v4083_v23  ;;  %v9574_v17 = vcombine.high %v4068_v33, %v4084_v61  ;;  %v4115_v29 = vld [vmem:[%s14632_s6 + $0x4f0] sm:$0xff]  ;;  %v4100_v21 = vld [vmem:[%s14632_s6 + $0x478] sm:$0xff]  ;;  %v9571_v11 = vcombine.low %v4067_v38, %v4083_v23  ;;  %v9573_v58 = vcombine.low %v4068_v33, %v4084_v61 }
 0x66f   : > { %8775 = vmatmul.mubr.bf16.vlgmr.msra.gmra.mrb[176].mxu1 %v12771_v7  ;;  %8869 = vmatmul.mubr.bf16.vlgmr.msra.gmra.mrb[168].mxu0 %v12771_v7  ;;  %v9604_v26 = vcombine.high %v4099_v14, %v4115_v29  ;;  %v9606_v28 = vcombine.high %v4100_v21, %v4116_v20  ;;  %v4131_v9 = vld [vmem:[%s14632_s6 + $0x570] sm:$0xff]  ;;  %v4132_v0 = vld [vmem:[%s14632_s6 + $0x578] sm:$0xff] }
 0x670   : > { %8780 = vmatprep.mubr.bf16.mxu1 %v12836_v57  ;;  %8874 = vmatprep.mubr.bf16.mxu0 %v12836_v57  ;;  %v4147_v25 = vld [vmem:[%s14632_s6 + $0x5f0] sm:$0xff]  ;;  %v4228_v39 = vld [vmem:[%s14632_s6 + $0x878] sm:$0xff] }
 0x671   : > { %8790 = vmatpush1.bf16.msra.mxu1 %v9983_v32  ;;  %8884 = vmatpush1.bf16.msra.mxu0 %v9985_v5  ;;  %v9603_v32 = vcombine.low %v4099_v14, %v4115_v29  ;;  %v9605_v5 = vcombine.low %v4100_v21, %v4116_v20  ;;  %v9635_v30 = vcombine.low %v4131_v9, %v4147_v25  ;;  %v4211_v54 = vld [vmem:[%s14632_s6 + $0x7f0] sm:$0xff]  ;;  %v4244_v43 = vld [vmem:[%s14632_s6 + $0x8f8] sm:$0xff] }
 0x672   : > { %8791 = vmatprep.subr.bf16.mxu1 %v10016_v48  ;;  %8885 = vmatprep.subr.bf16.mxu0 %v10018_v40  ;;  %v9636_v48 = vcombine.high %v4131_v9, %v4147_v25  ;;  %v4227_v52 = vld [vmem:[%s14632_s6 + $0x870] sm:$0xff]  ;;  %v4276_v27 = vld [vmem:[%s14632_s6 + $0x9f8] sm:$0xff] }
 0x673   : > { %v4243_v56 = vld [vmem:[%s14632_s6 + $0x8f0] sm:$0xff]  ;;  %v4292_v33 = vld [vmem:[%s14632_s6 + $0xa78] sm:$0xff] }
 0x674   : > { %v4259_v4 = vld [vmem:[%s14632_s6 + $0x970] sm:$0xff]  ;;  %v4308_v61 = vld [vmem:[%s14632_s6 + $0xaf8] sm:$0xff] }
 0x675   : > { %8792 = vmatpush1.bf16.msra.mxu1 %v10015_v34  ;;  %8886 = vmatpush1.bf16.msra.mxu0 %v10017_v2  ;;  %v4164_v34 = vld [vmem:[%s14632_s6 + $0x678] sm:$0xff]  ;;  %v4275_v24 = vld [vmem:[%s14632_s6 + $0x9f0] sm:$0xff] }
 0x676   : > { %8793 = vmatprep.subr.bf16.mxu1 %v7594_v60  ;;  %8887 = vmatprep.subr.bf16.mxu0 %v7600_v10  ;;  %v4180_v2 = vld [vmem:[%s14632_s6 + $0x6f8] sm:$0xff]  ;;  %v9668_v60 = vcombine.high %v4163_v50, %v4179_v62  ;;  %v4291_v38 = vld [vmem:[%s14632_s6 + $0xa70] sm:$0xff] }
 0x677   : > { %8781 = vmatmul.mubr.bf16.gmra.mrb[180].mxu1 %v12819_v53  ;;  %8875 = vmatmul.mubr.bf16.gmra.mrb[172].mxu0 %v12819_v53  ;;  %v9670_v10 = vcombine.high %v4164_v34, %v4180_v2  ;;  %v4307_v23 = vld [vmem:[%s14632_s6 + $0xaf0] sm:$0xff] }
 0x678   : > { %8821 = vmatprep.mubr.bf16.mxu1 %v10835_v18  ;;  %8915 = vmatprep.mubr.bf16.mxu0 %v10835_v18  ;;  %v9796_v14 = vcombine.high %v4291_v38, %v4307_v23  ;;  %v4339_v20 = vld [vmem:[%s14632_s6 + $0xbf0] sm:$0xff] }
 0x679   : > { %8794 = vmatpush1.bf16.msra.mxu1 %v7591_v19  ;;  %8888 = vmatpush1.bf16.msra.mxu0 %v7597_v63  ;;  %v9667_v19 = vcombine.low %v4163_v50, %v4179_v62  ;;  %v9669_v63 = vcombine.low %v4164_v34, %v4180_v2  ;;  %v4355_v50 = vld [vmem:[%s14632_s6 + $0xc70] sm:$0xff]  ;;  %v4356_v34 = vld [vmem:[%s14632_s6 + $0xc78] sm:$0xff] }
 0x67a   : > { %8930 = vmatprep.subr.bf16.mxu1 %v9476_v45  ;;  %9024 = vmatprep.subr.bf16.mxu0 %v9478_v47  ;;  %v9700_v45 = vcombine.high %v4195_v41, %v4211_v54  ;;  %v9702_v47 = vcombine.high %v4196_v16, %v4212_v36  ;;  %v4371_v62 = vld [vmem:[%s14632_s6 + $0xcf0] sm:$0xff]  ;;  %v4372_v2 = vld [vmem:[%s14632_s6 + $0xcf8] sm:$0xff] }
 0x67f   : > { %10079 = vmatmul.mubr.msk.bf16.vlgmr.msra.gmra.mrb[184].mxu1 %vm2776_vm7, %v12874_v55  ;;  %10081 = vmatmul.mubr.msk.bf16.vlgmr.msra.gmra.mrb[176].mxu0 %vm2776_vm7, %v12874_v55 }
 0x680   : > { %8931 = vmatpush1.bf16.msra.mxu1 %v9475_v51  ;;  %9025 = vmatpush1.bf16.msra.mxu0 %v9477_v44  ;;  %v9699_v51 = vcombine.low %v4195_v41, %v4211_v54  ;;  %v9701_v44 = vcombine.low %v4196_v16, %v4212_v36  ;;  %v4387_v41 = vld [vmem:[%s14632_s6 + $0xd70] sm:$0xff]  ;;  %v4388_v36 = vld [vmem:[%s14632_s6 + $0xd78] sm:$0xff] }
 0x681   : > { %8932 = vmatprep.subr.bf16.mxu1 %v9508_v15  ;;  %9026 = vmatprep.subr.bf16.mxu0 %v9510_v6  ;;  %v9732_v15 = vcombine.high %v4227_v52, %v4243_v56  ;;  %v9734_v6 = vcombine.high %v4228_v39, %v4244_v43  ;;  %v4403_v16 = vld [vmem:[%s14632_s6 + $0xdf0] sm:$0xff] }
 0x682   : > { %8827 = vmatprep.mubr.bf16.mxu1 %v10835_v18  ;;  %8921 = vmatprep.mubr.bf16.mxu0 %v10835_v18 }
 0x684   : > { %8933 = vmatpush1.bf16.msra.mxu1 %v9507_v59  ;;  %9027 = vmatpush1.bf16.msra.mxu0 %v9509_v3  ;;  %v9731_v59 = vcombine.low %v4227_v52, %v4243_v56  ;;  %v9733_v3 = vcombine.low %v4228_v39, %v4244_v43  ;;  %v9861_v52 = vcombine.low %v4356_v34, %v4372_v2 }
 0x685   : > { %8934 = vmatprep.subr.bf16.mxu1 %v9540_v37  ;;  %9028 = vmatprep.subr.bf16.mxu0 %v9542_v42  ;;  %v9764_v37 = vcombine.high %v4259_v4, %v4275_v24  ;;  %v9766_v42 = vcombine.high %v4260_v8, %v4276_v27  ;;  %v9892_v39 = vcombine.high %v4387_v41, %v4403_v16 }
 0x687   : > { %10080 = vmatmul.mubr.msk.bf16.gmra.mrb[180].mxu1 %vm2776_vm7, %v12908_v49  ;;  %10082 = vmatmul.mubr.msk.bf16.gmra.mrb[172].mxu0 %vm2776_vm7, %v12908_v49 }
 0x688   : > { %8935 = vmatpush1.bf16.msra.mxu1 %v9539_v31  ;;  %9029 = vmatpush1.bf16.msra.mxu0 %v9541_v1  ;;  %v9763_v31 = vcombine.low %v4259_v4, %v4275_v24  ;;  %v9765_v1 = vcombine.low %v4260_v8, %v4276_v27  ;;  %v9891_v4 = vcombine.low %v4387_v41, %v4403_v16 }
 0x689   : > { %8962 = vmatprep.mubr.bf16.mxu1 %v12775_v46  ;;  %9056 = vmatprep.mubr.bf16.mxu0 %v12775_v46  ;;  %v4148_v46 = vld [vmem:[%s14632_s6 + $0x5f8] sm:$0xff] }
 0x68a   : > { %8936 = vmatprep.subr.bf16.mxu1 %v9572_v12  ;;  %9030 = vmatprep.subr.bf16.mxu0 %v9574_v17  ;;  %v9638_v40 = vcombine.high %v4132_v0, %v4148_v46  ;;  %v9637_v22 = vcombine.low %v4132_v0, %v4148_v46  ;;  %v9798_v12 = vcombine.high %v4292_v33, %v4308_v61  ;;  %v4323_v17 = vld [vmem:[%s14632_s6 + $0xb70] sm:$0xff] }
 0x68b   : > { %v9795_v0 = vcombine.low %v4291_v38, %v4307_v23  ;;  %v9797_v46 = vcombine.low %v4292_v33, %v4308_v61  ;;  %v4452_v38 = vld [vmem:[%s14632_s6 + $0xf78] sm:$0xff] }
 0x68c   : > { %8937 = vmatpush1.bf16.msra.mxu1 %v9571_v11  ;;  %9031 = vmatpush1.bf16.msra.mxu0 %v9573_v58  ;;  %v4324_v11 = vld [vmem:[%s14632_s6 + $0xb78] sm:$0xff] }
 0x68d   : > { %8938 = vmatprep.subr.bf16.mxu1 %v9604_v26  ;;  %9032 = vmatprep.subr.bf16.mxu0 %v9606_v28  ;;  %v4340_v58 = vld [vmem:[%s14632_s6 + $0xbf8] sm:$0xff] }
 0x68e   : > { %v4468_v23 = vld [vmem:[%s14632_s6 + $0xff8] sm:$0xff] }
 0x690   : > { %8939 = vmatpush1.bf16.msra.mxu1 %v9603_v32  ;;  %9033 = vmatpush1.bf16.msra.mxu0 %v9605_v5 }
 0x691   : > { %8940 = vmatprep.subr.bf16.mxu1 %v9636_v48  ;;  %9034 = vmatprep.subr.bf16.mxu0 %v9638_v40  ;;  %v9828_v48 = vcombine.high %v4323_v17, %v4339_v20  ;;  %v9830_v40 = vcombine.high %v4324_v11, %v4340_v58 }
 0x694   : > { %8941 = vmatpush1.bf16.msra.mxu1 %v9635_v30  ;;  %9035 = vmatpush1.bf16.msra.mxu0 %v9637_v22  ;;  %v9827_v30 = vcombine.low %v4323_v17, %v4339_v20  ;;  %v9829_v22 = vcombine.low %v4324_v11, %v4340_v58  ;;  %v9958_v20 = vcombine.high %v4452_v38, %v4468_v23  ;;  %v4483_v11 = vld [vmem:[%s14632_s6 + $0x1070] sm:$0xff] }
 0x695   : > { %8942 = vmatprep.subr.bf16.mxu1 %v9668_v60  ;;  %9036 = vmatprep.subr.bf16.mxu0 %v9670_v10  ;;  %v9860_v60 = vcombine.high %v4355_v50, %v4371_v62  ;;  %v9862_v10 = vcombine.high %v4356_v34, %v4372_v2  ;;  %v4499_v58 = vld [vmem:[%s14632_s6 + $0x10f0] sm:$0xff] }
 0x698   : > { %8943 = vmatpush1.bf16.msra.mxu1 %v9667_v19  ;;  %9037 = vmatpush1.bf16.msra.mxu0 %v9669_v63  ;;  %v4404_v19 = vld [vmem:[%s14632_s6 + $0xdf8] sm:$0xff] }
 0x699   : > { %8944 = vmatprep.subr.bf16.mxu1 %v9700_v45  ;;  %9038 = vmatprep.subr.bf16.mxu0 %v9702_v47  ;;  %v9859_v47 = vcombine.low %v4355_v50, %v4371_v62  ;;  %v9894_v43 = vcombine.high %v4388_v36, %v4404_v19  ;;  %v9893_v24 = vcombine.low %v4388_v36, %v4404_v19  ;;  %v4516_v50 = vld [vmem:[%s14632_s6 + $0x1178] sm:$0xff] }
 0x69a   : > { %v4532_v62 = vld [vmem:[%s14632_s6 + $0x11f8] sm:$0xff]  ;;  %v9987_v36 = vcombine.low %v4483_v11, %v4499_v58 }
 0x69c   : > { %8945 = vmatpush1.bf16.msra.mxu1 %v9699_v51  ;;  %9039 = vmatpush1.bf16.msra.mxu0 %v9701_v44  ;;  %v4419_v51 = vld [vmem:[%s14632_s6 + $0xe70] sm:$0xff] }
 0x69d   : > { %8946 = vmatprep.subr.bf16.mxu1 %v9732_v15  ;;  %9040 = vmatprep.subr.bf16.mxu0 %v9734_v6  ;;  %v4435_v44 = vld [vmem:[%s14632_s6 + $0xef0] sm:$0xff]  ;;  %v4420_v15 = vld [vmem:[%s14632_s6 + $0xe78] sm:$0xff] }
 0x69e   : > { %v4436_v6 = vld [vmem:[%s14632_s6 + $0xef8] sm:$0xff]  ;;  %v9924_v8 = vcombine.high %v4419_v51, %v4435_v44 }
 0x69f   : > { %v9926_v27 = vcombine.high %v4420_v15, %v4436_v6 }
 0x6a0   : > { %8947 = vmatpush1.bf16.msra.mxu1 %v9731_v59  ;;  %9041 = vmatpush1.bf16.msra.mxu0 %v9733_v3  ;;  %v4451_v59 = vld [vmem:[%s14632_s6 + $0xf70] sm:$0xff] }
 0x6a1   : > { %8948 = vmatprep.subr.bf16.mxu1 %v9764_v37  ;;  %9042 = vmatprep.subr.bf16.mxu0 %v9766_v42  ;;  %v4467_v42 = vld [vmem:[%s14632_s6 + $0xff0] sm:$0xff] }
 0x6a2   : > { %v8400_v29 = vpop.f32.mrb[148].mxu1  ;;  %v8494_v21 = vpop.f32.mrb[144].mxu0 }
 0x6a3   : > { %v8401_v26 = vpop.f32.mrb[149].mxu1  ;;  %v8495_v28 = vpop.f32.mrb[145].mxu0  ;;  %v9956_v21 = vcombine.high %v4451_v59, %v4467_v42 }
 0x6a4   : > { %8949 = vmatpush1.bf16.msra.mxu1 %v9763_v31  ;;  %9043 = vmatpush1.bf16.msra.mxu0 %v9765_v1  ;;  %v8402_v9 = vpop.f32.mrb[150].mxu1  ;;  %v8496_v25 = vpop.f32.mrb[146].mxu0  ;;  %v4484_v26 = vld [vmem:[%s14632_s6 + $0x1078] sm:$0xff] }
 0x6a5   : > { %8950 = vmatprep.subr.bf16.mxu1 %v9796_v14  ;;  %9044 = vmatprep.subr.bf16.mxu0 %v9798_v12  ;;  %v8403_v32 = vpop.f32.mrb[151].mxu1  ;;  %v8497_v5 = vpop.f32.mrb[147].mxu0  ;;  %v9923_v14 = vcombine.low %v4419_v51, %v4435_v44  ;;  %v9925_v12 = vcombine.low %v4420_v15, %v4436_v6  ;;  %v4500_v28 = vld [vmem:[%s14632_s6 + $0x10f8] sm:$0xff]  ;;  %v9955_v9 = vcombine.low %v4451_v59, %v4467_v42 }
 0x6a6   : > { %v9957_v25 = vcombine.low %v4452_v38, %v4468_v23  ;;  %v4515_v32 = vld [vmem:[%s14632_s6 + $0x1170] sm:$0xff]  ;;  %v10021_v15 = vcombine.low %v4516_v50, %v4532_v62 }
 0x6a8   : > { %8951 = vmatpush1.bf16.msra.mxu1 %v9795_v0  ;;  %9045 = vmatpush1.bf16.msra.mxu0 %v9797_v46  ;;  %v9988_v0 = vcombine.high %v4483_v11, %v4499_v58  ;;  %v9990_v46 = vcombine.high %v4484_v26, %v4500_v28 }
 0x6a9   : > { %8952 = vmatprep.subr.bf16.mxu1 %v9828_v48  ;;  %9046 = vmatprep.subr.bf16.mxu0 %v9830_v40  ;;  %v4531_v40 = vld [vmem:[%s14632_s6 + $0x11f0] sm:$0xff] }
 0x6aa   : > { %v14520_v54 = vpop.f32.mrb[152].mxu1 }
 0x6ab   : > { %v14531_v63 = vpop.f32.mrb[153].mxu1 }
 0x6ac   : > { %8953 = vmatpush1.bf16.msra.mxu1 %v9827_v30  ;;  %9047 = vmatpush1.bf16.msra.mxu0 %v9829_v22  ;;  %v8410_v45 = vpop.f32.mrb[154].mxu1  ;;  %v4547_v22 = vld [vmem:[%s14632_s6 + $0x1270] sm:$0x11] }
 0x6ad   : > { %8954 = vmatprep.subr.bf16.mxu1 %v9860_v60  ;;  %9048 = vmatprep.subr.bf16.mxu0 %v9862_v10  ;;  %v8411_v56 = vpop.f32.mrb[155].mxu1  ;;  %v4548_v60 = vld [vmem:[%s14632_s6 + $0x1278] sm:$0x11]  ;;  %v10051_v6 = vcombine.low %v4547_v22, %v4547_v22 }
 0x6ae   : > { %v10054_v51 = vcombine.high %v4548_v60, %v4548_v60 }
 0x6b0   : > { %8955 = vmatpush1.bf16.msra.mxu1 %v9859_v47  ;;  %9049 = vmatpush1.bf16.msra.mxu0 %v9861_v52  ;;  %v9989_v47 = vcombine.low %v4484_v26, %v4500_v28  ;;  %v10020_v52 = vcombine.high %v4515_v32, %v4531_v40 }
 0x6b1   : > { %8956 = vmatprep.subr.bf16.mxu1 %v9892_v39  ;;  %9050 = vmatprep.subr.bf16.mxu0 %v9894_v43  ;;  %v10022_v39 = vcombine.high %v4516_v50, %v4532_v62  ;;  %v10052_v43 = vcombine.high %v4547_v22, %v4547_v22 }
 0x6b2   : > { %v8447_v3 = vpop.f32.mrb[156].mxu1  ;;  %v8541_v37 = vpop.f32.mrb[152].mxu0 }
 0x6b3   : > { %v8448_v33 = vpop.f32.mrb[157].mxu1  ;;  %v8542_v61 = vpop.f32.mrb[153].mxu0  ;;  %v7603_v3 = vand.u32 %v10051_v6, %v12792_v13 }
 0x6b4   : > { %8957 = vmatpush1.bf16.msra.mxu1 %v9891_v4  ;;  %9051 = vmatpush1.bf16.msra.mxu0 %v9893_v24  ;;  %v8449_v31 = vpop.f32.mrb[158].mxu1  ;;  %v8543_v1 = vpop.f32.mrb[154].mxu0  ;;  %v10053_v4 = vcombine.low %v4548_v60, %v4548_v60 }
 0x6b5   : > { %8958 = vmatprep.subr.bf16.mxu1 %v9924_v8  ;;  %9052 = vmatprep.subr.bf16.mxu0 %v9926_v27  ;;  %v8450_v17 = vpop.f32.mrb[159].mxu1  ;;  %v8544_v29 = vpop.f32.mrb[155].mxu0  ;;  %v7606_v27 = vand.u32 %v10052_v43, %v12792_v13 }
 0x6b8   : > { %8959 = vmatpush1.bf16.msra.mxu1 %v9923_v14  ;;  %9053 = vmatpush1.bf16.msra.mxu0 %v9925_v12 }
 0x6b9   : > { %8960 = vmatprep.subr.bf16.mxu1 %v9956_v21  ;;  %9054 = vmatprep.subr.bf16.mxu0 %v9958_v20 }
 0x6ba   : > { %v8453_v5 = vpop.f32.mrb[160].mxu1  ;;  %v8547_v48 = vpop.f32.mrb[148].mxu0 }
 0x6bb   : > { %v8454_v34 = vadd.f32 %v8453_v5, %v14520_v54  ;;  %v8455_v2 = vpop.f32.mrb[161].mxu1  ;;  %v8549_v30 = vpop.f32.mrb[149].mxu0 }
 0x6bc   : > { %8961 = vmatpush1.bf16.msra.mxu1 %v9955_v9  ;;  %9055 = vmatpush1.bf16.msra.mxu0 %v9957_v25  ;;  %v8456_v10 = vadd.f32 %v8455_v2, %v14531_v63  ;;  %v8457_v41 = vpop.f32.mrb[162].mxu1  ;;  %v8551_v16 = vpop.f32.mrb[150].mxu0  ;;  %v9181_v63 = vrot.slane %v8547_v48, 2  ;;  %v9185_v8 = vrot.slane %v8549_v30, 3 }
 0x6bd   : > { %v9175_v19 = vadd.f32 %v14335_v35, %v8454_v34  ;;  %v8458_v54 = vpop.f32.mrb[163].mxu1  ;;  %v8552_v45 = vpop.f32.mrb[151].mxu0  ;;  %8977 = vmatprep.subr.bf16.mxu1 %v9988_v0  ;;  %9071 = vmatprep.subr.bf16.mxu0 %v9990_v46  ;;  %v10019_v35 = vcombine.low %v4515_v32, %v4531_v40 }
 0x6be   : > { %v9177_v56 = vrot.slane %v8456_v10, 1 }
 0x6bf   : > { %8963 = vmatmul.mubr.bf16.vlgmr.msra.gmra.mrb[188].mxu1 %v12771_v7  ;;  %9057 = vmatmul.mubr.bf16.vlgmr.msra.gmra.mrb[180].mxu0 %v12771_v7  ;;  %v7612_v7 = vand.u32 %v10054_v51, %v12792_v13 }
 0x6c0   : > { %v9179_v44 = vadd.f32 %v9177_v56, %v9175_v19  ;;  %8968 = vmatprep.mubr.bf16.mxu1 %v12836_v57  ;;  %9062 = vmatprep.mubr.bf16.mxu0 %v12836_v57  ;;  %v7609_v57 = vand.u32 %v10053_v4, %v12792_v13 }
 0x6c1   : > { %8978 = vmatpush1.bf16.msra.mxu1 %v9987_v36  ;;  %9072 = vmatpush1.bf16.msra.mxu0 %v9989_v47 }
 0x6c2   : > { %v9183_v24 = vadd.f32 %v9181_v63, %v9179_v44  ;;  %8979 = vmatprep.subr.bf16.mxu1 %v10020_v52  ;;  %9073 = vmatprep.subr.bf16.mxu0 %v10022_v39 }
 0x6c4   : > { %v9187_v59 = vadd.f32 %v9185_v8, %v9183_v24 }
 0x6c5   : > { %8980 = vmatpush1.bf16.msra.mxu1 %v10019_v35  ;;  %9074 = vmatpush1.bf16.msra.mxu0 %v10021_v15 }
 0x6c6   : > { %8981 = vmatprep.subr.bf16.mxu1 %v7606_v27  ;;  %9075 = vmatprep.subr.bf16.mxu0 %v7612_v7 }
 0x6c7   : > { %8969 = vmatmul.mubr.bf16.gmra.mrb[192].mxu1 %v12819_v53  ;;  %9063 = vmatmul.mubr.bf16.gmra.mrb[184].mxu0 %v12819_v53 }
 0x6c8   : > { %9009 = vmatprep.mubr.bf16.mxu1 %v10835_v18  ;;  %9103 = vmatprep.mubr.bf16.mxu0 %v10835_v18 }
 0x6c9   : > { %8982 = vmatpush1.bf16.msra.mxu1 %v7603_v3  ;;  %9076 = vmatpush1.bf16.msra.mxu0 %v7609_v57 }
 0x6cf   : > { %10083 = vmatmul.mubr.msk.bf16.vlgmr.msra.gmra.mrb[196].mxu1 %vm2776_vm7, %v12874_v55  ;;  %10085 = vmatmul.mubr.msk.bf16.vlgmr.msra.gmra.mrb[188].mxu0 %vm2776_vm7, %v12874_v55 }
 0x6d0   : > { %9015 = vmatprep.mubr.bf16.mxu1 %v10835_v18  ;;  %9109 = vmatprep.mubr.bf16.mxu0 %v10835_v18 }
 0x6d7   : > { %10084 = vmatmul.mubr.msk.bf16.gmra.mrb[192].mxu1 %vm2776_vm7, %v12908_v49  ;;  %10086 = vmatmul.mubr.msk.bf16.gmra.mrb[184].mxu0 %vm2776_vm7, %v12908_v49 }
 0x6f2   : > { %v8588_v13 = vpop.f32.mrb[164].mxu1  ;;  %v8682_v53 = vpop.f32.mrb[156].mxu0 }
 0x6f3   : > { %v8589_v37 = vpop.f32.mrb[165].mxu1  ;;  %v8683_v42 = vpop.f32.mrb[157].mxu0 }
 0x6f4   : > { %v8590_v38 = vpop.f32.mrb[166].mxu1  ;;  %v8684_v23 = vpop.f32.mrb[158].mxu0 }
 0x6f5   : > { %v8591_v33 = vpop.f32.mrb[167].mxu1  ;;  %v8685_v61 = vpop.f32.mrb[159].mxu0 }
 0x702   : > { %v8635_v31 = vpop.f32.mrb[172].mxu1  ;;  %v8729_v55 = vpop.f32.mrb[164].mxu0 }
 0x703   : > { %v8636_v1 = vpop.f32.mrb[173].mxu1  ;;  %v8730_v14 = vpop.f32.mrb[165].mxu0 }
 0x704   : > { %v8637_v12 = vpop.f32.mrb[174].mxu1  ;;  %v8731_v18 = vpop.f32.mrb[166].mxu0 }
 0x705   : > { %v8638_v17 = vpop.f32.mrb[175].mxu1  ;;  %v8732_v29 = vpop.f32.mrb[167].mxu0 }
 0x70a   : > { %v8641_v21 = vpop.f32.mrb[168].mxu1  ;;  %v8735_v20 = vpop.f32.mrb[160].mxu0 }
 0x70b   : > { %v9189_v11 = vrot.slane %v8641_v21, 4  ;;  %v8643_v49 = vpop.f32.mrb[169].mxu1  ;;  %v8737_v58 = vpop.f32.mrb[161].mxu0  ;;  %v9197_v32 = vrot.slane %v8735_v20, 6 }
 0x70c   : > { %v9193_v26 = vrot.slane %v8643_v49, 5  ;;  %v8645_v28 = vpop.f32.mrb[170].mxu1  ;;  %v8739_v9 = vpop.f32.mrb[162].mxu0  ;;  %v9201_v48 = vrot.slane %v8737_v58, 7 }
 0x70d   : > { %v9191_v25 = vadd.f32 %v9189_v11, %v9187_v59  ;;  %v8646_v0 = vpop.f32.mrb[171].mxu1  ;;  %v8740_v46 = vpop.f32.mrb[163].mxu0 }
 0x70f   : > { %v9195_v5 = vadd.f32 %v9193_v26, %v9191_v25 }
 0x711   : > { %v9199_v40 = vadd.f32 %v9197_v32, %v9195_v5 }
 0x713   : > { %v9203_v50 = vadd.f32 %v9201_v48, %v9199_v40  ;;  %v9233_v40 = vld [vmem:[%s14633_s7] sm:$0x1] }
 0x742   : > { %v8776_v62 = vpop.f32.mrb[176].mxu1  ;;  %v8870_v34 = vpop.f32.mrb[168].mxu0 }
 0x743   : > { %v8777_v2 = vpop.f32.mrb[177].mxu1  ;;  %v8871_v30 = vpop.f32.mrb[169].mxu0  ;;  %v9236_v34 = vld [vmem:[%s14634_s8] sm:$0x1] }
 0x744   : > { %v8778_v22 = vpop.f32.mrb[178].mxu1  ;;  %v8872_v60 = vpop.f32.mrb[170].mxu0 }
 0x745   : > { %v8779_v10 = vpop.f32.mrb[179].mxu1  ;;  %v8873_v41 = vpop.f32.mrb[171].mxu0  ;;  %v9241_v60 = vld [vmem:[#allocation4] sm:$0x1] }
 0x752   : > { %v8823_v16 = vpop.f32.mrb[184].mxu1  ;;  %v8917_v36 = vpop.f32.mrb[176].mxu0 }
 0x753   : > { %v8824_v19 = vpop.f32.mrb[185].mxu1  ;;  %v8918_v54 = vpop.f32.mrb[177].mxu0 }
 0x754   : > { %v8825_v45 = vpop.f32.mrb[186].mxu1  ;;  %v8919_v47 = vpop.f32.mrb[178].mxu0 }
 0x755   : > { %v8826_v52 = vpop.f32.mrb[187].mxu1  ;;  %v8920_v56 = vpop.f32.mrb[179].mxu0 }
 0x75a   : > { %v8829_v39 = vpop.f32.mrb[180].mxu1  ;;  %v8923_v43 = vpop.f32.mrb[172].mxu0 }
 0x75b   : > { %v8830_v51 = vpop.f32.mrb[181].mxu1  ;;  %v8924_v63 = vpop.f32.mrb[173].mxu0 }
 0x75c   : > { %v8831_v44 = vpop.f32.mrb[182].mxu1  ;;  %v8925_v35 = vpop.f32.mrb[174].mxu0 }
 0x75d   : > { %v9204_v15 = vadd.f32 %v9203_v50, %v8831_v44  ;;  %v8833_v6 = vpop.f32.mrb[183].mxu1  ;;  %v8927_v4 = vpop.f32.mrb[175].mxu0  ;;  %v9210_v8 = vrot.slane %v8925_v35, 2 }
 0x75e   : > { %v9206_v24 = vrot.slane %v8833_v6, 1  ;;  %v9214_v59 = vrot.slane %v8927_v4, 3 }
 0x760   : > { %v9208_v27 = vadd.f32 %v9206_v24, %v9204_v15 }
 0x762   : > { %v9212_v7 = vadd.f32 %v9210_v8, %v9208_v27 }
 0x764   : > { %v9216_v3 = vadd.f32 %v9214_v59, %v9212_v7 }
 0x792   : > { %v8964_v57 = vpop.f32.mrb[188].mxu1  ;;  %v9058_v13 = vpop.f32.mrb[180].mxu0 }
 0x793   : > { %v8965_v53 = vpop.f32.mrb[189].mxu1  ;;  %v9059_v37 = vpop.f32.mrb[181].mxu0 }
 0x794   : > { %v8966_v42 = vpop.f32.mrb[190].mxu1  ;;  %v9060_v38 = vpop.f32.mrb[182].mxu0 }
 0x795   : > { %v8967_v23 = vpop.f32.mrb[191].mxu1  ;;  %v9061_v33 = vpop.f32.mrb[183].mxu0 }
 0x7a2   : > { %v9011_v61 = vpop.f32.mrb[196].mxu1  ;;  %v9105_v31 = vpop.f32.mrb[188].mxu0 }
 0x7a3   : > { %v9012_v55 = vpop.f32.mrb[197].mxu1  ;;  %v9106_v1 = vpop.f32.mrb[189].mxu0 }
 0x7a4   : > { %v9013_v14 = vpop.f32.mrb[198].mxu1  ;;  %v9107_v12 = vpop.f32.mrb[190].mxu0 }
 0x7a5   : > { %v9014_v18 = vpop.f32.mrb[199].mxu1  ;;  %v9108_v17 = vpop.f32.mrb[191].mxu0 }
 0x7aa   : > { %v9017_v29 = vpop.f32.mrb[192].mxu1  ;;  %v9111_v21 = vpop.f32.mrb[184].mxu0 }
 0x7ab   : > { %v9018_v20 = vpop.f32.mrb[193].mxu1  ;;  %v9112_v11 = vpop.f32.mrb[185].mxu0 }
 0x7ac   : > { %v9019_v49 = vpop.f32.mrb[194].mxu1  ;;  %v9113_v58 = vpop.f32.mrb[186].mxu0 }
 0x7ad   : > { %v9218_v26 = vrot.slane %v9019_v49, 4  ;;  %v9021_v28 = vpop.f32.mrb[195].mxu1  ;;  %v9115_v9 = vpop.f32.mrb[187].mxu0  ;;  %v9226_v46 = vrot.slane %v9113_v58, 6 }
 0x7ae   : > { %v9222_v25 = vrot.slane %v9021_v28, 5  ;;  %v9230_v48 = vrot.slane %v9115_v9, 7 }
 0x7af   : > { %v9220_v0 = vadd.f32 %v9218_v26, %v9216_v3 }
 0x7b1   : > { %v9224_v32 = vadd.f32 %v9222_v25, %v9220_v0 }
 0x7b3   : > { %v9228_v5 = vadd.f32 %v9226_v46, %v9224_v32 }
 0x7b5   : > { %v9232_v50 = vadd.f32 %v9230_v48, %v9228_v5 }
 0x7b7   : > { %v9234_v62 = vadd.f32 %v9233_v40, %v9232_v50 }
 0x7b9   : > { %v9235_v2 = vmax.f32 %v9234_v62, 0.0 }
 0x7bb   : > { %v9237_v30 = vmul.f32 %v9236_v34, %v9235_v2 }
 0x7bd   : > { %v9238_v22 = vsel %vm7515_vm10, %v9237_v30, 0.0 }
 0x7be   : > { %9239 = vadd.xlane.f32.xlu1 %v9238_v22 }
 0x84b   : > { %v9240_v10 = vpop.xlane.xlu1 %9239 }
 0x84c   : > { %v9242_v41 = vadd.f32 %v9241_v60, %v9240_v10 }
 0x84e   : > { %v9243_v16 = vsub.f32 0.0, %v9242_v41 }
 0x850   : > { %v9244_v36 = vmul.f32 1.442695, %v9243_v16 }
 0x852   : > { %10817 = vpow2.f32 %v9244_v36 }
 0x85c   : > { %v10818_v19 = vpop.eup %10817 }
 0x85d   : > { %v9246_v54 = vadd.f32 1.0, %v10818_v19 }
 0x85f   : > { %10819 = vrcp.f32 %v9246_v54 }
 0x869   : > { %v10820_v45 = vpop.eup %10819 }
 0x86a   : > { %9250 = vst.msk [vmem:[%s357_s19] sm:$0x1] %vm9249_vm14, %v10820_v45 }
 0x86b PF: > { %s22_s15 = sadd.s32 1, %s10827_s15  }
 0x86c   : > { %p19_p4 = scmp.ge.s32.totalorder %s22_s15, 4  }
 0x86e   :  { %21 = sbr.rel (!%p19_p4) target bundleno = 3 (0x3), region = 108 }

</bundles_post_ra>
